<compile_context>
chip_gen: v5e
topology: v5e:2x2
jax: 0.10.0
libtpu: 0.0.40
codegen_flags: <defaults>
</compile_context>

<pallas_src>
import numpy as np
import jax
import jax.numpy as jnp
from jax.experimental import pallas as pl
from jax.experimental.pallas import tpu as pltpu

EPS = 1e-5
SELU_ALPHA = 1.6732632423543772
SELU_SCALE = 1.0507009873554805

L_IN = 99
K1, K2, K3, K4 = 5, 7, 5, 7
C1, C2, C3, C4 = 64, 32, 32, 32
L1, L2F, L2, L3, L4 = 95, 89, 45, 41, 35   # L2F = conv2 stride-1 length before decimation
FLAT = C4 * L4                              # 32*35 = 1120


def cnn_kernel(x_ref,
               w1_ref, b1_ref, g1_ref, be1_ref,
               w2_ref, b2_ref, g2_ref, be2_ref,
               w3_ref, b3_ref, g3_ref, be3_ref,
               w4_ref, b4_ref, g4_ref, be4_ref,
               w5_hbm_ref, b5_ref, w6_ref, b6_ref,
               out_ref,
               w5_vmem, w5_sem, flat_ref):
    n_batch = x_ref.shape[0]

    # Kick off the dense5-weight DMA immediately so it overlaps the conv stack.
    w5_copy = pltpu.make_async_copy(w5_hbm_ref, w5_vmem, w5_sem)
    w5_copy.start()

    def im2col(h, l_in, k_taps, l_out):
        # h: (Cin, N*l_in) -> patches (k_taps*Cin, N*l_out); row order (tap, cin)
        samples = []
        for n in range(n_batch):
            base = n * l_in
            taps = [h[:, base + k: base + k + l_out] for k in range(k_taps)]
            samples.append(jnp.concatenate(taps, axis=0))
        return samples[0] if n_batch == 1 else jnp.concatenate(samples, axis=1)

    def batchnorm(h, g_ref, be_ref):
        # nn.BatchNorm1d training mode: per-channel stats over (batch, length)
        # = over the lane axis of the slab; biased variance, affine.
        mean = jnp.mean(h, axis=1, keepdims=True)
        c = h - mean
        var = jnp.mean(c * c, axis=1, keepdims=True)
        return g_ref[...] * c * jax.lax.rsqrt(var + EPS) + be_ref[...]

    def conv_bias_relu(h, w_ref, b_ref, l_in, k_taps, l_out):
        p = im2col(h, l_in, k_taps, l_out)
        acc = jnp.dot(w_ref[...], p, preferred_element_type=jnp.float32)
        return jnp.maximum(acc + b_ref[...], 0.0)

    # (N, 3, L_IN) -> channel-major slab (3, N*L_IN): batch along lanes.
    x = x_ref[...]
    h0 = x[0] if n_batch == 1 else jnp.concatenate(
        [x[n] for n in range(n_batch)], axis=1)

    # conv1 + ReLU + BN1
    h1 = batchnorm(conv_bias_relu(h0, w1_ref, b1_ref, L_IN, K1, L1),
                   g1_ref, be1_ref)                                    # (64, N*95)

    # conv2 (stride 2): stride-1 conv, then even-position decimation via ONE
    # 0/1 selection matmul on the batched slab (bias/ReLU commute with it).
    full2 = jnp.dot(w2_ref[...], im2col(h1, L1, K2, L2F),
                    preferred_element_type=jnp.float32)                # (32, N*89)
    rows = jax.lax.broadcasted_iota(jnp.int32, (n_batch * L2F, n_batch * L2), 0)
    cols = jax.lax.broadcasted_iota(jnp.int32, (n_batch * L2F, n_batch * L2), 1)
    keep = None
    for n in range(n_batch):      # block-diagonal even-column selector, no int div
        m = ((rows == 2 * cols + n * (L2F - 2 * L2))
             & (cols >= n * L2) & (cols < (n + 1) * L2))
        keep = m if keep is None else (keep | m)
    sel = keep.astype(jnp.float32)
    h2 = batchnorm(
        jnp.maximum(jnp.dot(full2, sel, preferred_element_type=jnp.float32)
                    + b2_ref[...], 0.0),
        g2_ref, be2_ref)                                               # (32, N*45)

    h3 = batchnorm(conv_bias_relu(h2, w3_ref, b3_ref, L2, K3, L3),
                   g3_ref, be3_ref)                                    # (32, N*41)
    h4 = batchnorm(conv_bias_relu(h3, w4_ref, b4_ref, L3, K4, L4),
                   g4_ref, be4_ref)                                    # (32, N*35)

    # torch's x.view(-1, 32*35): scatter each (channel, sample) strip into a
    # lane-dense (N, 1120) VMEM buffer.  Small static stores; avoids a lane-dim
    # reshape and keeps the conv->head handoff lane-dense and on-chip.
    for n in range(n_batch):
        for c in range(C4):
            flat_ref[n, c * L4:(c + 1) * L4] = h4[c, n * L4:(n + 1) * L4]

    # dense5 (bf16 weights, f32 accumulation) + SELU
    w5_copy.wait()
    flat = flat_ref[...].astype(jnp.bfloat16)
    y = jnp.dot(flat, w5_vmem[...], preferred_element_type=jnp.float32) + b5_ref[...]
    y = SELU_SCALE * jnp.where(y > 0.0, y,
                               SELU_ALPHA * (jnp.exp(jnp.minimum(y, 0.0)) - 1.0))

    # dense6 + softmax(dim=1)
    logits = jnp.dot(y, w6_ref[...], preferred_element_type=jnp.float32) + b6_ref[...]
    m = jnp.max(logits, axis=1, keepdims=True)
    e = jnp.exp(logits - m)
    out_ref[...] = e / jnp.sum(e, axis=1, keepdims=True)


def cnn_forward(x, params):
    (w1, b1, g1, be1, w2, b2, g2, be2, w3, b3, g3, be3, w4, b4, g4, be4,
     w5t, b5, w6t, b6) = params
    n = x.shape[0]
    outclasses = b6.shape[1]

    def full_spec(a):
        nd = a.ndim
        return pl.BlockSpec(a.shape, lambda i, _nd=nd: (0,) * _nd)

    regular = (x, w1, b1, g1, be1, w2, b2, g2, be2,
               w3, b3, g3, be3, w4, b4, g4, be4)
    in_specs = [full_spec(a) for a in regular]
    in_specs.append(pl.BlockSpec(memory_space=pl.ANY))   # w5t stays in HBM; DMA'd in-kernel
    in_specs += [full_spec(b5), full_spec(w6t), full_spec(b6)]

    # TODO(synk): batch cannot be split across v7x's two TensorCores here
    # because training-mode BatchNorm couples all samples in the batch.
    return pl.pallas_call(
        cnn_kernel,
        out_shape=jax.ShapeDtypeStruct((n, outclasses), jnp.float32),
        grid=(1,),
        in_specs=in_specs,
        out_specs=pl.BlockSpec((n, outclasses), lambda i: (0, 0)),
        scratch_shapes=[
            pltpu.VMEM(w5t.shape, w5t.dtype),       # dense5 weight landing buffer
            pltpu.SemaphoreType.DMA,                # its DMA completion semaphore
            pltpu.VMEM((n, FLAT), jnp.float32),     # lane-dense flatten buffer
        ],
        compiler_params=pltpu.CompilerParams(dimension_semantics=("arbitrary",)),
    )(*regular, w5t, b5, w6t, b6)


def init_params(key, outclasses):
    ks = jax.random.split(key, 6)

    def conv_pack(k, cout, cin, ksz):
        kw, kb = jax.random.split(k)
        bound = 1.0 / np.sqrt(cin * ksz)            # PyTorch default init
        w = jax.random.uniform(kw, (cout, cin, ksz), jnp.float32, -bound, bound)
        b = jax.random.uniform(kb, (cout, 1), jnp.float32, -bound, bound)
        # im2col packing: wp[co, k*cin + ci] = w[co, ci, k]
        wp = jnp.transpose(w, (0, 2, 1)).reshape(cout, ksz * cin)
        gamma = jnp.ones((cout, 1), jnp.float32)    # BatchNorm1d default affine
        beta = jnp.zeros((cout, 1), jnp.float32)
        return wp, b, gamma, beta

    def lin_pack(k, out_f, in_f, dtype):
        kw, kb = jax.random.split(k)
        bound = 1.0 / np.sqrt(in_f)
        w = jax.random.uniform(kw, (out_f, in_f), jnp.float32, -bound, bound)
        b = jax.random.uniform(kb, (1, out_f), jnp.float32, -bound, bound)
        return jnp.transpose(w).astype(dtype), b    # (in_f, out_f), (1, out_f)

    p1 = conv_pack(ks[0], C1, 3, K1)
    p2 = conv_pack(ks[1], C2, C1, K2)
    p3 = conv_pack(ks[2], C3, C2, K3)
    p4 = conv_pack(ks[3], C4, C3, K4)
    p5 = lin_pack(ks[4], 768, FLAT, jnp.bfloat16)   # dense5 weight in bf16 (dominant HBM traffic)
    p6 = lin_pack(ks[5], outclasses, 768, jnp.float32)
    return (*p1, *p2, *p3, *p4, *p5, *p6)


def reference_forward(x, params):
    """Pure-JAX/XLA reference of the same forward (for correctness checking)."""
    (w1, b1, g1, be1, w2, b2, g2, be2, w3, b3, g3, be3, w4, b4, g4, be4,
     w5t, b5, w6t, b6) = params
    hi = jax.lax.Precision.HIGHEST

    def unpack(wp, cin, ksz):
        cout = wp.shape[0]
        return wp.reshape(cout, ksz, cin).transpose(0, 2, 1)   # (cout, cin, ksz)

    def conv_bn_relu(h, wp, b, g, be, cin, ksz, stride):
        w = unpack(wp, cin, ksz)
        y = jax.lax.conv_general_dilated(
            h, w, window_strides=(stride,), padding='VALID',
            dimension_numbers=('NCH', 'OIH', 'NCH'), precision=hi)
        y = jnp.maximum(y + b[None, :, :], 0.0)
        mean = y.mean(axis=(0, 2), keepdims=True)
        var = ((y - mean) ** 2).mean(axis=(0, 2), keepdims=True)
        return g[None] * (y - mean) * jax.lax.rsqrt(var + EPS) + be[None]

    h = conv_bn_relu(x, w1, b1, g1, be1, 3, K1, 1)
    h = conv_bn_relu(h, w2, b2, g2, be2, C1, K2, 2)
    h = conv_bn_relu(h, w3, b3, g3, be3, C2, K3, 1)
    h = conv_bn_relu(h, w4, b4, g4, be4, C3, K4, 1)
    flat = h.reshape(h.shape[0], -1)
    # mirror the kernel's bf16 activation/weight quantization for dense5
    flat = flat.astype(jnp.bfloat16).astype(jnp.float32)
    y = jnp.dot(flat, w5t.astype(jnp.float32), precision=hi) + b5
    y = SELU_SCALE * jnp.where(y > 0.0, y,
                               SELU_ALPHA * (jnp.exp(jnp.minimum(y, 0.0)) - 1.0))
    logits = jnp.dot(y, w6t, precision=hi) + b6
    return jax.nn.softmax(logits, axis=1)


if __name__ == "__main__":
    outclasses = 10
    key = jax.random.PRNGKey(0)
    kx, kp = jax.random.split(key)
    x = jax.random.normal(kx, (2, 3, L_IN), jnp.float32)   # (N=2, C=3, L=99)
    params = init_params(kp, outclasses)

    probs = jax.block_until_ready(cnn_forward(x, params))
    ref = jax.block_until_ready(reference_forward(x, params))

    assert probs.shape == (2, outclasses)
    assert bool(jnp.all(jnp.isfinite(probs)))
    assert bool(jnp.all(jnp.abs(jnp.sum(probs, axis=1) - 1.0) < 1e-4))
    assert float(jnp.max(jnp.abs(probs - ref))) < 5e-3
    print("KERNEL_OK")
</pallas_src>

<mosaic_0001>
module attributes {stable_mosaic.version = 11 : i64} {
  func.func @cnn_kernel(%arg0: i32, %arg1: memref<2x3x99xf32, #tpu.memory_space<vmem>>, %arg2: memref<64x15xf32, #tpu.memory_space<vmem>>, %arg3: memref<64x1xf32, #tpu.memory_space<vmem>>, %arg4: memref<64x1xf32, #tpu.memory_space<vmem>>, %arg5: memref<64x1xf32, #tpu.memory_space<vmem>>, %arg6: memref<32x448xf32, #tpu.memory_space<vmem>>, %arg7: memref<32x1xf32, #tpu.memory_space<vmem>>, %arg8: memref<32x1xf32, #tpu.memory_space<vmem>>, %arg9: memref<32x1xf32, #tpu.memory_space<vmem>>, %arg10: memref<32x160xf32, #tpu.memory_space<vmem>>, %arg11: memref<32x1xf32, #tpu.memory_space<vmem>>, %arg12: memref<32x1xf32, #tpu.memory_space<vmem>>, %arg13: memref<32x1xf32, #tpu.memory_space<vmem>>, %arg14: memref<32x224xf32, #tpu.memory_space<vmem>>, %arg15: memref<32x1xf32, #tpu.memory_space<vmem>>, %arg16: memref<32x1xf32, #tpu.memory_space<vmem>>, %arg17: memref<32x1xf32, #tpu.memory_space<vmem>>, %arg18: memref<1120x768xbf16, #tpu.memory_space<any>>, %arg19: memref<1x768xf32, #tpu.memory_space<vmem>>, %arg20: memref<768x10xf32, #tpu.memory_space<vmem>>, %arg21: memref<1x10xf32, #tpu.memory_space<vmem>>, %arg22: memref<2x10xf32, #tpu.memory_space<vmem>>, %arg23: memref<1120x768xbf16, #tpu.memory_space<vmem>>, %arg24: memref<!tpu.dma_semaphore, #tpu.memory_space<semaphore_mem>>, %arg25: memref<2x1120xf32, #tpu.memory_space<vmem>>) attributes {dimension_semantics = [#tpu.dimension_semantics<arbitrary>], iteration_bounds = array<i64: 1>, scalar_prefetch = 0 : i64, scratch_operands = 3 : i64, tpu.core_type = #tpu.core_type<tc>, window_params = [{pipeline_mode = #tpu.pipeline_mode<synchronous>, transform_indices = @transform_0, window_bounds = array<i64: 2, 3, 99>}, {pipeline_mode = #tpu.pipeline_mode<synchronous>, transform_indices = @transform_1, window_bounds = array<i64: 64, 15>}, {pipeline_mode = #tpu.pipeline_mode<synchronous>, transform_indices = @transform_2, window_bounds = array<i64: 64, 1>}, {pipeline_mode = #tpu.pipeline_mode<synchronous>, transform_indices = @transform_3, window_bounds = array<i64: 64, 1>}, {pipeline_mode = #tpu.pipeline_mode<synchronous>, transform_indices = @transform_4, window_bounds = array<i64: 64, 1>}, {pipeline_mode = #tpu.pipeline_mode<synchronous>, transform_indices = @transform_5, window_bounds = array<i64: 32, 448>}, {pipeline_mode = #tpu.pipeline_mode<synchronous>, transform_indices = @transform_6, window_bounds = array<i64: 32, 1>}, {pipeline_mode = #tpu.pipeline_mode<synchronous>, transform_indices = @transform_7, window_bounds = array<i64: 32, 1>}, {pipeline_mode = #tpu.pipeline_mode<synchronous>, transform_indices = @transform_8, window_bounds = array<i64: 32, 1>}, {pipeline_mode = #tpu.pipeline_mode<synchronous>, transform_indices = @transform_9, window_bounds = array<i64: 32, 160>}, {pipeline_mode = #tpu.pipeline_mode<synchronous>, transform_indices = @transform_10, window_bounds = array<i64: 32, 1>}, {pipeline_mode = #tpu.pipeline_mode<synchronous>, transform_indices = @transform_11, window_bounds = array<i64: 32, 1>}, {pipeline_mode = #tpu.pipeline_mode<synchronous>, transform_indices = @transform_12, window_bounds = array<i64: 32, 1>}, {pipeline_mode = #tpu.pipeline_mode<synchronous>, transform_indices = @transform_13, window_bounds = array<i64: 32, 224>}, {pipeline_mode = #tpu.pipeline_mode<synchronous>, transform_indices = @transform_14, window_bounds = array<i64: 32, 1>}, {pipeline_mode = #tpu.pipeline_mode<synchronous>, transform_indices = @transform_15, window_bounds = array<i64: 32, 1>}, {pipeline_mode = #tpu.pipeline_mode<synchronous>, transform_indices = @transform_16, window_bounds = array<i64: 32, 1>}, {}, {pipeline_mode = #tpu.pipeline_mode<synchronous>, transform_indices = @transform_18, window_bounds = array<i64: 1, 768>}, {pipeline_mode = #tpu.pipeline_mode<synchronous>, transform_indices = @transform_19, window_bounds = array<i64: 768, 10>}, {pipeline_mode = #tpu.pipeline_mode<synchronous>, transform_indices = @transform_20, window_bounds = array<i64: 1, 10>}, {pipeline_mode = #tpu.pipeline_mode<synchronous>, transform_indices = @transform_21, window_bounds = array<i64: 2, 10>}]} {
    tpu.enqueue_dma source(%arg18 : memref<1120x768xbf16, #tpu.memory_space<any>>) target(%arg23 : memref<1120x768xbf16, #tpu.memory_space<vmem>>) target_semaphore(%arg24 : memref<!tpu.dma_semaphore, #tpu.memory_space<semaphore_mem>>)
    %c0 = arith.constant 0 : index
    %c0_0 = arith.constant 0 : index
    %c0_1 = arith.constant 0 : index
    %0 = vector.load %arg1[%c0, %c0_0, %c0_1] : memref<2x3x99xf32, #tpu.memory_space<vmem>>, vector<2x3x99xf32>
    %1 = vector.extract_strided_slice %0 {offsets = [0, 0, 0], sizes = [1, 3, 99], strides = [1, 1, 1]} : vector<2x3x99xf32> to vector<1x3x99xf32>
    %2 = vector.shape_cast %1 : vector<1x3x99xf32> to vector<3x99xf32>
    %3 = vector.extract_strided_slice %0 {offsets = [1, 0, 0], sizes = [1, 3, 99], strides = [1, 1, 1]} : vector<2x3x99xf32> to vector<1x3x99xf32>
    %4 = vector.shape_cast %3 : vector<1x3x99xf32> to vector<3x99xf32>
    %5 = tpu.concatenate %2, %4 in 1 : vector<3x99xf32>, vector<3x99xf32> -> vector<3x198xf32>
    %6 = vector.extract_strided_slice %5 {offsets = [0, 0], sizes = [3, 95], strides = [1, 1]} : vector<3x198xf32> to vector<3x95xf32>
    %7 = vector.extract_strided_slice %5 {offsets = [0, 1], sizes = [3, 95], strides = [1, 1]} : vector<3x198xf32> to vector<3x95xf32>
    %8 = vector.extract_strided_slice %5 {offsets = [0, 2], sizes = [3, 95], strides = [1, 1]} : vector<3x198xf32> to vector<3x95xf32>
    %9 = vector.extract_strided_slice %5 {offsets = [0, 3], sizes = [3, 95], strides = [1, 1]} : vector<3x198xf32> to vector<3x95xf32>
    %10 = vector.extract_strided_slice %5 {offsets = [0, 4], sizes = [3, 95], strides = [1, 1]} : vector<3x198xf32> to vector<3x95xf32>
    %11 = tpu.concatenate %6, %7, %8, %9, %10 in 0 : vector<3x95xf32>, vector<3x95xf32>, vector<3x95xf32>, vector<3x95xf32>, vector<3x95xf32> -> vector<15x95xf32>
    %12 = vector.extract_strided_slice %5 {offsets = [0, 99], sizes = [3, 95], strides = [1, 1]} : vector<3x198xf32> to vector<3x95xf32>
    %13 = vector.extract_strided_slice %5 {offsets = [0, 100], sizes = [3, 95], strides = [1, 1]} : vector<3x198xf32> to vector<3x95xf32>
    %14 = vector.extract_strided_slice %5 {offsets = [0, 101], sizes = [3, 95], strides = [1, 1]} : vector<3x198xf32> to vector<3x95xf32>
    %15 = vector.extract_strided_slice %5 {offsets = [0, 102], sizes = [3, 95], strides = [1, 1]} : vector<3x198xf32> to vector<3x95xf32>
    %16 = vector.extract_strided_slice %5 {offsets = [0, 103], sizes = [3, 95], strides = [1, 1]} : vector<3x198xf32> to vector<3x95xf32>
    %17 = tpu.concatenate %12, %13, %14, %15, %16 in 0 : vector<3x95xf32>, vector<3x95xf32>, vector<3x95xf32>, vector<3x95xf32>, vector<3x95xf32> -> vector<15x95xf32>
    %18 = tpu.concatenate %11, %17 in 1 : vector<15x95xf32>, vector<15x95xf32> -> vector<15x190xf32>
    %c0_2 = arith.constant 0 : index
    %c0_3 = arith.constant 0 : index
    %19 = vector.load %arg2[%c0_2, %c0_3] : memref<64x15xf32, #tpu.memory_space<vmem>>, vector<64x15xf32>
    %cst = arith.constant dense<0.000000e+00> : vector<64x190xf32>
    %20 = tpu.matmul %19, %18, %cst {dimension_numbers = #tpu.dot_dimension_numbers<[1], [0], [0], [1], [0, 0, 1, 1], [], []>} : vector<64x15xf32>, vector<15x190xf32>, vector<64x190xf32> -> vector<64x190xf32>
    %c0_4 = arith.constant 0 : index
    %c0_5 = arith.constant 0 : index
    %21 = vector.load %arg3[%c0_4, %c0_5] : memref<64x1xf32, #tpu.memory_space<vmem>>, vector<64x1xf32>
    %22 = vector.broadcast %21 : vector<64x1xf32> to vector<64x190xf32>
    %23 = arith.addf %20, %22 : vector<64x190xf32>
    %cst_6 = arith.constant 0.000000e+00 : f32
    %24 = vector.broadcast %cst_6 : f32 to vector<64x190xf32>
    %25 = arith.maximumf %23, %24 : vector<64x190xf32>
    %cst_7 = arith.constant dense<0.000000e+00> : vector<64xf32>
    %26 = vector.multi_reduction <add>, %25, %cst_7 [1] : vector<64x190xf32> to vector<64xf32>
    %27 = vector.shape_cast %26 : vector<64xf32> to vector<64x1xf32>
    %cst_8 = arith.constant 1.900000e+02 : f32
    %28 = vector.broadcast %cst_8 : f32 to vector<64x1xf32>
    %29 = arith.divf %27, %28 : vector<64x1xf32>
    %30 = vector.broadcast %29 : vector<64x1xf32> to vector<64x190xf32>
    %31 = arith.subf %25, %30 : vector<64x190xf32>
    %32 = arith.mulf %31, %31 : vector<64x190xf32>
    %cst_9 = arith.constant dense<0.000000e+00> : vector<64xf32>
    %33 = vector.multi_reduction <add>, %32, %cst_9 [1] : vector<64x190xf32> to vector<64xf32>
    %34 = vector.shape_cast %33 : vector<64xf32> to vector<64x1xf32>
    %cst_10 = arith.constant 1.900000e+02 : f32
    %35 = vector.broadcast %cst_10 : f32 to vector<64x1xf32>
    %36 = arith.divf %34, %35 : vector<64x1xf32>
    %c0_11 = arith.constant 0 : index
    %c0_12 = arith.constant 0 : index
    %37 = vector.load %arg4[%c0_11, %c0_12] : memref<64x1xf32, #tpu.memory_space<vmem>>, vector<64x1xf32>
    %38 = vector.broadcast %37 : vector<64x1xf32> to vector<64x190xf32>
    %39 = arith.mulf %38, %31 : vector<64x190xf32>
    %cst_13 = arith.constant 9.99999974E-6 : f32
    %40 = vector.broadcast %cst_13 : f32 to vector<64x1xf32>
    %41 = arith.addf %36, %40 : vector<64x1xf32>
    %42 = math.rsqrt %41 : vector<64x1xf32>
    %43 = vector.broadcast %42 : vector<64x1xf32> to vector<64x190xf32>
    %44 = arith.mulf %39, %43 : vector<64x190xf32>
    %c0_14 = arith.constant 0 : index
    %c0_15 = arith.constant 0 : index
    %45 = vector.load %arg5[%c0_14, %c0_15] : memref<64x1xf32, #tpu.memory_space<vmem>>, vector<64x1xf32>
    %46 = vector.broadcast %45 : vector<64x1xf32> to vector<64x190xf32>
    %47 = arith.addf %44, %46 : vector<64x190xf32>
    %c0_16 = arith.constant 0 : index
    %c0_17 = arith.constant 0 : index
    %48 = vector.load %arg6[%c0_16, %c0_17] : memref<32x448xf32, #tpu.memory_space<vmem>>, vector<32x448xf32>
    %49 = vector.extract_strided_slice %47 {offsets = [0, 0], sizes = [64, 89], strides = [1, 1]} : vector<64x190xf32> to vector<64x89xf32>
    %50 = vector.extract_strided_slice %47 {offsets = [0, 1], sizes = [64, 89], strides = [1, 1]} : vector<64x190xf32> to vector<64x89xf32>
    %51 = vector.extract_strided_slice %47 {offsets = [0, 2], sizes = [64, 89], strides = [1, 1]} : vector<64x190xf32> to vector<64x89xf32>
    %52 = vector.extract_strided_slice %47 {offsets = [0, 3], sizes = [64, 89], strides = [1, 1]} : vector<64x190xf32> to vector<64x89xf32>
    %53 = vector.extract_strided_slice %47 {offsets = [0, 4], sizes = [64, 89], strides = [1, 1]} : vector<64x190xf32> to vector<64x89xf32>
    %54 = vector.extract_strided_slice %47 {offsets = [0, 5], sizes = [64, 89], strides = [1, 1]} : vector<64x190xf32> to vector<64x89xf32>
    %55 = vector.extract_strided_slice %47 {offsets = [0, 6], sizes = [64, 89], strides = [1, 1]} : vector<64x190xf32> to vector<64x89xf32>
    %56 = tpu.concatenate %49, %50, %51, %52, %53, %54, %55 in 0 : vector<64x89xf32>, vector<64x89xf32>, vector<64x89xf32>, vector<64x89xf32>, vector<64x89xf32>, vector<64x89xf32>, vector<64x89xf32> -> vector<448x89xf32>
    %57 = vector.extract_strided_slice %47 {offsets = [0, 95], sizes = [64, 89], strides = [1, 1]} : vector<64x190xf32> to vector<64x89xf32>
    %58 = vector.extract_strided_slice %47 {offsets = [0, 96], sizes = [64, 89], strides = [1, 1]} : vector<64x190xf32> to vector<64x89xf32>
    %59 = vector.extract_strided_slice %47 {offsets = [0, 97], sizes = [64, 89], strides = [1, 1]} : vector<64x190xf32> to vector<64x89xf32>
    %60 = vector.extract_strided_slice %47 {offsets = [0, 98], sizes = [64, 89], strides = [1, 1]} : vector<64x190xf32> to vector<64x89xf32>
    %61 = vector.extract_strided_slice %47 {offsets = [0, 99], sizes = [64, 89], strides = [1, 1]} : vector<64x190xf32> to vector<64x89xf32>
    %62 = vector.extract_strided_slice %47 {offsets = [0, 100], sizes = [64, 89], strides = [1, 1]} : vector<64x190xf32> to vector<64x89xf32>
    %63 = vector.extract_strided_slice %47 {offsets = [0, 101], sizes = [64, 89], strides = [1, 1]} : vector<64x190xf32> to vector<64x89xf32>
    %64 = tpu.concatenate %57, %58, %59, %60, %61, %62, %63 in 0 : vector<64x89xf32>, vector<64x89xf32>, vector<64x89xf32>, vector<64x89xf32>, vector<64x89xf32>, vector<64x89xf32>, vector<64x89xf32> -> vector<448x89xf32>
    %65 = tpu.concatenate %56, %64 in 1 : vector<448x89xf32>, vector<448x89xf32> -> vector<448x178xf32>
    %cst_18 = arith.constant dense<0.000000e+00> : vector<32x178xf32>
    %66 = tpu.matmul %48, %65, %cst_18 {dimension_numbers = #tpu.dot_dimension_numbers<[1], [0], [0], [1], [0, 0, 1, 1], [], []>} : vector<32x448xf32>, vector<448x178xf32>, vector<32x178xf32> -> vector<32x178xf32>
    %67 = tpu.iota {dimensions = array<i32: 0>} : vector<178x90xi32>
    %68 = tpu.iota {dimensions = array<i32: 1>} : vector<178x90xi32>
    %c2_i32 = arith.constant 2 : i32
    %69 = vector.broadcast %c2_i32 : i32 to vector<178x90xi32>
    %70 = arith.muli %69, %68 : vector<178x90xi32>
    %c0_i32 = arith.constant 0 : i32
    %71 = vector.broadcast %c0_i32 : i32 to vector<178x90xi32>
    %72 = arith.addi %70, %71 : vector<178x90xi32>
    %73 = arith.cmpi eq, %67, %72 : vector<178x90xi32>
    %c0_i32_19 = arith.constant 0 : i32
    %74 = vector.broadcast %c0_i32_19 : i32 to vector<178x90xi32>
    %75 = arith.cmpi sge, %68, %74 : vector<178x90xi32>
    %76 = arith.andi %73, %75 : vector<178x90xi1>
    %c45_i32 = arith.constant 45 : i32
    %77 = vector.broadcast %c45_i32 : i32 to vector<178x90xi32>
    %78 = arith.cmpi slt, %68, %77 : vector<178x90xi32>
    %79 = arith.andi %76, %78 : vector<178x90xi1>
    %c2_i32_20 = arith.constant 2 : i32
    %80 = vector.broadcast %c2_i32_20 : i32 to vector<178x90xi32>
    %81 = arith.muli %80, %68 : vector<178x90xi32>
    %c-1_i32 = arith.constant -1 : i32
    %82 = vector.broadcast %c-1_i32 : i32 to vector<178x90xi32>
    %83 = arith.addi %81, %82 : vector<178x90xi32>
    %84 = arith.cmpi eq, %67, %83 : vector<178x90xi32>
    %c45_i32_21 = arith.constant 45 : i32
    %85 = vector.broadcast %c45_i32_21 : i32 to vector<178x90xi32>
    %86 = arith.cmpi sge, %68, %85 : vector<178x90xi32>
    %87 = arith.andi %84, %86 : vector<178x90xi1>
    %c90_i32 = arith.constant 90 : i32
    %88 = vector.broadcast %c90_i32 : i32 to vector<178x90xi32>
    %89 = arith.cmpi slt, %68, %88 : vector<178x90xi32>
    %90 = arith.andi %87, %89 : vector<178x90xi1>
    %91 = arith.ori %79, %90 : vector<178x90xi1>
    %92 = arith.extui %91 : vector<178x90xi1> to vector<178x90xi32>
    %93 = arith.sitofp %92 : vector<178x90xi32> to vector<178x90xf32>
    %cst_22 = arith.constant dense<0.000000e+00> : vector<32x90xf32>
    %94 = tpu.matmul %66, %93, %cst_22 {dimension_numbers = #tpu.dot_dimension_numbers<[1], [0], [0], [1], [0, 0, 1, 1], [], []>} : vector<32x178xf32>, vector<178x90xf32>, vector<32x90xf32> -> vector<32x90xf32>
    %c0_23 = arith.constant 0 : index
    %c0_24 = arith.constant 0 : index
    %95 = vector.load %arg7[%c0_23, %c0_24] : memref<32x1xf32, #tpu.memory_space<vmem>>, vector<32x1xf32>
    %96 = vector.broadcast %95 : vector<32x1xf32> to vector<32x90xf32>
    %97 = arith.addf %94, %96 : vector<32x90xf32>
    %cst_25 = arith.constant 0.000000e+00 : f32
    %98 = vector.broadcast %cst_25 : f32 to vector<32x90xf32>
    %99 = arith.maximumf %97, %98 : vector<32x90xf32>
    %cst_26 = arith.constant dense<0.000000e+00> : vector<32xf32>
    %100 = vector.multi_reduction <add>, %99, %cst_26 [1] : vector<32x90xf32> to vector<32xf32>
    %101 = vector.shape_cast %100 : vector<32xf32> to vector<32x1xf32>
    %cst_27 = arith.constant 9.000000e+01 : f32
    %102 = vector.broadcast %cst_27 : f32 to vector<32x1xf32>
    %103 = arith.divf %101, %102 : vector<32x1xf32>
    %104 = vector.broadcast %103 : vector<32x1xf32> to vector<32x90xf32>
    %105 = arith.subf %99, %104 : vector<32x90xf32>
    %106 = arith.mulf %105, %105 : vector<32x90xf32>
    %cst_28 = arith.constant dense<0.000000e+00> : vector<32xf32>
    %107 = vector.multi_reduction <add>, %106, %cst_28 [1] : vector<32x90xf32> to vector<32xf32>
    %108 = vector.shape_cast %107 : vector<32xf32> to vector<32x1xf32>
    %cst_29 = arith.constant 9.000000e+01 : f32
    %109 = vector.broadcast %cst_29 : f32 to vector<32x1xf32>
    %110 = arith.divf %108, %109 : vector<32x1xf32>
    %c0_30 = arith.constant 0 : index
    %c0_31 = arith.constant 0 : index
    %111 = vector.load %arg8[%c0_30, %c0_31] : memref<32x1xf32, #tpu.memory_space<vmem>>, vector<32x1xf32>
    %112 = vector.broadcast %111 : vector<32x1xf32> to vector<32x90xf32>
    %113 = arith.mulf %112, %105 : vector<32x90xf32>
    %cst_32 = arith.constant 9.99999974E-6 : f32
    %114 = vector.broadcast %cst_32 : f32 to vector<32x1xf32>
    %115 = arith.addf %110, %114 : vector<32x1xf32>
    %116 = math.rsqrt %115 : vector<32x1xf32>
    %117 = vector.broadcast %116 : vector<32x1xf32> to vector<32x90xf32>
    %118 = arith.mulf %113, %117 : vector<32x90xf32>
    %c0_33 = arith.constant 0 : index
    %c0_34 = arith.constant 0 : index
    %119 = vector.load %arg9[%c0_33, %c0_34] : memref<32x1xf32, #tpu.memory_space<vmem>>, vector<32x1xf32>
    %120 = vector.broadcast %119 : vector<32x1xf32> to vector<32x90xf32>
    %121 = arith.addf %118, %120 : vector<32x90xf32>
    %122 = vector.extract_strided_slice %121 {offsets = [0, 0], sizes = [32, 41], strides = [1, 1]} : vector<32x90xf32> to vector<32x41xf32>
    %123 = vector.extract_strided_slice %121 {offsets = [0, 1], sizes = [32, 41], strides = [1, 1]} : vector<32x90xf32> to vector<32x41xf32>
    %124 = vector.extract_strided_slice %121 {offsets = [0, 2], sizes = [32, 41], strides = [1, 1]} : vector<32x90xf32> to vector<32x41xf32>
    %125 = vector.extract_strided_slice %121 {offsets = [0, 3], sizes = [32, 41], strides = [1, 1]} : vector<32x90xf32> to vector<32x41xf32>
    %126 = vector.extract_strided_slice %121 {offsets = [0, 4], sizes = [32, 41], strides = [1, 1]} : vector<32x90xf32> to vector<32x41xf32>
    %127 = tpu.concatenate %122, %123, %124, %125, %126 in 0 : vector<32x41xf32>, vector<32x41xf32>, vector<32x41xf32>, vector<32x41xf32>, vector<32x41xf32> -> vector<160x41xf32>
    %128 = vector.extract_strided_slice %121 {offsets = [0, 45], sizes = [32, 41], strides = [1, 1]} : vector<32x90xf32> to vector<32x41xf32>
    %129 = vector.extract_strided_slice %121 {offsets = [0, 46], sizes = [32, 41], strides = [1, 1]} : vector<32x90xf32> to vector<32x41xf32>
    %130 = vector.extract_strided_slice %121 {offsets = [0, 47], sizes = [32, 41], strides = [1, 1]} : vector<32x90xf32> to vector<32x41xf32>
    %131 = vector.extract_strided_slice %121 {offsets = [0, 48], sizes = [32, 41], strides = [1, 1]} : vector<32x90xf32> to vector<32x41xf32>
    %132 = vector.extract_strided_slice %121 {offsets = [0, 49], sizes = [32, 41], strides = [1, 1]} : vector<32x90xf32> to vector<32x41xf32>
    %133 = tpu.concatenate %128, %129, %130, %131, %132 in 0 : vector<32x41xf32>, vector<32x41xf32>, vector<32x41xf32>, vector<32x41xf32>, vector<32x41xf32> -> vector<160x41xf32>
    %134 = tpu.concatenate %127, %133 in 1 : vector<160x41xf32>, vector<160x41xf32> -> vector<160x82xf32>
    %c0_35 = arith.constant 0 : index
    %c0_36 = arith.constant 0 : index
    %135 = vector.load %arg10[%c0_35, %c0_36] : memref<32x160xf32, #tpu.memory_space<vmem>>, vector<32x160xf32>
    %cst_37 = arith.constant dense<0.000000e+00> : vector<32x82xf32>
    %136 = tpu.matmul %135, %134, %cst_37 {dimension_numbers = #tpu.dot_dimension_numbers<[1], [0], [0], [1], [0, 0, 1, 1], [], []>} : vector<32x160xf32>, vector<160x82xf32>, vector<32x82xf32> -> vector<32x82xf32>
    %c0_38 = arith.constant 0 : index
    %c0_39 = arith.constant 0 : index
    %137 = vector.load %arg11[%c0_38, %c0_39] : memref<32x1xf32, #tpu.memory_space<vmem>>, vector<32x1xf32>
    %138 = vector.broadcast %137 : vector<32x1xf32> to vector<32x82xf32>
    %139 = arith.addf %136, %138 : vector<32x82xf32>
    %cst_40 = arith.constant 0.000000e+00 : f32
    %140 = vector.broadcast %cst_40 : f32 to vector<32x82xf32>
    %141 = arith.maximumf %139, %140 : vector<32x82xf32>
    %cst_41 = arith.constant dense<0.000000e+00> : vector<32xf32>
    %142 = vector.multi_reduction <add>, %141, %cst_41 [1] : vector<32x82xf32> to vector<32xf32>
    %143 = vector.shape_cast %142 : vector<32xf32> to vector<32x1xf32>
    %cst_42 = arith.constant 8.200000e+01 : f32
    %144 = vector.broadcast %cst_42 : f32 to vector<32x1xf32>
    %145 = arith.divf %143, %144 : vector<32x1xf32>
    %146 = vector.broadcast %145 : vector<32x1xf32> to vector<32x82xf32>
    %147 = arith.subf %141, %146 : vector<32x82xf32>
    %148 = arith.mulf %147, %147 : vector<32x82xf32>
    %cst_43 = arith.constant dense<0.000000e+00> : vector<32xf32>
    %149 = vector.multi_reduction <add>, %148, %cst_43 [1] : vector<32x82xf32> to vector<32xf32>
    %150 = vector.shape_cast %149 : vector<32xf32> to vector<32x1xf32>
    %cst_44 = arith.constant 8.200000e+01 : f32
    %151 = vector.broadcast %cst_44 : f32 to vector<32x1xf32>
    %152 = arith.divf %150, %151 : vector<32x1xf32>
    %c0_45 = arith.constant 0 : index
    %c0_46 = arith.constant 0 : index
    %153 = vector.load %arg12[%c0_45, %c0_46] : memref<32x1xf32, #tpu.memory_space<vmem>>, vector<32x1xf32>
    %154 = vector.broadcast %153 : vector<32x1xf32> to vector<32x82xf32>
    %155 = arith.mulf %154, %147 : vector<32x82xf32>
    %cst_47 = arith.constant 9.99999974E-6 : f32
    %156 = vector.broadcast %cst_47 : f32 to vector<32x1xf32>
    %157 = arith.addf %152, %156 : vector<32x1xf32>
    %158 = math.rsqrt %157 : vector<32x1xf32>
    %159 = vector.broadcast %158 : vector<32x1xf32> to vector<32x82xf32>
    %160 = arith.mulf %155, %159 : vector<32x82xf32>
    %c0_48 = arith.constant 0 : index
    %c0_49 = arith.constant 0 : index
    %161 = vector.load %arg13[%c0_48, %c0_49] : memref<32x1xf32, #tpu.memory_space<vmem>>, vector<32x1xf32>
    %162 = vector.broadcast %161 : vector<32x1xf32> to vector<32x82xf32>
    %163 = arith.addf %160, %162 : vector<32x82xf32>
    %164 = vector.extract_strided_slice %163 {offsets = [0, 0], sizes = [32, 35], strides = [1, 1]} : vector<32x82xf32> to vector<32x35xf32>
    %165 = vector.extract_strided_slice %163 {offsets = [0, 1], sizes = [32, 35], strides = [1, 1]} : vector<32x82xf32> to vector<32x35xf32>
    %166 = vector.extract_strided_slice %163 {offsets = [0, 2], sizes = [32, 35], strides = [1, 1]} : vector<32x82xf32> to vector<32x35xf32>
    %167 = vector.extract_strided_slice %163 {offsets = [0, 3], sizes = [32, 35], strides = [1, 1]} : vector<32x82xf32> to vector<32x35xf32>
    %168 = vector.extract_strided_slice %163 {offsets = [0, 4], sizes = [32, 35], strides = [1, 1]} : vector<32x82xf32> to vector<32x35xf32>
    %169 = vector.extract_strided_slice %163 {offsets = [0, 5], sizes = [32, 35], strides = [1, 1]} : vector<32x82xf32> to vector<32x35xf32>
    %170 = vector.extract_strided_slice %163 {offsets = [0, 6], sizes = [32, 35], strides = [1, 1]} : vector<32x82xf32> to vector<32x35xf32>
    %171 = tpu.concatenate %164, %165, %166, %167, %168, %169, %170 in 0 : vector<32x35xf32>, vector<32x35xf32>, vector<32x35xf32>, vector<32x35xf32>, vector<32x35xf32>, vector<32x35xf32>, vector<32x35xf32> -> vector<224x35xf32>
    %172 = vector.extract_strided_slice %163 {offsets = [0, 41], sizes = [32, 35], strides = [1, 1]} : vector<32x82xf32> to vector<32x35xf32>
    %173 = vector.extract_strided_slice %163 {offsets = [0, 42], sizes = [32, 35], strides = [1, 1]} : vector<32x82xf32> to vector<32x35xf32>
    %174 = vector.extract_strided_slice %163 {offsets = [0, 43], sizes = [32, 35], strides = [1, 1]} : vector<32x82xf32> to vector<32x35xf32>
    %175 = vector.extract_strided_slice %163 {offsets = [0, 44], sizes = [32, 35], strides = [1, 1]} : vector<32x82xf32> to vector<32x35xf32>
    %176 = vector.extract_strided_slice %163 {offsets = [0, 45], sizes = [32, 35], strides = [1, 1]} : vector<32x82xf32> to vector<32x35xf32>
    %177 = vector.extract_strided_slice %163 {offsets = [0, 46], sizes = [32, 35], strides = [1, 1]} : vector<32x82xf32> to vector<32x35xf32>
    %178 = vector.extract_strided_slice %163 {offsets = [0, 47], sizes = [32, 35], strides = [1, 1]} : vector<32x82xf32> to vector<32x35xf32>
    %179 = tpu.concatenate %172, %173, %174, %175, %176, %177, %178 in 0 : vector<32x35xf32>, vector<32x35xf32>, vector<32x35xf32>, vector<32x35xf32>, vector<32x35xf32>, vector<32x35xf32>, vector<32x35xf32> -> vector<224x35xf32>
    %180 = tpu.concatenate %171, %179 in 1 : vector<224x35xf32>, vector<224x35xf32> -> vector<224x70xf32>
    %c0_50 = arith.constant 0 : index
    %c0_51 = arith.constant 0 : index
    %181 = vector.load %arg14[%c0_50, %c0_51] : memref<32x224xf32, #tpu.memory_space<vmem>>, vector<32x224xf32>
    %cst_52 = arith.constant dense<0.000000e+00> : vector<32x70xf32>
    %182 = tpu.matmul %181, %180, %cst_52 {dimension_numbers = #tpu.dot_dimension_numbers<[1], [0], [0], [1], [0, 0, 1, 1], [], []>} : vector<32x224xf32>, vector<224x70xf32>, vector<32x70xf32> -> vector<32x70xf32>
    %c0_53 = arith.constant 0 : index
    %c0_54 = arith.constant 0 : index
    %183 = vector.load %arg15[%c0_53, %c0_54] : memref<32x1xf32, #tpu.memory_space<vmem>>, vector<32x1xf32>
    %184 = vector.broadcast %183 : vector<32x1xf32> to vector<32x70xf32>
    %185 = arith.addf %182, %184 : vector<32x70xf32>
    %cst_55 = arith.constant 0.000000e+00 : f32
    %186 = vector.broadcast %cst_55 : f32 to vector<32x70xf32>
    %187 = arith.maximumf %185, %186 : vector<32x70xf32>
    %cst_56 = arith.constant dense<0.000000e+00> : vector<32xf32>
    %188 = vector.multi_reduction <add>, %187, %cst_56 [1] : vector<32x70xf32> to vector<32xf32>
    %189 = vector.shape_cast %188 : vector<32xf32> to vector<32x1xf32>
    %cst_57 = arith.constant 7.000000e+01 : f32
    %190 = vector.broadcast %cst_57 : f32 to vector<32x1xf32>
    %191 = arith.divf %189, %190 : vector<32x1xf32>
    %192 = vector.broadcast %191 : vector<32x1xf32> to vector<32x70xf32>
    %193 = arith.subf %187, %192 : vector<32x70xf32>
    %194 = arith.mulf %193, %193 : vector<32x70xf32>
    %cst_58 = arith.constant dense<0.000000e+00> : vector<32xf32>
    %195 = vector.multi_reduction <add>, %194, %cst_58 [1] : vector<32x70xf32> to vector<32xf32>
    %196 = vector.shape_cast %195 : vector<32xf32> to vector<32x1xf32>
    %cst_59 = arith.constant 7.000000e+01 : f32
    %197 = vector.broadcast %cst_59 : f32 to vector<32x1xf32>
    %198 = arith.divf %196, %197 : vector<32x1xf32>
    %c0_60 = arith.constant 0 : index
    %c0_61 = arith.constant 0 : index
    %199 = vector.load %arg16[%c0_60, %c0_61] : memref<32x1xf32, #tpu.memory_space<vmem>>, vector<32x1xf32>
    %200 = vector.broadcast %199 : vector<32x1xf32> to vector<32x70xf32>
    %201 = arith.mulf %200, %193 : vector<32x70xf32>
    %cst_62 = arith.constant 9.99999974E-6 : f32
    %202 = vector.broadcast %cst_62 : f32 to vector<32x1xf32>
    %203 = arith.addf %198, %202 : vector<32x1xf32>
    %204 = math.rsqrt %203 : vector<32x1xf32>
    %205 = vector.broadcast %204 : vector<32x1xf32> to vector<32x70xf32>
    %206 = arith.mulf %201, %205 : vector<32x70xf32>
    %c0_63 = arith.constant 0 : index
    %c0_64 = arith.constant 0 : index
    %207 = vector.load %arg17[%c0_63, %c0_64] : memref<32x1xf32, #tpu.memory_space<vmem>>, vector<32x1xf32>
    %208 = vector.broadcast %207 : vector<32x1xf32> to vector<32x70xf32>
    %209 = arith.addf %206, %208 : vector<32x70xf32>
    %210 = vector.extract_strided_slice %209 {offsets = [0, 0], sizes = [1, 35], strides = [1, 1]} : vector<32x70xf32> to vector<1x35xf32>
    %211 = vector.shape_cast %210 : vector<1x35xf32> to vector<35xf32>
    %c0_65 = arith.constant 0 : index
    %c0_66 = arith.constant 0 : index
    %212 = vector.load %arg25[%c0_65, %c0_66] : memref<2x1120xf32, #tpu.memory_space<vmem>>, vector<1x35xf32>
    %213 = vector.shape_cast %212 : vector<1x35xf32> to vector<35xf32>
    %214 = vector.shape_cast %211 : vector<35xf32> to vector<1x35xf32>
    tpu.vector_store %arg25[%c0_65, %c0_66], %214 {strides = array<i32>} : memref<2x1120xf32, #tpu.memory_space<vmem>>, vector<1x35xf32>,
    %215 = vector.extract_strided_slice %209 {offsets = [1, 0], sizes = [1, 35], strides = [1, 1]} : vector<32x70xf32> to vector<1x35xf32>
    %216 = vector.shape_cast %215 : vector<1x35xf32> to vector<35xf32>
    %c0_67 = arith.constant 0 : index
    %c35 = arith.constant 35 : index
    %217 = vector.load %arg25[%c0_67, %c35] : memref<2x1120xf32, #tpu.memory_space<vmem>>, vector<1x35xf32>
    %218 = vector.shape_cast %217 : vector<1x35xf32> to vector<35xf32>
    %219 = vector.shape_cast %216 : vector<35xf32> to vector<1x35xf32>
    tpu.vector_store %arg25[%c0_67, %c35], %219 {strides = array<i32>} : memref<2x1120xf32, #tpu.memory_space<vmem>>, vector<1x35xf32>,
    %220 = vector.extract_strided_slice %209 {offsets = [2, 0], sizes = [1, 35], strides = [1, 1]} : vector<32x70xf32> to vector<1x35xf32>
    %221 = vector.shape_cast %220 : vector<1x35xf32> to vector<35xf32>
    %c0_68 = arith.constant 0 : index
    %c70 = arith.constant 70 : index
    %222 = vector.load %arg25[%c0_68, %c70] : memref<2x1120xf32, #tpu.memory_space<vmem>>, vector<1x35xf32>
    %223 = vector.shape_cast %222 : vector<1x35xf32> to vector<35xf32>
    %224 = vector.shape_cast %221 : vector<35xf32> to vector<1x35xf32>
    tpu.vector_store %arg25[%c0_68, %c70], %224 {strides = array<i32>} : memref<2x1120xf32, #tpu.memory_space<vmem>>, vector<1x35xf32>,
    %225 = vector.extract_strided_slice %209 {offsets = [3, 0], sizes = [1, 35], strides = [1, 1]} : vector<32x70xf32> to vector<1x35xf32>
    %226 = vector.shape_cast %225 : vector<1x35xf32> to vector<35xf32>
    %c0_69 = arith.constant 0 : index
    %c105 = arith.constant 105 : index
    %227 = vector.load %arg25[%c0_69, %c105] : memref<2x1120xf32, #tpu.memory_space<vmem>>, vector<1x35xf32>
    %228 = vector.shape_cast %227 : vector<1x35xf32> to vector<35xf32>
    %229 = vector.shape_cast %226 : vector<35xf32> to vector<1x35xf32>
    tpu.vector_store %arg25[%c0_69, %c105], %229 {strides = array<i32>} : memref<2x1120xf32, #tpu.memory_space<vmem>>, vector<1x35xf32>,
    %230 = vector.extract_strided_slice %209 {offsets = [4, 0], sizes = [1, 35], strides = [1, 1]} : vector<32x70xf32> to vector<1x35xf32>
    %231 = vector.shape_cast %230 : vector<1x35xf32> to vector<35xf32>
    %c0_70 = arith.constant 0 : index
    %c140 = arith.constant 140 : index
    %232 = vector.load %arg25[%c0_70, %c140] : memref<2x1120xf32, #tpu.memory_space<vmem>>, vector<1x35xf32>
    %233 = vector.shape_cast %232 : vector<1x35xf32> to vector<35xf32>
    %234 = vector.shape_cast %231 : vector<35xf32> to vector<1x35xf32>
    tpu.vector_store %arg25[%c0_70, %c140], %234 {strides = array<i32>} : memref<2x1120xf32, #tpu.memory_space<vmem>>, vector<1x35xf32>,
    %235 = vector.extract_strided_slice %209 {offsets = [5, 0], sizes = [1, 35], strides = [1, 1]} : vector<32x70xf32> to vector<1x35xf32>
    %236 = vector.shape_cast %235 : vector<1x35xf32> to vector<35xf32>
    %c0_71 = arith.constant 0 : index
    %c175 = arith.constant 175 : index
    %237 = vector.load %arg25[%c0_71, %c175] : memref<2x1120xf32, #tpu.memory_space<vmem>>, vector<1x35xf32>
    %238 = vector.shape_cast %237 : vector<1x35xf32> to vector<35xf32>
    %239 = vector.shape_cast %236 : vector<35xf32> to vector<1x35xf32>
    tpu.vector_store %arg25[%c0_71, %c175], %239 {strides = array<i32>} : memref<2x1120xf32, #tpu.memory_space<vmem>>, vector<1x35xf32>,
    %240 = vector.extract_strided_slice %209 {offsets = [6, 0], sizes = [1, 35], strides = [1, 1]} : vector<32x70xf32> to vector<1x35xf32>
    %241 = vector.shape_cast %240 : vector<1x35xf32> to vector<35xf32>
    %c0_72 = arith.constant 0 : index
    %c210 = arith.constant 210 : index
    %242 = vector.load %arg25[%c0_72, %c210] : memref<2x1120xf32, #tpu.memory_space<vmem>>, vector<1x35xf32>
    %243 = vector.shape_cast %242 : vector<1x35xf32> to vector<35xf32>
    %244 = vector.shape_cast %241 : vector<35xf32> to vector<1x35xf32>
    tpu.vector_store %arg25[%c0_72, %c210], %244 {strides = array<i32>} : memref<2x1120xf32, #tpu.memory_space<vmem>>, vector<1x35xf32>,
    %245 = vector.extract_strided_slice %209 {offsets = [7, 0], sizes = [1, 35], strides = [1, 1]} : vector<32x70xf32> to vector<1x35xf32>
    %246 = vector.shape_cast %245 : vector<1x35xf32> to vector<35xf32>
    %c0_73 = arith.constant 0 : index
    %c245 = arith.constant 245 : index
    %247 = vector.load %arg25[%c0_73, %c245] : memref<2x1120xf32, #tpu.memory_space<vmem>>, vector<1x35xf32>
    %248 = vector.shape_cast %247 : vector<1x35xf32> to vector<35xf32>
    %249 = vector.shape_cast %246 : vector<35xf32> to vector<1x35xf32>
    tpu.vector_store %arg25[%c0_73, %c245], %249 {strides = array<i32>} : memref<2x1120xf32, #tpu.memory_space<vmem>>, vector<1x35xf32>,
    %250 = vector.extract_strided_slice %209 {offsets = [8, 0], sizes = [1, 35], strides = [1, 1]} : vector<32x70xf32> to vector<1x35xf32>
    %251 = vector.shape_cast %250 : vector<1x35xf32> to vector<35xf32>
    %c0_74 = arith.constant 0 : index
    %c280 = arith.constant 280 : index
    %252 = vector.load %arg25[%c0_74, %c280] : memref<2x1120xf32, #tpu.memory_space<vmem>>, vector<1x35xf32>
    %253 = vector.shape_cast %252 : vector<1x35xf32> to vector<35xf32>
    %254 = vector.shape_cast %251 : vector<35xf32> to vector<1x35xf32>
    tpu.vector_store %arg25[%c0_74, %c280], %254 {strides = array<i32>} : memref<2x1120xf32, #tpu.memory_space<vmem>>, vector<1x35xf32>,
    %255 = vector.extract_strided_slice %209 {offsets = [9, 0], sizes = [1, 35], strides = [1, 1]} : vector<32x70xf32> to vector<1x35xf32>
    %256 = vector.shape_cast %255 : vector<1x35xf32> to vector<35xf32>
    %c0_75 = arith.constant 0 : index
    %c315 = arith.constant 315 : index
    %257 = vector.load %arg25[%c0_75, %c315] : memref<2x1120xf32, #tpu.memory_space<vmem>>, vector<1x35xf32>
    %258 = vector.shape_cast %257 : vector<1x35xf32> to vector<35xf32>
    %259 = vector.shape_cast %256 : vector<35xf32> to vector<1x35xf32>
    tpu.vector_store %arg25[%c0_75, %c315], %259 {strides = array<i32>} : memref<2x1120xf32, #tpu.memory_space<vmem>>, vector<1x35xf32>,
    %260 = vector.extract_strided_slice %209 {offsets = [10, 0], sizes = [1, 35], strides = [1, 1]} : vector<32x70xf32> to vector<1x35xf32>
    %261 = vector.shape_cast %260 : vector<1x35xf32> to vector<35xf32>
    %c0_76 = arith.constant 0 : index
    %c350 = arith.constant 350 : index
    %262 = vector.load %arg25[%c0_76, %c350] : memref<2x1120xf32, #tpu.memory_space<vmem>>, vector<1x35xf32>
    %263 = vector.shape_cast %262 : vector<1x35xf32> to vector<35xf32>
    %264 = vector.shape_cast %261 : vector<35xf32> to vector<1x35xf32>
    tpu.vector_store %arg25[%c0_76, %c350], %264 {strides = array<i32>} : memref<2x1120xf32, #tpu.memory_space<vmem>>, vector<1x35xf32>,
    %265 = vector.extract_strided_slice %209 {offsets = [11, 0], sizes = [1, 35], strides = [1, 1]} : vector<32x70xf32> to vector<1x35xf32>
    %266 = vector.shape_cast %265 : vector<1x35xf32> to vector<35xf32>
    %c0_77 = arith.constant 0 : index
    %c385 = arith.constant 385 : index
    %267 = vector.load %arg25[%c0_77, %c385] : memref<2x1120xf32, #tpu.memory_space<vmem>>, vector<1x35xf32>
    %268 = vector.shape_cast %267 : vector<1x35xf32> to vector<35xf32>
    %269 = vector.shape_cast %266 : vector<35xf32> to vector<1x35xf32>
    tpu.vector_store %arg25[%c0_77, %c385], %269 {strides = array<i32>} : memref<2x1120xf32, #tpu.memory_space<vmem>>, vector<1x35xf32>,
    %270 = vector.extract_strided_slice %209 {offsets = [12, 0], sizes = [1, 35], strides = [1, 1]} : vector<32x70xf32> to vector<1x35xf32>
    %271 = vector.shape_cast %270 : vector<1x35xf32> to vector<35xf32>
    %c0_78 = arith.constant 0 : index
    %c420 = arith.constant 420 : index
    %272 = vector.load %arg25[%c0_78, %c420] : memref<2x1120xf32, #tpu.memory_space<vmem>>, vector<1x35xf32>
    %273 = vector.shape_cast %272 : vector<1x35xf32> to vector<35xf32>
    %274 = vector.shape_cast %271 : vector<35xf32> to vector<1x35xf32>
    tpu.vector_store %arg25[%c0_78, %c420], %274 {strides = array<i32>} : memref<2x1120xf32, #tpu.memory_space<vmem>>, vector<1x35xf32>,
    %275 = vector.extract_strided_slice %209 {offsets = [13, 0], sizes = [1, 35], strides = [1, 1]} : vector<32x70xf32> to vector<1x35xf32>
    %276 = vector.shape_cast %275 : vector<1x35xf32> to vector<35xf32>
    %c0_79 = arith.constant 0 : index
    %c455 = arith.constant 455 : index
    %277 = vector.load %arg25[%c0_79, %c455] : memref<2x1120xf32, #tpu.memory_space<vmem>>, vector<1x35xf32>
    %278 = vector.shape_cast %277 : vector<1x35xf32> to vector<35xf32>
    %279 = vector.shape_cast %276 : vector<35xf32> to vector<1x35xf32>
    tpu.vector_store %arg25[%c0_79, %c455], %279 {strides = array<i32>} : memref<2x1120xf32, #tpu.memory_space<vmem>>, vector<1x35xf32>,
    %280 = vector.extract_strided_slice %209 {offsets = [14, 0], sizes = [1, 35], strides = [1, 1]} : vector<32x70xf32> to vector<1x35xf32>
    %281 = vector.shape_cast %280 : vector<1x35xf32> to vector<35xf32>
    %c0_80 = arith.constant 0 : index
    %c490 = arith.constant 490 : index
    %282 = vector.load %arg25[%c0_80, %c490] : memref<2x1120xf32, #tpu.memory_space<vmem>>, vector<1x35xf32>
    %283 = vector.shape_cast %282 : vector<1x35xf32> to vector<35xf32>
    %284 = vector.shape_cast %281 : vector<35xf32> to vector<1x35xf32>
    tpu.vector_store %arg25[%c0_80, %c490], %284 {strides = array<i32>} : memref<2x1120xf32, #tpu.memory_space<vmem>>, vector<1x35xf32>,
    %285 = vector.extract_strided_slice %209 {offsets = [15, 0], sizes = [1, 35], strides = [1, 1]} : vector<32x70xf32> to vector<1x35xf32>
    %286 = vector.shape_cast %285 : vector<1x35xf32> to vector<35xf32>
    %c0_81 = arith.constant 0 : index
    %c525 = arith.constant 525 : index
    %287 = vector.load %arg25[%c0_81, %c525] : memref<2x1120xf32, #tpu.memory_space<vmem>>, vector<1x35xf32>
    %288 = vector.shape_cast %287 : vector<1x35xf32> to vector<35xf32>
    %289 = vector.shape_cast %286 : vector<35xf32> to vector<1x35xf32>
    tpu.vector_store %arg25[%c0_81, %c525], %289 {strides = array<i32>} : memref<2x1120xf32, #tpu.memory_space<vmem>>, vector<1x35xf32>,
    %290 = vector.extract_strided_slice %209 {offsets = [16, 0], sizes = [1, 35], strides = [1, 1]} : vector<32x70xf32> to vector<1x35xf32>
    %291 = vector.shape_cast %290 : vector<1x35xf32> to vector<35xf32>
    %c0_82 = arith.constant 0 : index
    %c560 = arith.constant 560 : index
    %292 = vector.load %arg25[%c0_82, %c560] : memref<2x1120xf32, #tpu.memory_space<vmem>>, vector<1x35xf32>
    %293 = vector.shape_cast %292 : vector<1x35xf32> to vector<35xf32>
    %294 = vector.shape_cast %291 : vector<35xf32> to vector<1x35xf32>
    tpu.vector_store %arg25[%c0_82, %c560], %294 {strides = array<i32>} : memref<2x1120xf32, #tpu.memory_space<vmem>>, vector<1x35xf32>,
    %295 = vector.extract_strided_slice %209 {offsets = [17, 0], sizes = [1, 35], strides = [1, 1]} : vector<32x70xf32> to vector<1x35xf32>
    %296 = vector.shape_cast %295 : vector<1x35xf32> to vector<35xf32>
    %c0_83 = arith.constant 0 : index
    %c595 = arith.constant 595 : index
    %297 = vector.load %arg25[%c0_83, %c595] : memref<2x1120xf32, #tpu.memory_space<vmem>>, vector<1x35xf32>
    %298 = vector.shape_cast %297 : vector<1x35xf32> to vector<35xf32>
    %299 = vector.shape_cast %296 : vector<35xf32> to vector<1x35xf32>
    tpu.vector_store %arg25[%c0_83, %c595], %299 {strides = array<i32>} : memref<2x1120xf32, #tpu.memory_space<vmem>>, vector<1x35xf32>,
    %300 = vector.extract_strided_slice %209 {offsets = [18, 0], sizes = [1, 35], strides = [1, 1]} : vector<32x70xf32> to vector<1x35xf32>
    %301 = vector.shape_cast %300 : vector<1x35xf32> to vector<35xf32>
    %c0_84 = arith.constant 0 : index
    %c630 = arith.constant 630 : index
    %302 = vector.load %arg25[%c0_84, %c630] : memref<2x1120xf32, #tpu.memory_space<vmem>>, vector<1x35xf32>
    %303 = vector.shape_cast %302 : vector<1x35xf32> to vector<35xf32>
    %304 = vector.shape_cast %301 : vector<35xf32> to vector<1x35xf32>
    tpu.vector_store %arg25[%c0_84, %c630], %304 {strides = array<i32>} : memref<2x1120xf32, #tpu.memory_space<vmem>>, vector<1x35xf32>,
    %305 = vector.extract_strided_slice %209 {offsets = [19, 0], sizes = [1, 35], strides = [1, 1]} : vector<32x70xf32> to vector<1x35xf32>
    %306 = vector.shape_cast %305 : vector<1x35xf32> to vector<35xf32>
    %c0_85 = arith.constant 0 : index
    %c665 = arith.constant 665 : index
    %307 = vector.load %arg25[%c0_85, %c665] : memref<2x1120xf32, #tpu.memory_space<vmem>>, vector<1x35xf32>
    %308 = vector.shape_cast %307 : vector<1x35xf32> to vector<35xf32>
    %309 = vector.shape_cast %306 : vector<35xf32> to vector<1x35xf32>
    tpu.vector_store %arg25[%c0_85, %c665], %309 {strides = array<i32>} : memref<2x1120xf32, #tpu.memory_space<vmem>>, vector<1x35xf32>,
    %310 = vector.extract_strided_slice %209 {offsets = [20, 0], sizes = [1, 35], strides = [1, 1]} : vector<32x70xf32> to vector<1x35xf32>
    %311 = vector.shape_cast %310 : vector<1x35xf32> to vector<35xf32>
    %c0_86 = arith.constant 0 : index
    %c700 = arith.constant 700 : index
    %312 = vector.load %arg25[%c0_86, %c700] : memref<2x1120xf32, #tpu.memory_space<vmem>>, vector<1x35xf32>
    %313 = vector.shape_cast %312 : vector<1x35xf32> to vector<35xf32>
    %314 = vector.shape_cast %311 : vector<35xf32> to vector<1x35xf32>
    tpu.vector_store %arg25[%c0_86, %c700], %314 {strides = array<i32>} : memref<2x1120xf32, #tpu.memory_space<vmem>>, vector<1x35xf32>,
    %315 = vector.extract_strided_slice %209 {offsets = [21, 0], sizes = [1, 35], strides = [1, 1]} : vector<32x70xf32> to vector<1x35xf32>
    %316 = vector.shape_cast %315 : vector<1x35xf32> to vector<35xf32>
    %c0_87 = arith.constant 0 : index
    %c735 = arith.constant 735 : index
    %317 = vector.load %arg25[%c0_87, %c735] : memref<2x1120xf32, #tpu.memory_space<vmem>>, vector<1x35xf32>
    %318 = vector.shape_cast %317 : vector<1x35xf32> to vector<35xf32>
    %319 = vector.shape_cast %316 : vector<35xf32> to vector<1x35xf32>
    tpu.vector_store %arg25[%c0_87, %c735], %319 {strides = array<i32>} : memref<2x1120xf32, #tpu.memory_space<vmem>>, vector<1x35xf32>,
    %320 = vector.extract_strided_slice %209 {offsets = [22, 0], sizes = [1, 35], strides = [1, 1]} : vector<32x70xf32> to vector<1x35xf32>
    %321 = vector.shape_cast %320 : vector<1x35xf32> to vector<35xf32>
    %c0_88 = arith.constant 0 : index
    %c770 = arith.constant 770 : index
    %322 = vector.load %arg25[%c0_88, %c770] : memref<2x1120xf32, #tpu.memory_space<vmem>>, vector<1x35xf32>
    %323 = vector.shape_cast %322 : vector<1x35xf32> to vector<35xf32>
    %324 = vector.shape_cast %321 : vector<35xf32> to vector<1x35xf32>
    tpu.vector_store %arg25[%c0_88, %c770], %324 {strides = array<i32>} : memref<2x1120xf32, #tpu.memory_space<vmem>>, vector<1x35xf32>,
    %325 = vector.extract_strided_slice %209 {offsets = [23, 0], sizes = [1, 35], strides = [1, 1]} : vector<32x70xf32> to vector<1x35xf32>
    %326 = vector.shape_cast %325 : vector<1x35xf32> to vector<35xf32>
    %c0_89 = arith.constant 0 : index
    %c805 = arith.constant 805 : index
    %327 = vector.load %arg25[%c0_89, %c805] : memref<2x1120xf32, #tpu.memory_space<vmem>>, vector<1x35xf32>
    %328 = vector.shape_cast %327 : vector<1x35xf32> to vector<35xf32>
    %329 = vector.shape_cast %326 : vector<35xf32> to vector<1x35xf32>
    tpu.vector_store %arg25[%c0_89, %c805], %329 {strides = array<i32>} : memref<2x1120xf32, #tpu.memory_space<vmem>>, vector<1x35xf32>,
    %330 = vector.extract_strided_slice %209 {offsets = [24, 0], sizes = [1, 35], strides = [1, 1]} : vector<32x70xf32> to vector<1x35xf32>
    %331 = vector.shape_cast %330 : vector<1x35xf32> to vector<35xf32>
    %c0_90 = arith.constant 0 : index
    %c840 = arith.constant 840 : index
    %332 = vector.load %arg25[%c0_90, %c840] : memref<2x1120xf32, #tpu.memory_space<vmem>>, vector<1x35xf32>
    %333 = vector.shape_cast %332 : vector<1x35xf32> to vector<35xf32>
    %334 = vector.shape_cast %331 : vector<35xf32> to vector<1x35xf32>
    tpu.vector_store %arg25[%c0_90, %c840], %334 {strides = array<i32>} : memref<2x1120xf32, #tpu.memory_space<vmem>>, vector<1x35xf32>,
    %335 = vector.extract_strided_slice %209 {offsets = [25, 0], sizes = [1, 35], strides = [1, 1]} : vector<32x70xf32> to vector<1x35xf32>
    %336 = vector.shape_cast %335 : vector<1x35xf32> to vector<35xf32>
    %c0_91 = arith.constant 0 : index
    %c875 = arith.constant 875 : index
    %337 = vector.load %arg25[%c0_91, %c875] : memref<2x1120xf32, #tpu.memory_space<vmem>>, vector<1x35xf32>
    %338 = vector.shape_cast %337 : vector<1x35xf32> to vector<35xf32>
    %339 = vector.shape_cast %336 : vector<35xf32> to vector<1x35xf32>
    tpu.vector_store %arg25[%c0_91, %c875], %339 {strides = array<i32>} : memref<2x1120xf32, #tpu.memory_space<vmem>>, vector<1x35xf32>,
    %340 = vector.extract_strided_slice %209 {offsets = [26, 0], sizes = [1, 35], strides = [1, 1]} : vector<32x70xf32> to vector<1x35xf32>
    %341 = vector.shape_cast %340 : vector<1x35xf32> to vector<35xf32>
    %c0_92 = arith.constant 0 : index
    %c910 = arith.constant 910 : index
    %342 = vector.load %arg25[%c0_92, %c910] : memref<2x1120xf32, #tpu.memory_space<vmem>>, vector<1x35xf32>
    %343 = vector.shape_cast %342 : vector<1x35xf32> to vector<35xf32>
    %344 = vector.shape_cast %341 : vector<35xf32> to vector<1x35xf32>
    tpu.vector_store %arg25[%c0_92, %c910], %344 {strides = array<i32>} : memref<2x1120xf32, #tpu.memory_space<vmem>>, vector<1x35xf32>,
    %345 = vector.extract_strided_slice %209 {offsets = [27, 0], sizes = [1, 35], strides = [1, 1]} : vector<32x70xf32> to vector<1x35xf32>
    %346 = vector.shape_cast %345 : vector<1x35xf32> to vector<35xf32>
    %c0_93 = arith.constant 0 : index
    %c945 = arith.constant 945 : index
    %347 = vector.load %arg25[%c0_93, %c945] : memref<2x1120xf32, #tpu.memory_space<vmem>>, vector<1x35xf32>
    %348 = vector.shape_cast %347 : vector<1x35xf32> to vector<35xf32>
    %349 = vector.shape_cast %346 : vector<35xf32> to vector<1x35xf32>
    tpu.vector_store %arg25[%c0_93, %c945], %349 {strides = array<i32>} : memref<2x1120xf32, #tpu.memory_space<vmem>>, vector<1x35xf32>,
    %350 = vector.extract_strided_slice %209 {offsets = [28, 0], sizes = [1, 35], strides = [1, 1]} : vector<32x70xf32> to vector<1x35xf32>
    %351 = vector.shape_cast %350 : vector<1x35xf32> to vector<35xf32>
    %c0_94 = arith.constant 0 : index
    %c980 = arith.constant 980 : index
    %352 = vector.load %arg25[%c0_94, %c980] : memref<2x1120xf32, #tpu.memory_space<vmem>>, vector<1x35xf32>
    %353 = vector.shape_cast %352 : vector<1x35xf32> to vector<35xf32>
    %354 = vector.shape_cast %351 : vector<35xf32> to vector<1x35xf32>
    tpu.vector_store %arg25[%c0_94, %c980], %354 {strides = array<i32>} : memref<2x1120xf32, #tpu.memory_space<vmem>>, vector<1x35xf32>,
    %355 = vector.extract_strided_slice %209 {offsets = [29, 0], sizes = [1, 35], strides = [1, 1]} : vector<32x70xf32> to vector<1x35xf32>
    %356 = vector.shape_cast %355 : vector<1x35xf32> to vector<35xf32>
    %c0_95 = arith.constant 0 : index
    %c1015 = arith.constant 1015 : index
    %357 = vector.load %arg25[%c0_95, %c1015] : memref<2x1120xf32, #tpu.memory_space<vmem>>, vector<1x35xf32>
    %358 = vector.shape_cast %357 : vector<1x35xf32> to vector<35xf32>
    %359 = vector.shape_cast %356 : vector<35xf32> to vector<1x35xf32>
    tpu.vector_store %arg25[%c0_95, %c1015], %359 {strides = array<i32>} : memref<2x1120xf32, #tpu.memory_space<vmem>>, vector<1x35xf32>,
    %360 = vector.extract_strided_slice %209 {offsets = [30, 0], sizes = [1, 35], strides = [1, 1]} : vector<32x70xf32> to vector<1x35xf32>
    %361 = vector.shape_cast %360 : vector<1x35xf32> to vector<35xf32>
    %c0_96 = arith.constant 0 : index
    %c1050 = arith.constant 1050 : index
    %362 = vector.load %arg25[%c0_96, %c1050] : memref<2x1120xf32, #tpu.memory_space<vmem>>, vector<1x35xf32>
    %363 = vector.shape_cast %362 : vector<1x35xf32> to vector<35xf32>
    %364 = vector.shape_cast %361 : vector<35xf32> to vector<1x35xf32>
    tpu.vector_store %arg25[%c0_96, %c1050], %364 {strides = array<i32>} : memref<2x1120xf32, #tpu.memory_space<vmem>>, vector<1x35xf32>,
    %365 = vector.extract_strided_slice %209 {offsets = [31, 0], sizes = [1, 35], strides = [1, 1]} : vector<32x70xf32> to vector<1x35xf32>
    %366 = vector.shape_cast %365 : vector<1x35xf32> to vector<35xf32>
    %c0_97 = arith.constant 0 : index
    %c1085 = arith.constant 1085 : index
    %367 = vector.load %arg25[%c0_97, %c1085] : memref<2x1120xf32, #tpu.memory_space<vmem>>, vector<1x35xf32>
    %368 = vector.shape_cast %367 : vector<1x35xf32> to vector<35xf32>
    %369 = vector.shape_cast %366 : vector<35xf32> to vector<1x35xf32>
    tpu.vector_store %arg25[%c0_97, %c1085], %369 {strides = array<i32>} : memref<2x1120xf32, #tpu.memory_space<vmem>>, vector<1x35xf32>,
    %370 = vector.extract_strided_slice %209 {offsets = [0, 35], sizes = [1, 35], strides = [1, 1]} : vector<32x70xf32> to vector<1x35xf32>
    %371 = vector.shape_cast %370 : vector<1x35xf32> to vector<35xf32>
    %c1 = arith.constant 1 : index
    %c0_98 = arith.constant 0 : index
    %372 = vector.load %arg25[%c1, %c0_98] : memref<2x1120xf32, #tpu.memory_space<vmem>>, vector<1x35xf32>
    %373 = vector.shape_cast %372 : vector<1x35xf32> to vector<35xf32>
    %374 = vector.shape_cast %371 : vector<35xf32> to vector<1x35xf32>
    tpu.vector_store %arg25[%c1, %c0_98], %374 {strides = array<i32>} : memref<2x1120xf32, #tpu.memory_space<vmem>>, vector<1x35xf32>,
    %375 = vector.extract_strided_slice %209 {offsets = [1, 35], sizes = [1, 35], strides = [1, 1]} : vector<32x70xf32> to vector<1x35xf32>
    %376 = vector.shape_cast %375 : vector<1x35xf32> to vector<35xf32>
    %c1_99 = arith.constant 1 : index
    %c35_100 = arith.constant 35 : index
    %377 = vector.load %arg25[%c1_99, %c35_100] : memref<2x1120xf32, #tpu.memory_space<vmem>>, vector<1x35xf32>
    %378 = vector.shape_cast %377 : vector<1x35xf32> to vector<35xf32>
    %379 = vector.shape_cast %376 : vector<35xf32> to vector<1x35xf32>
    tpu.vector_store %arg25[%c1_99, %c35_100], %379 {strides = array<i32>} : memref<2x1120xf32, #tpu.memory_space<vmem>>, vector<1x35xf32>,
    %380 = vector.extract_strided_slice %209 {offsets = [2, 35], sizes = [1, 35], strides = [1, 1]} : vector<32x70xf32> to vector<1x35xf32>
    %381 = vector.shape_cast %380 : vector<1x35xf32> to vector<35xf32>
    %c1_101 = arith.constant 1 : index
    %c70_102 = arith.constant 70 : index
    %382 = vector.load %arg25[%c1_101, %c70_102] : memref<2x1120xf32, #tpu.memory_space<vmem>>, vector<1x35xf32>
    %383 = vector.shape_cast %382 : vector<1x35xf32> to vector<35xf32>
    %384 = vector.shape_cast %381 : vector<35xf32> to vector<1x35xf32>
    tpu.vector_store %arg25[%c1_101, %c70_102], %384 {strides = array<i32>} : memref<2x1120xf32, #tpu.memory_space<vmem>>, vector<1x35xf32>,
    %385 = vector.extract_strided_slice %209 {offsets = [3, 35], sizes = [1, 35], strides = [1, 1]} : vector<32x70xf32> to vector<1x35xf32>
    %386 = vector.shape_cast %385 : vector<1x35xf32> to vector<35xf32>
    %c1_103 = arith.constant 1 : index
    %c105_104 = arith.constant 105 : index
    %387 = vector.load %arg25[%c1_103, %c105_104] : memref<2x1120xf32, #tpu.memory_space<vmem>>, vector<1x35xf32>
    %388 = vector.shape_cast %387 : vector<1x35xf32> to vector<35xf32>
    %389 = vector.shape_cast %386 : vector<35xf32> to vector<1x35xf32>
    tpu.vector_store %arg25[%c1_103, %c105_104], %389 {strides = array<i32>} : memref<2x1120xf32, #tpu.memory_space<vmem>>, vector<1x35xf32>,
    %390 = vector.extract_strided_slice %209 {offsets = [4, 35], sizes = [1, 35], strides = [1, 1]} : vector<32x70xf32> to vector<1x35xf32>
    %391 = vector.shape_cast %390 : vector<1x35xf32> to vector<35xf32>
    %c1_105 = arith.constant 1 : index
    %c140_106 = arith.constant 140 : index
    %392 = vector.load %arg25[%c1_105, %c140_106] : memref<2x1120xf32, #tpu.memory_space<vmem>>, vector<1x35xf32>
    %393 = vector.shape_cast %392 : vector<1x35xf32> to vector<35xf32>
    %394 = vector.shape_cast %391 : vector<35xf32> to vector<1x35xf32>
    tpu.vector_store %arg25[%c1_105, %c140_106], %394 {strides = array<i32>} : memref<2x1120xf32, #tpu.memory_space<vmem>>, vector<1x35xf32>,
    %395 = vector.extract_strided_slice %209 {offsets = [5, 35], sizes = [1, 35], strides = [1, 1]} : vector<32x70xf32> to vector<1x35xf32>
    %396 = vector.shape_cast %395 : vector<1x35xf32> to vector<35xf32>
    %c1_107 = arith.constant 1 : index
    %c175_108 = arith.constant 175 : index
    %397 = vector.load %arg25[%c1_107, %c175_108] : memref<2x1120xf32, #tpu.memory_space<vmem>>, vector<1x35xf32>
    %398 = vector.shape_cast %397 : vector<1x35xf32> to vector<35xf32>
    %399 = vector.shape_cast %396 : vector<35xf32> to vector<1x35xf32>
    tpu.vector_store %arg25[%c1_107, %c175_108], %399 {strides = array<i32>} : memref<2x1120xf32, #tpu.memory_space<vmem>>, vector<1x35xf32>,
    %400 = vector.extract_strided_slice %209 {offsets = [6, 35], sizes = [1, 35], strides = [1, 1]} : vector<32x70xf32> to vector<1x35xf32>
    %401 = vector.shape_cast %400 : vector<1x35xf32> to vector<35xf32>
    %c1_109 = arith.constant 1 : index
    %c210_110 = arith.constant 210 : index
    %402 = vector.load %arg25[%c1_109, %c210_110] : memref<2x1120xf32, #tpu.memory_space<vmem>>, vector<1x35xf32>
    %403 = vector.shape_cast %402 : vector<1x35xf32> to vector<35xf32>
    %404 = vector.shape_cast %401 : vector<35xf32> to vector<1x35xf32>
    tpu.vector_store %arg25[%c1_109, %c210_110], %404 {strides = array<i32>} : memref<2x1120xf32, #tpu.memory_space<vmem>>, vector<1x35xf32>,
    %405 = vector.extract_strided_slice %209 {offsets = [7, 35], sizes = [1, 35], strides = [1, 1]} : vector<32x70xf32> to vector<1x35xf32>
    %406 = vector.shape_cast %405 : vector<1x35xf32> to vector<35xf32>
    %c1_111 = arith.constant 1 : index
    %c245_112 = arith.constant 245 : index
    %407 = vector.load %arg25[%c1_111, %c245_112] : memref<2x1120xf32, #tpu.memory_space<vmem>>, vector<1x35xf32>
    %408 = vector.shape_cast %407 : vector<1x35xf32> to vector<35xf32>
    %409 = vector.shape_cast %406 : vector<35xf32> to vector<1x35xf32>
    tpu.vector_store %arg25[%c1_111, %c245_112], %409 {strides = array<i32>} : memref<2x1120xf32, #tpu.memory_space<vmem>>, vector<1x35xf32>,
    %410 = vector.extract_strided_slice %209 {offsets = [8, 35], sizes = [1, 35], strides = [1, 1]} : vector<32x70xf32> to vector<1x35xf32>
    %411 = vector.shape_cast %410 : vector<1x35xf32> to vector<35xf32>
    %c1_113 = arith.constant 1 : index
    %c280_114 = arith.constant 280 : index
    %412 = vector.load %arg25[%c1_113, %c280_114] : memref<2x1120xf32, #tpu.memory_space<vmem>>, vector<1x35xf32>
    %413 = vector.shape_cast %412 : vector<1x35xf32> to vector<35xf32>
    %414 = vector.shape_cast %411 : vector<35xf32> to vector<1x35xf32>
    tpu.vector_store %arg25[%c1_113, %c280_114], %414 {strides = array<i32>} : memref<2x1120xf32, #tpu.memory_space<vmem>>, vector<1x35xf32>,
    %415 = vector.extract_strided_slice %209 {offsets = [9, 35], sizes = [1, 35], strides = [1, 1]} : vector<32x70xf32> to vector<1x35xf32>
    %416 = vector.shape_cast %415 : vector<1x35xf32> to vector<35xf32>
    %c1_115 = arith.constant 1 : index
    %c315_116 = arith.constant 315 : index
    %417 = vector.load %arg25[%c1_115, %c315_116] : memref<2x1120xf32, #tpu.memory_space<vmem>>, vector<1x35xf32>
    %418 = vector.shape_cast %417 : vector<1x35xf32> to vector<35xf32>
    %419 = vector.shape_cast %416 : vector<35xf32> to vector<1x35xf32>
    tpu.vector_store %arg25[%c1_115, %c315_116], %419 {strides = array<i32>} : memref<2x1120xf32, #tpu.memory_space<vmem>>, vector<1x35xf32>,
    %420 = vector.extract_strided_slice %209 {offsets = [10, 35], sizes = [1, 35], strides = [1, 1]} : vector<32x70xf32> to vector<1x35xf32>
    %421 = vector.shape_cast %420 : vector<1x35xf32> to vector<35xf32>
    %c1_117 = arith.constant 1 : index
    %c350_118 = arith.constant 350 : index
    %422 = vector.load %arg25[%c1_117, %c350_118] : memref<2x1120xf32, #tpu.memory_space<vmem>>, vector<1x35xf32>
    %423 = vector.shape_cast %422 : vector<1x35xf32> to vector<35xf32>
    %424 = vector.shape_cast %421 : vector<35xf32> to vector<1x35xf32>
    tpu.vector_store %arg25[%c1_117, %c350_118], %424 {strides = array<i32>} : memref<2x1120xf32, #tpu.memory_space<vmem>>, vector<1x35xf32>,
    %425 = vector.extract_strided_slice %209 {offsets = [11, 35], sizes = [1, 35], strides = [1, 1]} : vector<32x70xf32> to vector<1x35xf32>
    %426 = vector.shape_cast %425 : vector<1x35xf32> to vector<35xf32>
    %c1_119 = arith.constant 1 : index
    %c385_120 = arith.constant 385 : index
    %427 = vector.load %arg25[%c1_119, %c385_120] : memref<2x1120xf32, #tpu.memory_space<vmem>>, vector<1x35xf32>
    %428 = vector.shape_cast %427 : vector<1x35xf32> to vector<35xf32>
    %429 = vector.shape_cast %426 : vector<35xf32> to vector<1x35xf32>
    tpu.vector_store %arg25[%c1_119, %c385_120], %429 {strides = array<i32>} : memref<2x1120xf32, #tpu.memory_space<vmem>>, vector<1x35xf32>,
    %430 = vector.extract_strided_slice %209 {offsets = [12, 35], sizes = [1, 35], strides = [1, 1]} : vector<32x70xf32> to vector<1x35xf32>
    %431 = vector.shape_cast %430 : vector<1x35xf32> to vector<35xf32>
    %c1_121 = arith.constant 1 : index
    %c420_122 = arith.constant 420 : index
    %432 = vector.load %arg25[%c1_121, %c420_122] : memref<2x1120xf32, #tpu.memory_space<vmem>>, vector<1x35xf32>
    %433 = vector.shape_cast %432 : vector<1x35xf32> to vector<35xf32>
    %434 = vector.shape_cast %431 : vector<35xf32> to vector<1x35xf32>
    tpu.vector_store %arg25[%c1_121, %c420_122], %434 {strides = array<i32>} : memref<2x1120xf32, #tpu.memory_space<vmem>>, vector<1x35xf32>,
    %435 = vector.extract_strided_slice %209 {offsets = [13, 35], sizes = [1, 35], strides = [1, 1]} : vector<32x70xf32> to vector<1x35xf32>
    %436 = vector.shape_cast %435 : vector<1x35xf32> to vector<35xf32>
    %c1_123 = arith.constant 1 : index
    %c455_124 = arith.constant 455 : index
    %437 = vector.load %arg25[%c1_123, %c455_124] : memref<2x1120xf32, #tpu.memory_space<vmem>>, vector<1x35xf32>
    %438 = vector.shape_cast %437 : vector<1x35xf32> to vector<35xf32>
    %439 = vector.shape_cast %436 : vector<35xf32> to vector<1x35xf32>
    tpu.vector_store %arg25[%c1_123, %c455_124], %439 {strides = array<i32>} : memref<2x1120xf32, #tpu.memory_space<vmem>>, vector<1x35xf32>,
    %440 = vector.extract_strided_slice %209 {offsets = [14, 35], sizes = [1, 35], strides = [1, 1]} : vector<32x70xf32> to vector<1x35xf32>
    %441 = vector.shape_cast %440 : vector<1x35xf32> to vector<35xf32>
    %c1_125 = arith.constant 1 : index
    %c490_126 = arith.constant 490 : index
    %442 = vector.load %arg25[%c1_125, %c490_126] : memref<2x1120xf32, #tpu.memory_space<vmem>>, vector<1x35xf32>
    %443 = vector.shape_cast %442 : vector<1x35xf32> to vector<35xf32>
    %444 = vector.shape_cast %441 : vector<35xf32> to vector<1x35xf32>
    tpu.vector_store %arg25[%c1_125, %c490_126], %444 {strides = array<i32>} : memref<2x1120xf32, #tpu.memory_space<vmem>>, vector<1x35xf32>,
    %445 = vector.extract_strided_slice %209 {offsets = [15, 35], sizes = [1, 35], strides = [1, 1]} : vector<32x70xf32> to vector<1x35xf32>
    %446 = vector.shape_cast %445 : vector<1x35xf32> to vector<35xf32>
    %c1_127 = arith.constant 1 : index
    %c525_128 = arith.constant 525 : index
    %447 = vector.load %arg25[%c1_127, %c525_128] : memref<2x1120xf32, #tpu.memory_space<vmem>>, vector<1x35xf32>
    %448 = vector.shape_cast %447 : vector<1x35xf32> to vector<35xf32>
    %449 = vector.shape_cast %446 : vector<35xf32> to vector<1x35xf32>
    tpu.vector_store %arg25[%c1_127, %c525_128], %449 {strides = array<i32>} : memref<2x1120xf32, #tpu.memory_space<vmem>>, vector<1x35xf32>,
    %450 = vector.extract_strided_slice %209 {offsets = [16, 35], sizes = [1, 35], strides = [1, 1]} : vector<32x70xf32> to vector<1x35xf32>
    %451 = vector.shape_cast %450 : vector<1x35xf32> to vector<35xf32>
    %c1_129 = arith.constant 1 : index
    %c560_130 = arith.constant 560 : index
    %452 = vector.load %arg25[%c1_129, %c560_130] : memref<2x1120xf32, #tpu.memory_space<vmem>>, vector<1x35xf32>
    %453 = vector.shape_cast %452 : vector<1x35xf32> to vector<35xf32>
    %454 = vector.shape_cast %451 : vector<35xf32> to vector<1x35xf32>
    tpu.vector_store %arg25[%c1_129, %c560_130], %454 {strides = array<i32>} : memref<2x1120xf32, #tpu.memory_space<vmem>>, vector<1x35xf32>,
    %455 = vector.extract_strided_slice %209 {offsets = [17, 35], sizes = [1, 35], strides = [1, 1]} : vector<32x70xf32> to vector<1x35xf32>
    %456 = vector.shape_cast %455 : vector<1x35xf32> to vector<35xf32>
    %c1_131 = arith.constant 1 : index
    %c595_132 = arith.constant 595 : index
    %457 = vector.load %arg25[%c1_131, %c595_132] : memref<2x1120xf32, #tpu.memory_space<vmem>>, vector<1x35xf32>
    %458 = vector.shape_cast %457 : vector<1x35xf32> to vector<35xf32>
    %459 = vector.shape_cast %456 : vector<35xf32> to vector<1x35xf32>
    tpu.vector_store %arg25[%c1_131, %c595_132], %459 {strides = array<i32>} : memref<2x1120xf32, #tpu.memory_space<vmem>>, vector<1x35xf32>,
    %460 = vector.extract_strided_slice %209 {offsets = [18, 35], sizes = [1, 35], strides = [1, 1]} : vector<32x70xf32> to vector<1x35xf32>
    %461 = vector.shape_cast %460 : vector<1x35xf32> to vector<35xf32>
    %c1_133 = arith.constant 1 : index
    %c630_134 = arith.constant 630 : index
    %462 = vector.load %arg25[%c1_133, %c630_134] : memref<2x1120xf32, #tpu.memory_space<vmem>>, vector<1x35xf32>
    %463 = vector.shape_cast %462 : vector<1x35xf32> to vector<35xf32>
    %464 = vector.shape_cast %461 : vector<35xf32> to vector<1x35xf32>
    tpu.vector_store %arg25[%c1_133, %c630_134], %464 {strides = array<i32>} : memref<2x1120xf32, #tpu.memory_space<vmem>>, vector<1x35xf32>,
    %465 = vector.extract_strided_slice %209 {offsets = [19, 35], sizes = [1, 35], strides = [1, 1]} : vector<32x70xf32> to vector<1x35xf32>
    %466 = vector.shape_cast %465 : vector<1x35xf32> to vector<35xf32>
    %c1_135 = arith.constant 1 : index
    %c665_136 = arith.constant 665 : index
    %467 = vector.load %arg25[%c1_135, %c665_136] : memref<2x1120xf32, #tpu.memory_space<vmem>>, vector<1x35xf32>
    %468 = vector.shape_cast %467 : vector<1x35xf32> to vector<35xf32>
    %469 = vector.shape_cast %466 : vector<35xf32> to vector<1x35xf32>
    tpu.vector_store %arg25[%c1_135, %c665_136], %469 {strides = array<i32>} : memref<2x1120xf32, #tpu.memory_space<vmem>>, vector<1x35xf32>,
    %470 = vector.extract_strided_slice %209 {offsets = [20, 35], sizes = [1, 35], strides = [1, 1]} : vector<32x70xf32> to vector<1x35xf32>
    %471 = vector.shape_cast %470 : vector<1x35xf32> to vector<35xf32>
    %c1_137 = arith.constant 1 : index
    %c700_138 = arith.constant 700 : index
    %472 = vector.load %arg25[%c1_137, %c700_138] : memref<2x1120xf32, #tpu.memory_space<vmem>>, vector<1x35xf32>
    %473 = vector.shape_cast %472 : vector<1x35xf32> to vector<35xf32>
    %474 = vector.shape_cast %471 : vector<35xf32> to vector<1x35xf32>
    tpu.vector_store %arg25[%c1_137, %c700_138], %474 {strides = array<i32>} : memref<2x1120xf32, #tpu.memory_space<vmem>>, vector<1x35xf32>,
    %475 = vector.extract_strided_slice %209 {offsets = [21, 35], sizes = [1, 35], strides = [1, 1]} : vector<32x70xf32> to vector<1x35xf32>
    %476 = vector.shape_cast %475 : vector<1x35xf32> to vector<35xf32>
    %c1_139 = arith.constant 1 : index
    %c735_140 = arith.constant 735 : index
    %477 = vector.load %arg25[%c1_139, %c735_140] : memref<2x1120xf32, #tpu.memory_space<vmem>>, vector<1x35xf32>
    %478 = vector.shape_cast %477 : vector<1x35xf32> to vector<35xf32>
    %479 = vector.shape_cast %476 : vector<35xf32> to vector<1x35xf32>
    tpu.vector_store %arg25[%c1_139, %c735_140], %479 {strides = array<i32>} : memref<2x1120xf32, #tpu.memory_space<vmem>>, vector<1x35xf32>,
    %480 = vector.extract_strided_slice %209 {offsets = [22, 35], sizes = [1, 35], strides = [1, 1]} : vector<32x70xf32> to vector<1x35xf32>
    %481 = vector.shape_cast %480 : vector<1x35xf32> to vector<35xf32>
    %c1_141 = arith.constant 1 : index
    %c770_142 = arith.constant 770 : index
    %482 = vector.load %arg25[%c1_141, %c770_142] : memref<2x1120xf32, #tpu.memory_space<vmem>>, vector<1x35xf32>
    %483 = vector.shape_cast %482 : vector<1x35xf32> to vector<35xf32>
    %484 = vector.shape_cast %481 : vector<35xf32> to vector<1x35xf32>
    tpu.vector_store %arg25[%c1_141, %c770_142], %484 {strides = array<i32>} : memref<2x1120xf32, #tpu.memory_space<vmem>>, vector<1x35xf32>,
    %485 = vector.extract_strided_slice %209 {offsets = [23, 35], sizes = [1, 35], strides = [1, 1]} : vector<32x70xf32> to vector<1x35xf32>
    %486 = vector.shape_cast %485 : vector<1x35xf32> to vector<35xf32>
    %c1_143 = arith.constant 1 : index
    %c805_144 = arith.constant 805 : index
    %487 = vector.load %arg25[%c1_143, %c805_144] : memref<2x1120xf32, #tpu.memory_space<vmem>>, vector<1x35xf32>
    %488 = vector.shape_cast %487 : vector<1x35xf32> to vector<35xf32>
    %489 = vector.shape_cast %486 : vector<35xf32> to vector<1x35xf32>
    tpu.vector_store %arg25[%c1_143, %c805_144], %489 {strides = array<i32>} : memref<2x1120xf32, #tpu.memory_space<vmem>>, vector<1x35xf32>,
    %490 = vector.extract_strided_slice %209 {offsets = [24, 35], sizes = [1, 35], strides = [1, 1]} : vector<32x70xf32> to vector<1x35xf32>
    %491 = vector.shape_cast %490 : vector<1x35xf32> to vector<35xf32>
    %c1_145 = arith.constant 1 : index
    %c840_146 = arith.constant 840 : index
    %492 = vector.load %arg25[%c1_145, %c840_146] : memref<2x1120xf32, #tpu.memory_space<vmem>>, vector<1x35xf32>
    %493 = vector.shape_cast %492 : vector<1x35xf32> to vector<35xf32>
    %494 = vector.shape_cast %491 : vector<35xf32> to vector<1x35xf32>
    tpu.vector_store %arg25[%c1_145, %c840_146], %494 {strides = array<i32>} : memref<2x1120xf32, #tpu.memory_space<vmem>>, vector<1x35xf32>,
    %495 = vector.extract_strided_slice %209 {offsets = [25, 35], sizes = [1, 35], strides = [1, 1]} : vector<32x70xf32> to vector<1x35xf32>
    %496 = vector.shape_cast %495 : vector<1x35xf32> to vector<35xf32>
    %c1_147 = arith.constant 1 : index
    %c875_148 = arith.constant 875 : index
    %497 = vector.load %arg25[%c1_147, %c875_148] : memref<2x1120xf32, #tpu.memory_space<vmem>>, vector<1x35xf32>
    %498 = vector.shape_cast %497 : vector<1x35xf32> to vector<35xf32>
    %499 = vector.shape_cast %496 : vector<35xf32> to vector<1x35xf32>
    tpu.vector_store %arg25[%c1_147, %c875_148], %499 {strides = array<i32>} : memref<2x1120xf32, #tpu.memory_space<vmem>>, vector<1x35xf32>,
    %500 = vector.extract_strided_slice %209 {offsets = [26, 35], sizes = [1, 35], strides = [1, 1]} : vector<32x70xf32> to vector<1x35xf32>
    %501 = vector.shape_cast %500 : vector<1x35xf32> to vector<35xf32>
    %c1_149 = arith.constant 1 : index
    %c910_150 = arith.constant 910 : index
    %502 = vector.load %arg25[%c1_149, %c910_150] : memref<2x1120xf32, #tpu.memory_space<vmem>>, vector<1x35xf32>
    %503 = vector.shape_cast %502 : vector<1x35xf32> to vector<35xf32>
    %504 = vector.shape_cast %501 : vector<35xf32> to vector<1x35xf32>
    tpu.vector_store %arg25[%c1_149, %c910_150], %504 {strides = array<i32>} : memref<2x1120xf32, #tpu.memory_space<vmem>>, vector<1x35xf32>,
    %505 = vector.extract_strided_slice %209 {offsets = [27, 35], sizes = [1, 35], strides = [1, 1]} : vector<32x70xf32> to vector<1x35xf32>
    %506 = vector.shape_cast %505 : vector<1x35xf32> to vector<35xf32>
    %c1_151 = arith.constant 1 : index
    %c945_152 = arith.constant 945 : index
    %507 = vector.load %arg25[%c1_151, %c945_152] : memref<2x1120xf32, #tpu.memory_space<vmem>>, vector<1x35xf32>
    %508 = vector.shape_cast %507 : vector<1x35xf32> to vector<35xf32>
    %509 = vector.shape_cast %506 : vector<35xf32> to vector<1x35xf32>
    tpu.vector_store %arg25[%c1_151, %c945_152], %509 {strides = array<i32>} : memref<2x1120xf32, #tpu.memory_space<vmem>>, vector<1x35xf32>,
    %510 = vector.extract_strided_slice %209 {offsets = [28, 35], sizes = [1, 35], strides = [1, 1]} : vector<32x70xf32> to vector<1x35xf32>
    %511 = vector.shape_cast %510 : vector<1x35xf32> to vector<35xf32>
    %c1_153 = arith.constant 1 : index
    %c980_154 = arith.constant 980 : index
    %512 = vector.load %arg25[%c1_153, %c980_154] : memref<2x1120xf32, #tpu.memory_space<vmem>>, vector<1x35xf32>
    %513 = vector.shape_cast %512 : vector<1x35xf32> to vector<35xf32>
    %514 = vector.shape_cast %511 : vector<35xf32> to vector<1x35xf32>
    tpu.vector_store %arg25[%c1_153, %c980_154], %514 {strides = array<i32>} : memref<2x1120xf32, #tpu.memory_space<vmem>>, vector<1x35xf32>,
    %515 = vector.extract_strided_slice %209 {offsets = [29, 35], sizes = [1, 35], strides = [1, 1]} : vector<32x70xf32> to vector<1x35xf32>
    %516 = vector.shape_cast %515 : vector<1x35xf32> to vector<35xf32>
    %c1_155 = arith.constant 1 : index
    %c1015_156 = arith.constant 1015 : index
    %517 = vector.load %arg25[%c1_155, %c1015_156] : memref<2x1120xf32, #tpu.memory_space<vmem>>, vector<1x35xf32>
    %518 = vector.shape_cast %517 : vector<1x35xf32> to vector<35xf32>
    %519 = vector.shape_cast %516 : vector<35xf32> to vector<1x35xf32>
    tpu.vector_store %arg25[%c1_155, %c1015_156], %519 {strides = array<i32>} : memref<2x1120xf32, #tpu.memory_space<vmem>>, vector<1x35xf32>,
    %520 = vector.extract_strided_slice %209 {offsets = [30, 35], sizes = [1, 35], strides = [1, 1]} : vector<32x70xf32> to vector<1x35xf32>
    %521 = vector.shape_cast %520 : vector<1x35xf32> to vector<35xf32>
    %c1_157 = arith.constant 1 : index
    %c1050_158 = arith.constant 1050 : index
    %522 = vector.load %arg25[%c1_157, %c1050_158] : memref<2x1120xf32, #tpu.memory_space<vmem>>, vector<1x35xf32>
    %523 = vector.shape_cast %522 : vector<1x35xf32> to vector<35xf32>
    %524 = vector.shape_cast %521 : vector<35xf32> to vector<1x35xf32>
    tpu.vector_store %arg25[%c1_157, %c1050_158], %524 {strides = array<i32>} : memref<2x1120xf32, #tpu.memory_space<vmem>>, vector<1x35xf32>,
    %525 = vector.extract_strided_slice %209 {offsets = [31, 35], sizes = [1, 35], strides = [1, 1]} : vector<32x70xf32> to vector<1x35xf32>
    %526 = vector.shape_cast %525 : vector<1x35xf32> to vector<35xf32>
    %c1_159 = arith.constant 1 : index
    %c1085_160 = arith.constant 1085 : index
    %527 = vector.load %arg25[%c1_159, %c1085_160] : memref<2x1120xf32, #tpu.memory_space<vmem>>, vector<1x35xf32>
    %528 = vector.shape_cast %527 : vector<1x35xf32> to vector<35xf32>
    %529 = vector.shape_cast %526 : vector<35xf32> to vector<1x35xf32>
    tpu.vector_store %arg25[%c1_159, %c1085_160], %529 {strides = array<i32>} : memref<2x1120xf32, #tpu.memory_space<vmem>>, vector<1x35xf32>,
    tpu.wait_dma2 semaphore(%arg24 : memref<!tpu.dma_semaphore, #tpu.memory_space<semaphore_mem>>) src(%arg18 : memref<1120x768xbf16, #tpu.memory_space<any>>) dst(%arg23 : memref<1120x768xbf16, #tpu.memory_space<vmem>>)
    %c0_161 = arith.constant 0 : index
    %c0_162 = arith.constant 0 : index
    %530 = vector.load %arg25[%c0_161, %c0_162] : memref<2x1120xf32, #tpu.memory_space<vmem>>, vector<2x1120xf32>
    %531 = arith.truncf %530 : vector<2x1120xf32> to vector<2x1120xbf16>
    %c0_163 = arith.constant 0 : index
    %c0_164 = arith.constant 0 : index
    %532 = vector.load %arg23[%c0_163, %c0_164] : memref<1120x768xbf16, #tpu.memory_space<vmem>>, vector<1120x768xbf16>
    %cst_165 = arith.constant dense<0.000000e+00> : vector<2x768xf32>
    %533 = tpu.matmul %531, %532, %cst_165 {dimension_numbers = #tpu.dot_dimension_numbers<[1], [0], [0], [1], [0, 0, 1, 1], [], []>} : vector<2x1120xbf16>, vector<1120x768xbf16>, vector<2x768xf32> -> vector<2x768xf32>
    %c0_166 = arith.constant 0 : index
    %c0_167 = arith.constant 0 : index
    %534 = vector.load %arg19[%c0_166, %c0_167] : memref<1x768xf32, #tpu.memory_space<vmem>>, vector<1x768xf32>
    %535 = vector.broadcast %534 : vector<1x768xf32> to vector<2x768xf32>
    %536 = arith.addf %533, %535 : vector<2x768xf32>
    %cst_168 = arith.constant 0.000000e+00 : f32
    %537 = vector.broadcast %cst_168 : f32 to vector<2x768xf32>
    %538 = arith.cmpf ogt, %536, %537 : vector<2x768xf32>
    %cst_169 = arith.constant 0.000000e+00 : f32
    %539 = vector.broadcast %cst_169 : f32 to vector<2x768xf32>
    %540 = arith.minimumf %536, %539 : vector<2x768xf32>
    %541 = math.exp %540 : vector<2x768xf32>
    %cst_170 = arith.constant 1.000000e+00 : f32
    %542 = vector.broadcast %cst_170 : f32 to vector<2x768xf32>
    %543 = arith.subf %541, %542 : vector<2x768xf32>
    %cst_171 = arith.constant 1.67326319 : f32
    %544 = vector.broadcast %cst_171 : f32 to vector<2x768xf32>
    %545 = arith.mulf %544, %543 : vector<2x768xf32>
    %546 = arith.select %538, %536, %545 : vector<2x768xi1>, vector<2x768xf32>
    %cst_172 = arith.constant 1.05070102 : f32
    %547 = vector.broadcast %cst_172 : f32 to vector<2x768xf32>
    %548 = arith.mulf %547, %546 : vector<2x768xf32>
    %c0_173 = arith.constant 0 : index
    %c0_174 = arith.constant 0 : index
    %549 = vector.load %arg20[%c0_173, %c0_174] : memref<768x10xf32, #tpu.memory_space<vmem>>, vector<768x10xf32>
    %cst_175 = arith.constant dense<0.000000e+00> : vector<2x10xf32>
    %550 = tpu.matmul %548, %549, %cst_175 {dimension_numbers = #tpu.dot_dimension_numbers<[1], [0], [0], [1], [0, 0, 1, 1], [], []>} : vector<2x768xf32>, vector<768x10xf32>, vector<2x10xf32> -> vector<2x10xf32>
    %c0_176 = arith.constant 0 : index
    %c0_177 = arith.constant 0 : index
    %551 = vector.load %arg21[%c0_176, %c0_177] : memref<1x10xf32, #tpu.memory_space<vmem>>, vector<1x10xf32>
    %552 = vector.broadcast %551 : vector<1x10xf32> to vector<2x10xf32>
    %553 = arith.addf %550, %552 : vector<2x10xf32>
    %cst_178 = arith.constant dense<0xFF800000> : vector<2xf32>
    %554 = vector.multi_reduction <maximumf>, %553, %cst_178 [1] : vector<2x10xf32> to vector<2xf32>
    %555 = vector.shape_cast %554 : vector<2xf32> to vector<2x1xf32>
    %556 = vector.broadcast %555 : vector<2x1xf32> to vector<2x10xf32>
    %557 = arith.subf %553, %556 : vector<2x10xf32>
    %558 = math.exp %557 : vector<2x10xf32>
    %cst_179 = arith.constant dense<0.000000e+00> : vector<2xf32>
    %559 = vector.multi_reduction <add>, %558, %cst_179 [1] : vector<2x10xf32> to vector<2xf32>
    %560 = vector.shape_cast %559 : vector<2xf32> to vector<2x1xf32>
    %561 = vector.broadcast %560 : vector<2x1xf32> to vector<2x10xf32>
    %562 = arith.divf %558, %561 : vector<2x10xf32>
    %c0_180 = arith.constant 0 : index
    %c0_181 = arith.constant 0 : index
    %563 = vector.load %arg22[%c0_180, %c0_181] : memref<2x10xf32, #tpu.memory_space<vmem>>, vector<2x10xf32>
    tpu.vector_store %arg22[%c0_180, %c0_181], %562 {strides = array<i32>} : memref<2x10xf32, #tpu.memory_space<vmem>>, vector<2x10xf32>,
    return
  }
  func.func @transform_0(%arg0: i32) -> (i32, i32, i32) {
    %c0_i32 = arith.constant 0 : i32
    %c0_i32_0 = arith.constant 0 : i32
    %c0_i32_1 = arith.constant 0 : i32
    %c0_i32_2 = arith.constant 0 : i32
    return %c0_i32, %c0_i32_0, %c0_i32_1 : i32, i32, i32
  }
  func.func @transform_1(%arg0: i32) -> (i32, i32) {
    %c0_i32 = arith.constant 0 : i32
    %c0_i32_0 = arith.constant 0 : i32
    %c0_i32_1 = arith.constant 0 : i32
    return %c0_i32, %c0_i32_0 : i32, i32
  }
  func.func @transform_2(%arg0: i32) -> (i32, i32) {
    %c0_i32 = arith.constant 0 : i32
    %c0_i32_0 = arith.constant 0 : i32
    %c0_i32_1 = arith.constant 0 : i32
    return %c0_i32, %c0_i32_0 : i32, i32
  }
  func.func @transform_3(%arg0: i32) -> (i32, i32) {
    %c0_i32 = arith.constant 0 : i32
    %c0_i32_0 = arith.constant 0 : i32
    %c0_i32_1 = arith.constant 0 : i32
    return %c0_i32, %c0_i32_0 : i32, i32
  }
  func.func @transform_4(%arg0: i32) -> (i32, i32) {
    %c0_i32 = arith.constant 0 : i32
    %c0_i32_0 = arith.constant 0 : i32
    %c0_i32_1 = arith.constant 0 : i32
    return %c0_i32, %c0_i32_0 : i32, i32
  }
  func.func @transform_5(%arg0: i32) -> (i32, i32) {
    %c0_i32 = arith.constant 0 : i32
    %c0_i32_0 = arith.constant 0 : i32
    %c0_i32_1 = arith.constant 0 : i32
    return %c0_i32, %c0_i32_0 : i32, i32
  }
  func.func @transform_6(%arg0: i32) -> (i32, i32) {
    %c0_i32 = arith.constant 0 : i32
    %c0_i32_0 = arith.constant 0 : i32
    %c0_i32_1 = arith.constant 0 : i32
    return %c0_i32, %c0_i32_0 : i32, i32
  }
  func.func @transform_7(%arg0: i32) -> (i32, i32) {
    %c0_i32 = arith.constant 0 : i32
    %c0_i32_0 = arith.constant 0 : i32
    %c0_i32_1 = arith.constant 0 : i32
    return %c0_i32, %c0_i32_0 : i32, i32
  }
  func.func @transform_8(%arg0: i32) -> (i32, i32) {
    %c0_i32 = arith.constant 0 : i32
    %c0_i32_0 = arith.constant 0 : i32
    %c0_i32_1 = arith.constant 0 : i32
    return %c0_i32, %c0_i32_0 : i32, i32
  }
  func.func @transform_9(%arg0: i32) -> (i32, i32) {
    %c0_i32 = arith.constant 0 : i32
    %c0_i32_0 = arith.constant 0 : i32
    %c0_i32_1 = arith.constant 0 : i32
    return %c0_i32, %c0_i32_0 : i32, i32
  }
  func.func @transform_10(%arg0: i32) -> (i32, i32) {
    %c0_i32 = arith.constant 0 : i32
    %c0_i32_0 = arith.constant 0 : i32
    %c0_i32_1 = arith.constant 0 : i32
    return %c0_i32, %c0_i32_0 : i32, i32
  }
  func.func @transform_11(%arg0: i32) -> (i32, i32) {
    %c0_i32 = arith.constant 0 : i32
    %c0_i32_0 = arith.constant 0 : i32
    %c0_i32_1 = arith.constant 0 : i32
    return %c0_i32, %c0_i32_0 : i32, i32
  }
  func.func @transform_12(%arg0: i32) -> (i32, i32) {
    %c0_i32 = arith.constant 0 : i32
    %c0_i32_0 = arith.constant 0 : i32
    %c0_i32_1 = arith.constant 0 : i32
    return %c0_i32, %c0_i32_0 : i32, i32
  }
  func.func @transform_13(%arg0: i32) -> (i32, i32) {
    %c0_i32 = arith.constant 0 : i32
    %c0_i32_0 = arith.constant 0 : i32
    %c0_i32_1 = arith.constant 0 : i32
    return %c0_i32, %c0_i32_0 : i32, i32
  }
  func.func @transform_14(%arg0: i32) -> (i32, i32) {
    %c0_i32 = arith.constant 0 : i32
    %c0_i32_0 = arith.constant 0 : i32
    %c0_i32_1 = arith.constant 0 : i32
    return %c0_i32, %c0_i32_0 : i32, i32
  }
  func.func @transform_15(%arg0: i32) -> (i32, i32) {
    %c0_i32 = arith.constant 0 : i32
    %c0_i32_0 = arith.constant 0 : i32
    %c0_i32_1 = arith.constant 0 : i32
    return %c0_i32, %c0_i32_0 : i32, i32
  }
  func.func @transform_16(%arg0: i32) -> (i32, i32) {
    %c0_i32 = arith.constant 0 : i32
    %c0_i32_0 = arith.constant 0 : i32
    %c0_i32_1 = arith.constant 0 : i32
    return %c0_i32, %c0_i32_0 : i32, i32
  }
  func.func @transform_18(%arg0: i32) -> (i32, i32) {
    %c0_i32 = arith.constant 0 : i32
    %c0_i32_0 = arith.constant 0 : i32
    %c0_i32_1 = arith.constant 0 : i32
    return %c0_i32, %c0_i32_0 : i32, i32
  }
  func.func @transform_19(%arg0: i32) -> (i32, i32) {
    %c0_i32 = arith.constant 0 : i32
    %c0_i32_0 = arith.constant 0 : i32
    %c0_i32_1 = arith.constant 0 : i32
    return %c0_i32, %c0_i32_0 : i32, i32
  }
  func.func @transform_20(%arg0: i32) -> (i32, i32) {
    %c0_i32 = arith.constant 0 : i32
    %c0_i32_0 = arith.constant 0 : i32
    %c0_i32_1 = arith.constant 0 : i32
    return %c0_i32, %c0_i32_0 : i32, i32
  }
  func.func @transform_21(%arg0: i32) -> (i32, i32) {
    %c0_i32 = arith.constant 0 : i32
    %c0_i32_0 = arith.constant 0 : i32
    %c0_i32_1 = arith.constant 0 : i32
    return %c0_i32, %c0_i32_0 : i32, i32
  }
}

</mosaic_0001>

<bundles_post_ra>
// kernel: tpu_custom_call.1
= control target key start
LH: loop header
LB: loop body
LE: loop exit
PB: predicated region body
PF: predicated region fallthrough
CT: control target
= control target key end

     0   :  { %s13740_s0 = inlined_call_operand.vmem [shape: f32[2,3,99], index: 0, kind: input, shape index: {}]   ;;  %s13741_s1 = inlined_call_operand.vmem [shape: f32[64,15], index: 1, kind: input, shape index: {}]   ;;  %s13742_s2 = inlined_call_operand.vmem [shape: f32[64,1], index: 2, kind: input, shape index: {}]   ;;  %s13743_s3 = inlined_call_operand.vmem [shape: f32[64,1], index: 3, kind: input, shape index: {}]   ;;  %s13744_s4 = inlined_call_operand.vmem [shape: f32[64,1], index: 4, kind: input, shape index: {}]   ;;  %s13745_s5 = inlined_call_operand.hbm [shape: f32[32,448], index: 5, kind: input, shape index: {}]   ;;  %s13746_s6 = inlined_call_operand.vmem [shape: f32[32,1], index: 6, kind: input, shape index: {}]   ;;  %s13747_s7 = inlined_call_operand.vmem [shape: f32[32,1], index: 7, kind: input, shape index: {}]   ;;  %s13748_s8 = inlined_call_operand.vmem [shape: f32[32,1], index: 8, kind: input, shape index: {}]   ;;  %s13749_s9 = inlined_call_operand.hbm [shape: f32[32,160], index: 9, kind: input, shape index: {}]   ;;  %s13750_s10 = inlined_call_operand.vmem [shape: f32[32,1], index: 10, kind: input, shape index: {}]   ;;  %s13751_s11 = inlined_call_operand.vmem [shape: f32[32,1], index: 11, kind: input, shape index: {}]   ;;  %s13752_s12 = inlined_call_operand.vmem [shape: f32[32,1], index: 12, kind: input, shape index: {}]   ;;  %s13753_s13 = inlined_call_operand.hbm [shape: f32[32,224], index: 13, kind: input, shape index: {}]   ;;  %s13754_s14 = inlined_call_operand.vmem [shape: f32[32,1], index: 14, kind: input, shape index: {}]   ;;  %s13755_s15 = inlined_call_operand.vmem [shape: f32[32,1], index: 15, kind: input, shape index: {}]   ;;  %s13756_s16 = inlined_call_operand.vmem [shape: f32[32,1], index: 16, kind: input, shape index: {}]   ;;  %s13757_s17 = inlined_call_operand.hbm [shape: bf16[1120,768], index: 17, kind: input, shape index: {}]   ;;  %s13758_s18 = inlined_call_operand.hbm [shape: f32[1,768], index: 18, kind: input, shape index: {}]   ;;  %s13759_s19 = inlined_call_operand.vmem [shape: f32[768,10], index: 19, kind: input, shape index: {}]   ;;  %s13760_s20 = inlined_call_operand.hbm [shape: f32[1,10], index: 20, kind: input, shape index: {}]   ;;  %s13761_s21 = inlined_call_operand.hbm [shape: f32[2,10], index: 21, kind: output, shape index: {}]  }
   0x1   :  { %13888 = sst [smem:[#allocation74_spill]] %s13740_s0 }
   0x2   :  { %13889 = sst [smem:[#allocation75_spill]] %s13741_s1 }
   0x3   :  { %13890 = sst [smem:[#allocation76_spill]] %s13742_s2 }
   0x4   :  { %13891 = sst [smem:[#allocation77_spill]] %s13743_s3 }
   0x5   :  { %13892 = sst [smem:[#allocation78_spill]] %s13744_s4 }
   0x6   :  { %13893 = sst [smem:[#allocation79_spill]] %s13745_s5 }
   0x7   :  { %13894 = sst [smem:[#allocation80_spill]] %s13759_s19 }
   0x8   :  { %13895 = sst [smem:[#allocation81_spill]] %s13761_s21 }
   0x9   :  { %26 = vsyncpa [#allocation6], 0 }
   0xa   :  { %27 = vsyncpa [#allocation9], 0 }
   0xb   :  { %28 = vsyncpa [#allocation12], 0  ;;  %s63_s26 = sshll.u32 %s13749_s9, 4  ;;  %s64_s26 = int_to_ptr.hbm [resolvable:$true] %s63_s26 }
   0xc   :  { %29 = vsyncpa [#allocation7], 0  ;;  %s10432_s27 = smov [#allocation8]   ;;  %s102_s0 = sshll.u32 %s13758_s18, 4  ;;  %s103_s0 = int_to_ptr.hbm [resolvable:$true] %s102_s0 }
   0xd   :  { %s65_s3 = sshll.u32 %s10432_s27, 4  ;;  %s10433_s4 = smov 256   ;;  %s66_s3 = int_to_ptr.vmem [resolvable:$true] %s65_s3 }
   0xe   :  { %s10434_s30 = smov 16   ;;  %s10435_s5 = smov [#allocation11]  }
   0xf   :  { %71 = dma.hbm_to_vmem [thread:$0]  %s64_s26, 1024, %s66_s3, [#allocation9], %s10433_s4, %s10433_s4, %s10434_s30  }
  0x10   :  { %s104_s22 = sshll.u32 %s10435_s5, 4  ;;  %s13896_s24 = sld [smem:[#allocation79_spill]]  ;;  %s105_s22 = int_to_ptr.vmem [resolvable:$true] %s104_s22 }
  0x11   :  { %107 = dma.hbm_to_vmem [thread:$0]  %s103_s0, 96, %s105_s22, [#allocation12]  }
  0x12   :  { %s10436_s9 = smov [#allocation5]   ;;  %s82_s18 = sshll.u32 %s13753_s13, 4  ;;  %s83_s18 = int_to_ptr.hbm [resolvable:$true] %s82_s18 }
  0x13   :  { %s46_s25 = sshll.u32 %s10436_s9, 4  ;;  %s10437_s28 = smov 512   ;;  %s47_s25 = int_to_ptr.vmem [resolvable:$true] %s46_s25 }
  0x14   :  { %s10438_s29 = smov 32   ;;  %s10439_s26 = smov [#allocation10]  }
  0x15   :  { %s84_s3 = sshll.u32 %s10439_s26, 4  ;;  %s115_s23 = sshll.u32 %s13760_s20, 4  ;;  %s85_s3 = int_to_ptr.vmem [resolvable:$true] %s84_s3  ;;  %s116_s23 = int_to_ptr.hbm [resolvable:$true] %s115_s23 }
  0x16   :  { %s44_s2 = sshll.u32 %s13896_s24, 4  ;;  %s10440_s0 = smov [#allocation13]   ;;  %s45_s2 = int_to_ptr.hbm [resolvable:$true] %s44_s2 }
  0x17   :  { %52 = dma.hbm_to_vmem [thread:$0]  %s45_s2, 2048, %s47_s25, [#allocation6], %s10437_s28, %s10437_s28, %s10438_s29  }
  0x18   :  { %90 = dma.hbm_to_vmem [thread:$0]  %s83_s18, 1024, %s85_s3, [#allocation9], %s10433_s4, %s10433_s4, %s10434_s30  }
  0x19   :  { %s117_s22 = sshll.u32 %s10440_s0, 4  ;;  %s118_s22 = int_to_ptr.vmem [resolvable:$true] %s117_s22 }
  0x1a   :  { %120 = dma.hbm_to_vmem [thread:$0]  %s116_s23, 16, %s118_s22, [#allocation12]  }
  0x1b   :  { %10422 = dma.done.wait [#allocation6], 2048  }
  0x1c   :  { %10423 = vsyncadd [#allocation6], 4294965248 }
  0x1d   :  { %10424 = dma.done.wait [#allocation9], 2048  }
  0x1e   :  { %10425 = vsyncadd [#allocation9], 4294965248 }
  0x1f   :  { %10426 = dma.done.wait [#allocation12], 112  }
  0x20   :  { %10427 = vsyncadd [#allocation12], 4294967184  ;;  %s13897_s1 = sld [smem:[#allocation74_spill]]  ;;  %s10441_s24 = smov 99   ;;  %vm161_vm0 = vcmask 809984   ;;  %vm180_vm1 = vcmask 1042432  }
  0x21   :  { %s10442_s4 = smov 125   ;;  %s10443_s30 = smov 126   ;;  %vm182_vm2 = vcmask 1045504   ;;  %v10446_v17 = vmov 0   ;;  %vm191_vm3 = vcmask 1039360   ;;  %vm198_vm4 = vcmask 1031168  }
  0x22   :  { %s10444_s2 = smov 127   ;;  %s10445_s9 = smov 124   ;;  %9506 = vset.pattern.permute.xlu1 %v10446_v17  ;;  %9505 = vset.pattern.permute.xlu0 %v10446_v17  ;;  %vm184_vm5 = vcmask 1040384   ;;  %vm186_vm6 = vcmask 1043456   ;;  %vm205_vm7 = vcmask 1022976   ;;  %vm212_vm8 = vcmask 1014784  }
  0x23   :  { %9504 = vset.pattern.permute.xlu2 %v10446_v17  ;;  %s13898_s18 = sld [smem:[#allocation76_spill]]  ;;  %vm325_vm9 = vcmask 1046528   ;;  %vm300_vm10 = vcmask 121856   ;;  %vm13866_vm11 = vcmask 777216   ;;  %vm429_vm12 = vcmask 506880   ;;  %s10449_s5 = smov 122  }
  0x24   :  { %s13899_s0 = sld [smem:[#allocation77_spill]]  ;;  %s10459_s19 = smov 59  }
  0x25   :  { %s13900_s20 = sld [smem:[#allocation78_spill]]  ;;  %s10460_s25 = smov 24  }
  0x26   :  { %v156_v0 = vld [vmem:[%s13897_s1 + $0x4] sm:$0x7]  ;;  %v155_v1 = vld [vmem:[%s13897_s1] sm:$0x7]  ;;  %s13901_s1 = sld [smem:[#allocation75_spill]]  ;;  %s10469_s28 = smov 107  }
  0x27   :  { %158 = vrot.lane.b32.xlu0 %v156_v0, %s10441_s24  ;;  %s10457_s24 = smov 117   ;;  %s10470_s29 = smov 118  }
  0x28   :  { %s10471_s26 = smov 47   ;;  %s10473_s3 = smov 25  }
  0x29   :  { %v257_v40 = vld [vmem:[%s13898_s18 + $0x28] sm:$0xff]  ;;  %v255_v41 = vld [vmem:[%s13898_s18 + $0x18] sm:$0xff]  ;;  %v252_v42 = vld [vmem:[%s13898_s18] sm:$0xff]  ;;  %s10474_s23 = smov 94   ;;  %s10476_s22 = smov 71  }
  0x2a   :  { %v554_v43 = vld [vmem:[%s13899_s0 + $0x28] sm:$0xff]  ;;  %v258_v44 = vld [vmem:[%s13898_s18 + $0x30] sm:$0xff]  ;;  %v259_v45 = vld [vmem:[%s13898_s18 + $0x38] sm:$0xff]  ;;  %s10479_s13 = smov 95   ;;  %s10482_s21 = smov 84  }
  0x2b   :  { %v723_v46 = vld [vmem:[%s13900_s20 + $0x30] sm:$0xff]  ;;  %v253_v47 = vld [vmem:[%s13898_s18 + $0x8] sm:$0xff]  ;;  %v720_v49 = vld [vmem:[%s13900_s20 + $0x18] sm:$0xff]  ;;  %s149_s27 = sshll.u32 %s13757_s17, 4  ;;  %s150_s27 = int_to_ptr.hbm [resolvable:$true] %s149_s27 }
  0x2c   :  { %v551_v48 = vld [vmem:[%s13899_s0 + $0x10] sm:$0xff]  ;;  %v256_v51 = vld [vmem:[%s13898_s18 + $0x20] sm:$0xff]  ;;  %v718_v52 = vld [vmem:[%s13900_s20 + $0x8] sm:$0xff] }
  0x2d   :  { %v555_v50 = vld [vmem:[%s13899_s0 + $0x30] sm:$0xff]  ;;  %v724_v54 = vld [vmem:[%s13900_s20 + $0x38] sm:$0xff]  ;;  %v721_v58 = vld [vmem:[%s13900_s20 + $0x20] sm:$0xff] }
  0x2e   :  { %v254_v55 = vld [vmem:[%s13898_s18 + $0x10] sm:$0xff]  ;;  %v552_v56 = vld [vmem:[%s13899_s0 + $0x18] sm:$0xff]  ;;  %v553_v59 = vld [vmem:[%s13899_s0 + $0x20] sm:$0xff]  ;;  %s10481_s18 = smov 60  }
  0x2f   :  { %v556_v57 = vld [vmem:[%s13899_s0 + $0x38] sm:$0xff]  ;;  %v244_v62 = vld [vmem:[%s13901_s1] sm:$0xff]  ;;  %v722_v0 = vld [vmem:[%s13900_s20 + $0x28] sm:$0xff] }
  0x30   :  { %v549_v63 = vld [vmem:[%s13899_s0] sm:$0xff] }
  0x99   :  { %v159_v2 = vpop.permute.xlu0 %158 }
  0x9a   :  { %v202_v3 = vrot.slane %v159_v2, 7  ;;  %v195_v4 = vrot.slane %v159_v2, 2  ;;  %v162_v5 = vsel %vm161_vm0, %v155_v1, %v159_v2  ;;  %v188_v6 = vrot.slane %v159_v2, 5  ;;  %v245_v1 = vld [vmem:[%s13901_s1 + $0x8] sm:$0xff] }
  0x9b   :  { %v164_v7 = vrot.slane %v162_v5, 5  ;;  %v209_v9 = vrot.slane %v159_v2, 4  ;;  %v172_v10 = vrot.slane %v162_v5, 7  ;;  %v168_v11 = vrot.slane %v162_v5, 2 }
  0x9c   :  { %203 = vrot.lane.b32.xlu1 %v202_v3, %s10442_s4  ;;  %196 = vrot.lane.b32.xlu0 %v195_v4, %s10443_s30  ;;  %v176_v12 = vrot.slane %v162_v5, 4  ;;  %v717_v3 = vld [vmem:[%s13900_s20] sm:$0xff]  ;;  %v550_v4 = vld [vmem:[%s13899_s0 + $0x8] sm:$0xff]  ;;  %s10480_s0 = smov 2  }
  0x9d   :  { %v9494_v8 = vpack.i.bf16 %v164_v7, %v188_v6 }
  0x9f   :  { %9495 = vrot.lane.b32.xlu2 %v9494_v8, %s10444_s2 }
  0xa4   :  { %210 = vrot.lane.b32.xlu1 %v209_v9, %s10445_s9  ;;  %173 = vrot.lane.b32.xlu0 %v172_v10, %s10442_s4  ;;  %v248_v9 = vld [vmem:[%s13901_s1 + $0x20] sm:$0xff] }
  0xa7   :  { %169 = vrot.lane.b32.xlu2 %v168_v11, %s10443_s30  ;;  %v246_v11 = vld [vmem:[%s13901_s1 + $0x10] sm:$0xff] }
  0xac   :  { %177 = vrot.lane.b32.xlu1 %v176_v12, %s10445_s9  ;;  %v719_v12 = vld [vmem:[%s13900_s20 + $0x10] sm:$0xff]  ;;  %s10472_s20 = smov 82  }
  0xf9   :  { %v9496_v13 = vpop.permute.xlu2 %9495 }
  0xfa   :  { %v9498_v14 = vunpack.i.h.bf16 %v9496_v13  ;;  %v9497_v19 = vunpack.i.l.bf16 %v9496_v13  ;;  %v249_v13 = vld [vmem:[%s13901_s1 + $0x28] sm:$0xff] }
  0xfc   :  { %v181_v15 = vsel %vm180_vm1, %v162_v5, %v9498_v14  ;;  %v192_v20 = vsel %vm191_vm3, %v9498_v14, %v9497_v19  ;;  %v217_v23 = vsel %vm180_vm1, %v159_v2, %v9497_v19  ;;  %v247_v14 = vld [vmem:[%s13901_s1 + $0x18] sm:$0xff] }
  0xfd   :  { %v216_v25 = vsel %vm180_vm1, %v162_v5, %v192_v20 }
 0x101   :  { %v170_v16 = vpop.permute.xlu2 %169 }
 0x102   :  { %v10629_v18 = vsel %vm182_vm2, %v181_v15, %v170_v16  ;;  %v250_v15 = vld [vmem:[%s13901_s1 + $0x30] sm:$0xff] }
 0x10e   :  { %v204_v21 = vpop.permute.xlu1 %203  ;;  %v197_v22 = vpop.permute.xlu0 %196 }
 0x10f   :  { %v199_v24 = vsel %vm198_vm4, %v170_v16, %v197_v22  ;;  %v219_v26 = vsel %vm182_vm2, %v217_v23, %v197_v22  ;;  %v221_v30 = vsel %vm184_vm5, %v197_v22, %v204_v21 }
 0x110   :  { %v218_v27 = vsel %vm182_vm2, %v216_v25, %v199_v24 }
 0x111   :  { %v9499_v28 = vpack.i.bf16 %v218_v27, %v219_v26 }
 0x113   :  { %9500 = vrot.lane.b32.xlu0 %v9499_v28, %s10445_s9 }
 0x116   :  { %v211_v29 = vpop.permute.xlu1 %210  ;;  %v174_v32 = vpop.permute.xlu0 %173 }
 0x117   :  { %v223_v31 = vsel %vm186_vm6, %v221_v30, %v211_v29  ;;  %v206_v33 = vsel %vm205_vm7, %v174_v32, %v204_v21  ;;  %v185_v34 = vsel %vm184_vm5, %v170_v16, %v174_v32  ;;  %v251_v16 = vld [vmem:[%s13901_s1 + $0x38] sm:$0xff]  ;;  %s10448_s1 = smov 123  }
 0x118   :  { %234 = vrot.lane.b32.xlu2 %v223_v31, %s10445_s9  ;;  %v220_v37 = vsel %vm184_vm5, %v199_v24, %v206_v33 }
 0x11b   :  { %292 = vperm.xlu0 %9505, %v258_v44  }
 0x11e   :  { %v178_v35 = vpop.permute.xlu1 %177 }
 0x11f   :  { %v213_v36 = vsel %vm212_vm8, %v178_v35, %v211_v29  ;;  %v10641_v38 = vsel %vm186_vm6, %v185_v34, %v178_v35 }
 0x120   :  { %v222_v39 = vsel %vm186_vm6, %v220_v37, %v213_v36  ;;  %297 = vperm.xlu2 %9504, %v259_v45  }
 0x121   :  { %232 = vrot.lane.b32.xlu1 %v222_v39, %s10445_s9 }
 0x123   :  { %267 = vperm.xlu0 %9505, %v253_v47  }
 0x128   :  { %282 = vperm.xlu2 %9504, %v256_v51  }
 0x129   :  { %287 = vperm.xlu1 %9506, %v257_v40  }
 0x12b   :  { %589 = vperm.xlu0 %9505, %v555_v50  }
 0x130   :  { %272 = vperm.xlu2 %9504, %v254_v55  }
 0x131   :  { %277 = vperm.xlu1 %9506, %v255_v41  }
 0x133   :  { %762 = vperm.xlu0 %9505, %v724_v54  }
 0x138   :  { %594 = vperm.xlu2 %9504, %v556_v57  }
 0x139   :  { %262 = vperm.xlu1 %9506, %v252_v42  }
 0x13b   :  { %574 = vperm.xlu0 %9505, %v552_v56  }
 0x140   :  { %579 = vperm.xlu2 %9504, %v553_v59  }
 0x141   :  { %584 = vperm.xlu1 %9506, %v554_v43  }
 0x143   :  { %747 = vperm.xlu0 %9505, %v721_v58  }
 0x148   :  { %752 = vperm.xlu2 %9504, %v722_v0  }
 0x149   :  { %757 = vperm.xlu1 %9506, %v723_v46  }
 0x14b   :  { %559 = vperm.xlu0 %9505, %v549_v63  }
 0x150   :  { %564 = vperm.xlu2 %9504, %v550_v4  }
 0x151   :  { %569 = vperm.xlu1 %9506, %v551_v48  }
 0x153   :  { %727 = vperm.xlu0 %9505, %v717_v3  }
 0x158   :  { %737 = vperm.xlu2 %9504, %v719_v12  }
 0x159   :  { %742 = vperm.xlu1 %9506, %v720_v49  }
 0x161   :  { %732 = vperm.xlu1 %9506, %v718_v52  }
 0x172   :  { %v235_v53 = vpop.permute.xlu2 %234 }
 0x173   :  { %7223 = vmatpush.msk.msra.mxu1 %vm325_vm9, %v235_v53 }
 0x17a   :  { %v10765_v20 = vpop.permute.xlu2 %297 }
 0x182   :  { %v283_v25 = vpop.permute.xlu2 %282 }
 0x185   :  { %v9501_v60 = vpop.permute.xlu0 %9500 }
 0x186   :  { %v9502_v61 = vunpack.i.l.bf16 %v9501_v60  ;;  %v9503_v2 = vunpack.i.h.bf16 %v9501_v60 }
 0x188   :  { %387 = vmatpush.msra.mxu1 %v9502_v61  ;;  %v236_v7 = vsel %vm212_vm8, %v9503_v2, %v9502_v61 }
 0x189   :  { %7224 = vmatmul.msk.f32.vlgmr.msra.gmra.mxu1 %vm300_vm10, %v244_v62  ;;  %v242_v10 = vsel %vm13866_vm11, %v10629_v18, %v236_v7 }
 0x18a   :  { %v273_v41 = vpop.permute.xlu2 %272 }
 0x18d   :  { %v293_v21 = vpop.permute.xlu0 %292 }
 0x191   :  { %7225 = vmatmul.msk.f32.gmra.mxu1 %vm300_vm10, %v245_v1 }
 0x193   :  { %v233_v5 = vpop.permute.xlu1 %232 }
 0x194   :  { %v237_v6 = vsel %vm212_vm8, %v233_v5, %v235_v53 }
 0x195   :  { %v243_v8 = vsel %vm13866_vm11, %v10641_v38, %v237_v6  ;;  %v268_v28 = vpop.permute.xlu0 %267 }
 0x196   :  { %7214 = vmatpush.msk.msra.mxu0 %vm325_vm9, %v243_v8  ;;  %9435 = vmatpush.msk.msra.mxu2 %vm325_vm9, %v243_v8 }
 0x198   :  { %346 = vmatpush.msra.mxu0 %v242_v10  ;;  %9436 = vmatpush.msra.mxu2 %v242_v10 }
 0x199   :  { %7215 = vmatmul.msk.f32.vlgmr.msra.gmra.mxu0 %vm300_vm10, %v244_v62  ;;  %7219 = vmatmul.msk.f32.vlgmr.msra.gmra.mxu2 %vm300_vm10, %v248_v9 }
 0x19a   :  { %7226 = vmatmul.msk.f32.gmra.mxu1 %vm300_vm10, %v246_v11 }
 0x19b   :  { %v288_v17 = vpop.permute.xlu1 %287 }
 0x1a1   :  { %7216 = vmatmul.msk.f32.gmra.mxu0 %vm300_vm10, %v245_v1  ;;  %7220 = vmatmul.msk.f32.gmra.mxu2 %vm300_vm10, %v249_v13 }
 0x1a2   :  { %7227 = vmatmul.msk.f32.gmra.mxu1 %vm300_vm10, %v247_v14 }
 0x1a3   :  { %v278_v19 = vpop.permute.xlu1 %277 }
 0x1a9   :  { %7217 = vmatmul.msk.f32.gmra.mxu0 %vm300_vm10, %v246_v11  ;;  %7221 = vmatmul.msk.f32.gmra.mxu2 %vm300_vm10, %v250_v15 }
 0x1aa   :  { %7228 = vmatmul.msk.f32.gmra.mxu1 %vm300_vm10, %v248_v9 }
 0x1ab   :  { %v263_v23 = vpop.permute.xlu1 %262 }
 0x1b1   :  { %7218 = vmatmul.msk.f32.gmra.mxu0 %vm300_vm10, %v247_v14  ;;  %7222 = vmatmul.msk.f32.gmra.mxu2 %vm300_vm10, %v251_v16 }
 0x1b2   :  { %7229 = vmatmul.msk.f32.gmra.mxu1 %vm300_vm10, %v249_v13 }
 0x1ba   :  { %7230 = vmatmul.msk.f32.gmra.mxu1 %vm300_vm10, %v250_v15 }
 0x1c2   :  { %7231 = vmatmul.msk.f32.gmra.mxu1 %vm300_vm10, %v251_v16 }
 0x206   :  { %v389_v18 = vpop.f32.mrf.mxu1 }
 0x207   :  { %v10767_v24 = vadd.f32 %v389_v18, %v263_v23 }
 0x209   :  { %v414_v26 = vmax.f32 %v10767_v24, 0.0 }
 0x20b   :  { %v430_v33 = vsel %vm429_vm12, %v414_v26, 0.0 }
 0x20e   :  { %v392_v22 = vpop.f32.mrf.mxu1 }
 0x20f   :  { %v10772_v31 = vadd.f32 %v392_v22, %v268_v28 }
 0x211   :  { %v416_v35 = vmax.f32 %v10772_v31, 0.0 }
 0x213   :  { %v434_v40 = vsel %vm429_vm12, %v416_v35, 0.0 }
 0x216   :  { %v348_v27 = vpop.f32.mrf.mxu0 }
 0x217   :  { %v10770_v29 = vadd.f32 %v348_v27, %v263_v23  ;;  %v395_v30 = vpop.f32.mrf.mxu1 }
 0x218   :  { %v10787_v43 = vadd.f32 %v395_v30, %v273_v41  ;;  %v10859_v30 = vpop.permute.xlu0 %589 }
 0x219   :  { %v413_v32 = vmax.f32 %v10770_v29, 0.0 }
 0x21a   :  { %v418_v45 = vmax.f32 %v10787_v43, 0.0 }
 0x21b   :  { %v431_v34 = vadd.f32 %v430_v33, %v413_v32  ;;  %v10861_v33 = vpop.permute.xlu1 %584 }
 0x21c   :  { %v360_v36 = vpop.f32.mrf.mxu2  ;;  %v438_v52 = vsel %vm429_vm12, %v418_v45, 0.0 }
 0x21d   :  { %432 = vadd.xlane.f32.xlu2 %v431_v34  ;;  %v10823_v5 = vadd.f32 %v360_v36, %v283_v25 }
 0x21e   :  { %v351_v37 = vpop.f32.mrf.mxu0 }
 0x21f   :  { %v10781_v38 = vadd.f32 %v351_v37, %v268_v28  ;;  %v398_v39 = vpop.f32.mrf.mxu1  ;;  %v421_v11 = vmax.f32 %v10823_v5, 0.0  ;;  %v10857_v28 = vpop.permute.xlu2 %594 }
 0x220   :  { %v10795_v51 = vadd.f32 %v398_v39, %v278_v19  ;;  %v10865_v34 = vpop.permute.xlu0 %762  ;;  %v10447_v39 = vmov 190.0  }
 0x221   :  { %v415_v42 = vmax.f32 %v10781_v38, 0.0  ;;  %10187 = vrcp.f32 %v10447_v39 }
 0x222   :  { %v420_v54 = vmax.f32 %v10795_v51, 0.0 }
 0x223   :  { %v435_v44 = vadd.f32 %v434_v40, %v415_v42  ;;  %v10867_v36 = vpop.permute.xlu1 %757 }
 0x224   :  { %v363_v49 = vpop.f32.mrf.mxu2  ;;  %v442_v0 = vsel %vm429_vm12, %v420_v54, 0.0 }
 0x225   :  { %436 = vadd.xlane.f32.xlu1 %v435_v44  ;;  %v10803_v56 = vadd.f32 %v363_v49, %v288_v17 }
 0x226   :  { %v354_v46 = vpop.f32.mrf.mxu0 }
 0x227   :  { %v10792_v47 = vadd.f32 %v354_v46, %v273_v41  ;;  %v401_v48 = vpop.f32.mrf.mxu1  ;;  %v423_v1 = vmax.f32 %v10803_v56, 0.0  ;;  %v10188_v41 = vpop.eup %10187 }
 0x228   :  { %v10807_v59 = vadd.f32 %v401_v48, %v283_v25  ;;  %v10871_v40 = vpop.permute.xlu0 %574  ;;  %v463_v48 = vmul.f32 190.0, %v10188_v41  ;;  %vm467_vm13 = vweird.f32 %v10188_v41 }
 0x229   :  { %v417_v50 = vmax.f32 %v10792_v47, 0.0 }
 0x22a   :  { %v422_v3 = vmax.f32 %v10807_v59, 0.0  ;;  %v464_v49 = vsub.f32 1.0, %v463_v48 }
 0x22b   :  { %v439_v53 = vadd.f32 %v438_v52, %v417_v50  ;;  %v10873_v44 = vpop.permute.xlu1 %569 }
 0x22c   :  { %v366_v62 = vpop.f32.mrf.mxu2  ;;  %v446_v10 = vsel %vm429_vm12, %v422_v3, 0.0 }
 0x22d   :  { %440 = vadd.xlane.f32.xlu0 %v439_v53  ;;  %v10827_v7 = vadd.f32 %v366_v62, %v293_v21  ;;  %v447_v14 = vadd.f32 %v446_v10, %v421_v11 }
 0x22e   :  { %v357_v55 = vpop.f32.mrf.mxu0 }
 0x22f   :  { %v10805_v57 = vadd.f32 %v357_v55, %v278_v19  ;;  %v404_v58 = vpop.f32.mrf.mxu1  ;;  %v425_v13 = vmax.f32 %v10827_v7, 0.0  ;;  %v465_v55 = vmul.f32 %v10188_v41, %v464_v49 }
 0x230   :  { %v10809_v60 = vadd.f32 %v404_v58, %v288_v17  ;;  %v10877_v52 = vpop.permute.xlu0 %747 }
 0x231   :  { %v419_v61 = vmax.f32 %v10805_v57, 0.0  ;;  %v466_v62 = vadd.f32 %v10188_v41, %v465_v55 }
 0x232   :  { %v424_v63 = vmax.f32 %v10809_v60, 0.0 }
 0x233   :  { %v443_v2 = vadd.f32 %v442_v0, %v419_v61  ;;  %v10879_v53 = vpop.permute.xlu1 %742 }
 0x234   :  { %v450_v4 = vsel %vm429_vm12, %v424_v63, 0.0  ;;  %v369_v15 = vpop.f32.mrf.mxu2 }
 0x235   :  { %444 = vadd.xlane.f32.xlu2 %v443_v2  ;;  %v451_v6 = vadd.f32 %v450_v4, %v423_v1  ;;  %v10845_v18 = vadd.f32 %v369_v15, %v10765_v20  ;;  %v10885_v2 = vsel %vm467_vm13, %v10188_v41, %v466_v62 }
 0x237   :  { %v407_v8 = vpop.f32.mrf.mxu1  ;;  %452 = vadd.xlane.f32.xlu1 %v451_v6  ;;  %v427_v23 = vmax.f32 %v10845_v18, 0.0 }
 0x238   :  { %v10829_v9 = vadd.f32 %v407_v8, %v293_v21  ;;  %v10883_v0 = vpop.permute.xlu0 %559 }
 0x23a   :  { %v426_v12 = vmax.f32 %v10829_v9, 0.0 }
 0x23b   :  { %v10887_v4 = vpop.permute.xlu1 %732 }
 0x23c   :  { %v454_v16 = vsel %vm429_vm12, %v426_v12, 0.0 }
 0x23d   :  { %448 = vadd.xlane.f32.xlu2 %v447_v14  ;;  %v455_v17 = vadd.f32 %v454_v16, %v425_v13 }
 0x23f   :  { %v410_v19 = vpop.f32.mrf.mxu1  ;;  %456 = vadd.xlane.f32.xlu0 %v455_v17 }
 0x240   :  { %v10848_v21 = vadd.f32 %v410_v19, %v10765_v20  ;;  %v10863_v20 = vpop.permute.xlu2 %579  ;;  %v10903_v19 = vpop.permute.xlu0 %727 }
 0x242   :  { %v428_v22 = vmax.f32 %v10848_v21, 0.0 }
 0x244   :  { %v458_v25 = vsel %vm429_vm12, %v428_v22, 0.0 }
 0x245   :  { %v459_v27 = vadd.f32 %v458_v25, %v427_v23 }
 0x247   :  { %460 = vadd.xlane.f32.xlu2 %v459_v27 }
 0x248   :  { %v10869_v37 = vpop.permute.xlu2 %752 }
 0x250   :  { %v10875_v46 = vpop.permute.xlu2 %564 }
 0x258   :  { %v10881_v58 = vpop.permute.xlu2 %737 }
 0x290   :  { %v433_v6 = vpop.xlane.xlu2 %432 }
 0x291   :  { %v469_v8 = vmul.f32 %v10885_v2, %v433_v6 }
 0x293   :  { %v10892_v10 = vsub.f32 %v413_v32, %v469_v8  ;;  %v10896_v14 = vsub.f32 %v414_v26, %v469_v8 }
 0x295   :  { %v493_v15 = vmul.f32 %v10892_v10, %v10892_v10  ;;  %v494_v16 = vmul.f32 %v10896_v14, %v10896_v14 }
 0x297   :  { %v509_v17 = vsel %vm429_vm12, %v494_v16, 0.0 }
 0x298   :  { %v437_v25 = vpop.xlane.xlu1 %436  ;;  %v510_v27 = vadd.f32 %v509_v17, %v493_v15 }
 0x299   :  { %v470_v29 = vmul.f32 %v10885_v2, %v437_v25 }
 0x29a   :  { %511 = vadd.xlane.f32.xlu1 %v510_v27 }
 0x29b   :  { %v10908_v24 = vsub.f32 %v415_v42, %v470_v29  ;;  %v10912_v26 = vsub.f32 %v416_v35, %v470_v29 }
 0x29d   :  { %v495_v32 = vmul.f32 %v10908_v24, %v10908_v24  ;;  %v496_v39 = vmul.f32 %v10912_v26, %v10912_v26 }
 0x29f   :  { %v513_v41 = vsel %vm429_vm12, %v496_v39, 0.0 }
 0x2a0   :  { %v441_v48 = vpop.xlane.xlu0 %440  ;;  %v514_v49 = vadd.f32 %v513_v41, %v495_v32 }
 0x2a1   :  { %v471_v55 = vmul.f32 %v10885_v2, %v441_v48 }
 0x2a2   :  { %515 = vadd.xlane.f32.xlu0 %v514_v49 }
 0x2a3   :  { %v10922_v38 = vsub.f32 %v417_v50, %v471_v55  ;;  %v10926_v31 = vsub.f32 %v418_v45, %v471_v55 }
 0x2a5   :  { %v497_v35 = vmul.f32 %v10922_v38, %v10922_v38  ;;  %v498_v42 = vmul.f32 %v10926_v31, %v10926_v31 }
 0x2a7   :  { %v517_v62 = vsel %vm429_vm12, %v498_v42, 0.0 }
 0x2a8   :  { %v445_v6 = vpop.xlane.xlu2 %444  ;;  %v518_v8 = vadd.f32 %v517_v62, %v497_v35 }
 0x2a9   :  { %v472_v15 = vmul.f32 %v10885_v2, %v445_v6 }
 0x2aa   :  { %v453_v16 = vpop.xlane.xlu1 %452  ;;  %519 = vadd.xlane.f32.xlu2 %v518_v8 }
 0x2ab   :  { %v10936_v47 = vsub.f32 %v419_v61, %v472_v15  ;;  %v10940_v43 = vsub.f32 %v420_v54, %v472_v15  ;;  %v474_v45 = vmul.f32 %v10885_v2, %v453_v16 }
 0x2ad   :  { %v10945_v50 = vsub.f32 %v423_v1, %v474_v45  ;;  %v10949_v17 = vsub.f32 %v424_v63, %v474_v45  ;;  %v499_v25 = vmul.f32 %v10936_v47, %v10936_v47  ;;  %v500_v57 = vmul.f32 %v10940_v43, %v10940_v43 }
 0x2af   :  { %v503_v51 = vmul.f32 %v10945_v50, %v10945_v50  ;;  %v504_v54 = vmul.f32 %v10949_v17, %v10949_v17  ;;  %v521_v56 = vsel %vm429_vm12, %v500_v57, 0.0 }
 0x2b0   :  { %v449_v61 = vpop.xlane.xlu2 %448  ;;  %v522_v60 = vadd.f32 %v521_v56, %v499_v25 }
 0x2b1   :  { %v473_v1 = vmul.f32 %v10885_v2, %v449_v61  ;;  %v529_v63 = vsel %vm429_vm12, %v504_v54, 0.0 }
 0x2b2   :  { %v457_v27 = vpop.xlane.xlu0 %456  ;;  %v530_v29 = vadd.f32 %v529_v63, %v503_v51  ;;  %523 = vadd.xlane.f32.xlu1 %v522_v60 }
 0x2b3   :  { %v10964_v32 = vsub.f32 %v421_v11, %v473_v1  ;;  %v10968_v39 = vsub.f32 %v422_v3, %v473_v1  ;;  %v475_v41 = vmul.f32 %v10885_v2, %v457_v27 }
 0x2b4   :  { %531 = vadd.xlane.f32.xlu2 %v530_v29 }
 0x2b5   :  { %v10973_v48 = vsub.f32 %v425_v13, %v475_v41  ;;  %v10977_v49 = vsub.f32 %v426_v12, %v475_v41  ;;  %v501_v5 = vmul.f32 %v10964_v32, %v10964_v32  ;;  %v502_v59 = vmul.f32 %v10968_v39, %v10968_v39 }
 0x2b7   :  { %v505_v3 = vmul.f32 %v10973_v48, %v10973_v48  ;;  %v506_v11 = vmul.f32 %v10977_v49, %v10977_v49  ;;  %v525_v7 = vsel %vm429_vm12, %v502_v59, 0.0  ;;  %v598_v59 = vmul.f32 %v10883_v0, %v10896_v14 }
 0x2b8   :  { %v526_v13 = vadd.f32 %v525_v7, %v501_v5  ;;  %v597_v5 = vmul.f32 %v10883_v0, %v10892_v10 }
 0x2b9   :  { %v533_v55 = vsel %vm429_vm12, %v506_v11, 0.0 }
 0x2ba   :  { %v461_v9 = vpop.xlane.xlu2 %460  ;;  %v534_v12 = vadd.f32 %v533_v55, %v505_v3  ;;  %527 = vadd.xlane.f32.xlu0 %v526_v13 }
 0x2bb   :  { %v476_v35 = vmul.f32 %v10885_v2, %v461_v9 }
 0x2bc   :  { %535 = vadd.xlane.f32.xlu1 %v534_v12 }
 0x2bd   :  { %v10992_v42 = vsub.f32 %v427_v23, %v476_v35  ;;  %v10996_v62 = vsub.f32 %v428_v22, %v476_v35 }
 0x2bf   :  { %v507_v6 = vmul.f32 %v10992_v42, %v10992_v42  ;;  %v508_v8 = vmul.f32 %v10996_v62, %v10996_v62 }
 0x2c1   :  { %v537_v15 = vsel %vm429_vm12, %v508_v8, 0.0 }
 0x2c2   :  { %v538_v16 = vadd.f32 %v537_v15, %v507_v6 }
 0x2c4   :  { %539 = vadd.xlane.f32.xlu0 %v538_v16 }
 0x30d   :  { %v512_v45 = vpop.xlane.xlu1 %511 }
 0x30e   :  { %v541_v25 = vmul.f32 %v512_v45, %v10885_v2  ;;  %v599_v45 = vmul.f32 %v10875_v46, %v10908_v24 }
 0x310   :  { %v613_v18 = vadd.f32 1e-05, %v541_v25  ;;  %v600_v25 = vmul.f32 %v10875_v46, %v10912_v26 }
 0x312   :  { %10189 = vrsqrt.f32 %v613_v18  ;;  %vm627_vm15 = vweird.f32 %v613_v18 }
 0x315   :  { %v516_v23 = vpop.xlane.xlu0 %515 }
 0x316   :  { %v542_v21 = vmul.f32 %v516_v23, %v10885_v2 }
 0x318   :  { %v10190_v22 = vpop.eup %10189  ;;  %v614_v57 = vadd.f32 1e-05, %v542_v21 }
 0x319   :  { %v622_v51 = vmul.f32 %v10190_v22, %v613_v18  ;;  %vm628_vm14 = vweird.f32 %v10190_v22 }
 0x31a   :  { %10191 = vrsqrt.f32 %v614_v57  ;;  %vm629_vm0 = vmor %vm627_vm15, %vm628_vm14  ;;  %vm637_vm2 = vweird.f32 %v614_v57 }
 0x31b   :  { %v623_v54 = vmul.f32 %v10190_v22, %v622_v51 }
 0x31d   :  { %v624_v61 = vmul.f32 0.5, %v623_v54  ;;  %v520_v56 = vpop.xlane.xlu2 %519 }
 0x31e   :  { %v543_v1 = vmul.f32 %v520_v56, %v10885_v2 }
 0x31f   :  { %v625_v60 = vsub.f32 1.5, %v624_v61 }
 0x320   :  { %v10192_v63 = vpop.eup %10191  ;;  %v615_v27 = vadd.f32 1e-05, %v543_v1 }
 0x321   :  { %v626_v29 = vmul.f32 %v10190_v22, %v625_v60  ;;  %v632_v41 = vmul.f32 %v10192_v63, %v614_v57  ;;  %vm638_vm1 = vweird.f32 %v10192_v63 }
 0x322   :  { %10193 = vrsqrt.f32 %v615_v27  ;;  %vm639_vm5 = vmor %vm637_vm2, %vm638_vm1  ;;  %vm647_vm9 = vweird.f32 %v615_v27 }
 0x323   :  { %v630_v3 = vsel %vm629_vm0, %v10190_v22, %v626_v29  ;;  %v633_v11 = vmul.f32 %v10192_v63, %v632_v41 }
 0x324   :  { %v701_v7 = vmul.f32 %v630_v3, %v597_v5  ;;  %v702_v13 = vmul.f32 %v630_v3, %v598_v59  ;;  %v601_v59 = vmul.f32 %v10873_v44, %v10922_v38  ;;  %v602_v3 = vmul.f32 %v10873_v44, %v10926_v31 }
 0x325   :  { %v634_v55 = vmul.f32 0.5, %v633_v11  ;;  %v524_v35 = vpop.xlane.xlu1 %523  ;;  %v603_v44 = vmul.f32 %v10871_v40, %v10936_v47  ;;  %v604_v38 = vmul.f32 %v10871_v40, %v10940_v43 }
 0x326   :  { %v11011_v9 = vadd.f32 %v10903_v19, %v701_v7  ;;  %v766_v12 = vadd.f32 %v10903_v19, %v702_v13  ;;  %v544_v10 = vmul.f32 %v524_v35, %v10885_v2 }
 0x327   :  { %v635_v6 = vsub.f32 1.5, %v634_v55  ;;  %v532_v26 = vpop.xlane.xlu2 %531 }
 0x328   :  { %13902 = vst [vmem:[#allocation24_spill] sm:$0xff] %v11011_v9  ;;  %v10194_v8 = vpop.eup %10193  ;;  %v11016_v0 = vpack.i.bf16 %v766_v12, %v11011_v9  ;;  %v616_v16 = vadd.f32 1e-05, %v544_v10  ;;  %v546_v60 = vmul.f32 %v532_v26, %v10885_v2 }
 0x329   :  { %v636_v14 = vmul.f32 %v10192_v63, %v635_v6  ;;  %v642_v15 = vmul.f32 %v10194_v8, %v615_v27  ;;  %vm648_vm6 = vweird.f32 %v10194_v8 }
 0x32a   :  { %9513 = vrot.lane.b32.xlu2 %v11016_v0, %s10442_s4  ;;  %9508 = vrot.lane.b32.xlu1 %v11016_v0, %s10444_s2  ;;  %10195 = vrsqrt.f32 %v616_v16  ;;  %vm649_vm10 = vmor %vm647_vm9, %vm648_vm6  ;;  %v11043_v5 = vadd.f32 1e-05, %v546_v60  ;;  %vm657_vm13 = vweird.f32 %v616_v16 }
 0x32b   :  { %v640_v19 = vsel %vm639_vm5, %v10192_v63, %v636_v14  ;;  %v643_v18 = vmul.f32 %v10194_v8, %v642_v15  ;;  %9518 = vrot.lane.b32.xlu0 %v11016_v0, %s10443_s30 }
 0x32c   :  { %v703_v23 = vmul.f32 %v640_v19, %v599_v45  ;;  %v704_v21 = vmul.f32 %v640_v19, %v600_v25  ;;  %vm677_vm5 = vweird.f32 %v11043_v5 }
 0x32d   :  { %v644_v22 = vmul.f32 0.5, %v643_v18  ;;  %v528_v57 = vpop.xlane.xlu0 %527 }
 0x32e   :  { %v11029_v24 = vadd.f32 %v10887_v4, %v703_v23  ;;  %v768_v46 = vadd.f32 %v10887_v4, %v704_v21  ;;  %v545_v54 = vmul.f32 %v528_v57, %v10885_v2 }
 0x32f   :  { %v645_v51 = vsub.f32 1.5, %v644_v22  ;;  %v536_v7 = vpop.xlane.xlu1 %535 }
 0x330   :  { %13903 = vst [vmem:[#allocation25_spill] sm:$0xff] %v11029_v24  ;;  %v11034_v61 = vpack.i.bf16 %v768_v46, %v11029_v24  ;;  %v10196_v56 = vpop.eup %10195  ;;  %v617_v63 = vadd.f32 1e-05, %v545_v54  ;;  %v547_v35 = vmul.f32 %v536_v7, %v10885_v2  ;;  %v606_v46 = vmul.f32 %v10863_v20, %v10968_v39 }
 0x331   :  { %v646_v1 = vmul.f32 %v10194_v8, %v645_v51  ;;  %v652_v29 = vmul.f32 %v10196_v56, %v616_v16  ;;  %vm658_vm12 = vweird.f32 %v10196_v56  ;;  %v607_v7 = vmul.f32 %v10861_v33, %v10945_v50 }
 0x332   :  { %9523 = vrot.lane.b32.xlu2 %v11016_v0, %s10448_s1  ;;  %9548 = vrot.lane.b32.xlu1 %v11034_v61, %s10443_s30  ;;  %10197 = vrsqrt.f32 %v617_v63  ;;  %vm659_vm14 = vmor %vm657_vm13, %vm658_vm12  ;;  %v619_v25 = vadd.f32 1e-05, %v547_v35  ;;  %vm667_vm0 = vweird.f32 %v617_v63  ;;  %v609_v35 = vmul.f32 %v10859_v30, %v10973_v48 }
 0x333   :  { %9538 = vrot.lane.b32.xlu0 %v11034_v61, %s10444_s2  ;;  %v653_v4 = vmul.f32 %v10196_v56, %v652_v29  ;;  %v650_v41 = vsel %vm649_vm10, %v10194_v8, %v646_v1  ;;  %10199 = vrsqrt.f32 %v11043_v5 }
 0x334   :  { %v705_v13 = vmul.f32 %v650_v41, %v601_v59  ;;  %v706_v55 = vmul.f32 %v650_v41, %v602_v3  ;;  %10201 = vrsqrt.f32 %v619_v25  ;;  %vm687_vm10 = vweird.f32 %v619_v25 }
 0x335   :  { %v654_v11 = vmul.f32 0.5, %v653_v4 }
 0x336   :  { %v11062_v31 = vadd.f32 %v10881_v58, %v705_v13  ;;  %v770_v8 = vadd.f32 %v10881_v58, %v706_v55  ;;  %v608_v13 = vmul.f32 %v10861_v33, %v10949_v17 }
 0x337   :  { %v655_v27 = vsub.f32 1.5, %v654_v11 }
 0x338   :  { %v10198_v12 = vpop.eup %10197  ;;  %13904 = vst [vmem:[#allocation26_spill] sm:$0xff] %v11062_v31  ;;  %v11070_v23 = vpack.i.bf16 %v770_v8, %v11062_v31 }
 0x339   :  { %v656_v6 = vmul.f32 %v10196_v56, %v655_v27  ;;  %v662_v10 = vmul.f32 %v10198_v12, %v617_v63  ;;  %v10200_v18 = vpop.eup %10199  ;;  %vm668_vm15 = vweird.f32 %v10198_v12 }
 0x33a   :  { %9528 = vrot.lane.b32.xlu2 %v11016_v0, %s10445_s9  ;;  %9563 = vrot.lane.b32.xlu1 %v11034_v61, %s10449_s5  ;;  %v672_v21 = vmul.f32 %v10200_v18, %v11043_v5  ;;  %vm669_vm1 = vmor %vm667_vm0, %vm668_vm15  ;;  %v10202_v1 = vpop.eup %10201  ;;  %vm678_vm2 = vweird.f32 %v10200_v18  ;;  %vm1069_vm0 = vcmask 1006592  }
 0x33b   :  { %9543 = vrot.lane.b32.xlu0 %v11034_v61, %s10442_s4  ;;  %v660_v14 = vsel %vm659_vm14, %v10196_v56, %v656_v6  ;;  %v663_v15 = vmul.f32 %v10198_v12, %v662_v10  ;;  %v540_v56 = vpop.xlane.xlu0 %539  ;;  %v682_v39 = vmul.f32 %v10202_v1, %v619_v25  ;;  %vm679_vm6 = vmor %vm677_vm5, %vm678_vm2  ;;  %vm688_vm9 = vweird.f32 %v10202_v1 }
 0x33c   :  { %v707_v16 = vmul.f32 %v660_v14, %v603_v44  ;;  %v708_v45 = vmul.f32 %v660_v14, %v604_v38  ;;  %v673_v54 = vmul.f32 %v10200_v18, %v672_v21  ;;  %vm689_vm12 = vmor %vm687_vm10, %vm688_vm9  ;;  %v610_v6 = vmul.f32 %v10859_v30, %v10977_v49 }
 0x33d   :  { %v664_v19 = vmul.f32 0.5, %v663_v15  ;;  %v683_v41 = vmul.f32 %v10202_v1, %v682_v39 }
 0x33e   :  { %v11066_v47 = vadd.f32 %v10879_v53, %v707_v16  ;;  %v772_v40 = vadd.f32 %v10879_v53, %v708_v45  ;;  %v605_v53 = vmul.f32 %v10863_v20, %v10964_v32  ;;  %v548_v32 = vmul.f32 %v540_v56, %v10885_v2 }
 0x33f   :  { %v665_v43 = vsub.f32 1.5, %v664_v19  ;;  %v674_v20 = vmul.f32 0.5, %v673_v54  ;;  %v684_v2 = vmul.f32 0.5, %v683_v41  ;;  %v612_v16 = vmul.f32 %v10857_v28, %v10996_v62 }
 0x340   :  { %v11073_v58 = vpack.i.bf16 %v772_v40, %v11066_v47  ;;  %v620_v29 = vadd.f32 1e-05, %v548_v32 }
 0x341   :  { %v666_v22 = vmul.f32 %v10198_v12, %v665_v43  ;;  %v675_v4 = vsub.f32 1.5, %v674_v20  ;;  %v685_v3 = vsub.f32 1.5, %v684_v2 }
 0x342   :  { %9533 = vrot.lane.b32.xlu2 %v11016_v0, %s10449_s5  ;;  %9593 = vrot.lane.b32.xlu1 %v11070_v23, %s10449_s5  ;;  %10203 = vrsqrt.f32 %v620_v29  ;;  %vm697_vm14 = vweird.f32 %v620_v29 }
 0x343   :  { %9608 = vrot.lane.b32.xlu0 %v11073_v58, %s10443_s30  ;;  %v670_v26 = vsel %vm669_vm1, %v10198_v12, %v666_v22  ;;  %v686_v27 = vmul.f32 %v10202_v1, %v685_v3  ;;  %vm1094_vm1 = vcmask 998400  }
 0x344   :  { %v709_v57 = vmul.f32 %v670_v26, %v605_v53  ;;  %v710_v51 = vmul.f32 %v670_v26, %v606_v46 }
 0x345   :  { %v690_v17 = vsel %vm689_vm12, %v10202_v1, %v686_v27 }
 0x346   :  { %v11087_v0 = vadd.f32 %v10877_v52, %v709_v57  ;;  %v774_v60 = vadd.f32 %v10877_v52, %v710_v51  ;;  %v676_v52 = vmul.f32 %v10200_v18, %v675_v4  ;;  %v713_v10 = vmul.f32 %v690_v17, %v609_v35 }
 0x347   :  { %v714_v44 = vmul.f32 %v690_v17, %v610_v6 }
 0x348   :  { %v11092_v63 = vpack.i.bf16 %v774_v60, %v11087_v0  ;;  %v680_v59 = vsel %vm679_vm6, %v10200_v18, %v676_v52  ;;  %v10204_v11 = vpop.eup %10203 }
 0x349   :  { %v711_v55 = vmul.f32 %v680_v59, %v607_v7  ;;  %v692_v12 = vmul.f32 %v10204_v11, %v620_v29  ;;  %v778_v30 = vadd.f32 %v10867_v36, %v714_v44  ;;  %vm698_vm13 = vweird.f32 %v10204_v11 }
 0x34a   :  { %9553 = vrot.lane.b32.xlu2 %v11034_v61, %s10448_s1  ;;  %9598 = vrot.lane.b32.xlu1 %v11073_v58, %s10444_s2  ;;  %vm699_vm15 = vmor %vm697_vm14, %vm698_vm13 }
 0x34b   :  { %9628 = vrot.lane.b32.xlu0 %v11092_v63, %s10444_s2  ;;  %v11118_v50 = vadd.f32 %v10869_v37, %v711_v55  ;;  %v693_v5 = vmul.f32 %v10204_v11, %v692_v12 }
 0x34d   :  { %v694_v8 = vmul.f32 0.5, %v693_v5 }
 0x34f   :  { %v695_v48 = vsub.f32 1.5, %v694_v8 }
 0x351   :  { %v696_v14 = vmul.f32 %v10204_v11, %v695_v48 }
 0x352   :  { %9558 = vrot.lane.b32.xlu2 %v11034_v61, %s10445_s9  ;;  %9603 = vrot.lane.b32.xlu1 %v11073_v58, %s10442_s4  ;;  %v712_v61 = vmul.f32 %v680_v59, %v608_v13 }
 0x353   :  { %9633 = vrot.lane.b32.xlu0 %v11092_v63, %s10442_s4  ;;  %v700_v15 = vsel %vm699_vm15, %v10204_v11, %v696_v14 }
 0x354   :  { %v776_v33 = vadd.f32 %v10869_v37, %v712_v61  ;;  %v11135_v37 = vadd.f32 %v10867_v36, %v713_v10  ;;  %v611_v36 = vmul.f32 %v10857_v28, %v10992_v42  ;;  %v716_v25 = vmul.f32 %v700_v15, %v612_v16 }
 0x356   :  { %v11126_v38 = vpack.i.bf16 %v776_v33, %v11118_v50  ;;  %v11139_v49 = vpack.i.bf16 %v778_v30, %v11135_v37  ;;  %v715_v45 = vmul.f32 %v700_v15, %v611_v36  ;;  %v780_v18 = vadd.f32 %v10865_v34, %v716_v25 }
 0x358   :  { %v11158_v19 = vadd.f32 %v10865_v34, %v715_v45 }
 0x35a   :  { %9613 = vrot.lane.b32.xlu1 %v11073_v58, %s10448_s1  ;;  %9568 = vrot.lane.b32.xlu2 %v11070_v23, %s10444_s2  ;;  %v11162_v42 = vpack.i.bf16 %v780_v18, %v11158_v19 }
 0x35b   :  { %9648 = vrot.lane.b32.xlu0 %v11092_v63, %s10445_s9 }
 0x362   :  { %9623 = vrot.lane.b32.xlu1 %v11073_v58, %s10449_s5  ;;  %9573 = vrot.lane.b32.xlu2 %v11070_v23, %s10442_s4 }
 0x363   :  { %9673 = vrot.lane.b32.xlu0 %v11126_v38, %s10448_s1 }
 0x36a   :  { %9638 = vrot.lane.b32.xlu1 %v11092_v63, %s10443_s30  ;;  %9578 = vrot.lane.b32.xlu2 %v11070_v23, %s10443_s30 }
 0x36b   :  { %9698 = vrot.lane.b32.xlu0 %v11139_v49, %s10443_s30 }
 0x372   :  { %9653 = vrot.lane.b32.xlu1 %v11092_v63, %s10449_s5  ;;  %9583 = vrot.lane.b32.xlu2 %v11070_v23, %s10448_s1 }
 0x373   :  { %9713 = vrot.lane.b32.xlu0 %v11139_v49, %s10449_s5 }
 0x37a   :  { %9588 = vrot.lane.b32.xlu2 %v11070_v23, %s10445_s9  ;;  %9678 = vrot.lane.b32.xlu1 %v11126_v38, %s10445_s9 }
 0x37b   :  { %9723 = vrot.lane.b32.xlu0 %v11162_v42, %s10442_s4 }
 0x382   :  { %9618 = vrot.lane.b32.xlu2 %v11073_v58, %s10445_s9  ;;  %9688 = vrot.lane.b32.xlu1 %v11139_v49, %s10444_s2 }
 0x384   :  { %v11174_v28 = vpop.permute.xlu2 %9513 }
 0x385   :  { %v9516_v34 = vunpack.i.h.bf16 %v11174_v28  ;;  %v13775_v62 = vunpack.i.l.bf16 %v11174_v28 }
 0x387   :  { %v1021_v40 = vsel %vm205_vm7, %v13775_v62, %v9516_v34 }
 0x388   :  { %v9752_v43 = vpack.i.bf16 %v9516_v34, %v1021_v40 }
 0x38a   :  { %9643 = vrot.lane.b32.xlu2 %v11092_v63, %s10448_s1  ;;  %9693 = vrot.lane.b32.xlu1 %v11139_v49, %s10442_s4 }
 0x38b   :  { %9753 = vrot.lane.b32.xlu0 %v9752_v43, %s10449_s5 }
 0x38c   :  { %v11186_v23 = vpop.permute.xlu2 %9523 }
 0x38d   :  { %13905 = vst [vmem:[#allocation27_spill] sm:$0xff] %v11186_v23 }
 0x392   :  { %9703 = vrot.lane.b32.xlu1 %v11139_v49, %s10448_s1  ;;  %9658 = vrot.lane.b32.xlu2 %v11126_v38, %s10444_s2 }
 0x394   :  { %v11192_v58 = vpop.permute.xlu2 %9528 }
 0x395   :  { %13906 = vst [vmem:[#allocation28_spill] sm:$0xff] %v11192_v58 }
 0x39a   :  { %9728 = vrot.lane.b32.xlu1 %v11162_v42, %s10443_s30  ;;  %9663 = vrot.lane.b32.xlu2 %v11126_v38, %s10442_s4 }
 0x39c   :  { %v11198_v21 = vpop.permute.xlu1 %9508  ;;  %v11200_v22 = vpop.permute.xlu2 %9533 }
 0x39d   :  { %13907 = vst [vmem:[#allocation29_spill] sm:$0xff] %v11200_v22  ;;  %v11202_v53 = vpop.permute.xlu0 %9518  ;;  %v9511_v51 = vunpack.i.h.bf16 %v11198_v21  ;;  %v13780_v54 = vunpack.i.l.bf16 %v11198_v21 }
 0x39e   :  { %13908 = vst [vmem:[#allocation30_spill] sm:$0xff] %v11202_v53  ;;  %v9521_v46 = vunpack.i.h.bf16 %v11202_v53  ;;  %v13768_v26 = vunpack.i.l.bf16 %v11202_v53 }
 0x39f   :  { %v973_v63 = vsel %vm191_vm3, %v13780_v54, %v9511_v51 }
 0x3a0   :  { %v997_v57 = vsel %vm198_vm4, %v13768_v26, %v9521_v46  ;;  %v9747_v20 = vpack.i.bf16 %v9511_v51, %v973_v63 }
 0x3a1   :  { %v9757_v56 = vpack.i.bf16 %v9521_v46, %v997_v57 }
 0x3a2   :  { %9743 = vrot.lane.b32.xlu1 %v11162_v42, %s10449_s5  ;;  %9668 = vrot.lane.b32.xlu2 %v11126_v38, %s10443_s30 }
 0x3a3   :  { %9758 = vrot.lane.b32.xlu0 %v9757_v56, %s10449_s5 }
 0x3a4   :  { %v11216_v1 = vpop.permute.xlu1 %9548  ;;  %v11218_v60 = vpop.permute.xlu2 %9553 }
 0x3a5   :  { %13909 = vst [vmem:[#allocation31_spill] sm:$0xff] %v11216_v1  ;;  %v11220_v32 = vpop.permute.xlu0 %9538  ;;  %v9551_v39 = vunpack.i.h.bf16 %v11216_v1  ;;  %v13770_v29 = vunpack.i.l.bf16 %v11216_v1 }
 0x3a6   :  { %13910 = vst [vmem:[#allocation32_spill] sm:$0xff] %v11218_v60  ;;  %v9541_v46 = vunpack.i.h.bf16 %v11220_v32  ;;  %v13784_v56 = vunpack.i.l.bf16 %v11220_v32 }
 0x3a7   :  { %v998_v2 = vsel %vm198_vm4, %v13770_v29, %v9551_v39 }
 0x3a8   :  { %v9772_v11 = vpack.i.bf16 %v9551_v39, %v998_v2 }
 0x3aa   :  { %9748 = vrot.lane.b32.xlu1 %v9747_v20, %s10449_s5  ;;  %9683 = vrot.lane.b32.xlu2 %v11126_v38, %s10449_s5 }
 0x3ac   :  { %v11230_v4 = vpop.permute.xlu1 %9563  ;;  %v11232_v41 = vpop.permute.xlu2 %9558 }
 0x3ad   :  { %13911 = vst [vmem:[#allocation33_spill] sm:$0xff] %v11230_v4  ;;  %v11234_v52 = vpop.permute.xlu0 %9543 }
 0x3ae   :  { %13912 = vst [vmem:[#allocation34_spill] sm:$0xff] %v11232_v41  ;;  %v9546_v59 = vunpack.i.h.bf16 %v11234_v52  ;;  %v13776_v3 = vunpack.i.l.bf16 %v11234_v52 }
 0x3b0   :  { %v1022_v7 = vsel %vm205_vm7, %v13776_v3, %v9546_v59 }
 0x3b1   :  { %v9767_v13 = vpack.i.bf16 %v9546_v59, %v1022_v7 }
 0x3b2   :  { %9773 = vrot.lane.b32.xlu1 %v9772_v11, %s10449_s5  ;;  %9708 = vrot.lane.b32.xlu2 %v11139_v49, %s10445_s9  ;;  %v974_v11 = vsel %vm191_vm3, %v13784_v56, %v9541_v46 }
 0x3b3   :  { %9768 = vrot.lane.b32.xlu0 %v9767_v13, %s10449_s5  ;;  %v9762_v13 = vpack.i.bf16 %v9541_v46, %v974_v11 }
 0x3b4   :  { %v11248_v55 = vpop.permute.xlu1 %9593  ;;  %v11250_v61 = vpop.permute.xlu2 %9568 }
 0x3b5   :  { %13913 = vst [vmem:[#allocation35_spill] sm:$0xff] %v11248_v55  ;;  %v11252_v27 = vpop.permute.xlu0 %9608  ;;  %v9571_v12 = vunpack.i.h.bf16 %v11250_v61  ;;  %v13785_v33 = vunpack.i.l.bf16 %v11250_v61 }
 0x3b6   :  { %13914 = vst [vmem:[#allocation36_spill] sm:$0xff] %v11252_v27  ;;  %v9611_v35 = vunpack.i.h.bf16 %v11252_v27  ;;  %v13773_v6 = vunpack.i.l.bf16 %v11252_v27 }
 0x3b7   :  { %v975_v17 = vsel %vm191_vm3, %v13785_v33, %v9571_v12 }
 0x3b8   :  { %v9777_v5 = vpack.i.bf16 %v9571_v12, %v975_v17  ;;  %v1000_v48 = vsel %vm198_vm4, %v13773_v6, %v9611_v35 }
 0x3b9   :  { %v9802_v16 = vpack.i.bf16 %v9611_v35, %v1000_v48 }
 0x3ba   :  { %9718 = vrot.lane.b32.xlu2 %v11162_v42, %s10444_s2 }
 0x3bb   :  { %9778 = vrot.lane.b32.xlu0 %v9777_v5, %s10449_s5 }
 0x3bc   :  { %v11264_v10 = vpop.permute.xlu1 %9598  ;;  %v11266_v44 = vpop.permute.xlu2 %9573 }
 0x3bd   :  { %v11268_v38 = vpop.permute.xlu0 %9628  ;;  %v9576_v8 = vunpack.i.h.bf16 %v11266_v44  ;;  %v13777_v30 = vunpack.i.l.bf16 %v11266_v44  ;;  %v9601_v15 = vunpack.i.h.bf16 %v11264_v10  ;;  %v13788_v36 = vunpack.i.l.bf16 %v11264_v10 }
 0x3be   :  { %v9631_v63 = vunpack.i.h.bf16 %v11268_v38  ;;  %v13789_v20 = vunpack.i.l.bf16 %v11268_v38 }
 0x3bf   :  { %v1023_v49 = vsel %vm205_vm7, %v13777_v30, %v9576_v8  ;;  %v976_v34 = vsel %vm191_vm3, %v13788_v36, %v9601_v15 }
 0x3c0   :  { %v9782_v14 = vpack.i.bf16 %v9576_v8, %v1023_v49  ;;  %v9792_v57 = vpack.i.bf16 %v9601_v15, %v976_v34  ;;  %v977_v7 = vsel %vm191_vm3, %v13789_v20, %v9631_v63 }
 0x3c1   :  { %v9807_v12 = vpack.i.bf16 %v9631_v63, %v977_v7 }
 0x3c2   :  { %9733 = vrot.lane.b32.xlu2 %v11162_v42, %s10448_s1  ;;  %9783 = vrot.lane.b32.xlu1 %v9782_v14, %s10449_s5 }
 0x3c3   :  { %9803 = vrot.lane.b32.xlu0 %v9802_v16, %s10449_s5 }
 0x3c4   :  { %v11284_v45 = vpop.permute.xlu1 %9603  ;;  %v11286_v25 = vpop.permute.xlu2 %9578 }
 0x3c5   :  { %13915 = vst [vmem:[#allocation37_spill] sm:$0xff] %v11286_v25  ;;  %v11288_v18 = vpop.permute.xlu0 %9633  ;;  %v13772_v17 = vunpack.i.l.bf16 %v11286_v25  ;;  %v9606_v49 = vunpack.i.h.bf16 %v11284_v45  ;;  %v13778_v14 = vunpack.i.l.bf16 %v11284_v45 }
 0x3c6   :  { %v9636_v40 = vunpack.i.h.bf16 %v11288_v18  ;;  %v13779_v43 = vunpack.i.l.bf16 %v11288_v18 }
 0x3c7   :  { %v1024_v46 = vsel %vm205_vm7, %v13778_v14, %v9606_v49 }
 0x3c8   :  { %v1025_v51 = vsel %vm205_vm7, %v13779_v43, %v9636_v40 }
 0x3c9   :  { %v9812_v39 = vpack.i.bf16 %v9636_v40, %v1025_v51  ;;  %v9797_v51 = vpack.i.bf16 %v9606_v49, %v1024_v46 }
 0x3ca   :  { %9738 = vrot.lane.b32.xlu2 %v11162_v42, %s10445_s9  ;;  %9793 = vrot.lane.b32.xlu1 %v9792_v57, %s10449_s5  ;;  %v9581_v42 = vunpack.i.h.bf16 %v11286_v25 }
 0x3cb   :  { %9813 = vrot.lane.b32.xlu0 %v9812_v39, %s10449_s5 }
 0x3cc   :  { %v11306_v2 = vpop.permute.xlu1 %9613  ;;  %v11308_v59 = vpop.permute.xlu2 %9583  ;;  %v999_v8 = vsel %vm198_vm4, %v13772_v17, %v9581_v42 }
 0x3cd   :  { %13916 = vst [vmem:[#allocation38_spill] sm:$0xff] %v11306_v2  ;;  %v9787_v48 = vpack.i.bf16 %v9581_v42, %v999_v8  ;;  %v9556_v8 = vunpack.i.h.bf16 %v11218_v60 }
 0x3ce   :  { %13917 = vst [vmem:[#allocation39_spill] sm:$0xff] %v11308_v59 }
 0x3d2   :  { %9763 = vrot.lane.b32.xlu2 %v9762_v13, %s10449_s5  ;;  %9808 = vrot.lane.b32.xlu1 %v9807_v12, %s10449_s5 }
 0x3d4   :  { %v11320_v5 = vpop.permute.xlu1 %9623  ;;  %v11322_v35 = vpop.permute.xlu2 %9588 }
 0x3d5   :  { %13918 = vst [vmem:[#allocation40_spill] sm:$0xff] %v11320_v5 }
 0x3d6   :  { %13919 = vst [vmem:[#allocation41_spill] sm:$0xff] %v11322_v35 }
 0x3da   :  { %9788 = vrot.lane.b32.xlu2 %v9787_v48, %s10449_s5  ;;  %v13771_v48 = vunpack.i.l.bf16 %v11218_v60 }
 0x3dc   :  { %v11330_v15 = vpop.permute.xlu1 %9638  ;;  %v11332_v16 = vpop.permute.xlu2 %9618 }
 0x3dd   :  { %13920 = vst [vmem:[#allocation42_spill] sm:$0xff] %v11330_v15  ;;  %v9641_v34 = vunpack.i.h.bf16 %v11330_v15  ;;  %v13774_v40 = vunpack.i.l.bf16 %v11330_v15 }
 0x3de   :  { %13921 = vst [vmem:[#allocation43_spill] sm:$0xff] %v11332_v16 }
 0x3df   :  { %v1001_v57 = vsel %vm198_vm4, %v13774_v40, %v9641_v34 }
 0x3e0   :  { %v9817_v63 = vpack.i.bf16 %v9641_v34, %v1001_v57 }
 0x3e2   :  { %9798 = vrot.lane.b32.xlu2 %v9797_v51, %s10449_s5  ;;  %9818 = vrot.lane.b32.xlu1 %v9817_v63, %s10449_s5  ;;  %v1071_v51 = vsel %vm1069_vm0, %v13771_v48, %v9556_v8 }
 0x3e4   :  { %v11344_v39 = vpop.permute.xlu1 %9653  ;;  %v11346_v11 = vpop.permute.xlu2 %9643 }
 0x3e5   :  { %13922 = vst [vmem:[#allocation44_spill] sm:$0xff] %v11344_v39  ;;  %v9646_v7 = vunpack.i.h.bf16 %v11346_v11  ;;  %v13769_v13 = vunpack.i.l.bf16 %v11346_v11 }
 0x3e6   :  { %13923 = vst [vmem:[#allocation45_spill] sm:$0xff] %v11346_v11 }
 0x3e7   :  { %v1074_v12 = vsel %vm1069_vm0, %v13769_v13, %v9646_v7 }
 0x3e8   :  { %v9822_v42 = vpack.i.bf16 %v9646_v7, %v1074_v12  ;;  %v9887_v12 = vpack.i.bf16 %v9556_v8, %v1071_v51 }
 0x3ea   :  { %9823 = vrot.lane.b32.xlu2 %v9822_v42, %s10449_s5  ;;  %v11370_v42 = vpop.permute.xlu0 %9648 }
 0x3eb   :  { %13925 = vst [vmem:[#allocation47_spill] sm:$0xff] %v11370_v42  ;;  %v9651_v36 = vunpack.i.h.bf16 %v11370_v42  ;;  %v13795_v20 = vunpack.i.l.bf16 %v11370_v42 }
 0x3ec   :  { %v11356_v49 = vpop.permute.xlu1 %9678  ;;  %v11358_v34 = vpop.permute.xlu2 %9658 }
 0x3ed   :  { %13924 = vst [vmem:[#allocation46_spill] sm:$0xff] %v11356_v49  ;;  %v9661_v46 = vunpack.i.h.bf16 %v11358_v34  ;;  %v13790_v57 = vunpack.i.l.bf16 %v11358_v34 }
 0x3ef   :  { %v978_v63 = vsel %vm191_vm3, %v13790_v57, %v9661_v46 }
 0x3f0   :  { %v9827_v7 = vpack.i.bf16 %v9661_v46, %v978_v63 }
 0x3f2   :  { %9828 = vrot.lane.b32.xlu1 %v9827_v7, %s10449_s5  ;;  %9888 = vrot.lane.b32.xlu2 %v9887_v12, %s10449_s5  ;;  %v9616_v7 = vunpack.i.h.bf16 %v11306_v2  ;;  %v13781_v12 = vunpack.i.l.bf16 %v11306_v2 }
 0x3f4   :  { %v11372_v26 = vpop.permute.xlu1 %9688  ;;  %v11374_v13 = vpop.permute.xlu2 %9663 }
 0x3f5   :  { %v9691_v29 = vunpack.i.h.bf16 %v11372_v26  ;;  %v13791_v48 = vunpack.i.l.bf16 %v11372_v26  ;;  %v9666_v17 = vunpack.i.h.bf16 %v11374_v13  ;;  %v13782_v6 = vunpack.i.l.bf16 %v11374_v13 }
 0x3f7   :  { %v979_v8 = vsel %vm191_vm3, %v13791_v48, %v9691_v29  ;;  %v1026_v46 = vsel %vm205_vm7, %v13782_v6, %v9666_v17 }
 0x3f8   :  { %v9847_v51 = vpack.i.bf16 %v9691_v29, %v979_v8  ;;  %v9832_v63 = vpack.i.bf16 %v9666_v17, %v1026_v46  ;;  %v1073_v29 = vsel %vm1069_vm0, %v13781_v12, %v9616_v7  ;;  %v11399_v17 = vpop.permute.xlu0 %9673 }
 0x3f9   :  { %13927 = vst [vmem:[#allocation49_spill] sm:$0xff] %v11399_v17  ;;  %v9852_v46 = vpack.i.bf16 %v9616_v7, %v1073_v29  ;;  %v13786_v14 = vunpack.i.l.bf16 %v11399_v17 }
 0x3fa   :  { %9848 = vrot.lane.b32.xlu1 %v9847_v51, %s10449_s5  ;;  %9833 = vrot.lane.b32.xlu0 %v9832_v63, %s10449_s5  ;;  %v9676_v63 = vunpack.i.h.bf16 %v11399_v17 }
 0x3fc   :  { %v11390_v40 = vpop.permute.xlu1 %9693  ;;  %v11392_v62 = vpop.permute.xlu2 %9668 }
 0x3fd   :  { %13926 = vst [vmem:[#allocation48_spill] sm:$0xff] %v11392_v62  ;;  %v9671_v3 = vunpack.i.h.bf16 %v11392_v62  ;;  %v13783_v30 = vunpack.i.l.bf16 %v11392_v62  ;;  %v13797_v56 = vunpack.i.l.bf16 %v11390_v40 }
 0x3ff   :  { %v1002_v8 = vsel %vm198_vm4, %v13783_v30, %v9671_v3  ;;  %v9696_v30 = vunpack.i.h.bf16 %v11390_v40 }
 0x400   :  { %v9837_v51 = vpack.i.bf16 %v9671_v3, %v1002_v8  ;;  %v1075_v3 = vsel %vm1069_vm0, %v13786_v14, %v9676_v63  ;;  %v11426_v33 = vpop.permute.xlu0 %9698 }
 0x401   :  { %v9842_v8 = vpack.i.bf16 %v9676_v63, %v1075_v3  ;;  %13930 = vst [vmem:[#allocation52_spill] sm:$0xff] %v11426_v33  ;;  %v1027_v3 = vsel %vm205_vm7, %v13797_v56, %v9696_v30  ;;  %v9701_v48 = vunpack.i.h.bf16 %v11426_v33 }
 0x402   :  { %9853 = vrot.lane.b32.xlu1 %v9852_v46, %s10449_s5  ;;  %9838 = vrot.lane.b32.xlu0 %v9837_v51, %s10449_s5  ;;  %v9526_v46 = vunpack.i.h.bf16 %v11186_v23  ;;  %v13793_v51 = vunpack.i.l.bf16 %v11186_v23  ;;  %v9857_v57 = vpack.i.bf16 %v9696_v30, %v1027_v3  ;;  %v13796_v23 = vunpack.i.l.bf16 %v11426_v33 }
 0x403   :  { %v1049_v30 = vsel %vm212_vm8, %v13795_v20, %v9651_v36  ;;  %v11461_v3 = vunpack.i.h.bf16 %v11344_v39 }
 0x404   :  { %v11408_v43 = vpop.permute.xlu1 %9703  ;;  %v11410_v54 = vpop.permute.xlu2 %9683  ;;  %v1070_v63 = vsel %vm1069_vm0, %v13793_v51, %v9526_v46 }
 0x405   :  { %13928 = vst [vmem:[#allocation50_spill] sm:$0xff] %v11408_v43  ;;  %v9706_v12 = vunpack.i.h.bf16 %v11408_v43  ;;  %v13787_v6 = vunpack.i.l.bf16 %v11408_v43 }
 0x406   :  { %13929 = vst [vmem:[#allocation51_spill] sm:$0xff] %v11410_v54 }
 0x407   :  { %v1076_v7 = vsel %vm1069_vm0, %v13787_v6, %v9706_v12 }
 0x408   :  { %v9867_v29 = vpack.i.bf16 %v9706_v12, %v1076_v7 }
 0x40a   :  { %9868 = vrot.lane.b32.xlu1 %v9867_v29, %s10449_s5  ;;  %9843 = vrot.lane.b32.xlu0 %v9842_v8, %s10449_s5  ;;  %v9892_v8 = vpack.i.bf16 %v9526_v46, %v1070_v63  ;;  %v1003_v46 = vsel %vm198_vm4, %v13796_v23, %v9701_v48  ;;  %v9922_v63 = vpack.i.bf16 %v9651_v36, %v1049_v30 }
 0x40c   :  { %v11428_v14 = vpop.permute.xlu2 %9708  ;;  %v11448_v51 = vpop.permute.xlu1 %9728 }
 0x40d   :  { %13931 = vst [vmem:[#allocation53_spill] sm:$0xff] %v11428_v14  ;;  %v9711_v6 = vunpack.i.h.bf16 %v11428_v14  ;;  %v13794_v12 = vunpack.i.l.bf16 %v11428_v14 }
 0x40f   :  { %v1051_v7 = vsel %vm212_vm8, %v13794_v12, %v9711_v6 }
 0x410   :  { %v9897_v29 = vpack.i.bf16 %v9711_v6, %v1051_v7  ;;  %v11452_v6 = vpop.permute.xlu0 %9713  ;;  %v9862_v7 = vpack.i.bf16 %v9701_v48, %v1003_v46 }
 0x411   :  { %13932 = vst [vmem:[#allocation54_spill] sm:$0xff] %v11452_v6  ;;  %v11489_v56 = vunpack.i.h.bf16 %v11452_v6  ;;  %v13806_v14 = vunpack.i.l.bf16 %v11452_v6  ;;  %v9586_v6 = vunpack.i.h.bf16 %v11308_v59 }
 0x412   :  { %9898 = vrot.lane.b32.xlu2 %v9897_v29, %s10449_s5  ;;  %9893 = vrot.lane.b32.xlu1 %v9892_v8, %s10449_s5 }
 0x413   :  { %9858 = vrot.lane.b32.xlu0 %v9857_v57, %s10449_s5  ;;  %v13799_v57 = vunpack.i.l.bf16 %v11344_v39 }
 0x414   :  { %v11450_v12 = vpop.permute.xlu2 %9718  ;;  %v11478_v30 = vpop.permute.xlu1 %9743 }
 0x415   :  { %v9721_v29 = vunpack.i.h.bf16 %v11450_v12  ;;  %v13802_v8 = vunpack.i.l.bf16 %v11450_v12  ;;  %v11476_v48 = vsel %vm1094_vm1, %v13799_v57, %v11461_v3  ;;  %13934 = vst [vmem:[#allocation56_spill] sm:$0xff] %v11478_v30  ;;  %v11495_v39 = vunpack.i.h.bf16 %v11478_v30 }
 0x416   :  { %v9937_v57 = vpack.i.bf16 %v11461_v3, %v11476_v48 }
 0x417   :  { %v980_v46 = vsel %vm191_vm3, %v13802_v8, %v9721_v29  ;;  %v13808_v8 = vunpack.i.l.bf16 %v11478_v30  ;;  %v13820_v30 = vunpack.i.l.bf16 %v11308_v59  ;;  %vm1455_vm3 = vcmask 728064  }
 0x418   :  { %v9872_v60 = vpack.i.bf16 %v9721_v29, %v980_v46 }
 0x419   :  { %v11513_v29 = vsel %vm1094_vm1, %v13808_v8, %v11495_v39 }
 0x41a   :  { %9923 = vrot.lane.b32.xlu1 %v9922_v63, %s10449_s5  ;;  %v11483_v63 = vpop.permute.xlu0 %9723  ;;  %v9957_v46 = vpack.i.bf16 %v11495_v39, %v11513_v29 }
 0x41b   :  { %9863 = vrot.lane.b32.xlu0 %v9862_v7, %s10449_s5  ;;  %v9726_v2 = vunpack.i.h.bf16 %v11483_v63  ;;  %v13811_v53 = vunpack.i.l.bf16 %v11483_v63 }
 0x41c   :  { %v11468_v20 = vpop.permute.xlu2 %9733 }
 0x41d   :  { %13933 = vst [vmem:[#allocation55_spill] sm:$0xff] %v11468_v20  ;;  %v9736_v23 = vunpack.i.h.bf16 %v11468_v20  ;;  %v13807_v36 = vunpack.i.l.bf16 %v11468_v20 }
 0x41f   :  { %v1077_v7 = vsel %vm1069_vm0, %v13807_v36, %v9736_v23  ;;  %v13814_v36 = vunpack.i.l.bf16 %v11332_v16 }
 0x420   :  { %v9912_v42 = vpack.i.bf16 %v9736_v23, %v1077_v7  ;;  %v11507_v23 = vsel %vm1094_vm1, %v13806_v14, %v11489_v56  ;;  %v13817_v7 = vunpack.i.l.bf16 %v11232_v41  ;;  %v9621_v14 = vunpack.i.h.bf16 %v11332_v16 }
 0x422   :  { %9913 = vrot.lane.b32.xlu2 %v9912_v42, %s10449_s5  ;;  %9938 = vrot.lane.b32.xlu1 %v9937_v57, %s10449_s5  ;;  %v1028_v42 = vsel %vm205_vm7, %v13811_v53, %v9726_v2  ;;  %v9561_v57 = vunpack.i.h.bf16 %v11232_v41  ;;  %v1048_v53 = vsel %vm212_vm8, %v13814_v36, %v9621_v14  ;;  %v13819_v36 = vunpack.i.l.bf16 %v11320_v5 }
 0x423   :  { %9873 = vrot.lane.b32.xlu0 %v9872_v60, %s10449_s5  ;;  %v9917_v60 = vpack.i.bf16 %v11489_v56, %v11507_v23  ;;  %v9877_v8 = vpack.i.bf16 %v9726_v2, %v1028_v42  ;;  %v1072_v2 = vsel %vm1069_vm0, %v13820_v30, %v9586_v6  ;;  %v11541_v42 = vunpack.i.h.bf16 %v11230_v4  ;;  %v11580_v30 = vpop.permute.xlu1 %9748 }
 0x424   :  { %v1046_v11 = vsel %vm212_vm8, %v13817_v7, %v9561_v57  ;;  %v9882_v16 = vpack.i.bf16 %v9586_v6, %v1072_v2  ;;  %v9731_v41 = vunpack.i.h.bf16 %v11448_v51  ;;  %v13821_v7 = vunpack.i.l.bf16 %v11448_v51  ;;  %v11568_v6 = vpop.permute.xlu0 %9753 }
 0x425   :  { %13935 = vst [vmem:[#allocation57_spill] sm:$0xff] %v11541_v42  ;;  %v9962_v1 = vpack.i.bf16 %v9561_v57, %v1046_v11  ;;  %v9531_v57 = vunpack.i.h.bf16 %v11192_v58  ;;  %v13824_v2 = vunpack.i.l.bf16 %v11192_v58  ;;  %v1996_v58 = vld [vmem:[%s13746_s6] sm:$0xff] }
 0x426   :  { %v1004_v11 = vsel %vm198_vm4, %v13821_v7, %v9731_v41  ;;  %vm1512_vm4 = vcmask 523264  }
 0x427   :  { %v1045_v7 = vsel %vm212_vm8, %v13824_v2, %v9531_v57 }
 0x42a   :  { %9918 = vrot.lane.b32.xlu2 %v9917_v60, %s10449_s5  ;;  %9958 = vrot.lane.b32.xlu1 %v9957_v46, %s10449_s5  ;;  %v9932_v60 = vpack.i.bf16 %v9621_v14, %v1048_v53  ;;  %v13818_v46 = vunpack.i.l.bf16 %v11230_v4  ;;  %v9972_v4 = vpack.i.bf16 %v9531_v57, %v1045_v7  ;;  %v9591_v57 = vunpack.i.h.bf16 %v11322_v35 }
 0x42b   :  { %9878 = vrot.lane.b32.xlu0 %v9877_v8, %s10449_s5  ;;  %v11545_v8 = vunpack.i.h.bf16 %v11320_v5  ;;  %v11595_v5 = vunpack.i.h.bf16 %v11410_v54  ;;  %v11600_v2 = vpop.permute.xlu1 %9773 }
 0x42c   :  { %v11563_v14 = vsel %vm1094_vm1, %v13818_v46, %v11541_v42  ;;  %v9681_v46 = vunpack.i.h.bf16 %v11356_v49  ;;  %13938 = vst [vmem:[#allocation60_spill] sm:$0xff] %v11600_v2 }
 0x42d   :  { %v11557_v53 = vsel %vm1094_vm1, %v13819_v36, %v11545_v8  ;;  %13936 = vst [vmem:[#allocation58_spill] sm:$0xff] %v11563_v14  ;;  %v13825_v36 = vunpack.i.l.bf16 %v11356_v49 }
 0x432   :  { %9933 = vrot.lane.b32.xlu2 %v9932_v60, %s10449_s5  ;;  %9963 = vrot.lane.b32.xlu1 %v9962_v1, %s10449_s5  ;;  %v9947_v1 = vpack.i.bf16 %v11545_v8, %v11557_v53  ;;  %v9902_v60 = vpack.i.bf16 %v9731_v41, %v1004_v11  ;;  %v1050_v41 = vsel %vm212_vm8, %v13825_v36, %v9681_v46  ;;  %v11589_v11 = vpop.permute.xlu0 %9758 }
 0x433   :  { %9883 = vrot.lane.b32.xlu0 %v9882_v16, %s10449_s5  ;;  %v9977_v16 = vpack.i.bf16 %v11541_v42, %v11563_v14  ;;  %13937 = vst [vmem:[#allocation59_spill] sm:$0xff] %v11589_v11 }
 0x43a   :  { %9948 = vrot.lane.b32.xlu2 %v9947_v1, %s10449_s5  ;;  %9978 = vrot.lane.b32.xlu1 %v9977_v16, %s10449_s5  ;;  %v1998_v1 = vld [vmem:[%s13746_s6 + $0x10] sm:$0xff]  ;;  %v9907_v16 = vpack.i.bf16 %v9681_v46, %v1050_v41  ;;  %v11608_v7 = vpop.permute.xlu0 %9768  ;;  %v1999_v46 = vld [vmem:[%s13746_s6 + $0x18] sm:$0xff]  ;;  %v13831_v41 = vunpack.i.l.bf16 %v11322_v35 }
 0x43b   :  { %9903 = vrot.lane.b32.xlu0 %v9902_v60, %s10449_s5  ;;  %v13826_v60 = vunpack.i.l.bf16 %v11410_v54  ;;  %v2150_v35 = vld [vmem:[%s13747_s7 + $0x18] sm:$0xff] }
 0x43d   :  { %v11606_v36 = vsel %vm1094_vm1, %v13826_v60, %v11595_v5  ;;  %v11623_v60 = vpop.permute.xlu2 %9738 }
 0x43e   :  { %13939 = vst [vmem:[#allocation61_spill] sm:$0xff] %v11623_v60  ;;  %v9741_v59 = vunpack.i.h.bf16 %v11623_v60 }
 0x442   :  { %9973 = vrot.lane.b32.xlu2 %v9972_v4, %s10449_s5  ;;  %2012 = vperm.xlu1 %9506, %v1998_v1   ;;  %v9927_v4 = vpack.i.bf16 %v11595_v5, %v11606_v36  ;;  %v11618_v1 = vpop.permute.xlu1 %9783  ;;  %v11628_v49 = vpop.permute.xlu0 %9778 }
 0x443   :  { %9908 = vrot.lane.b32.xlu0 %v9907_v16, %s10449_s5  ;;  %v1047_v16 = vsel %vm212_vm8, %v13831_v41, %v9591_v57 }
 0x444   :  { %v9942_v54 = vpack.i.bf16 %v9591_v57, %v1047_v16  ;;  %v11642_v57 = vunpack.i.h.bf16 %v11248_v55  ;;  %v13836_v16 = vunpack.i.l.bf16 %v11248_v55 }
 0x446   :  { %13940 = vst [vmem:[#allocation62_spill] sm:$0xff] %v11642_v57 }
 0x44a   :  { %2017 = vperm.xlu2 %9504, %v1999_v46   ;;  %v13834_v46 = vunpack.i.l.bf16 %v11623_v60  ;;  %v11636_v41 = vpop.permute.xlu1 %9793 }
 0x44b   :  { %9928 = vrot.lane.b32.xlu0 %v9927_v4, %s10449_s5 }
 0x44c   :  { %v1052_v4 = vsel %vm212_vm8, %v13834_v46, %v9741_v59 }
 0x44d   :  { %v9952_v17 = vpack.i.bf16 %v9741_v59, %v1052_v4  ;;  %v11659_v4 = vunpack.i.h.bf16 %v11200_v22 }
 0x44f   :  { %13942 = vst [vmem:[#allocation64_spill] sm:$0xff] %v11659_v4 }
 0x452   :  { %2002 = vperm.xlu2 %9504, %v1996_v58   ;;  %v11645_v58 = vpop.permute.xlu0 %9803  ;;  %v11654_v46 = vpop.permute.xlu1 %9808 }
 0x453   :  { %9943 = vrot.lane.b32.xlu0 %v9942_v54, %s10449_s5  ;;  %v11652_v54 = vsel %vm1094_vm1, %v13836_v16, %v11642_v57  ;;  %v11671_v16 = vpop.permute.xlu2 %9763 }
 0x454   :  { %13941 = vst [vmem:[#allocation63_spill] sm:$0xff] %v11652_v54  ;;  %v9967_v59 = vpack.i.bf16 %v11642_v57, %v11652_v54  ;;  %v9811_v54 = vunpack.i.h.bf16 %v11654_v46  ;;  %v9795_v57 = vunpack.i.l.bf16 %v11636_v41 }
 0x45a   :  { %2168 = vperm.xlu2 %9504, %v2150_v35   ;;  %v13842_v35 = vunpack.i.l.bf16 %v11200_v22  ;;  %v11663_v60 = vpop.permute.xlu0 %9813  ;;  %v11673_v55 = vpop.permute.xlu1 %9818 }
 0x45b   :  { %9953 = vrot.lane.b32.xlu0 %v9952_v17, %s10449_s5  ;;  %v11683_v22 = vpop.permute.xlu2 %9788 }
 0x45c   :  { %v11669_v17 = vsel %vm1094_vm1, %v13842_v35, %v11659_v4  ;;  %13944 = vst [vmem:[#allocation66_spill] sm:$0xff] %v11683_v22 }
 0x45d   :  { %13943 = vst [vmem:[#allocation65_spill] sm:$0xff] %v11669_v17  ;;  %v9982_v25 = vpack.i.bf16 %v11659_v4, %v11669_v17 }
 0x463   :  { %9968 = vrot.lane.b32.xlu0 %v9967_v59, %s10449_s5  ;;  %v1997_v59 = vld [vmem:[%s13746_s6 + $0x8] sm:$0xff]  ;;  %v11687_v11 = vpop.permute.xlu2 %9798  ;;  %s10468_s6 = smov 36  }
 0x464   :  { %v9829_v27 = vpop.permute.xlu1 %9828 }
 0x465   :  { %v9830_v14 = vunpack.i.l.bf16 %v9829_v27  ;;  %v9831_v31 = vunpack.i.h.bf16 %v9829_v27  ;;  %v9796_v27 = vunpack.i.h.bf16 %v11636_v41 }
 0x46b   :  { %9983 = vrot.lane.b32.xlu0 %v9982_v25, %s10449_s5  ;;  %v11695_v9 = vpop.permute.xlu2 %9823 }
 0x46c   :  { %v11678_v43 = vpop.permute.xlu0 %9833  ;;  %v9849_v20 = vpop.permute.xlu1 %9848  ;;  %13947 = vst [vmem:[#allocation69_spill] sm:$0xff] %v11695_v9 }
 0x46d   :  { %v9851_v42 = vunpack.i.h.bf16 %v9849_v20 }
 0x473   :  { %2007 = vperm.xlu0 %9505, %v1997_v59   ;;  %v11701_v62 = vpop.permute.xlu2 %9888  ;;  %v9850_v59 = vunpack.i.l.bf16 %v9849_v20 }
 0x474   :  { %v11685_v35 = vpop.permute.xlu0 %9838  ;;  %v11691_v4 = vpop.permute.xlu1 %9853  ;;  %13949 = vst [vmem:[#allocation71_spill] sm:$0xff] %v11701_v62 }
 0x475   :  { %13946 = vst [vmem:[#allocation68_spill] sm:$0xff] %v11691_v4  ;;  %v9810_v4 = vunpack.i.l.bf16 %v11654_v46  ;;  %v1301_v9 = vsel %vm1094_vm1, %v9850_v59, %v9851_v42  ;;  %v13953_v46 = vunpack.i.l.bf16 %v11372_v26  ;;  %v1298_v26 = vsel %vm1094_vm1, %v9795_v57, %v9796_v27 }
 0x476   :  { %v9751_v57 = vunpack.i.h.bf16 %v11580_v30 }
 0x477   :  { %v1470_v59 = vsel %vm1455_vm3, %v13953_v46, %v1301_v9  ;;  %v9766_v9 = vunpack.i.h.bf16 %v11671_v16  ;;  %v13955_v46 = vunpack.i.l.bf16 %v11268_v38  ;;  %v13956_v38 = vunpack.i.l.bf16 %v11264_v10 }
 0x478   :  { %v13958_v10 = vunpack.i.l.bf16 %v11250_v61  ;;  %v13960_v61 = vunpack.i.l.bf16 %v11220_v32 }
 0x47b   :  { %v11708_v62 = vpop.permute.xlu2 %9898 }
 0x47c   :  { %v11689_v15 = vpop.permute.xlu0 %9843  ;;  %v11699_v2 = vpop.permute.xlu1 %9868  ;;  %13950 = vst [vmem:[#allocation72_spill] sm:$0xff] %v11708_v62  ;;  %v9781_v62 = vunpack.i.h.bf16 %v11628_v49 }
 0x47d   :  { %13945 = vst [vmem:[#allocation67_spill] sm:$0xff] %v11689_v15 }
 0x47e   :  { %13948 = vst [vmem:[#allocation70_spill] sm:$0xff] %v11699_v2  ;;  %v13952_v2 = vunpack.i.l.bf16 %v11450_v12 }
 0x484   :  { %v11710_v20 = vpop.permute.xlu1 %9893 }
 0x485   :  { %v11693_v25 = vpop.permute.xlu0 %9858  ;;  %13951 = vst [vmem:[#allocation73_spill] sm:$0xff] %v11710_v20 }
 0x486   :  { %v9860_v20 = vunpack.i.l.bf16 %v11693_v25  ;;  %v9861_v12 = vunpack.i.h.bf16 %v11693_v25  ;;  %v9750_v25 = vunpack.i.l.bf16 %v11580_v30 }
 0x48d   :  { %v11697_v17 = vpop.permute.xlu0 %9863 }
 0x495   :  { %v9874_v24 = vpop.permute.xlu0 %9873 }
 0x496   :  { %v9875_v22 = vunpack.i.l.bf16 %v9874_v24  ;;  %v9876_v33 = vunpack.i.h.bf16 %v9874_v24 }
 0x498   :  { %1641 = vmatpush.msrb.mxu0 %v9876_v33  ;;  %v1302_v15 = vsel %vm1094_vm1, %v9875_v22, %v9876_v33  ;;  %v1300_v22 = vsel %vm1094_vm1, %v9830_v14, %v9831_v31  ;;  %v9780_v33 = vunpack.i.l.bf16 %v11628_v49  ;;  %v13954_v14 = vunpack.i.l.bf16 %v11358_v34 }
 0x499   :  { %v1471_v24 = vsel %vm1455_vm3, %v13952_v2, %v1302_v15  ;;  %v1299_v15 = vsel %vm1094_vm1, %v9810_v4, %v9811_v54  ;;  %v9835_v49 = vunpack.i.l.bf16 %v11678_v43  ;;  %v9836_v4 = vunpack.i.h.bf16 %v11678_v43 }
 0x49a   :  { %1525 = vmatpush.msrb.mxu2 %v1471_v24  ;;  %1642 = vmatpush.msrb.mxu0 %v9851_v42  ;;  %v9765_v42 = vunpack.i.l.bf16 %v11671_v16  ;;  %v1469_v41 = vsel %vm1455_vm3, %v13954_v14, %v1300_v22  ;;  %v1468_v34 = vsel %vm1455_vm3, %v13955_v46, %v1299_v15  ;;  %v1297_v22 = vsel %vm1094_vm1, %v9780_v33, %v9781_v62 }
 0x49b   :  { %v9815_v16 = vunpack.i.l.bf16 %v11663_v60  ;;  %v9816_v43 = vunpack.i.h.bf16 %v11663_v60  ;;  %v1467_v15 = vsel %vm1455_vm3, %v13956_v38, %v1298_v26  ;;  %v13957_v33 = vunpack.i.l.bf16 %v11483_v63 }
 0x49c   :  { %1526 = vmatpush.msrb.mxu2 %v1470_v59  ;;  %1643 = vmatpush.msrb.mxu0 %v9831_v31  ;;  %v9800_v14 = vunpack.i.l.bf16 %v11687_v11  ;;  %v9801_v60 = vunpack.i.h.bf16 %v11687_v11  ;;  %v1466_v63 = vsel %vm1455_vm3, %v13958_v10, %v1297_v22  ;;  %v13959_v26 = vunpack.i.l.bf16 %v11390_v40 }
 0x49d   :  { %v9879_v2 = vpop.permute.xlu0 %9878  ;;  %v1315_v11 = vsel %vm1094_vm1, %v9815_v16, %v9816_v43  ;;  %v9755_v22 = vunpack.i.l.bf16 %v11568_v6  ;;  %v9806_v10 = vunpack.i.h.bf16 %v11645_v58 }
 0x49e   :  { %v9880_v24 = vunpack.i.l.bf16 %v9879_v2  ;;  %1527 = vmatpush.msrb.mxu2 %v1469_v41  ;;  %1644 = vmatpush.msrb.mxu0 %v9811_v54  ;;  %v9881_v31 = vunpack.i.h.bf16 %v9879_v2  ;;  %v1317_v54 = vsel %vm1094_vm1, %v9860_v20, %v9861_v12  ;;  %v11743_v2 = vpop.permute.xlu2 %9913  ;;  %v1316_v20 = vsel %vm1094_vm1, %v9835_v49, %v9836_v4  ;;  %v11755_v41 = vpop.permute.xlu1 %9923 }
 0x49f   :  { %v9786_v49 = vunpack.i.h.bf16 %v11618_v1 }
 0x4a0   :  { %1528 = vmatpush.msrb.mxu2 %v1468_v34  ;;  %1645 = vmatpush.msrb.mxu0 %v9796_v27  ;;  %v1318_v59 = vsel %vm1094_vm1, %v9880_v24, %v9881_v31  ;;  %v1296_v27 = vsel %vm1094_vm1, %v9765_v42, %v9766_v9  ;;  %v1486_v24 = vsel %vm1455_vm3, %v13959_v26, %v1317_v54  ;;  %v9770_v34 = vunpack.i.l.bf16 %v11608_v7 }
 0x4a1   :  { %1670 = vmatpush.msrb.mxu1 %v9881_v31  ;;  %v1487_v30 = vsel %vm1455_vm3, %v13957_v33, %v1318_v59  ;;  %v9785_v31 = vunpack.i.l.bf16 %v11618_v1  ;;  %v1295_v42 = vsel %vm1094_vm1, %v9750_v25, %v9751_v57  ;;  %v1465_v40 = vsel %vm1455_vm3, %v13960_v61, %v1296_v27 }
 0x4a2   :  { %1529 = vmatpush.msrb.mxu2 %v1467_v15  ;;  %1554 = vmatpush.msra.mxu3 %v1487_v30  ;;  %v1314_v25 = vsel %vm1094_vm1, %v9800_v14, %v9801_v60  ;;  %v9771_v1 = vunpack.i.h.bf16 %v11608_v7  ;;  %v9756_v59 = vunpack.i.h.bf16 %v11568_v6  ;;  %v13964_v7 = vunpack.i.l.bf16 %v11284_v45 }
 0x4a3   :  { %1646 = vmatpush.msrb.mxu0 %v9781_v62  ;;  %1671 = vmatpush.msrb.mxu1 %v9861_v12  ;;  %v13961_v12 = vunpack.i.l.bf16 %v11374_v13  ;;  %v1313_v16 = vsel %vm1094_vm1, %v9785_v31, %v9786_v49  ;;  %v13965_v6 = vunpack.i.l.bf16 %v11266_v44  ;;  %v9865_v45 = vunpack.i.l.bf16 %v11697_v17  ;;  %v13973_v31 = vld [vmem:[#allocation52_spill] sm:$0xff] }
 0x4a4   :  { %1530 = vmatpush.msrb.mxu2 %v1466_v63  ;;  %1555 = vmatpush.msra.mxu3 %v1486_v24  ;;  %v13966_v44 = vunpack.i.l.bf16 %v11234_v52  ;;  %v9840_v15 = vunpack.i.l.bf16 %v11685_v35  ;;  %v9841_v30 = vunpack.i.h.bf16 %v11685_v35  ;;  %v9821_v35 = vunpack.i.h.bf16 %v11673_v55  ;;  %v13969_v63 = vld [vmem:[#allocation70_spill] sm:$0xff] }
 0x4a5   :  { %1647 = vmatpush.msrb.mxu0 %v9766_v9  ;;  %1672 = vmatpush.msrb.mxu1 %v9836_v4  ;;  %v11767_v62 = vpop.permute.xlu0 %9883  ;;  %v1485_v46 = vsel %vm1455_vm3, %v13961_v12, %v1316_v20  ;;  %v13962_v9 = vunpack.i.l.bf16 %v11198_v21  ;;  %v13963_v4 = vunpack.i.l.bf16 %v11288_v18  ;;  %v1463_v21 = vsel %vm1455_vm3, %v11158_v19, %v11513_v29  ;;  %v13970_v24 = vld [vmem:[#allocation62_spill] sm:$0xff] }
 0x4a6   :  { %1531 = vmatpush.msrb.mxu2 %v1465_v40  ;;  %1556 = vmatpush.msra.mxu3 %v1485_v46  ;;  %v1483_v18 = vsel %vm1455_vm3, %v13964_v7, %v1314_v25  ;;  %v11795_v54 = vpop.permute.xlu2 %9918  ;;  %v1482_v19 = vsel %vm1455_vm3, %v13965_v6, %v1313_v16  ;;  %v1311_v29 = vsel %vm1094_vm1, %v9755_v22, %v9756_v59  ;;  %v11807_v38 = vpop.permute.xlu1 %9938  ;;  %v9915_v20 = vunpack.i.l.bf16 %v11743_v2  ;;  %v13977_v40 = vld [vmem:[#allocation25_spill] sm:$0xff]  ;;  %v13978_v25 = vld [vmem:[#allocation67_spill] sm:$0xff]  ;;  %v13980_v22 = vld [vmem:[#allocation48_spill] sm:$0xff] }
 0x4a7   :  { %1648 = vmatpush.msrb.mxu0 %v9751_v57  ;;  %1673 = vmatpush.msrb.mxu1 %v9816_v43  ;;  %v1464_v32 = vsel %vm1455_vm3, %v13962_v9, %v1295_v42  ;;  %v1484_v13 = vsel %vm1455_vm3, %v13963_v4, %v1315_v11  ;;  %v1312_v57 = vsel %vm1094_vm1, %v9770_v34, %v9771_v1  ;;  %v9866_v43 = vunpack.i.h.bf16 %v11697_v17  ;;  %v13979_v4 = vld [vmem:[#allocation57_spill] sm:$0xff]  ;;  %v13982_v7 = vld [vmem:[#allocation60_spill] sm:$0xff] }
 0x4a8   :  { %1532 = vmatpush.msrb.mxu2 %v1464_v32  ;;  %1557 = vmatpush.msra.mxu3 %v1484_v13  ;;  %v9871_v26 = vunpack.i.h.bf16 %v13969_v63  ;;  %v13974_v42 = vunpack.i.l.bf16 %v13973_v31  ;;  %v9845_v9 = vunpack.i.l.bf16 %v13978_v25  ;;  %v13981_v16 = vunpack.i.l.bf16 %v13980_v22 }
 0x4a9   :  { %1649 = vmatpush.msrb.mxu0 %v11495_v39  ;;  %1674 = vmatpush.msrb.mxu1 %v9801_v60  ;;  %v1462_v39 = vsel %vm1455_vm3, %v11135_v37, %v11507_v23  ;;  %v1461_v37 = vsel %vm1455_vm3, %v11118_v50, %v11606_v36  ;;  %v1481_v23 = vsel %vm1455_vm3, %v13966_v44, %v1312_v57  ;;  %v13967_v50 = vunpack.i.l.bf16 %v11174_v28  ;;  %v13983_v57 = vld [vmem:[#allocation65_spill] sm:$0xff]  ;;  %v13986_v44 = vld [vmem:[#allocation64_spill] sm:$0xff] }
 0x4aa   :  { %1533 = vmatpush.msrb.mxu2 %v1463_v21  ;;  %1558 = vmatpush.msra.mxu3 %v1483_v18  ;;  %v9820_v36 = vunpack.i.l.bf16 %v11673_v55  ;;  %v1309_v27 = vsel %vm1094_vm1, %v9865_v45, %v9866_v43  ;;  %v13968_v28 = vunpack.i.l.bf16 %v11448_v51  ;;  %v9805_v60 = vunpack.i.l.bf16 %v11645_v58  ;;  %v13976_v58 = vld [vmem:[#allocation58_spill] sm:$0xff] }
 0x4ab   :  { %1650 = vmatpush.msrb.mxu0 %v11489_v56  ;;  %1675 = vmatpush.msrb.mxu1 %v9786_v49  ;;  %v1480_v52 = vsel %vm1455_vm3, %v13967_v50, %v1311_v29  ;;  %v1308_v55 = vsel %vm1094_vm1, %v9840_v15, %v9841_v30  ;;  %v1478_v11 = vsel %vm1455_vm3, %v13974_v42, %v1309_v27  ;;  %v13975_v49 = vld [vmem:[#allocation66_spill] sm:$0xff]  ;;  %v9775_v18 = vunpack.i.l.bf16 %v13982_v7  ;;  %v13985_v29 = vld [vmem:[#allocation69_spill] sm:$0xff] }
 0x4ac   :  { %1534 = vmatpush.msrb.mxu2 %v1462_v39  ;;  %1559 = vmatpush.msra.mxu3 %v1482_v19  ;;  %v9790_v61 = vunpack.i.l.bf16 %v13975_v49  ;;  %v1457_v12 = vsel %vm1455_vm3, %v13977_v40, %v13976_v58  ;;  %v1307_v46 = vsel %vm1094_vm1, %v9820_v36, %v9821_v35  ;;  %v9791_v34 = vunpack.i.h.bf16 %v13975_v49  ;;  %v13984_v39 = vld [vmem:[#allocation24_spill] sm:$0xff]  ;;  %v13997_v49 = vld [vmem:[#allocation37_spill] sm:$0xff] }
 0x4ad   :  { %1651 = vmatpush.msrb.mxu0 %v11595_v5  ;;  %1676 = vmatpush.msrb.mxu1 %v9771_v1  ;;  %v9904_v56 = vpop.permute.xlu0 %9903  ;;  %v1460_v5 = vsel %vm1455_vm3, %v11087_v0, %v11476_v48  ;;  %v1459_v0 = vsel %vm1455_vm3, %v11066_v47, %v11557_v53  ;;  %v13971_v47 = vld [vmem:[#allocation63_spill] sm:$0xff]  ;;  %v13972_v53 = vld [vmem:[#allocation26_spill] sm:$0xff]  ;;  %v9846_v1 = vunpack.i.h.bf16 %v13978_v25  ;;  %v1456_v6 = vsel %vm1455_vm3, %v13984_v39, %v13983_v57 }
 0x4ae   :  { %v9905_v33 = vunpack.i.l.bf16 %v9904_v56  ;;  %1535 = vmatpush.msrb.mxu2 %v1461_v37  ;;  %1560 = vmatpush.msra.mxu3 %v1481_v23  ;;  %v9906_v17 = vunpack.i.h.bf16 %v9904_v56  ;;  %v1458_v51 = vsel %vm1455_vm3, %v13972_v53, %v13971_v47  ;;  %v11858_v32 = vpop.permute.xlu2 %9933  ;;  %v1306_v19 = vsel %vm1094_vm1, %v9805_v60, %v9806_v10  ;;  %v11877_v37 = vpop.permute.xlu1 %9958  ;;  %v13987_v23 = vld [vmem:[#allocation42_spill] sm:$0xff] }
 0x4af   :  { %1652 = vmatpush.msrb.mxu0 %v11461_v3  ;;  %1677 = vmatpush.msrb.mxu1 %v9756_v59  ;;  %v9916_v3 = vunpack.i.h.bf16 %v11743_v2  ;;  %v1477_v59 = vsel %vm1455_vm3, %v13981_v16, %v1308_v55  ;;  %v9776_v45 = vunpack.i.h.bf16 %v13982_v7  ;;  %v9825_v56 = vunpack.i.l.bf16 %v13985_v29  ;;  %v13995_v53 = vld [vmem:[#allocation50_spill] sm:$0xff]  ;;  %v14001_v16 = vld [vmem:[#allocation71_spill] sm:$0xff] }
 0x4b0   :  { %1536 = vmatpush.msrb.mxu2 %v1460_v5  ;;  %1561 = vmatpush.msra.mxu3 %v1480_v52  ;;  %v1310_v14 = vsel %vm1094_vm1, %v9905_v33, %v9906_v17  ;;  %v13988_v15 = vunpack.i.l.bf16 %v13987_v23  ;;  %v13989_v5 = vld [vmem:[#allocation59_spill] sm:$0xff]  ;;  %v1305_v27 = vsel %vm1094_vm1, %v9790_v61, %v9791_v34  ;;  %v9960_v47 = vunpack.i.l.bf16 %v11877_v37  ;;  %v788_v2 = vld [vmem:[#allocation5 + $0x38] sm:$0xff] }
 0x4b1   :  { %1653 = vmatpush.msrb.mxu0 %v11545_v8  ;;  %1678 = vmatpush.msrb.mxu1 %v9906_v17  ;;  %v1479_v48 = vsel %vm1455_vm3, %v13968_v28, %v1310_v14  ;;  %v9870_v8 = vunpack.i.l.bf16 %v13969_v63  ;;  %v1334_v21 = vsel %vm1094_vm1, %v9915_v20, %v9916_v3  ;;  %v9760_v50 = vunpack.i.l.bf16 %v13989_v5  ;;  %v13990_v52 = vld [vmem:[#allocation55_spill] sm:$0xff]  ;;  %v13992_v20 = vld [vmem:[#allocation68_spill] sm:$0xff] }
 0x4b2   :  { %1537 = vmatpush.msrb.mxu2 %v1459_v0  ;;  %1562 = vmatpush.msra.mxu3 %v1479_v48  ;;  %v1476_v33 = vsel %vm1455_vm3, %v13988_v15, %v1307_v46  ;;  %v13991_v36 = vunpack.i.l.bf16 %v13990_v52  ;;  %v9856_v0 = vunpack.i.h.bf16 %v13992_v20  ;;  %v9855_v28 = vunpack.i.l.bf16 %v13992_v20  ;;  %v13993_v48 = vld [vmem:[#allocation36_spill] sm:$0xff]  ;;  %v14007_v52 = vld [vmem:[#allocation30_spill] sm:$0xff] }
 0x4b3   :  { %1654 = vmatpush.msrb.mxu0 %v13970_v24  ;;  %1679 = vmatpush.msrb.mxu1 %v9866_v43  ;;  %v9826_v43 = vunpack.i.h.bf16 %v13985_v29  ;;  %v1333_v17 = vsel %vm1094_vm1, %v9870_v8, %v9871_v26  ;;  %v13994_v60 = vunpack.i.l.bf16 %v13993_v48  ;;  %v1332_v8 = vsel %vm1094_vm1, %v9845_v9, %v9846_v1  ;;  %v13999_v9 = vld [vmem:[#allocation49_spill] sm:$0xff]  ;;  %v782_v15 = vld [vmem:[#allocation5 + $0x8] sm:$0xff] }
 0x4b4   :  { %1538 = vmatpush.msrb.mxu2 %v1458_v51  ;;  %1563 = vmatpush.msra.mxu3 %v1478_v11  ;;  %v1503_v14 = vsel %vm1455_vm3, %v13991_v36, %v1334_v21  ;;  %v9961_v24 = vunpack.i.h.bf16 %v11877_v37  ;;  %v13996_v51 = vunpack.i.l.bf16 %v13995_v53  ;;  %v9886_v42 = vunpack.i.h.bf16 %v11767_v62  ;;  %v14011_v53 = vld [vmem:[#allocation56_spill] sm:$0xff] }
 0x4b5   :  { %1655 = vmatpush.msrb.mxu0 %v13979_v4  ;;  %1680 = vmatpush.msrb.mxu1 %v9841_v30  ;;  %v11861_v13 = vpop.permute.xlu0 %9908  ;;  %v781_v30 = vld [vmem:[#allocation5] sm:$0xff]  ;;  %v1475_v55 = vsel %vm1455_vm3, %v13994_v60, %v1306_v19  ;;  %v9885_v11 = vunpack.i.l.bf16 %v11767_v62  ;;  %v13998_v61 = vunpack.i.l.bf16 %v13997_v49  ;;  %v1331_v40 = vsel %vm1094_vm1, %v9825_v56, %v9826_v43  ;;  %v795_v62 = vld [vmem:[#allocation5 + $0x70] sm:$0xff] }
 0x4b6   :  { %1539 = vmatpush.msrb.mxu2 %v1457_v12  ;;  %1564 = vmatpush.msra.mxu3 %v1477_v59  ;;  %v1502_v31 = vsel %vm1455_vm3, %v13996_v51, %v1333_v17  ;;  %v9921_v12 = vunpack.i.h.bf16 %v11795_v54  ;;  %v9920_v46 = vunpack.i.l.bf16 %v11795_v54  ;;  %v14000_v4 = vunpack.i.l.bf16 %v13999_v9  ;;  %v14006_v17 = vld [vmem:[#allocation73_spill] sm:$0xff]  ;;  %v14015_v9 = vld [vmem:[#allocation54_spill] sm:$0xff] }
 0x4b7   :  { %1656 = vmatpush.msrb.mxu0 %v13986_v44  ;;  %1681 = vmatpush.msrb.mxu1 %v9821_v35  ;;  %v9761_v35 = vunpack.i.h.bf16 %v13989_v5  ;;  %v1474_v58 = vsel %vm1455_vm3, %v13998_v61, %v1305_v27  ;;  %v9891_v59 = vunpack.i.h.bf16 %v14001_v16  ;;  %v9890_v21 = vunpack.i.l.bf16 %v14001_v16  ;;  %v14004_v44 = vld [vmem:[#allocation45_spill] sm:$0xff]  ;;  %v14013_v61 = vld [vmem:[#allocation39_spill] sm:$0xff] }
 0x4b8   :  { %1540 = vmatpush.msrb.mxu2 %v1456_v6  ;;  %1565 = vmatpush.msra.mxu3 %v1476_v33  ;;  %v1501_v22 = vsel %vm1455_vm3, %v14000_v4, %v1332_v8  ;;  %v1330_v6 = vsel %vm1094_vm1, %v9855_v28, %v9856_v0  ;;  %v14005_v23 = vunpack.i.l.bf16 %v14004_v44  ;;  %v1342_v33 = vsel %vm1094_vm1, %v9960_v47, %v9961_v24  ;;  %v785_v28 = vld [vmem:[#allocation5 + $0x20] sm:$0xff]  ;;  %v791_v54 = vld [vmem:[#allocation5 + $0x50] sm:$0xff] }
 0x4b9   :  { %1682 = vmatpush.msrb.mxu1 %v9806_v10  ;;  %v1304_v10 = vsel %vm1094_vm1, %v9775_v18, %v9776_v45  ;;  %1541 = vmatmul.f32.vlgmr.msrb.gmra.mxu2 %v781_v30  ;;  %v14002_v18 = vld [vmem:[#allocation31_spill] sm:$0xff]  ;;  %v9895_v5 = vunpack.i.l.bf16 %v14006_v17  ;;  %v14008_v36 = vunpack.i.l.bf16 %v14007_v52  ;;  %v1329_v27 = vsel %vm1094_vm1, %v9885_v11, %v9886_v42 }
 0x4ba   :  { %1583 = vmatpush.msra.mxu2 %v1503_v14  ;;  %1566 = vmatpush.msra.mxu3 %v1475_v55  ;;  %v14003_v57 = vunpack.i.l.bf16 %v14002_v18  ;;  %v9941_v48 = vunpack.i.h.bf16 %v11807_v38  ;;  %v9940_v60 = vunpack.i.l.bf16 %v11807_v38  ;;  %v14009_v55 = vld [vmem:[#allocation38_spill] sm:$0xff]  ;;  %v14012_v51 = vunpack.i.l.bf16 %v14011_v53 }
 0x4bb   :  { %1683 = vmatpush.msrb.mxu1 %v9791_v34  ;;  %v1303_v34 = vsel %vm1094_vm1, %v9760_v50, %v9761_v35  ;;  %1657 = vmatmul.f32.vlgmr.msrb.gmra.mxu0 %v781_v30  ;;  %v9896_v30 = vunpack.i.h.bf16 %v14006_v17  ;;  %v11940_v50 = vpop.permute.xlu2 %9948  ;;  %v14010_v8 = vunpack.i.l.bf16 %v14009_v55  ;;  %v14016_v4 = vunpack.i.l.bf16 %v14015_v9  ;;  %v14025_v55 = vld [vmem:[#allocation40_spill] sm:$0xff]  ;;  %v792_v38 = vld [vmem:[#allocation5 + $0x58] sm:$0xff] }
 0x4bc   :  { %1584 = vmatpush.msra.mxu2 %v1502_v31  ;;  %1567 = vmatpush.msra.mxu3 %v1474_v58  ;;  %v1473_v39 = vsel %vm1455_vm3, %v14003_v57, %v1304_v10  ;;  %v1472_v14 = vsel %vm1455_vm3, %v14008_v36, %v1303_v34  ;;  %v1511_v31 = vsel %vm1455_vm3, %v14012_v51, %v1342_v33  ;;  %v9951_v11 = vunpack.i.h.bf16 %v11940_v50  ;;  %v11993_v36 = vpop.permute.xlu1 %9963 }
 0x4bd   :  { %1684 = vmatpush.msrb.mxu1 %v9776_v45  ;;  %v11922_v7 = vpop.permute.xlu0 %9928  ;;  %v1500_v45 = vsel %vm1455_vm3, %v14005_v23, %v1331_v40  ;;  %v1499_v47 = vsel %vm1455_vm3, %v14010_v8, %v1330_v6  ;;  %v1328_v10 = vsel %vm1094_vm1, %v9890_v21, %v9891_v59  ;;  %v9950_v49 = vunpack.i.l.bf16 %v11940_v50  ;;  %v14017_v21 = vld [vmem:[#allocation32_spill] sm:$0xff] }
 0x4be   :  { %1585 = vmatpush.msra.mxu2 %v1501_v22  ;;  %v9931_v19 = vunpack.i.h.bf16 %v11922_v7  ;;  %v9930_v56 = vunpack.i.l.bf16 %v11922_v7  ;;  %1568 = vmatpush.msra.mxu3 %v1473_v39  ;;  %v14014_v58 = vunpack.i.l.bf16 %v14013_v61  ;;  %v1327_v34 = vsel %vm1094_vm1, %v9895_v5, %v9896_v30  ;;  %v786_v5 = vld [vmem:[#allocation5 + $0x28] sm:$0xff] }
 0x4bf   :  { %1685 = vmatpush.msrb.mxu1 %v9761_v35  ;;  %v1341_v35 = vsel %vm1094_vm1, %v9920_v46, %v9921_v12  ;;  %v14018_v18 = vunpack.i.l.bf16 %v14017_v21  ;;  %v1339_v39 = vsel %vm1094_vm1, %v9940_v60, %v9941_v48  ;;  %v1338_v52 = vsel %vm1094_vm1, %v9950_v49, %v9951_v11  ;;  %v789_v60 = vld [vmem:[#allocation5 + $0x40] sm:$0xff] }
 0x4c0   :  { %1586 = vmatpush.msra.mxu2 %v1500_v45  ;;  %1569 = vmatpush.msra.mxu3 %v1472_v14  ;;  %v1498_v40 = vsel %vm1455_vm3, %v14014_v58, %v1329_v27  ;;  %v1340_v46 = vsel %vm1094_vm1, %v9930_v56, %v9931_v19  ;;  %v1510_v22 = vsel %vm1455_vm3, %v14016_v4, %v1341_v35  ;;  %v14019_v56 = vld [vmem:[#allocation51_spill] sm:$0xff]  ;;  %v14023_v14 = vld [vmem:[#allocation44_spill] sm:$0xff]  ;;  %v14026_v8 = vunpack.i.l.bf16 %v14025_v55 }
 0x4c1   :  { %1686 = vmatmul.f32.vlgmr.msrb.gmra.mxu1 %v782_v15  ;;  %1570 = vmatmul.f32.vlgmr.msra.gmra.mxu3 %v782_v15  ;;  %v1497_v57 = vsel %vm1455_vm3, %v14018_v18, %v1328_v10  ;;  %v14020_v44 = vunpack.i.l.bf16 %v14019_v56  ;;  %v14021_v45 = vld [vmem:[#allocation27_spill] sm:$0xff]  ;;  %v14024_v27 = vunpack.i.l.bf16 %v14023_v14  ;;  %v14027_v35 = vld [vmem:[#allocation72_spill] sm:$0xff]  ;;  %v9911_v10 = vunpack.i.h.bf16 %v11861_v13 }
 0x4c2   :  { %1587 = vmatpush.msra.mxu2 %v1499_v47  ;;  %1620 = vmatpush.msrb.mxu3 %v1511_v31  ;;  %v14022_v15 = vunpack.i.l.bf16 %v14021_v45  ;;  %v1507_v47 = vsel %vm1455_vm3, %v14026_v8, %v1338_v52  ;;  %v9901_v53 = vunpack.i.h.bf16 %v14027_v35  ;;  %v9900_v51 = vunpack.i.l.bf16 %v14027_v35  ;;  %v14030_v45 = vld [vmem:[#allocation53_spill] sm:$0xff]  ;;  %v14032_v8 = vld [vmem:[#allocation46_spill] sm:$0xff] }
 0x4c3   :  { %1544 = vmatmul.f32.gmra.mxu2 %v785_v28  ;;  %1660 = vmatmul.f32.gmra.mxu0 %v785_v28  ;;  %v1509_v23 = vsel %vm1455_vm3, %v14020_v44, %v1340_v46  ;;  %v1508_v28 = vsel %vm1455_vm3, %v14024_v27, %v1339_v39  ;;  %v9910_v49 = vunpack.i.l.bf16 %v11861_v13  ;;  %v9926_v46 = vunpack.i.h.bf16 %v11755_v41  ;;  %v14028_v39 = vld [vmem:[#allocation61_spill] sm:$0xff]  ;;  %v12033_v52 = vpop.permute.xlu2 %9973 }
 0x4c4   :  { %1588 = vmatpush.msra.mxu2 %v1498_v40  ;;  %1621 = vmatpush.msrb.mxu3 %v1510_v22  ;;  %v1496_v33 = vsel %vm1455_vm3, %v14022_v15, %v1327_v34  ;;  %v790_v40 = vld [vmem:[#allocation5 + $0x48] sm:$0xff]  ;;  %v9925_v9 = vunpack.i.l.bf16 %v11755_v41  ;;  %v1325_v22 = vsel %vm1094_vm1, %v9900_v51, %v9901_v53  ;;  %v793_v34 = vld [vmem:[#allocation5 + $0x60] sm:$0xff]  ;;  %v9936_v21 = vunpack.i.h.bf16 %v11858_v32 }
 0x4c5   :  { %v11982_v6 = vpop.permute.xlu0 %9943  ;;  %v9935_v18 = vunpack.i.l.bf16 %v11858_v32  ;;  %v14029_v56 = vunpack.i.l.bf16 %v14028_v39  ;;  %v14031_v15 = vunpack.i.l.bf16 %v14030_v45  ;;  %v9976_v39 = vunpack.i.h.bf16 %v12033_v52 }
 0x4c6   :  { %1589 = vmatpush.msra.mxu2 %v1497_v57  ;;  %1622 = vmatpush.msrb.mxu3 %v1509_v23  ;;  %v12019_v57 = vpop.permute.xlu1 %9978  ;;  %v1324_v23 = vsel %vm1094_vm1, %v9910_v49, %v9911_v10  ;;  %v1757_v41 = vlaneseq }
 0x4c7   :  { %v9981_v14 = vunpack.i.h.bf16 %v12019_v57  ;;  %v9980_v27 = vunpack.i.l.bf16 %v12019_v57  ;;  %v1322_v49 = vsel %vm1094_vm1, %v9935_v18, %v9936_v21 }
 0x4c8   :  { %1590 = vmatpush.msra.mxu2 %v1496_v33  ;;  %1623 = vmatpush.msrb.mxu3 %v1508_v28  ;;  %v1494_v33 = vsel %vm1455_vm3, %v14031_v15, %v1325_v22  ;;  %v9946_v28 = vunpack.i.h.bf16 %v11982_v6  ;;  %v794_v22 = vld [vmem:[#allocation5 + $0x68] sm:$0xff]  ;;  %v12139_v63 = vand.u32 127, %v1757_v41 }
 0x4c9   :  { %1689 = vmatmul.f32.gmra.mxu1 %v786_v5  ;;  %1573 = vmatmul.f32.gmra.mxu3 %v786_v5  ;;  %v1323_v5 = vsel %vm1094_vm1, %v9925_v9, %v9926_v46  ;;  %v1336_v15 = vsel %vm1094_vm1, %v9980_v27, %v9981_v14 }
 0x4ca   :  { %1624 = vmatpush.msrb.mxu3 %v1507_v47  ;;  %v14033_v47 = vunpack.i.l.bf16 %v14032_v8  ;;  %v12144_v25 = vmul.u32 2, %v12139_v63  ;;  %vm1831_vm7 = vcmp.lt.s32.totalorder %v12139_v63, 45  ;;  %vm1879_vm8 = vcmp.ge.s32.totalorder %v12139_v63, 45 }
 0x4cb   :  { %1547 = vmatmul.f32.gmra.mxu2 %v789_v60  ;;  %1663 = vmatmul.f32.gmra.mxu0 %v789_v60  ;;  %v9945_v60 = vunpack.i.l.bf16 %v11982_v6  ;;  %vm1903_vm6 = vcmp.lt.s32.totalorder %v12139_v63, 90 }
 0x4cc   :  { %v1493_v51 = vsel %vm1455_vm3, %v14033_v47, %v1324_v23  ;;  %v9975_v23 = vunpack.i.l.bf16 %v12033_v52  ;;  %v12149_v32 = vadd.s32 4294967295, %v12144_v25 }
 0x4cd   :  { %v12003_v31 = vpop.permute.xlu0 %9953  ;;  %v1321_v18 = vsel %vm1094_vm1, %v9945_v60, %v9946_v28 }
 0x4ce   :  { %v9956_v61 = vunpack.i.h.bf16 %v12003_v31  ;;  %v9955_v58 = vunpack.i.l.bf16 %v12003_v31 }
 0x4d0   :  { %v1326_v4 = vsel %vm1094_vm1, %v9955_v58, %v9956_v61  ;;  %v9966_v58 = vunpack.i.h.bf16 %v11993_v36 }
 0x4d1   :  { %1692 = vmatmul.f32.gmra.mxu1 %v790_v40  ;;  %1576 = vmatmul.f32.gmra.mxu3 %v790_v40  ;;  %v1495_v44 = vsel %vm1455_vm3, %v14029_v56, %v1326_v4  ;;  %v9965_v40 = vunpack.i.l.bf16 %v11993_v36 }
 0x4d2   :  { %1591 = vmatpush.msra.mxu2 %v1495_v44 }
 0x4d3   :  { %1550 = vmatmul.f32.gmra.mxu2 %v793_v34  ;;  %1666 = vmatmul.f32.gmra.mxu0 %v793_v34  ;;  %v14034_v34 = vld [vmem:[#allocation47_spill] sm:$0xff]  ;;  %v1320_v60 = vsel %vm1094_vm1, %v9965_v40, %v9966_v58 }
 0x4d4   :  { %1592 = vmatpush.msra.mxu2 %v1494_v33  ;;  %v14035_v56 = vunpack.i.l.bf16 %v14034_v34  ;;  %v14036_v33 = vld [vmem:[#allocation43_spill] sm:$0xff] }
 0x4d5   :  { %v9969_v55 = vpop.permute.xlu0 %9968 }
 0x4d6   :  { %v9971_v9 = vunpack.i.h.bf16 %v9969_v55  ;;  %v9970_v4 = vunpack.i.l.bf16 %v9969_v55  ;;  %1593 = vmatpush.msra.mxu2 %v1493_v51  ;;  %v1492_v44 = vsel %vm1455_vm3, %v14035_v56, %v1323_v5  ;;  %v14037_v55 = vunpack.i.l.bf16 %v14036_v33  ;;  %v14038_v5 = vld [vmem:[#allocation35_spill] sm:$0xff]  ;;  %v14042_v56 = vld [vmem:[#allocation33_spill] sm:$0xff]  ;;  %v14044_v33 = vld [vmem:[#allocation34_spill] sm:$0xff] }
 0x4d7   :  { %v14039_v47 = vunpack.i.l.bf16 %v14038_v5 }
 0x4d8   :  { %1594 = vmatpush.msra.mxu2 %v1492_v44  ;;  %v1337_v45 = vsel %vm1094_vm1, %v9970_v4, %v9971_v9  ;;  %v1491_v8 = vsel %vm1455_vm3, %v14037_v55, %v1322_v49  ;;  %v14040_v4 = vld [vmem:[#allocation41_spill] sm:$0xff]  ;;  %v1319_v49 = vsel %vm1094_vm1, %v9975_v23, %v9976_v39  ;;  %v14045_v55 = vunpack.i.l.bf16 %v14044_v33 }
 0x4d9   :  { %1695 = vmatmul.f32.gmra.mxu1 %v794_v22  ;;  %1579 = vmatmul.f32.gmra.mxu3 %v794_v22  ;;  %v1506_v51 = vsel %vm1455_vm3, %v14039_v47, %v1337_v45  ;;  %v14041_v34 = vunpack.i.l.bf16 %v14040_v4  ;;  %v14043_v22 = vunpack.i.l.bf16 %v14042_v56  ;;  %v783_v47 = vld [vmem:[#allocation5 + $0x10] sm:$0xff] }
 0x4da   :  { %1595 = vmatpush.msra.mxu2 %v1491_v8  ;;  %1625 = vmatpush.msrb.mxu3 %v1506_v51  ;;  %v1489_v8 = vsel %vm1455_vm3, %v14045_v55, %v1320_v60  ;;  %v14048_v23 = vld [vmem:[#allocation29_spill] sm:$0xff] }
 0x4db   :  { %v1490_v27 = vsel %vm1455_vm3, %v14041_v34, %v1321_v18  ;;  %v1505_v44 = vsel %vm1455_vm3, %v14043_v22, %v1336_v15  ;;  %v14046_v18 = vld [vmem:[#allocation28_spill] sm:$0xff]  ;;  %v784_v34 = vld [vmem:[#allocation5 + $0x18] sm:$0xff] }
 0x4dc   :  { %1596 = vmatpush.msra.mxu2 %v1490_v27  ;;  %1626 = vmatpush.msrb.mxu3 %v1505_v44  ;;  %v14047_v51 = vunpack.i.l.bf16 %v14046_v18  ;;  %v14049_v27 = vunpack.i.l.bf16 %v14048_v23  ;;  %v787_v60 = vld [vmem:[#allocation5 + $0x30] sm:$0xff] }
 0x4dd   :  { %v9984_v45 = vpop.permute.xlu0 %9983 }
 0x4de   :  { %v9986_v40 = vunpack.i.h.bf16 %v9984_v45  ;;  %v9985_v5 = vunpack.i.l.bf16 %v9984_v45  ;;  %1597 = vmatpush.msra.mxu2 %v1489_v8  ;;  %v1488_v4 = vsel %vm1455_vm3, %v14047_v51, %v1319_v49  ;;  %v10451_v8 = vmov 0.0  }
 0x4e0   :  { %1598 = vmatpush.msra.mxu2 %v1488_v4  ;;  %v1335_v15 = vsel %vm1094_vm1, %v9985_v5, %v9986_v40 }
 0x4e1   :  { %1599 = vmatmul.f32.vlgmr.msra.gmra.mxu2 %v783_v47  ;;  %v1504_v56 = vsel %vm1455_vm3, %v14049_v27, %v1335_v15 }
 0x4e2   :  { %1699 = vmatpush.msrb.mxu2 %v9916_v3  ;;  %1627 = vmatpush.msrb.mxu3 %v1504_v56  ;;  %v796_v3 = vld [vmem:[#allocation5 + $0x78] sm:$0xff] }
 0x4e3   :  { %7232 = vmatmul.msk.f32.vlgmr.msrb.gmra.mxu3 %vm1512_vm4, %v784_v34 }
 0x4e4   :  { %1700 = vmatpush.msrb.mxu2 %v9871_v26  ;;  %1736 = vmatpush.msra.mxu3 %v9961_v24  ;;  %v12141_v26 = vshrl.u32 %v1757_v41, 7 }
 0x4e6   :  { %1701 = vmatpush.msrb.mxu2 %v9846_v1  ;;  %1737 = vmatpush.msra.mxu3 %v9921_v12  ;;  %v1773_v1 = vadd.s32 120, %v12141_v26  ;;  %v1772_v13 = vadd.s32 112, %v12141_v26  ;;  %v1771_v29 = vadd.s32 104, %v12141_v26  ;;  %v1770_v37 = vadd.s32 96, %v12141_v26 }
 0x4e7   :  { %v1769_v20 = vadd.s32 88, %v12141_v26  ;;  %v1767_v24 = vadd.s32 72, %v12141_v26  ;;  %v1766_v12 = vadd.s32 64, %v12141_v26  ;;  %v1765_v16 = vadd.s32 56, %v12141_v26 }
 0x4e8   :  { %1702 = vmatpush.msrb.mxu2 %v9826_v43  ;;  %1738 = vmatpush.msra.mxu3 %v9931_v19  ;;  %vm1799_vm2 = vcmp.eq.s32.totalorder %v1773_v1, %v12144_v25  ;;  %vm1871_vm5 = vcmp.eq.s32.totalorder %v1773_v1, %v12149_v32  ;;  %vm1798_vm13 = vcmp.eq.s32.totalorder %v1772_v13, %v12144_v25  ;;  %v10450_v43 = vmov 1.0  }
 0x4e9   :  { %1602 = vmatmul.f32.gmra.mxu2 %v787_v60  ;;  %vm1847_vm9 = vmand %vm1799_vm2, %vm1831_vm7  ;;  %vm1870_vm14 = vcmp.eq.s32.totalorder %v1772_v13, %v12149_v32  ;;  %vm1797_vm3 = vcmp.eq.s32.totalorder %v1771_v29, %v12144_v25  ;;  %vm1869_vm2 = vcmp.eq.s32.totalorder %v1771_v29, %v12149_v32  ;;  %v1764_v19 = vadd.s32 48, %v12141_v26 }
 0x4ea   :  { %1703 = vmatpush.msrb.mxu2 %v9856_v0  ;;  %1739 = vmatpush.msra.mxu3 %v9941_v48  ;;  %vm1895_vm10 = vmand %vm1871_vm5, %vm1879_vm8  ;;  %v1768_v0 = vadd.s32 80, %v12141_v26  ;;  %v1763_v17 = vadd.s32 40, %v12141_v26  ;;  %v1762_v50 = vadd.s32 32, %v12141_v26  ;;  %v1760_v36 = vadd.s32 16, %v12141_v26 }
 0x4eb   :  { %7233 = vmatmul.msk.f32.gmra.mxu3 %vm1512_vm4, %v788_v2  ;;  %vm1919_vm12 = vmand %vm1895_vm10, %vm1903_vm6  ;;  %v1780_v35 = vadd.s32 176, %v12141_v26  ;;  %v1759_v31 = vadd.s32 8, %v12141_v26  ;;  %v12327_v57 = vadd.s32 144, %v12141_v26 }
 0x4ec   :  { %1704 = vmatpush.msrb.mxu2 %v9886_v42  ;;  %1740 = vmatpush.msra.mxu3 %v9951_v11  ;;  %vm1942_vm15 = vmor %vm1847_vm9, %vm1919_vm12  ;;  %vm1796_vm12 = vcmp.eq.s32.totalorder %v1770_v37, %v12144_v25  ;;  %v1761_v11 = vadd.s32 24, %v12141_v26 }
 0x4ed   :  { %7263 = vmatpush.msk.msra.mxu0 %vm1942_vm15, %v10450_v43  ;;  %vm1846_vm0 = vmand %vm1798_vm13, %vm1831_vm7 }
 0x4ee   :  { %1705 = vmatpush.msrb.mxu2 %v9891_v59  ;;  %1741 = vmatpush.msra.mxu3 %v9971_v9  ;;  %vm1894_vm1 = vmand %vm1870_vm14, %vm1879_vm8  ;;  %vm1868_vm14 = vcmp.eq.s32.totalorder %v1770_v37, %v12149_v32 }
 0x4ef   :  { %vm1845_vm9 = vmand %vm1797_vm3, %vm1831_vm7  ;;  %vm1795_vm3 = vcmp.eq.s32.totalorder %v1769_v20, %v12144_v25 }
 0x4f0   :  { %1706 = vmatpush.msrb.mxu2 %v9896_v30  ;;  %1742 = vmatpush.msra.mxu3 %v9981_v14  ;;  %vm1893_vm10 = vmand %vm1869_vm2, %vm1879_vm8  ;;  %vm1867_vm2 = vcmp.eq.s32.totalorder %v1769_v20, %v12149_v32 }
 0x4f1   :  { %1605 = vmatmul.f32.gmra.mxu2 %v791_v54  ;;  %vm1917_vm13 = vmand %vm1893_vm10, %vm1903_vm6 }
 0x4f2   :  { %1707 = vmatpush.msrb.mxu2 %v9956_v61  ;;  %1743 = vmatpush.msra.mxu3 %v9986_v40  ;;  %vm1940_vm15 = vmor %vm1845_vm9, %vm1917_vm13  ;;  %v1778_v61 = vadd.s32 160, %v12141_v26 }
 0x4f3   :  { %7234 = vmatmul.msk.f32.gmra.mxu3 %vm1512_vm4, %v792_v38  ;;  %vm1843_vm9 = vmand %vm1795_vm3, %vm1831_vm7  ;;  %vm1793_vm3 = vcmp.eq.s32.totalorder %v1767_v24, %v12144_v25 }
 0x4f4   :  { %1708 = vmatpush.msrb.mxu2 %v9901_v53  ;;  %vm1891_vm10 = vmand %vm1867_vm2, %vm1879_vm8  ;;  %vm1865_vm2 = vcmp.eq.s32.totalorder %v1767_v24, %v12149_v32 }
 0x4f5   :  { %vm1915_vm13 = vmand %vm1891_vm10, %vm1903_vm6 }
 0x4f6   :  { %1709 = vmatpush.msrb.mxu2 %v9911_v10  ;;  %vm1889_vm10 = vmand %vm1865_vm2, %vm1879_vm8  ;;  %v1779_v10 = vadd.s32 168, %v12141_v26 }
 0x4f8   :  { %1710 = vmatpush.msrb.mxu2 %v9926_v46 }
 0x4f9   :  { %1608 = vmatmul.f32.gmra.mxu2 %v795_v62 }
 0x4fa   :  { %1711 = vmatpush.msrb.mxu2 %v9936_v21  ;;  %v12319_v21 = vadd.s32 152, %v12141_v26 }
 0x4fb   :  { %7235 = vmatmul.msk.f32.gmra.mxu3 %vm1512_vm4, %v796_v3 }
 0x4fc   :  { %1712 = vmatpush.msrb.mxu2 %v9946_v28  ;;  %v12345_v28 = vadd.s32 136, %v12141_v26 }
 0x4fe   :  { %1713 = vmatpush.msrb.mxu2 %v9966_v58 }
 0x500   :  { %1714 = vmatpush.msrb.mxu2 %v9976_v39  ;;  %v12358_v39 = vadd.s32 128, %v12141_v26 }
 0x501   :  { %1715 = vmatmul.f32.vlgmr.msrb.gmra.mxu2 %v783_v47 }
 0x503   :  { %7236 = vmatmul.msk.f32.vlgmr.msra.gmra.mxu3 %vm1512_vm4, %v784_v34 }
 0x509   :  { %1718 = vmatmul.f32.gmra.mxu2 %v787_v60 }
 0x50b   :  { %7237 = vmatmul.msk.f32.gmra.mxu3 %vm1512_vm4, %v788_v2 }
 0x511   :  { %1721 = vmatmul.f32.gmra.mxu2 %v791_v54 }
 0x513   :  { %7238 = vmatmul.msk.f32.gmra.mxu3 %vm1512_vm4, %v792_v38 }
 0x519   :  { %1724 = vmatmul.f32.gmra.mxu2 %v795_v62 }
 0x51b   :  { %7239 = vmatmul.msk.f32.gmra.mxu3 %vm1512_vm4, %v796_v3  ;;  %vm1918_vm4 = vmand %vm1894_vm1, %vm1903_vm6 }
 0x51c   :  { %vm1941_vm5 = vmor %vm1846_vm0, %vm1918_vm4 }
 0x51d   :  { %7264 = vmatpush.msk.msra.mxu0 %vm1941_vm5, %v10450_v43  ;;  %vm1844_vm0 = vmand %vm1796_vm12, %vm1831_vm7  ;;  %vm1794_vm12 = vcmp.eq.s32.totalorder %v1768_v0, %v12144_v25 }
 0x51e   :  { %vm1892_vm1 = vmand %vm1868_vm14, %vm1879_vm8  ;;  %vm1866_vm14 = vcmp.eq.s32.totalorder %v1768_v0, %v12149_v32 }
 0x51f   :  { %7265 = vmatpush.msk.msra.mxu0 %vm1940_vm15, %v10450_v43  ;;  %vm1916_vm4 = vmand %vm1892_vm1, %vm1903_vm6 }
 0x520   :  { %vm1939_vm5 = vmor %vm1844_vm0, %vm1916_vm4 }
 0x521   :  { %7266 = vmatpush.msk.msra.mxu0 %vm1939_vm5, %v10450_v43  ;;  %vm1938_vm15 = vmor %vm1843_vm9, %vm1915_vm13 }
 0x522   :  { %vm1842_vm0 = vmand %vm1794_vm12, %vm1831_vm7  ;;  %vm1792_vm12 = vcmp.eq.s32.totalorder %v1766_v12, %v12144_v25 }
 0x523   :  { %7267 = vmatpush.msk.msra.mxu0 %vm1938_vm15, %v10450_v43  ;;  %vm1890_vm1 = vmand %vm1866_vm14, %vm1879_vm8  ;;  %vm1864_vm14 = vcmp.eq.s32.totalorder %v1766_v12, %v12149_v32 }
 0x524   :  { %vm1914_vm4 = vmand %vm1890_vm1, %vm1903_vm6 }
 0x525   :  { %vm1937_vm5 = vmor %vm1842_vm0, %vm1914_vm4  ;;  %vm1784_vm4 = vcmp.eq.s32.totalorder %v12141_v26, %v12144_v25 }
 0x526   :  { %7268 = vmatpush.msk.msra.mxu0 %vm1937_vm5, %v10450_v43  ;;  %vm1841_vm9 = vmand %vm1793_vm3, %vm1831_vm7  ;;  %vm1791_vm3 = vcmp.eq.s32.totalorder %v1765_v16, %v12144_v25  ;;  %vm1863_vm5 = vcmp.eq.s32.totalorder %v1765_v16, %v12149_v32 }
 0x527   :  { %vm1913_vm13 = vmand %vm1889_vm10, %vm1903_vm6 }
 0x528   :  { %vm1936_vm15 = vmor %vm1841_vm9, %vm1913_vm13  ;;  %vm1790_vm13 = vcmp.eq.s32.totalorder %v1764_v19, %v12144_v25 }
 0x529   :  { %7269 = vmatpush.msk.msra.mxu0 %vm1936_vm15, %v10450_v43  ;;  %vm1840_vm0 = vmand %vm1792_vm12, %vm1831_vm7  ;;  %vm1862_vm15 = vcmp.eq.s32.totalorder %v1764_v19, %v12149_v32 }
 0x52a   :  { %vm1888_vm1 = vmand %vm1864_vm14, %vm1879_vm8 }
 0x52b   :  { %vm1912_vm2 = vmand %vm1888_vm1, %vm1903_vm6 }
 0x52c   :  { %vm1935_vm9 = vmor %vm1840_vm0, %vm1912_vm2  ;;  %vm1789_vm2 = vcmp.eq.s32.totalorder %v1763_v17, %v12144_v25 }
 0x52d   :  { %7270 = vmatpush.msk.msra.mxu0 %vm1935_vm9, %v10450_v43  ;;  %vm1839_vm10 = vmand %vm1791_vm3, %vm1831_vm7  ;;  %vm1861_vm9 = vcmp.eq.s32.totalorder %v1763_v17, %v12149_v32 }
 0x52e   :  { %vm1887_vm12 = vmand %vm1863_vm5, %vm1879_vm8 }
 0x52f   :  { %vm1911_vm14 = vmand %vm1887_vm12, %vm1903_vm6 }
 0x530   :  { %vm1934_vm0 = vmor %vm1839_vm10, %vm1911_vm14  ;;  %vm1788_vm14 = vcmp.eq.s32.totalorder %v1762_v50, %v12144_v25 }
 0x531   :  { %7271 = vmatpush.msk.msra.mxu0 %vm1934_vm0, %v10450_v43  ;;  %vm1838_vm1 = vmand %vm1790_vm13, %vm1831_vm7  ;;  %vm1860_vm0 = vcmp.eq.s32.totalorder %v1762_v50, %v12149_v32 }
 0x532   :  { %vm1886_vm3 = vmand %vm1862_vm15, %vm1879_vm8 }
 0x533   :  { %vm1910_vm5 = vmand %vm1886_vm3, %vm1903_vm6 }
 0x534   :  { %vm1933_vm10 = vmor %vm1838_vm1, %vm1910_vm5  ;;  %vm1787_vm5 = vcmp.eq.s32.totalorder %v1761_v11, %v12144_v25 }
 0x535   :  { %7272 = vmatpush.msk.msra.mxu0 %vm1933_vm10, %v10450_v43  ;;  %vm1837_vm12 = vmand %vm1789_vm2, %vm1831_vm7  ;;  %vm1859_vm10 = vcmp.eq.s32.totalorder %v1761_v11, %v12149_v32  ;;  %v2018_v11 = vpop.permute.xlu2 %2017 }
 0x536   :  { %vm1885_vm13 = vmand %vm1861_vm9, %vm1879_vm8 }
 0x537   :  { %vm1909_vm15 = vmand %vm1885_vm13, %vm1903_vm6  ;;  %vm1806_vm13 = vcmp.eq.s32.totalorder %v1780_v35, %v12144_v25 }
 0x538   :  { %vm1932_vm1 = vmor %vm1837_vm12, %vm1909_vm15  ;;  %vm1878_vm15 = vcmp.eq.s32.totalorder %v1780_v35, %v12149_v32  ;;  %v1658_v34 = vpop.f32.mrf.mxu0 }
 0x539   :  { %7273 = vmatpush.msk.msra.mxu0 %vm1932_vm1, %v10450_v43  ;;  %vm1836_vm3 = vmand %vm1788_vm14, %vm1831_vm7  ;;  %vm1786_vm1 = vcmp.eq.s32.totalorder %v1760_v36, %v12144_v25 }
 0x53a   :  { %vm1884_vm2 = vmand %vm1860_vm0, %vm1879_vm8 }
 0x53b   :  { %vm1908_vm9 = vmand %vm1884_vm2, %vm1903_vm6  ;;  %vm1858_vm2 = vcmp.eq.s32.totalorder %v1760_v36, %v12149_v32 }
 0x53c   :  { %v12205_v42 = vpop.f32.mrf.mxu2  ;;  %vm1931_vm12 = vmor %vm1836_vm3, %vm1908_vm9 }
 0x53d   :  { %7274 = vmatpush.msk.msra.mxu0 %vm1931_vm12, %v10450_v43  ;;  %vm1835_vm14 = vmand %vm1787_vm5, %vm1831_vm7  ;;  %v2003_v36 = vpop.permute.xlu2 %2002 }
 0x53e   :  { %vm1883_vm0 = vmand %vm1859_vm10, %vm1879_vm8  ;;  %v1687_v23 = vpop.f32.mrf.mxu1 }
 0x53f   :  { %vm1907_vm3 = vmand %vm1883_vm0, %vm1903_vm6  ;;  %vm1785_vm0 = vcmp.eq.s32.totalorder %v1759_v31, %v12144_v25  ;;  %v1688_v38 = vadd.f32 %v1687_v23, %v1658_v34  ;;  %v2149_v34 = vld [vmem:[%s13747_s7 + $0x10] sm:$0xff]  ;;  %v10452_v23 = vmov 90.0  }
 0x540   :  { %vm1930_vm9 = vmor %vm1835_vm14, %vm1907_vm3  ;;  %vm1804_vm14 = vcmp.eq.s32.totalorder %v1778_v61, %v12144_v25  ;;  %vm1876_vm3 = vcmp.eq.s32.totalorder %v1778_v61, %v12149_v32  ;;  %v1661_v62 = vpop.f32.mrf.mxu0  ;;  %10205 = vrcp.f32 %v10452_v23 }
 0x541   :  { %7275 = vmatpush.msk.msra.mxu0 %vm1930_vm9, %v10450_v43  ;;  %vm1834_vm5 = vmand %vm1786_vm1, %vm1831_vm7  ;;  %vm1857_vm9 = vcmp.eq.s32.totalorder %v1759_v31, %v12149_v32  ;;  %vm1801_vm1 = vcmp.eq.s32.totalorder %v12345_v28, %v12144_v25 }
 0x542   :  { %vm1882_vm10 = vmand %vm1858_vm2, %vm1879_vm8 }
 0x543   :  { %vm1906_vm11 = vmand %vm1882_vm10, %vm1903_vm6 }
 0x544   :  { %v12224_v59 = vpop.f32.mrf.mxu3  ;;  %vm1929_vm12 = vmor %vm1834_vm5, %vm1906_vm11 }
 0x545   :  { %7276 = vmatpush.msk.msra.mxu0 %vm1929_vm12, %v10450_v43  ;;  %vm12332_vm2 = vmand %vm1785_vm0, %vm1831_vm7  ;;  %v1572_v14 = vadd.f32 %v12224_v59, %v12205_v42  ;;  %vm1856_vm0 = vcmp.eq.s32.totalorder %v12141_v26, %v12149_v32 }
 0x546   :  { %v12229_v7 = vpop.f32.mrf.mxu2  ;;  %vm1881_vm11 = vmand %vm1857_vm9, %vm1879_vm8  ;;  %v1690_v3 = vpop.f32.mrf.mxu1 }
 0x547   :  { %vm1905_vm12 = vmand %vm1881_vm11, %vm1903_vm6  ;;  %v1691_v13 = vadd.f32 %v1690_v3, %v1661_v62  ;;  %v12487_v62 = vpop.permute.xlu2 %2168 }
 0x548   :  { %vm1928_vm9 = vmor %vm12332_vm2, %vm1905_vm12  ;;  %v1664_v29 = vpop.f32.mrf.mxu0 }
 0x549   :  { %7277 = vmatpush.msk.msra.mxu0 %vm1928_vm9, %v10450_v43  ;;  %vm1832_vm11 = vmand %vm1784_vm4, %vm1831_vm7 }
 0x54a   :  { %vm1880_vm2 = vmand %vm1856_vm0, %vm1879_vm8 }
 0x54b   :  { %vm1904_vm9 = vmand %vm1880_vm2, %vm1903_vm6  ;;  %vm2033_vm2 = vcmask 1041408  }
 0x54c   :  { %v12250_v30 = vpop.f32.mrf.mxu3  ;;  %vm1927_vm10 = vmor %vm1832_vm11, %vm1904_vm9 }
 0x54d   :  { %7278 = vmatpush.msk.msra.mxu0 %vm1927_vm10, %v10450_v43  ;;  %vm1854_vm4 = vmand %vm1806_vm13, %vm1831_vm7  ;;  %v1575_v49 = vadd.f32 %v12250_v30, %v12229_v7  ;;  %vm14052_vm13 = vcmp.eq.s32.totalorder %v1779_v10, %v12144_v25 }
 0x54e   :  { %v12262_v48 = vpop.f32.mrf.mxu2  ;;  %vm1902_vm0 = vmand %vm1878_vm15, %vm1879_vm8  ;;  %vm14053_vm15 = vcmp.eq.s32.totalorder %v1779_v10, %v12149_v32  ;;  %v1693_v20 = vpop.f32.mrf.mxu1 }
 0x54f   :  { %vm1926_vm11 = vmand %vm1902_vm0, %vm1903_vm6  ;;  %v1694_v63 = vadd.f32 %v1693_v20, %v1664_v29 }
 0x550   :  { %vm1949_vm10 = vmor %vm1854_vm4, %vm1926_vm11  ;;  %v1667_v16 = vpop.f32.mrf.mxu0 }
 0x551   :  { %v7262_v40 = vsel %vm1949_vm10, 1.0, %v10451_v8  ;;  %vm1853_vm9 = vmand %vm14052_vm13, %vm1831_vm7 }
 0x552   :  { %7279 = vmatpush.msk.msra.mxu1 %vm2033_vm2, %v7262_v40  ;;  %vm1901_vm5 = vmand %vm14053_vm15, %vm1879_vm8  ;;  %vm14056_vm15 = vcmp.eq.s32.totalorder %v12327_v57, %v12144_v25 }
 0x553   :  { %vm1925_vm0 = vmand %vm1901_vm5, %vm1903_vm6 }
 0x554   :  { %v12274_v6 = vpop.f32.mrf.mxu3  ;;  %vm1948_vm12 = vmor %vm1853_vm9, %vm1925_vm0 }
 0x555   :  { %7280 = vmatpush.msk.msra.mxu1 %vm1948_vm12, %v10450_v43  ;;  %vm1852_vm4 = vmand %vm1804_vm14, %vm1831_vm7  ;;  %v1578_v47 = vadd.f32 %v12274_v6, %v12262_v48  ;;  %vm14054_vm14 = vcmp.eq.s32.totalorder %v12319_v21, %v12144_v25 }
 0x556   :  { %v12292_v53 = vpop.f32.mrf.mxu2  ;;  %vm1900_vm11 = vmand %vm1876_vm3, %vm1879_vm8  ;;  %vm14055_vm3 = vcmp.eq.s32.totalorder %v12319_v21, %v12149_v32  ;;  %v1696_v7 = vpop.f32.mrf.mxu1 }
 0x557   :  { %vm1924_vm5 = vmand %vm1900_vm11, %vm1903_vm6  ;;  %v1697_v19 = vadd.f32 %v1696_v7, %v1667_v16  ;;  %v2008_v21 = vpop.permute.xlu0 %2007 }
 0x558   :  { %vm1947_vm12 = vmor %vm1852_vm4, %vm1924_vm5  ;;  %vm14057_vm4 = vcmp.eq.s32.totalorder %v12327_v57, %v12149_v32 }
 0x559   :  { %7281 = vmatpush.msk.msra.mxu1 %vm1947_vm12, %v10450_v43  ;;  %vm1851_vm2 = vmand %vm14054_vm14, %vm1831_vm7 }
 0x55a   :  { %vm1899_vm10 = vmand %vm14055_vm3, %vm1879_vm8 }
 0x55b   :  { %vm1923_vm13 = vmand %vm1899_vm10, %vm1903_vm6 }
 0x55c   :  { %v12308_v46 = vpop.f32.mrf.mxu3  ;;  %vm1946_vm9 = vmor %vm1851_vm2, %vm1923_vm13  ;;  %vm14058_vm2 = vcmp.eq.s32.totalorder %v12345_v28, %v12149_v32 }
 0x55d   :  { %7282 = vmatpush.msk.msra.mxu1 %vm1946_vm9, %v10450_v43  ;;  %vm1850_vm0 = vmand %vm14056_vm15, %vm1831_vm7  ;;  %v1581_v27 = vadd.f32 %v12308_v46, %v12292_v53  ;;  %vm14060_vm15 = vcmp.eq.s32.totalorder %v12358_v39, %v12149_v32 }
 0x55e   :  { %vm1898_vm11 = vmand %vm14057_vm4, %vm1879_vm8 }
 0x55f   :  { %vm1922_vm5 = vmand %vm1898_vm11, %vm1903_vm6 }
 0x560   :  { %vm1945_vm12 = vmor %vm1850_vm0, %vm1922_vm5  ;;  %vm2020_vm5 = vcmask 408576  }
 0x561   :  { %7283 = vmatpush.msk.msra.mxu1 %vm1945_vm12, %v10450_v43  ;;  %vm1849_vm14 = vmand %vm1801_vm1, %vm1831_vm7  ;;  %vm14059_vm1 = vcmp.eq.s32.totalorder %v12358_v39, %v12144_v25  ;;  %v2013_v39 = vpop.permute.xlu1 %2012 }
 0x562   :  { %vm1897_vm3 = vmand %vm14058_vm2, %vm1879_vm8 }
 0x563   :  { %vm1921_vm10 = vmand %vm1897_vm3, %vm1903_vm6 }
 0x564   :  { %v1600_v58 = vpop.f32.mrf.mxu2  ;;  %vm1944_vm13 = vmor %vm1849_vm14, %vm1921_vm10 }
 0x565   :  { %v1601_v9 = vadd.f32 %v1600_v58, %v1572_v14  ;;  %7284 = vmatpush.msk.msra.mxu1 %vm1944_vm13, %v10450_v43  ;;  %vm1848_vm9 = vmand %vm14059_vm1, %vm1831_vm7  ;;  %vm2099_vm7 = vcmask 736256  }
 0x566   :  { %v1629_v22 = vpop.f32.mrf.mxu3  ;;  %vm1896_vm0 = vmand %vm14060_vm15, %vm1879_vm8 }
 0x567   :  { %v1630_v44 = vadd.f32 %v1629_v22, %v1601_v9  ;;  %vm1920_vm4 = vmand %vm1896_vm0, %vm1903_vm6 }
 0x568   :  { %vm1943_vm11 = vmor %vm1848_vm9, %vm1920_vm4 }
 0x569   :  { %2053 = vmatmul.f32.vlgmr.msra.gmra.mxu0 %v1630_v44  ;;  %7285 = vmatpush.msk.msra.mxu1 %vm1943_vm11, %v10450_v43  ;;  %vm2351_vm11 = vcmask 334848  }
 0x56c   :  { %v1603_v45 = vpop.f32.mrf.mxu2 }
 0x56d   :  { %v1604_v33 = vadd.f32 %v1603_v45, %v1575_v49 }
 0x56e   :  { %v1632_v55 = vpop.f32.mrf.mxu3 }
 0x56f   :  { %v1633_v5 = vadd.f32 %v1632_v55, %v1604_v33 }
 0x571   :  { %2056 = vmatmul.f32.gmra.mxu0 %v1633_v5 }
 0x574   :  { %v1606_v18 = vpop.f32.mrf.mxu2 }
 0x575   :  { %v1607_v51 = vadd.f32 %v1606_v18, %v1578_v47 }
 0x576   :  { %v1635_v4 = vpop.f32.mrf.mxu3 }
 0x577   :  { %v1636_v15 = vadd.f32 %v1635_v4, %v1607_v51  ;;  %v2226_v51 = vld [vmem:[%s13748_s8 + $0x18] sm:$0xff]  ;;  %v2148_v4 = vld [vmem:[%s13747_s7 + $0x8] sm:$0xff] }
 0x579   :  { %2059 = vmatmul.f32.gmra.mxu0 %v1636_v15  ;;  %v2147_v15 = vld [vmem:[%s13747_s7] sm:$0xff]  ;;  %s10478_s7 = smov 14  }
 0x57c   :  { %v1609_v56 = vpop.f32.mrf.mxu2 }
 0x57d   :  { %v1610_v60 = vadd.f32 %v1609_v56, %v1581_v27  ;;  %v10206_v27 = vpop.eup %10205 }
 0x57e   :  { %v1638_v2 = vpop.f32.mrf.mxu3  ;;  %v2113_v56 = vmul.f32 90.0, %v10206_v27  ;;  %vm2117_vm8 = vweird.f32 %v10206_v27 }
 0x57f   :  { %v1639_v54 = vadd.f32 %v1638_v2, %v1610_v60 }
 0x580   :  { %v2114_v60 = vsub.f32 1.0, %v2113_v56 }
 0x581   :  { %2062 = vmatmul.f32.gmra.mxu0 %v1639_v54 }
 0x582   :  { %v2115_v2 = vmul.f32 %v10206_v27, %v2114_v60 }
 0x584   :  { %v1716_v41 = vpop.f32.mrf.mxu2  ;;  %v2116_v54 = vadd.f32 %v10206_v27, %v2115_v2 }
 0x585   :  { %v1717_v26 = vadd.f32 %v1716_v41, %v1688_v38 }
 0x586   :  { %v1745_v1 = vpop.f32.mrf.mxu3  ;;  %v2118_v38 = vsel %vm2117_vm8, %v10206_v27, %v2116_v54 }
 0x587   :  { %v1746_v25 = vadd.f32 %v1745_v1, %v1717_v26 }
 0x589   :  { %7286 = vmatmul.msk.f32.vlgmr.msra.gmra.mxu1 %vm2020_vm5, %v1746_v25 }
 0x58c   :  { %v1719_v37 = vpop.f32.mrf.mxu2 }
 0x58d   :  { %v1720_v0 = vadd.f32 %v1719_v37, %v1691_v13 }
 0x58e   :  { %v1748_v32 = vpop.f32.mrf.mxu3 }
 0x58f   :  { %v1749_v24 = vadd.f32 %v1748_v32, %v1720_v0 }
 0x591   :  { %7287 = vmatmul.msk.f32.gmra.mxu1 %vm2020_vm5, %v1749_v24 }
 0x594   :  { %v1722_v42 = vpop.f32.mrf.mxu2 }
 0x595   :  { %v1723_v12 = vadd.f32 %v1722_v42, %v1694_v63 }
 0x596   :  { %v1751_v59 = vpop.f32.mrf.mxu3 }
 0x597   :  { %v1752_v43 = vadd.f32 %v1751_v59, %v1723_v12 }
 0x599   :  { %7288 = vmatmul.msk.f32.gmra.mxu1 %vm2020_vm5, %v1752_v43 }
 0x59c   :  { %v1725_v17 = vpop.f32.mrf.mxu2 }
 0x59d   :  { %v1726_v30 = vadd.f32 %v1725_v17, %v1697_v19  ;;  %v2225_v17 = vld [vmem:[%s13748_s8 + $0x10] sm:$0xff] }
 0x59e   :  { %v1754_v50 = vpop.f32.mrf.mxu3 }
 0x59f   :  { %v1755_v48 = vadd.f32 %v1754_v50, %v1726_v30  ;;  %v2224_v30 = vld [vmem:[%s13748_s8 + $0x8] sm:$0xff]  ;;  %v2223_v50 = vld [vmem:[%s13748_s8] sm:$0xff]  ;;  %s10458_s8 = smov 93  }
 0x5a1   :  { %7289 = vmatmul.msk.f32.gmra.mxu1 %vm2020_vm5, %v1755_v48  ;;  %vm2404_vm5 = vcmask 261120  }
 0x5e6   :  { %v2054_v6 = vpop.f32.mrf.mxu0 }
 0x5e7   :  { %v2055_v35 = vadd.f32 %v2054_v6, %v2003_v36 }
 0x5ee   :  { %v2057_v53 = vpop.f32.mrf.mxu0 }
 0x5ef   :  { %v2058_v57 = vadd.f32 %v2057_v53, %v2008_v21 }
 0x5f6   :  { %v2060_v28 = vpop.f32.mrf.mxu0 }
 0x5f7   :  { %v2061_v22 = vadd.f32 %v2060_v28, %v2013_v39 }
 0x5fe   :  { %v2063_v33 = vpop.f32.mrf.mxu0 }
 0x5ff   :  { %v2064_v8 = vadd.f32 %v2063_v33, %v2018_v11 }
 0x606   :  { %v2083_v31 = vpop.f32.mrf.mxu1 }
 0x607   :  { %v2084_v10 = vadd.f32 %v2083_v31, %v2055_v35 }
 0x609   :  { %v2095_v61 = vmax.f32 %v2084_v10, 0.0 }
 0x60b   :  { %v2100_v46 = vsel %vm2099_vm7, %v2095_v61, 0.0 }
 0x60c   :  { %2101 = vadd.xlane.f32.xlu1 %v2100_v46 }
 0x60e   :  { %v2086_v52 = vpop.f32.mrf.mxu1 }
 0x60f   :  { %v2087_v14 = vadd.f32 %v2086_v52, %v2058_v57 }
 0x611   :  { %v2096_v58 = vmax.f32 %v2087_v14, 0.0 }
 0x613   :  { %v2103_v9 = vsel %vm2099_vm7, %v2096_v58, 0.0 }
 0x614   :  { %2104 = vadd.xlane.f32.xlu2 %v2103_v9 }
 0x616   :  { %v2089_v44 = vpop.f32.mrf.mxu1 }
 0x617   :  { %v2090_v49 = vadd.f32 %v2089_v44, %v2061_v22 }
 0x619   :  { %v2097_v45 = vmax.f32 %v2090_v49, 0.0 }
 0x61b   :  { %v2106_v55 = vsel %vm2099_vm7, %v2097_v45, 0.0 }
 0x61c   :  { %2107 = vadd.xlane.f32.xlu0 %v2106_v55 }
 0x61e   :  { %v2092_v40 = vpop.f32.mrf.mxu1 }
 0x61f   :  { %v2093_v5 = vadd.f32 %v2092_v40, %v2064_v8 }
 0x621   :  { %v2098_v47 = vmax.f32 %v2093_v5, 0.0 }
 0x623   :  { %v2109_v18 = vsel %vm2099_vm7, %v2098_v47, 0.0 }
 0x624   :  { %2110 = vadd.xlane.f32.xlu1 %v2109_v18 }
 0x62c   :  { %2244 = vperm.xlu2 %9504, %v2226_v51  }
 0x630   :  { %2158 = vperm.xlu0 %9505, %v2148_v4  }
 0x638   :  { %2153 = vperm.xlu0 %9505, %v2147_v15  }
 0x63d   :  { %2163 = vperm.xlu1 %9506, %v2149_v34  }
 0x67f   :  { %v2102_v3 = vpop.xlane.xlu1 %2101 }
 0x680   :  { %v2119_v41 = vmul.f32 %v2118_v38, %v2102_v3 }
 0x682   :  { %v12489_v26 = vsub.f32 %v2095_v61, %v2119_v41 }
 0x684   :  { %v2127_v1 = vmul.f32 %v12489_v26, %v12489_v26 }
 0x686   :  { %v2131_v25 = vsel %vm2099_vm7, %v2127_v1, 0.0 }
 0x687   :  { %v2105_v13 = vpop.xlane.xlu2 %2104  ;;  %2132 = vadd.xlane.f32.xlu0 %v2131_v25 }
 0x688   :  { %v2120_v29 = vmul.f32 %v2118_v38, %v2105_v13 }
 0x68a   :  { %v12494_v37 = vsub.f32 %v2096_v58, %v2120_v29 }
 0x68c   :  { %v2128_v20 = vmul.f32 %v12494_v37, %v12494_v37 }
 0x68e   :  { %v2134_v0 = vsel %vm2099_vm7, %v2128_v20, 0.0 }
 0x68f   :  { %v2108_v32 = vpop.xlane.xlu0 %2107  ;;  %2135 = vadd.xlane.f32.xlu1 %v2134_v0  ;;  %v12518_v31 = vpop.permute.xlu2 %2244 }
 0x690   :  { %v2121_v24 = vmul.f32 %v2118_v38, %v2108_v32 }
 0x692   :  { %v12499_v63 = vsub.f32 %v2097_v45, %v2121_v24 }
 0x694   :  { %v2129_v42 = vmul.f32 %v12499_v63, %v12499_v63 }
 0x696   :  { %v2137_v12 = vsel %vm2099_vm7, %v2129_v42, 0.0 }
 0x697   :  { %2138 = vadd.xlane.f32.xlu2 %v2137_v12  ;;  %v2111_v16 = vpop.xlane.xlu1 %2110 }
 0x698   :  { %v2122_v59 = vmul.f32 %v2118_v38, %v2111_v16 }
 0x69a   :  { %v12504_v7 = vsub.f32 %v2098_v47, %v2122_v59 }
 0x69c   :  { %v2130_v43 = vmul.f32 %v12504_v7, %v12504_v7 }
 0x69e   :  { %v2140_v19 = vsel %vm2099_vm7, %v2130_v43, 0.0  ;;  %vm13874_vm7 = vcmask 670720  }
 0x69f   :  { %2141 = vadd.xlane.f32.xlu0 %v2140_v19 }
 0x6a2   :  { %v2159_v48 = vpop.permute.xlu0 %2158 }
 0x6a3   :  { %v2172_v60 = vmul.f32 %v2159_v48, %v12494_v37 }
 0x6a8   :  { %2239 = vperm.xlu1 %9506, %v2225_v17  }
 0x6aa   :  { %v2154_v11 = vpop.permute.xlu0 %2153 }
 0x6ab   :  { %v2171_v3 = vmul.f32 %v2154_v11, %v12489_v26  ;;  %v2174_v26 = vmul.f32 %v12487_v62, %v12504_v7 }
 0x6af   :  { %2234 = vperm.xlu2 %9504, %v2224_v30   ;;  %v2164_v6 = vpop.permute.xlu1 %2163 }
 0x6b0   :  { %v2173_v20 = vmul.f32 %v2164_v6, %v12499_v63 }
 0x6b3   :  { %2229 = vperm.xlu0 %9505, %v2223_v50  }
 0x6fa   :  { %v2133_v36 = vpop.xlane.xlu0 %2132 }
 0x6fb   :  { %v2143_v35 = vmul.f32 %v2133_v36, %v2118_v38 }
 0x6fd   :  { %v2175_v53 = vadd.f32 1e-05, %v2143_v35 }
 0x6ff   :  { %10207 = vrsqrt.f32 %v2175_v53  ;;  %vm2185_vm3 = vweird.f32 %v2175_v53 }
 0x702   :  { %v2136_v10 = vpop.xlane.xlu1 %2135 }
 0x703   :  { %v2144_v61 = vmul.f32 %v2136_v10, %v2118_v38 }
 0x705   :  { %v2176_v46 = vadd.f32 1e-05, %v2144_v61  ;;  %v10208_v21 = vpop.eup %10207 }
 0x706   :  { %v2180_v28 = vmul.f32 %v10208_v21, %v2175_v53  ;;  %vm2186_vm14 = vweird.f32 %v10208_v21 }
 0x707   :  { %10209 = vrsqrt.f32 %v2176_v46  ;;  %vm2195_vm12 = vweird.f32 %v2176_v46  ;;  %vm2187_vm13 = vmor %vm2185_vm3, %vm2186_vm14 }
 0x708   :  { %v2181_v22 = vmul.f32 %v10208_v21, %v2180_v28 }
 0x70a   :  { %v2139_v57 = vpop.xlane.xlu2 %2138  ;;  %v2182_v55 = vmul.f32 0.5, %v2181_v22 }
 0x70b   :  { %v2145_v52 = vmul.f32 %v2139_v57, %v2118_v38 }
 0x70c   :  { %v2183_v18 = vsub.f32 1.5, %v2182_v55  ;;  %v2380_v55 = vld [vmem:[%s13750_s10] sm:$0xff] }
 0x70d   :  { %v10210_v14 = vpop.eup %10209  ;;  %v2177_v58 = vadd.f32 1e-05, %v2145_v52 }
 0x70e   :  { %v2190_v9 = vmul.f32 %v10210_v14, %v2176_v46  ;;  %vm2196_vm6 = vweird.f32 %v10210_v14  ;;  %v2184_v23 = vmul.f32 %v10208_v21, %v2183_v18 }
 0x70f   :  { %10211 = vrsqrt.f32 %v2177_v58  ;;  %vm2197_vm2 = vmor %vm2195_vm12, %vm2196_vm6  ;;  %vm2205_vm1 = vweird.f32 %v2177_v58 }
 0x710   :  { %v2191_v39 = vmul.f32 %v10210_v14, %v2190_v9 }
 0x712   :  { %v2142_v44 = vpop.xlane.xlu0 %2141  ;;  %v2192_v49 = vmul.f32 0.5, %v2191_v39  ;;  %v2235_v0 = vpop.permute.xlu2 %2234 }
 0x713   :  { %v2146_v45 = vmul.f32 %v2142_v44, %v2118_v38  ;;  %v2188_v38 = vsel %vm2187_vm13, %v10208_v21, %v2184_v23 }
 0x714   :  { %v2193_v5 = vsub.f32 1.5, %v2192_v49  ;;  %v2219_v29 = vmul.f32 %v2188_v38, %v2171_v3 }
 0x715   :  { %v10212_v33 = vpop.eup %10211  ;;  %v2178_v8 = vadd.f32 1e-05, %v2146_v45 }
 0x716   :  { %v2200_v40 = vmul.f32 %v10212_v33, %v2177_v58  ;;  %v2194_v4 = vmul.f32 %v10210_v14, %v2193_v5  ;;  %vm2206_vm10 = vweird.f32 %v10212_v33  ;;  %v2529_v5 = vld [vmem:[%s13751_s11 + $0x10] sm:$0xff] }
 0x717   :  { %10213 = vrsqrt.f32 %v2178_v8  ;;  %vm2207_vm9 = vmor %vm2205_vm1, %vm2206_vm10  ;;  %vm2215_vm0 = vweird.f32 %v2178_v8 }
 0x718   :  { %v2201_v47 = vmul.f32 %v10212_v33, %v2200_v40  ;;  %v2198_v56 = vsel %vm2197_vm2, %v10210_v14, %v2194_v4  ;;  %v2530_v40 = vld [vmem:[%s13751_s11 + $0x18] sm:$0xff] }
 0x719   :  { %v2220_v41 = vmul.f32 %v2198_v56, %v2172_v60 }
 0x71a   :  { %v2202_v51 = vmul.f32 0.5, %v2201_v47  ;;  %v2240_v19 = vpop.permute.xlu1 %2239 }
 0x71b   :  { %v12523_v37 = vadd.f32 %v2235_v0, %v2220_v41 }
 0x71c   :  { %v2203_v15 = vsub.f32 1.5, %v2202_v51 }
 0x71d   :  { %v10214_v34 = vpop.eup %10213 }
 0x71e   :  { %v2210_v27 = vmul.f32 %v10214_v34, %v2178_v8  ;;  %v2204_v54 = vmul.f32 %v10212_v33, %v2203_v15  ;;  %vm2216_vm15 = vweird.f32 %v10214_v34  ;;  %v2382_v8 = vld [vmem:[%s13750_s10 + $0x10] sm:$0xff] }
 0x71f   :  { %vm2217_vm4 = vmor %vm2215_vm0, %vm2216_vm15 }
 0x720   :  { %v2211_v2 = vmul.f32 %v10214_v34, %v2210_v27  ;;  %v2208_v13 = vsel %vm2207_vm9, %v10212_v33, %v2204_v54  ;;  %v2383_v33 = vld [vmem:[%s13750_s10 + $0x18] sm:$0xff] }
 0x721   :  { %v2221_v12 = vmul.f32 %v2208_v13, %v2173_v20 }
 0x722   :  { %v2212_v1 = vmul.f32 0.5, %v2211_v2 }
 0x723   :  { %v12535_v17 = vadd.f32 %v2240_v19, %v2221_v12 }
 0x724   :  { %v2213_v25 = vsub.f32 1.5, %v2212_v1 }
 0x725   :  { %v2230_v32 = vpop.permute.xlu0 %2229 }
 0x726   :  { %v2214_v24 = vmul.f32 %v10214_v34, %v2213_v25  ;;  %v12525_v42 = vadd.f32 %v2230_v32, %v2219_v29 }
 0x728   :  { %v2218_v16 = vsel %vm2217_vm4, %v10214_v34, %v2214_v24  ;;  %v9992_v59 = vpack.i.bf16 %v12525_v42, %v12523_v37 }
 0x729   :  { %v2222_v43 = vmul.f32 %v2218_v16, %v2174_v26 }
 0x72a   :  { %9993 = vrot.lane.b32.xlu2 %v9992_v59, %s10442_s4 }
 0x72b   :  { %v12533_v63 = vadd.f32 %v12518_v31, %v2222_v43  ;;  %v2381_v31 = vld [vmem:[%s13750_s10 + $0x8] sm:$0xff]  ;;  %s10477_s10 = smov 106  }
 0x72d   :  { %v9997_v30 = vpack.i.bf16 %v12535_v17, %v12533_v63 }
 0x72f   :  { %9998 = vrot.lane.b32.xlu0 %v9997_v30, %s10443_s30  ;;  %9988 = vrot.lane.b32.xlu1 %v9997_v30, %s10442_s4 }
 0x732   :  { %10008 = vrot.lane.b32.xlu2 %v9997_v30, %s10444_s2 }
 0x737   :  { %10013 = vrot.lane.b32.xlu0 %v9992_v59, %s10444_s2  ;;  %10003 = vrot.lane.b32.xlu1 %v9992_v59, %s10443_s30 }
 0x73a   :  { %10023 = vrot.lane.b32.xlu2 %v9992_v59, %s10445_s9 }
 0x73f   :  { %10018 = vrot.lane.b32.xlu1 %v9997_v30, %s10445_s9 }
 0x784   :  { %v12546_v62 = vpop.permute.xlu2 %9993 }
 0x785   :  { %v9996_v7 = vunpack.i.h.bf16 %v12546_v62  ;;  %v9995_v50 = vunpack.i.l.bf16 %v12546_v62  ;;  %10033 = vrot.lane.b32.xlu1 %v12546_v62, %s10445_s9 }
 0x78c   :  { %v12552_v48 = vpop.permute.xlu2 %10008 }
 0x78d   :  { %v10011_v11 = vunpack.i.h.bf16 %v12552_v48  ;;  %v10010_v6 = vunpack.i.l.bf16 %v12552_v48  ;;  %10048 = vrot.lane.b32.xlu1 %v12552_v48, %s10445_s9 }
 0x794   :  { %v12558_v36 = vpop.permute.xlu2 %10023 }
 0x795   :  { %v10026_v35 = vunpack.i.h.bf16 %v12558_v36  ;;  %v10025_v53 = vunpack.i.l.bf16 %v12558_v36  ;;  %10063 = vrot.lane.b32.xlu1 %v12558_v36, %s10445_s9 }
 0x79d   :  { %2391 = vperm.xlu1 %9506, %v2381_v31  }
 0x7a1   :  { %v9999_v10 = vpop.permute.xlu0 %9998  ;;  %v9989_v61 = vpop.permute.xlu1 %9988 }
 0x7a2   :  { %v10001_v46 = vunpack.i.h.bf16 %v9999_v10  ;;  %v10000_v21 = vunpack.i.l.bf16 %v9999_v10  ;;  %v9991_v57 = vunpack.i.h.bf16 %v9989_v61  ;;  %v9990_v52 = vunpack.i.l.bf16 %v9989_v61  ;;  %10038 = vrot.lane.b32.xlu2 %v9999_v10, %s10445_s9  ;;  %10028 = vrot.lane.b32.xlu0 %v9989_v61, %s10445_s9 }
 0x7a9   :  { %v12569_v14 = vpop.permute.xlu0 %10013  ;;  %v10004_v28 = vpop.permute.xlu1 %10003 }
 0x7aa   :  { %v10016_v58 = vunpack.i.h.bf16 %v12569_v14  ;;  %v10015_v9 = vunpack.i.l.bf16 %v12569_v14  ;;  %v10006_v39 = vunpack.i.h.bf16 %v10004_v28  ;;  %v10005_v22 = vunpack.i.l.bf16 %v10004_v28  ;;  %10053 = vrot.lane.b32.xlu2 %v12569_v14, %s10445_s9  ;;  %10043 = vrot.lane.b32.xlu0 %v10004_v28, %s10445_s9  ;;  %v2372_v28 = vld [vmem:[#allocation8] sm:$0xff] }
 0x7ab   :  { %v2353_v14 = vsel %vm2351_vm11, %v12523_v37, %v10025_v53  ;;  %v2378_v37 = vld [vmem:[#allocation8 + $0x30] sm:$0xff] }
 0x7b1   :  { %v12576_v44 = vpop.permute.xlu1 %10018 }
 0x7b2   :  { %v10021_v49 = vunpack.i.h.bf16 %v12576_v44  ;;  %v10020_v45 = vunpack.i.l.bf16 %v12576_v44  ;;  %2401 = vperm.xlu2 %9504, %v2383_v33   ;;  %10058 = vrot.lane.b32.xlu0 %v12576_v44, %s10445_s9 }
 0x7ba   :  { %2386 = vperm.xlu2 %9504, %v2380_v55   ;;  %2396 = vperm.xlu0 %9505, %v2382_v8  }
 0x7c2   :  { %2548 = vperm.xlu2 %9504, %v2530_v40   ;;  %2543 = vperm.xlu0 %9505, %v2529_v5  }
 0x7f7   :  { %v10034_v47 = vpop.permute.xlu1 %10033 }
 0x7f8   :  { %v10035_v15 = vunpack.i.l.bf16 %v10034_v47  ;;  %v10036_v27 = vunpack.i.h.bf16 %v10034_v47 }
 0x7fa   :  { %v2365_v54 = vsel %vm2351_vm11, %v9995_v50, %v10035_v15  ;;  %v2364_v41 = vsel %vm2351_vm11, %v9996_v7, %v10036_v27 }
 0x7fc   :  { %v10039_v23 = vpop.permute.xlu2 %10038 }
 0x7fd   :  { %v10040_v2 = vunpack.i.l.bf16 %v10039_v23  ;;  %v10041_v3 = vunpack.i.h.bf16 %v10039_v23 }
 0x7ff   :  { %v10049_v60 = vpop.permute.xlu1 %10048  ;;  %v2363_v25 = vsel %vm2351_vm11, %v10000_v21, %v10040_v2  ;;  %v2362_v29 = vsel %vm2351_vm11, %v10001_v46, %v10041_v3  ;;  %v2373_v21 = vld [vmem:[#allocation8 + $0x8] sm:$0xff] }
 0x800   :  { %v10050_v20 = vunpack.i.l.bf16 %v10049_v60  ;;  %v10051_v12 = vunpack.i.h.bf16 %v10049_v60 }
 0x802   :  { %v2359_v62 = vsel %vm2351_vm11, %v10010_v6, %v10050_v20  ;;  %v2358_v10 = vsel %vm2351_vm11, %v10011_v11, %v10051_v12  ;;  %v10453_v20 = vmov 82.0  }
 0x803   :  { %10215 = vrcp.f32 %v10453_v20 }
 0x804   :  { %v10054_v0 = vpop.permute.xlu2 %10053 }
 0x805   :  { %v10055_v19 = vunpack.i.l.bf16 %v10054_v0  ;;  %v10056_v50 = vunpack.i.h.bf16 %v10054_v0 }
 0x807   :  { %v10064_v24 = vpop.permute.xlu1 %10063  ;;  %v2357_v6 = vsel %vm2351_vm11, %v10015_v9, %v10055_v19  ;;  %v2356_v48 = vsel %vm2351_vm11, %v10016_v58, %v10056_v50  ;;  %v2375_v58 = vld [vmem:[#allocation8 + $0x18] sm:$0xff]  ;;  %v2374_v9 = vld [vmem:[#allocation8 + $0x10] sm:$0xff] }
 0x808   :  { %v10065_v30 = vunpack.i.l.bf16 %v10064_v24  ;;  %v10066_v31 = vunpack.i.h.bf16 %v10064_v24 }
 0x809   :  { %v10216_v0 = vpop.eup %10215 }
 0x80a   :  { %v2369_v46 = vsel %vm2351_vm11, %v10025_v53, %v10065_v30  ;;  %v2368_v11 = vsel %vm2351_vm11, %v10026_v35, %v10066_v31  ;;  %vm2497_vm8 = vweird.f32 %v10216_v0 }
 0x80c   :  { %v2402_v36 = vpop.permute.xlu2 %2401 }
 0x80f   :  { %v2392_v8 = vpop.permute.xlu1 %2391 }
 0x814   :  { %v10029_v18 = vpop.permute.xlu0 %10028  ;;  %v2387_v44 = vpop.permute.xlu2 %2386 }
 0x815   :  { %v10031_v51 = vunpack.i.h.bf16 %v10029_v18  ;;  %v10030_v4 = vunpack.i.l.bf16 %v10029_v18 }
 0x817   :  { %v2367_v34 = vsel %vm2351_vm11, %v9990_v52, %v10030_v4  ;;  %v2366_v56 = vsel %vm2351_vm11, %v9991_v57, %v10031_v51  ;;  %v2355_v57 = vsel %vm2351_vm11, %v12533_v63, %v10020_v45  ;;  %v2354_v52 = vsel %vm2351_vm11, %v12535_v17, %v10021_v49  ;;  %v2377_v17 = vld [vmem:[#allocation8 + $0x28] sm:$0xff] }
 0x818   :  { %2417 = vmatpush.msra.mxu2 %v2367_v34  ;;  %v2352_v63 = vsel %vm2351_vm11, %v12525_v42, %v10026_v35 }
 0x81a   :  { %2418 = vmatpush.msra.mxu2 %v2366_v56 }
 0x81c   :  { %v10044_v38 = vpop.permute.xlu0 %10043  ;;  %2419 = vmatpush.msra.mxu2 %v2365_v54 }
 0x81d   :  { %v10045_v1 = vunpack.i.l.bf16 %v10044_v38  ;;  %v10046_v13 = vunpack.i.h.bf16 %v10044_v38 }
 0x81e   :  { %2420 = vmatpush.msra.mxu2 %v2364_v41 }
 0x81f   :  { %v2361_v32 = vsel %vm2351_vm11, %v10005_v22, %v10045_v1  ;;  %v2360_v43 = vsel %vm2351_vm11, %v10006_v39, %v10046_v13  ;;  %v2376_v39 = vld [vmem:[#allocation8 + $0x20] sm:$0xff]  ;;  %v2379_v22 = vld [vmem:[#allocation8 + $0x38] sm:$0xff]  ;;  %v2528_v13 = vld [vmem:[%s13751_s11 + $0x8] sm:$0xff] }
 0x820   :  { %2421 = vmatpush.msra.mxu2 %v2363_v25  ;;  %v2527_v25 = vld [vmem:[%s13751_s11] sm:$0xff]  ;;  %s10456_s11 = smov 70  }
 0x822   :  { %2422 = vmatpush.msra.mxu2 %v2362_v29  ;;  %v2606_v29 = vld [vmem:[%s13752_s12 + $0x18] sm:$0xff] }
 0x824   :  { %v10059_v26 = vpop.permute.xlu0 %10058  ;;  %2423 = vmatpush.msra.mxu2 %v2361_v32  ;;  %v2493_v32 = vmul.f32 82.0, %v10216_v0 }
 0x825   :  { %v10061_v16 = vunpack.i.h.bf16 %v10059_v26  ;;  %v10060_v59 = vunpack.i.l.bf16 %v10059_v26 }
 0x826   :  { %2424 = vmatpush.msra.mxu2 %v2360_v43  ;;  %v2494_v24 = vsub.f32 1.0, %v2493_v32  ;;  %v2549_v43 = vpop.permute.xlu2 %2548 }
 0x827   :  { %v2371_v7 = vsel %vm2351_vm11, %v10020_v45, %v10060_v59  ;;  %v2370_v61 = vsel %vm2351_vm11, %v10021_v49, %v10061_v16  ;;  %vm2779_vm11 = vcmask 285696  }
 0x828   :  { %2425 = vmatpush.msra.mxu2 %v2359_v62  ;;  %2458 = vmatpush.msrb.mxu3 %v2371_v7  ;;  %v2495_v26 = vmul.f32 %v10216_v0, %v2494_v24 }
 0x82a   :  { %2426 = vmatpush.msra.mxu2 %v2358_v10  ;;  %2459 = vmatpush.msrb.mxu3 %v2370_v61  ;;  %v2496_v16 = vadd.f32 %v10216_v0, %v2495_v26 }
 0x82c   :  { %2427 = vmatpush.msra.mxu2 %v2357_v6  ;;  %2460 = vmatpush.msrb.mxu3 %v2369_v46  ;;  %v2397_v15 = vpop.permute.xlu0 %2396  ;;  %v12662_v59 = vsel %vm2497_vm8, %v10216_v0, %v2496_v16  ;;  %vm13884_vm8 = vcmask 572416  }
 0x82e   :  { %2428 = vmatpush.msra.mxu2 %v2356_v48  ;;  %2461 = vmatpush.msrb.mxu3 %v2368_v11 }
 0x82f   :  { %7290 = vmatmul.msk.f32.vlgmr.msrb.gmra.mxu3 %vm2404_vm5, %v2373_v21 }
 0x830   :  { %2429 = vmatpush.msra.mxu2 %v2355_v57 }
 0x832   :  { %2430 = vmatpush.msra.mxu2 %v2354_v52 }
 0x834   :  { %2431 = vmatpush.msra.mxu2 %v2353_v14  ;;  %v2544_v12 = vpop.permute.xlu0 %2543 }
 0x836   :  { %2432 = vmatpush.msra.mxu2 %v2352_v63 }
 0x837   :  { %2433 = vmatmul.f32.vlgmr.msra.gmra.mxu2 %v2372_v28  ;;  %7291 = vmatmul.msk.f32.gmra.mxu3 %vm2404_vm5, %v2375_v58 }
 0x83f   :  { %2436 = vmatmul.f32.gmra.mxu2 %v2374_v9  ;;  %7292 = vmatmul.msk.f32.gmra.mxu3 %vm2404_vm5, %v2377_v17 }
 0x847   :  { %2439 = vmatmul.f32.gmra.mxu2 %v2376_v39  ;;  %7293 = vmatmul.msk.f32.gmra.mxu3 %vm2404_vm5, %v2379_v22  ;;  %v2604_v22 = vld [vmem:[%s13752_s12 + $0x8] sm:$0xff]  ;;  %vm13867_vm5 = vcmask 785408  }
 0x84f   :  { %2442 = vmatmul.f32.gmra.mxu2 %v2378_v37  ;;  %v2603_v37 = vld [vmem:[%s13752_s12] sm:$0xff] }
 0x8b2   :  { %v2463_v53 = vpop.f32.mrf.mxu3 }
 0x8ba   :  { %v2434_v42 = vpop.f32.mrf.mxu2  ;;  %v2466_v45 = vpop.f32.mrf.mxu3 }
 0x8bb   :  { %v2435_v35 = vadd.f32 %v2434_v42, %v2387_v44 }
 0x8bd   :  { %v2464_v49 = vadd.f32 %v2463_v53, %v2435_v35 }
 0x8bf   :  { %v2475_v33 = vmax.f32 %v2464_v49, 0.0 }
 0x8c1   :  { %v2480_v55 = vsel %vm13874_vm7, %v2475_v33, 0.0 }
 0x8c2   :  { %v2437_v40 = vpop.f32.mrf.mxu2  ;;  %2481 = vadd.xlane.f32.xlu0 %v2480_v55  ;;  %v2469_v51 = vpop.f32.mrf.mxu3 }
 0x8c3   :  { %v2438_v5 = vadd.f32 %v2437_v40, %v2392_v8 }
 0x8c5   :  { %v2467_v47 = vadd.f32 %v2466_v45, %v2438_v5 }
 0x8c7   :  { %v2476_v18 = vmax.f32 %v2467_v47, 0.0 }
 0x8c9   :  { %v2483_v4 = vsel %vm13874_vm7, %v2476_v18, 0.0 }
 0x8ca   :  { %v2440_v34 = vpop.f32.mrf.mxu2  ;;  %2484 = vadd.xlane.f32.xlu2 %v2483_v4  ;;  %v2472_v54 = vpop.f32.mrf.mxu3 }
 0x8cb   :  { %v2441_v23 = vadd.f32 %v2440_v34, %v2397_v15 }
 0x8cd   :  { %v2470_v27 = vadd.f32 %v2469_v51, %v2441_v23 }
 0x8cf   :  { %v2477_v56 = vmax.f32 %v2470_v27, 0.0 }
 0x8d1   :  { %v2486_v60 = vsel %vm13874_vm7, %v2477_v56, 0.0 }
 0x8d2   :  { %v2443_v2 = vpop.f32.mrf.mxu2  ;;  %2487 = vadd.xlane.f32.xlu1 %v2486_v60 }
 0x8d3   :  { %v2444_v38 = vadd.f32 %v2443_v2, %v2402_v36  ;;  %v2605_v36 = vld [vmem:[%s13752_s12 + $0x10] sm:$0xff]  ;;  %s10487_s12 = smov [#allocation2]  }
 0x8d5   :  { %v2473_v3 = vadd.f32 %v2472_v54, %v2444_v38 }
 0x8d7   :  { %v2478_v41 = vmax.f32 %v2473_v3, 0.0 }
 0x8d9   :  { %v2489_v1 = vsel %vm13874_vm7, %v2478_v41, 0.0 }
 0x8da   :  { %2490 = vadd.xlane.f32.xlu0 %v2489_v1 }
 0x8e2   :  { %2533 = vperm.xlu2 %9504, %v2527_v25  }
 0x8eb   :  { %2538 = vperm.xlu1 %9506, %v2528_v13  }
 0x8ee   :  { %2624 = vperm.xlu0 %9505, %v2606_v29  }
 0x935   :  { %v2482_v19 = vpop.xlane.xlu0 %2481 }
 0x936   :  { %v2499_v30 = vmul.f32 %v12662_v59, %v2482_v19 }
 0x938   :  { %v12665_v62 = vsub.f32 %v2475_v33, %v2499_v30 }
 0x93a   :  { %v2507_v7 = vmul.f32 %v12665_v62, %v12665_v62 }
 0x93c   :  { %v2511_v50 = vsel %vm13874_vm7, %v2507_v7, 0.0 }
 0x93d   :  { %v2485_v31 = vpop.xlane.xlu2 %2484  ;;  %2512 = vadd.xlane.f32.xlu1 %v2511_v50 }
 0x93e   :  { %v2500_v10 = vmul.f32 %v12662_v59, %v2485_v31 }
 0x940   :  { %v12671_v61 = vsub.f32 %v2476_v18, %v2500_v10 }
 0x942   :  { %v2508_v6 = vmul.f32 %v12671_v61, %v12671_v61 }
 0x944   :  { %v2514_v46 = vsel %vm13874_vm7, %v2508_v6, 0.0 }
 0x945   :  { %v2488_v21 = vpop.xlane.xlu1 %2487  ;;  %2515 = vadd.xlane.f32.xlu0 %v2514_v46  ;;  %v2534_v45 = vpop.permute.xlu2 %2533 }
 0x946   :  { %v2501_v48 = vmul.f32 %v12662_v59, %v2488_v21  ;;  %v2551_v25 = vmul.f32 %v2534_v45, %v12665_v62 }
 0x948   :  { %v2505_v11 = vsub.f32 %v2477_v56, %v2501_v48 }
 0x94a   :  { %v2509_v57 = vmul.f32 %v2505_v11, %v2505_v11  ;;  %v12677_v52 = vmul.f32 %v2544_v12, %v2505_v11 }
 0x94c   :  { %v2517_v14 = vsel %vm13874_vm7, %v2509_v57, 0.0 }
 0x94d   :  { %2518 = vadd.xlane.f32.xlu2 %v2517_v14  ;;  %v2491_v28 = vpop.xlane.xlu0 %2490 }
 0x94e   :  { %v2502_v58 = vmul.f32 %v12662_v59, %v2491_v28 }
 0x950   :  { %v2506_v63 = vsub.f32 %v2478_v41, %v2502_v58 }
 0x952   :  { %v12681_v9 = vmul.f32 %v2549_v43, %v2506_v63  ;;  %v2510_v17 = vmul.f32 %v2506_v63, %v2506_v63 }
 0x954   :  { %v2520_v39 = vsel %vm13874_vm7, %v2510_v17, 0.0  ;;  %vm13878_vm7 = vcmask 483528  }
 0x955   :  { %2521 = vadd.xlane.f32.xlu1 %v2520_v39 }
 0x959   :  { %2614 = vperm.xlu0 %9505, %v2604_v22  }
 0x95d   :  { %v2539_v53 = vpop.permute.xlu1 %2538 }
 0x95e   :  { %v2552_v0 = vmul.f32 %v2539_v53, %v12671_v61 }
 0x960   :  { %v12693_v44 = vpop.permute.xlu0 %2624 }
 0x965   :  { %2609 = vperm.xlu2 %9504, %v2603_v37  }
 0x96e   :  { %2619 = vperm.xlu1 %9506, %v2605_v36  }
 0x9b0   :  { %v2513_v42 = vpop.xlane.xlu1 %2512 }
 0x9b1   :  { %v2523_v35 = vmul.f32 %v2513_v42, %v12662_v59 }
 0x9b3   :  { %v2555_v49 = vadd.f32 1e-05, %v2523_v35 }
 0x9b5   :  { %10217 = vrsqrt.f32 %v2555_v49  ;;  %vm2565_vm12 = vweird.f32 %v2555_v49 }
 0x9b8   :  { %v2516_v33 = vpop.xlane.xlu0 %2515 }
 0x9b9   :  { %v2524_v55 = vmul.f32 %v2516_v33, %v12662_v59 }
 0x9bb   :  { %v10218_v8 = vpop.eup %10217  ;;  %v2556_v40 = vadd.f32 1e-05, %v2524_v55 }
 0x9bc   :  { %v2560_v5 = vmul.f32 %v10218_v8, %v2555_v49  ;;  %vm2566_vm6 = vweird.f32 %v10218_v8 }
 0x9bd   :  { %10219 = vrsqrt.f32 %v2556_v40  ;;  %vm2567_vm14 = vmor %vm2565_vm12, %vm2566_vm6  ;;  %vm2575_vm3 = vweird.f32 %v2556_v40 }
 0x9be   :  { %v2561_v47 = vmul.f32 %v10218_v8, %v2560_v5 }
 0x9c0   :  { %v2562_v18 = vmul.f32 0.5, %v2561_v47  ;;  %v2519_v51 = vpop.xlane.xlu2 %2518 }
 0x9c1   :  { %v2525_v4 = vmul.f32 %v2519_v51, %v12662_v59 }
 0x9c2   :  { %v2563_v15 = vsub.f32 1.5, %v2562_v18 }
 0x9c3   :  { %v10220_v34 = vpop.eup %10219  ;;  %v2557_v23 = vadd.f32 1e-05, %v2525_v4 }
 0x9c4   :  { %v2570_v27 = vmul.f32 %v10220_v34, %v2556_v40  ;;  %v2564_v60 = vmul.f32 %v10218_v8, %v2563_v15  ;;  %vm2576_vm2 = vweird.f32 %v10220_v34 }
 0x9c5   :  { %10221 = vrsqrt.f32 %v2557_v23  ;;  %vm2577_vm10 = vmor %vm2575_vm3, %vm2576_vm2  ;;  %vm2585_vm1 = vweird.f32 %v2557_v23  ;;  %vm3067_vm3 = vcmask 278528  }
 0x9c6   :  { %v2571_v56 = vmul.f32 %v10220_v34, %v2570_v27  ;;  %v2568_v41 = vsel %vm2567_vm14, %v10218_v8, %v2564_v60 }
 0x9c7   :  { %v2599_v32 = vmul.f32 %v2568_v41, %v2551_v25 }
 0x9c8   :  { %v2572_v2 = vmul.f32 0.5, %v2571_v56  ;;  %v2522_v54 = vpop.xlane.xlu1 %2521  ;;  %v2610_v26 = vpop.permute.xlu2 %2609 }
 0x9c9   :  { %v2526_v38 = vmul.f32 %v2522_v54, %v12662_v59  ;;  %v12701_v19 = vadd.f32 %v2610_v26, %v2599_v32 }
 0x9ca   :  { %v2573_v3 = vsub.f32 1.5, %v2572_v2 }
 0x9cb   :  { %v10222_v1 = vpop.eup %10221  ;;  %v2558_v13 = vadd.f32 1e-05, %v2526_v38  ;;  %v2615_v43 = vpop.permute.xlu0 %2614 }
 0x9cc   :  { %v2580_v29 = vmul.f32 %v10222_v1, %v2557_v23  ;;  %v2574_v20 = vmul.f32 %v10220_v34, %v2573_v3  ;;  %vm2586_vm13 = vweird.f32 %v10222_v1 }
 0x9cd   :  { %10223 = vrsqrt.f32 %v2558_v13  ;;  %vm2587_vm15 = vmor %vm2585_vm1, %vm2586_vm13  ;;  %vm2595_vm0 = vweird.f32 %v2558_v13 }
 0x9ce   :  { %v2581_v24 = vmul.f32 %v10222_v1, %v2580_v29  ;;  %v2578_v12 = vsel %vm2577_vm10, %v10220_v34, %v2574_v20 }
 0x9cf   :  { %v2600_v16 = vmul.f32 %v2578_v12, %v2552_v0 }
 0x9d0   :  { %v2582_v59 = vmul.f32 0.5, %v2581_v24 }
 0x9d1   :  { %v12703_v30 = vadd.f32 %v2615_v43, %v2600_v16  ;;  %v2816_v16 = vld [vmem:[%s13754_s14] sm:$0xff] }
 0x9d2   :  { %v2583_v50 = vsub.f32 1.5, %v2582_v59  ;;  %v2817_v59 = vld [vmem:[%s13754_s14 + $0x8] sm:$0xff] }
 0x9d3   :  { %v10224_v62 = vpop.eup %10223  ;;  %v10067_v7 = vpack.i.bf16 %v12701_v19, %v12703_v30 }
 0x9d4   :  { %v2590_v31 = vmul.f32 %v10224_v62, %v2558_v13  ;;  %v2584_v6 = vmul.f32 %v10222_v1, %v2583_v50  ;;  %vm2596_vm9 = vweird.f32 %v10224_v62 }
 0x9d5   :  { %10068 = vrot.lane.b32.xlu0 %v10067_v7, %s10442_s4  ;;  %vm2597_vm4 = vmor %vm2595_vm0, %vm2596_vm9  ;;  %vm3075_vm9 = vcmask 565528  }
 0x9d6   :  { %v2591_v10 = vmul.f32 %v10224_v62, %v2590_v31  ;;  %v2588_v48 = vsel %vm2587_vm15, %v10222_v1, %v2584_v6  ;;  %vm13883_vm15 = vcmask 852528  }
 0x9d7   :  { %v2601_v14 = vmul.f32 %v2588_v48, %v12677_v52 }
 0x9d8   :  { %v2592_v61 = vmul.f32 0.5, %v2591_v10 }
 0x9da   :  { %v2593_v46 = vsub.f32 1.5, %v2592_v61 }
 0x9dc   :  { %v2594_v21 = vmul.f32 %v10224_v62, %v2593_v46 }
 0x9dd   :  { %10073 = vrot.lane.b32.xlu0 %v10067_v7, %s10443_s30 }
 0x9de   :  { %v2598_v11 = vsel %vm2597_vm4, %v10224_v62, %v2594_v21 }
 0x9df   :  { %v2602_v57 = vmul.f32 %v2598_v11, %v12681_v9 }
 0x9e0   :  { %v2620_v28 = vpop.permute.xlu1 %2619 }
 0x9e1   :  { %v12712_v58 = vadd.f32 %v12693_v44, %v2602_v57  ;;  %v12714_v63 = vadd.f32 %v2620_v28, %v2601_v14 }
 0x9e3   :  { %v10082_v17 = vpack.i.bf16 %v12714_v63, %v12712_v58 }
 0x9e5   :  { %10083 = vrot.lane.b32.xlu2 %v10082_v17, %s10443_s30  ;;  %10078 = vrot.lane.b32.xlu1 %v10082_v17, %s10442_s4  ;;  %s10462_s4 = smov 48   ;;  %s10463_s30 = smov 83  }
 0x9e6   :  { %10113 = vrot.lane.b32.xlu0 %v10082_v17, %s10448_s1 }
 0x9ed   :  { %10098 = vrot.lane.b32.xlu1 %v10082_v17, %s10449_s5  ;;  %10088 = vrot.lane.b32.xlu2 %v10067_v7, %s10449_s5 }
 0x9ee   :  { %10118 = vrot.lane.b32.xlu0 %v10082_v17, %s10445_s9 }
 0x9f5   :  { %10103 = vrot.lane.b32.xlu1 %v10082_v17, %s10444_s2  ;;  %10093 = vrot.lane.b32.xlu2 %v10067_v7, %s10444_s2  ;;  %s10464_s2 = smov 105  }
 0x9fd   :  { %10108 = vrot.lane.b32.xlu1 %v10067_v7, %s10448_s1  ;;  %10123 = vrot.lane.b32.xlu2 %v10067_v7, %s10445_s9  ;;  %s10465_s9 = smov 12   ;;  %s10466_s1 = smov 72  }
 0xa3f   :  { %v12728_v52 = vpop.permute.xlu2 %10083 }
 0xa40   :  { %v10086_v9 = vunpack.i.h.bf16 %v12728_v52  ;;  %v10085_v39 = vunpack.i.l.bf16 %v12728_v52  ;;  %10143 = vrot.lane.b32.xlu2 %v12728_v52, %s10449_s5 }
 0xa47   :  { %v12734_v22 = vpop.permute.xlu0 %10068  ;;  %v10089_v49 = vpop.permute.xlu2 %10088 }
 0xa48   :  { %v10071_v37 = vunpack.i.h.bf16 %v12734_v22  ;;  %v10070_v36 = vunpack.i.l.bf16 %v12734_v22  ;;  %10128 = vrot.lane.b32.xlu0 %v12734_v22, %s10449_s5  ;;  %v12764_v34 = vunpack.i.h.bf16 %v10089_v49  ;;  %v12766_v23 = vunpack.i.l.bf16 %v10089_v49 }
 0xa4f   :  { %v12740_v44 = vpop.permute.xlu0 %10073  ;;  %v12759_v51 = vpop.permute.xlu2 %10093 }
 0xa50   :  { %v10076_v33 = vunpack.i.h.bf16 %v12740_v44  ;;  %v10075_v55 = vunpack.i.l.bf16 %v12740_v44  ;;  %v10095_v60 = vunpack.i.l.bf16 %v12759_v51  ;;  %v10096_v29 = vunpack.i.h.bf16 %v12759_v51 }
 0xa57   :  { %v10079_v53 = vpop.permute.xlu1 %10078  ;;  %v12798_v24 = vpop.permute.xlu2 %10123 }
 0xa58   :  { %v10081_v42 = vunpack.i.h.bf16 %v10079_v53  ;;  %v10080_v35 = vunpack.i.l.bf16 %v10079_v53  ;;  %10138 = vrot.lane.b32.xlu1 %v10079_v53, %s10449_s5  ;;  %v12749_v5 = vpop.permute.xlu0 %10113  ;;  %v10126_v26 = vunpack.i.h.bf16 %v12798_v24  ;;  %v10125_v12 = vunpack.i.l.bf16 %v12798_v24 }
 0xa59   :  { %v10115_v4 = vunpack.i.l.bf16 %v12749_v5  ;;  %v10116_v41 = vunpack.i.h.bf16 %v12749_v5 }
 0xa5b   :  { %v10172_v38 = vpack.i.bf16 %v10095_v60, %v10115_v4  ;;  %v10162_v32 = vpack.i.bf16 %v10096_v29, %v10116_v41 }
 0xa5f   :  { %v10099_v45 = vpop.permute.xlu1 %10098 }
 0xa60   :  { %v12745_v8 = vunpack.i.h.bf16 %v10099_v45  ;;  %v12747_v40 = vunpack.i.l.bf16 %v10099_v45  ;;  %v12781_v3 = vpop.permute.xlu0 %10118 }
 0xa61   :  { %v10121_v1 = vunpack.i.h.bf16 %v12781_v3  ;;  %v10120_v25 = vunpack.i.l.bf16 %v12781_v3 }
 0xa62   :  { %v10132_v47 = vpack.i.bf16 %v10076_v33, %v12745_v8  ;;  %v10147_v18 = vpack.i.bf16 %v10075_v55, %v12747_v40  ;;  %v2782_v51 = vsel %vm2779_vm11, %v12714_v63, %v12745_v8  ;;  %v2780_v63 = vsel %vm2779_vm11, %v12701_v19, %v12764_v34  ;;  %v2810_v19 = vld [vmem:[#allocation10 + $0x10] sm:$0xff] }
 0xa64   :  { %10148 = vrot.lane.b32.xlu1 %v10147_v18, %s10449_s5  ;;  %10133 = vrot.lane.b32.xlu0 %v10132_v47, %s10449_s5 }
 0xa67   :  { %v12762_v15 = vpop.permute.xlu1 %10103 }
 0xa68   :  { %v10106_v27 = vunpack.i.h.bf16 %v12762_v15  ;;  %v10105_v56 = vunpack.i.l.bf16 %v12762_v15 }
 0xa6a   :  { %v10152_v2 = vpack.i.bf16 %v10106_v27, %v12764_v34  ;;  %v10157_v54 = vpack.i.bf16 %v10105_v56, %v12766_v23 }
 0xa6c   :  { %10158 = vrot.lane.b32.xlu2 %v10157_v54, %s10449_s5  ;;  %10153 = vrot.lane.b32.xlu1 %v10152_v2, %s10449_s5 }
 0xa6d   :  { %10173 = vrot.lane.b32.xlu0 %v10172_v38, %s10449_s5 }
 0xa6f   :  { %v12789_v13 = vpop.permute.xlu1 %10108 }
 0xa70   :  { %v10111_v20 = vunpack.i.h.bf16 %v12789_v13  ;;  %v10110_v0 = vunpack.i.l.bf16 %v12789_v13 }
 0xa74   :  { %10163 = vrot.lane.b32.xlu2 %v10162_v32, %s10449_s5  ;;  %10168 = vrot.lane.b32.xlu1 %v12789_v13, %s10449_s5  ;;  %v2814_v13 = vld [vmem:[#allocation10 + $0x30] sm:$0xff] }
 0xa75   :  { %10178 = vrot.lane.b32.xlu0 %v12781_v3, %s10449_s5  ;;  %v2812_v3 = vld [vmem:[#allocation10 + $0x20] sm:$0xff] }
 0xa7c   :  { %10183 = vrot.lane.b32.xlu2 %v12798_v24, %s10449_s5  ;;  %2822 = vperm.xlu1 %9506, %v2816_v16   ;;  %s10467_s5 = smov 37  }
 0xa84   :  { %2827 = vperm.xlu2 %9504, %v2817_v59  }
 0xa9a   :  { %v10144_v43 = vpop.permute.xlu2 %10143 }
 0xa9b   :  { %v10145_v48 = vunpack.i.l.bf16 %v10144_v43  ;;  %v10146_v14 = vunpack.i.h.bf16 %v10144_v43 }
 0xa9d   :  { %v2791_v45 = vsel %vm2779_vm11, %v10085_v39, %v10145_v48  ;;  %v2790_v22 = vsel %vm2779_vm11, %v10086_v9, %v10146_v14 }
 0xaba   :  { %v10129_v62 = vpop.permute.xlu0 %10128 }
 0xabb   :  { %v10130_v10 = vunpack.i.l.bf16 %v10129_v62  ;;  %v10131_v6 = vunpack.i.h.bf16 %v10129_v62 }
 0xabd   :  { %v2793_v11 = vsel %vm2779_vm11, %v10070_v36, %v10130_v10  ;;  %v2792_v53 = vsel %vm2779_vm11, %v10071_v37, %v10131_v6 }
 0xac6   :  { %v10159_v21 = vpop.permute.xlu2 %10158 }
 0xac7   :  { %v10160_v49 = vunpack.i.l.bf16 %v10159_v21  ;;  %v10161_v18 = vunpack.i.h.bf16 %v10159_v21 }
 0xac9   :  { %v2805_v2 = vsel %vm2779_vm11, %v12766_v23, %v10160_v49 }
 0xaca   :  { %v10139_v7 = vpop.permute.xlu1 %10138 }
 0xacb   :  { %v10141_v50 = vunpack.i.h.bf16 %v10139_v7  ;;  %v10140_v31 = vunpack.i.l.bf16 %v10139_v7 }
 0xacd   :  { %v2795_v61 = vsel %vm2779_vm11, %v10080_v35, %v10140_v31  ;;  %v2794_v46 = vsel %vm2779_vm11, %v10081_v42, %v10141_v50 }
 0xace   :  { %2853 = vmatpush.msrb.mxu0 %v2795_v61  ;;  %v10164_v54 = vpop.permute.xlu2 %10163 }
 0xacf   :  { %v10165_v43 = vunpack.i.l.bf16 %v10164_v54  ;;  %v10166_v50 = vunpack.i.h.bf16 %v10164_v54 }
 0xad0   :  { %2854 = vmatpush.msrb.mxu0 %v2794_v46 }
 0xad1   :  { %v2802_v31 = vsel %vm2779_vm11, %v10116_v41, %v10165_v43 }
 0xad2   :  { %2855 = vmatpush.msrb.mxu0 %v2793_v11 }
 0xad4   :  { %2856 = vmatpush.msrb.mxu0 %v2792_v53 }
 0xad6   :  { %v10149_v57 = vpop.permute.xlu1 %10148  ;;  %v10134_v17 = vpop.permute.xlu0 %10133  ;;  %2857 = vmatpush.msrb.mxu0 %v2791_v45 }
 0xad7   :  { %v10150_v28 = vunpack.i.l.bf16 %v10149_v57  ;;  %v10135_v35 = vunpack.i.l.bf16 %v10134_v17  ;;  %v10151_v42 = vunpack.i.h.bf16 %v10149_v57  ;;  %v10136_v47 = vunpack.i.h.bf16 %v10134_v17  ;;  %v10184_v41 = vpop.permute.xlu2 %10183 }
 0xad8   :  { %2858 = vmatpush.msrb.mxu0 %v2790_v22  ;;  %v10185_v21 = vunpack.i.l.bf16 %v10184_v41  ;;  %v10186_v48 = vunpack.i.h.bf16 %v10184_v41  ;;  %v3039_v22 = vld [vmem:[%s13756_s16] sm:$0xff] }
 0xad9   :  { %v2807_v36 = vsel %vm2779_vm11, %v12747_v40, %v10150_v28  ;;  %v2806_v37 = vsel %vm2779_vm11, %v12745_v8, %v10135_v35  ;;  %v2789_v39 = vsel %vm2779_vm11, %v10075_v55, %v10151_v42  ;;  %v2788_v16 = vsel %vm2779_vm11, %v10076_v33, %v10136_v47  ;;  %v2818_v47 = vld [vmem:[%s13754_s14 + $0x10] sm:$0xff] }
 0xada   :  { %2886 = vmatpush.msrb.mxu1 %v2807_v36  ;;  %2859 = vmatpush.msrb.mxu0 %v2789_v39  ;;  %v2787_v55 = vsel %vm2779_vm11, %v10105_v56, %v10161_v18  ;;  %v2964_v18 = vld [vmem:[%s13755_s15 + $0x8] sm:$0xff] }
 0xadb   :  { %v3040_v39 = vld [vmem:[%s13756_s16 + $0x8] sm:$0xff] }
 0xadc   :  { %2887 = vmatpush.msrb.mxu1 %v2806_v37  ;;  %2860 = vmatpush.msrb.mxu0 %v2788_v16  ;;  %v2819_v37 = vld [vmem:[%s13754_s14 + $0x18] sm:$0xff]  ;;  %s10475_s14 = smov 1  }
 0xade   :  { %v10154_v38 = vpop.permute.xlu1 %10153  ;;  %2888 = vmatpush.msrb.mxu1 %v2805_v2  ;;  %2861 = vmatpush.msrb.mxu0 %v2787_v55  ;;  %v10454_v2 = vmov 70.0  }
 0xadf   :  { %v10156_v52 = vunpack.i.h.bf16 %v10154_v38  ;;  %v10155_v32 = vunpack.i.l.bf16 %v10154_v38  ;;  %v10174_v9 = vpop.permute.xlu0 %10173  ;;  %v2828_v53 = vpop.permute.xlu2 %2827  ;;  %10225 = vrcp.f32 %v10454_v2 }
 0xae0   :  { %v10175_v59 = vunpack.i.l.bf16 %v10174_v9  ;;  %v10176_v62 = vunpack.i.h.bf16 %v10174_v9 }
 0xae1   :  { %v2804_v7 = vsel %vm2779_vm11, %v12764_v34, %v10155_v32  ;;  %v2786_v44 = vsel %vm2779_vm11, %v10106_v27, %v10156_v52  ;;  %v2811_v34 = vld [vmem:[#allocation10 + $0x18] sm:$0xff] }
 0xae2   :  { %2889 = vmatpush.msrb.mxu1 %v2804_v7  ;;  %v2803_v33 = vsel %vm2779_vm11, %v10115_v4, %v10175_v59  ;;  %2862 = vmatpush.msrb.mxu0 %v2786_v44  ;;  %v2785_v56 = vsel %vm2779_vm11, %v10095_v60, %v10176_v62  ;;  %v2784_v4 = vsel %vm2779_vm11, %v10096_v29, %v10166_v50 }
 0xae3   :  { %v2783_v60 = vsel %vm2779_vm11, %v12712_v58, %v12747_v40  ;;  %v2781_v58 = vsel %vm2779_vm11, %v12703_v30, %v12766_v23  ;;  %v2797_v30 = vsel %vm2779_vm11, %v10125_v12, %v10185_v21  ;;  %v2809_v23 = vld [vmem:[#allocation10 + $0x8] sm:$0xff] }
 0xae4   :  { %2890 = vmatpush.msrb.mxu1 %v2803_v33  ;;  %2863 = vmatpush.msrb.mxu0 %v2785_v56 }
 0xae5   :  { %v10226_v54 = vpop.eup %10225 }
 0xae6   :  { %v10169_v10 = vpop.permute.xlu1 %10168  ;;  %2891 = vmatpush.msrb.mxu1 %v2802_v31  ;;  %2864 = vmatpush.msrb.mxu0 %v2784_v4  ;;  %v2929_v38 = vmul.f32 70.0, %v10226_v54  ;;  %vm2933_vm6 = vweird.f32 %v10226_v54 }
 0xae7   :  { %v10171_v15 = vunpack.i.h.bf16 %v10169_v10  ;;  %v10170_v61 = vunpack.i.l.bf16 %v10169_v10  ;;  %v10179_v27 = vpop.permute.xlu0 %10178 }
 0xae8   :  { %v10180_v6 = vunpack.i.l.bf16 %v10179_v27  ;;  %2865 = vmatpush.msrb.mxu0 %v2783_v60  ;;  %v10181_v46 = vunpack.i.h.bf16 %v10179_v27  ;;  %v2930_v52 = vsub.f32 1.0, %v2929_v38 }
 0xae9   :  { %v2801_v5 = vsel %vm2779_vm11, %v10110_v0, %v10170_v61  ;;  %v2800_v29 = vsel %vm2779_vm11, %v10111_v20, %v10171_v15  ;;  %v2808_v0 = vld [vmem:[#allocation10] sm:$0xff]  ;;  %v2815_v20 = vld [vmem:[#allocation10 + $0x38] sm:$0xff] }
 0xaea   :  { %2892 = vmatpush.msrb.mxu1 %v2801_v5  ;;  %2866 = vmatpush.msrb.mxu0 %v2782_v51  ;;  %v2799_v40 = vsel %vm2779_vm11, %v10120_v25, %v10180_v6  ;;  %v2798_v8 = vsel %vm2779_vm11, %v10121_v1, %v10181_v46  ;;  %v2796_v25 = vsel %vm2779_vm11, %v10126_v26, %v10186_v48  ;;  %v2813_v1 = vld [vmem:[#allocation10 + $0x28] sm:$0xff] }
 0xaeb   :  { %v2931_v32 = vmul.f32 %v10226_v54, %v2930_v52  ;;  %v2963_v46 = vld [vmem:[%s13755_s15] sm:$0xff] }
 0xaec   :  { %2893 = vmatpush.msrb.mxu1 %v2800_v29  ;;  %2867 = vmatpush.msrb.mxu0 %v2781_v58  ;;  %v2965_v29 = vld [vmem:[%s13755_s15 + $0x10] sm:$0xff] }
 0xaed   :  { %v2932_v9 = vadd.f32 %v10226_v54, %v2931_v32 }
 0xaee   :  { %2894 = vmatpush.msrb.mxu1 %v2799_v40  ;;  %2868 = vmatpush.msrb.mxu0 %v2780_v63  ;;  %v2823_v26 = vpop.permute.xlu1 %2822  ;;  %v3041_v63 = vld [vmem:[%s13756_s16 + $0x10] sm:$0xff] }
 0xaef   :  { %2869 = vmatmul.f32.vlgmr.msrb.gmra.mxu0 %v2808_v0  ;;  %v12912_v16 = vsel %vm2933_vm6, %v10226_v54, %v2932_v9 }
 0xaf0   :  { %2895 = vmatpush.msrb.mxu1 %v2798_v8  ;;  %v3042_v8 = vld [vmem:[%s13756_s16 + $0x18] sm:$0xff]  ;;  %s10455_s16 = smov 35  }
 0xaf2   :  { %2896 = vmatpush.msrb.mxu1 %v2797_v30 }
 0xaf4   :  { %2897 = vmatpush.msrb.mxu1 %v2796_v25 }
 0xaf5   :  { %7294 = vmatmul.msk.f32.vlgmr.msrb.gmra.mxu1 %vm13867_vm5, %v2809_v23 }
 0xaf7   :  { %2872 = vmatmul.f32.gmra.mxu0 %v2810_v19 }
 0xafd   :  { %7295 = vmatmul.msk.f32.gmra.mxu1 %vm13867_vm5, %v2811_v34 }
 0xaff   :  { %2875 = vmatmul.f32.gmra.mxu0 %v2812_v3 }
 0xb05   :  { %7296 = vmatmul.msk.f32.gmra.mxu1 %vm13867_vm5, %v2813_v1 }
 0xb07   :  { %2878 = vmatmul.f32.gmra.mxu0 %v2814_v13 }
 0xb0d   :  { %7297 = vmatmul.msk.f32.gmra.mxu1 %vm13867_vm5, %v2815_v20  ;;  %vm13869_vm5 = vcmask 762328  }
 0xb6c   :  { %v2870_v24 = vpop.f32.mrf.mxu0 }
 0xb6d   :  { %v2871_v12 = vadd.f32 %v2870_v24, %v2823_v26 }
 0xb72   :  { %v2899_v11 = vpop.f32.mrf.mxu1 }
 0xb73   :  { %v2900_v57 = vadd.f32 %v2899_v11, %v2871_v12 }
 0xb74   :  { %v2873_v28 = vpop.f32.mrf.mxu0 }
 0xb75   :  { %v2911_v14 = vmax.f32 %v2900_v57, 0.0  ;;  %v2874_v35 = vadd.f32 %v2873_v28, %v2828_v53 }
 0xb77   :  { %v2916_v17 = vsel %vm13884_vm8, %v2911_v14, 0.0 }
 0xb78   :  { %2917 = vadd.xlane.f32.xlu0 %v2916_v17 }
 0xb7a   :  { %v2902_v49 = vpop.f32.mrf.mxu1 }
 0xb7b   :  { %v2903_v42 = vadd.f32 %v2902_v49, %v2874_v35 }
 0xb7c   :  { %v2876_v56 = vpop.f32.mrf.mxu0 }
 0xb7d   :  { %v2912_v45 = vmax.f32 %v2903_v42, 0.0 }
 0xb7f   :  { %v2919_v36 = vsel %vm13884_vm8, %v2912_v45, 0.0 }
 0xb80   :  { %2920 = vadd.xlane.f32.xlu2 %v2919_v36 }
 0xb82   :  { %v2905_v10 = vpop.f32.mrf.mxu1 }
 0xb84   :  { %v2879_v27 = vpop.f32.mrf.mxu0 }
 0xb8a   :  { %v2908_v6 = vpop.f32.mrf.mxu1 }
 0xb8c   :  { %2832 = vperm.xlu0 %9505, %v2818_v47  }
 0xb98   :  { %3045 = vperm.xlu2 %9504, %v3039_v22  }
 0xba0   :  { %2837 = vperm.xlu2 %9504, %v2819_v37  }
 0xba8   :  { %2974 = vperm.xlu2 %9504, %v2964_v18  }
 0xbb0   :  { %3050 = vperm.xlu2 %9504, %v3040_v39  }
 0xbeb   :  { %v2918_v59 = vpop.xlane.xlu0 %2917 }
 0xbec   :  { %v2935_v43 = vmul.f32 %v12912_v16, %v2918_v59 }
 0xbee   :  { %v2939_v62 = vsub.f32 %v2911_v14, %v2935_v43 }
 0xbf0   :  { %v2943_v55 = vmul.f32 %v2939_v62, %v2939_v62 }
 0xbf2   :  { %v2947_v7 = vsel %vm13884_vm8, %v2943_v55, 0.0 }
 0xbf3   :  { %v2921_v50 = vpop.xlane.xlu2 %2920  ;;  %2948 = vadd.xlane.f32.xlu1 %v2947_v7 }
 0xbf4   :  { %v2936_v44 = vmul.f32 %v12912_v16, %v2921_v50 }
 0xbf6   :  { %v12917_v33 = vsub.f32 %v2912_v45, %v2936_v44 }
 0xbf8   :  { %v2944_v31 = vmul.f32 %v12917_v33, %v12917_v33 }
 0xbfa   :  { %v2950_v15 = vsel %vm13884_vm8, %v2944_v31, 0.0 }
 0xbfb   :  { %v3046_v61 = vpop.permute.xlu2 %3045  ;;  %2951 = vadd.xlane.f32.xlu0 %v2950_v15 }
 0xbfe   :  { %v2833_v21 = vpop.permute.xlu0 %2832 }
 0xbff   :  { %v2877_v58 = vadd.f32 %v2876_v56, %v2833_v21 }
 0xc01   :  { %v12929_v40 = vadd.f32 %v2905_v10, %v2877_v58 }
 0xc03   :  { %v2838_v4 = vpop.permute.xlu2 %2837  ;;  %v2913_v0 = vmax.f32 %v12929_v40, 0.0 }
 0xc04   :  { %v2880_v60 = vadd.f32 %v2879_v27, %v2838_v4 }
 0xc05   :  { %v2922_v48 = vsel %vm13884_vm8, %v2913_v0, 0.0 }
 0xc06   :  { %v2909_v5 = vadd.f32 %v2908_v6, %v2880_v60 }
 0xc08   :  { %v2914_v41 = vmax.f32 %v2909_v5, 0.0  ;;  %v2966_v5 = vld [vmem:[%s13755_s15 + $0x18] sm:$0xff]  ;;  %s10461_s15 = smov 13  }
 0xc0a   :  { %v2925_v51 = vsel %vm13884_vm8, %v2914_v41, 0.0 }
 0xc0b   :  { %2926 = vadd.xlane.f32.xlu0 %v2925_v51  ;;  %v2975_v54 = vpop.permute.xlu2 %2974 }
 0xc0c   :  { %2969 = vperm.xlu1 %9506, %v2963_v46   ;;  %v2988_v9 = vmul.f32 %v2975_v54, %v12917_v33 }
 0xc1f   :  { %2979 = vperm.xlu0 %9505, %v2965_v29  }
 0xc36   :  { %2923 = vadd.xlane.f32.xlu1 %v2922_v48 }
 0xc4f   :  { %3055 = vperm.xlu1 %9506, %v3041_v63  }
 0xc57   :  { %3060 = vperm.xlu1 %9506, %v3042_v8  }
 0xc66   :  { %v2949_v30 = vpop.xlane.xlu1 %2948 }
 0xc67   :  { %v2959_v23 = vmul.f32 %v2949_v30, %v12912_v16 }
 0xc69   :  { %v2991_v25 = vadd.f32 1e-05, %v2959_v23 }
 0xc6b   :  { %10227 = vrsqrt.f32 %v2991_v25  ;;  %vm3001_vm14 = vweird.f32 %v2991_v25 }
 0xc6e   :  { %v2952_v19 = vpop.xlane.xlu0 %2951 }
 0xc6f   :  { %v2960_v34 = vmul.f32 %v2952_v19, %v12912_v16 }
 0xc71   :  { %v10228_v3 = vpop.eup %10227  ;;  %v2992_v1 = vadd.f32 1e-05, %v2960_v34 }
 0xc72   :  { %v2996_v13 = vmul.f32 %v10228_v3, %v2991_v25  ;;  %vm3002_vm12 = vweird.f32 %v10228_v3 }
 0xc73   :  { %10229 = vrsqrt.f32 %v2992_v1  ;;  %vm3003_vm2 = vmor %vm3001_vm14, %vm3002_vm12  ;;  %vm3011_vm13 = vweird.f32 %v2992_v1 }
 0xc74   :  { %v2997_v20 = vmul.f32 %v10228_v3, %v2996_v13 }
 0xc76   :  { %v2998_v24 = vmul.f32 0.5, %v2997_v20 }
 0xc78   :  { %v2999_v26 = vsub.f32 1.5, %v2998_v24 }
 0xc79   :  { %v10230_v12 = vpop.eup %10229 }
 0xc7a   :  { %v3006_v11 = vmul.f32 %v10230_v12, %v2992_v1  ;;  %v3000_v57 = vmul.f32 %v10228_v3, %v2999_v26  ;;  %vm3012_vm10 = vweird.f32 %v10230_v12 }
 0xc7b   :  { %vm3013_vm1 = vmor %vm3011_vm13, %vm3012_vm10  ;;  %vm3093_vm10 = vcmask 859136  }
 0xc7c   :  { %v3007_v35 = vmul.f32 %v10230_v12, %v3006_v11  ;;  %v3004_v49 = vsel %vm3003_vm2, %v10228_v3, %v3000_v57  ;;  %vm3096_vm2 = vcmask 1041224  }
 0xc7e   :  { %v2970_v14 = vpop.permute.xlu1 %2969  ;;  %v2927_v28 = vpop.xlane.xlu0 %2926  ;;  %v3008_v22 = vmul.f32 0.5, %v3007_v35 }
 0xc7f   :  { %v2987_v17 = vmul.f32 %v2970_v14, %v2939_v62  ;;  %v2938_v53 = vmul.f32 %v12912_v16, %v2927_v28  ;;  %v3051_v62 = vpop.permute.xlu2 %3050 }
 0xc80   :  { %v3009_v2 = vsub.f32 1.5, %v3008_v22 }
 0xc81   :  { %v3035_v42 = vmul.f32 %v3004_v49, %v2987_v17  ;;  %v12944_v45 = vsub.f32 %v2914_v41, %v2938_v53 }
 0xc82   :  { %v3010_v38 = vmul.f32 %v10230_v12, %v3009_v2 }
 0xc83   :  { %v12946_v36 = vadd.f32 %v3046_v61, %v3035_v42  ;;  %v2946_v47 = vmul.f32 %v12944_v45, %v12944_v45 }
 0xc84   :  { %v3014_v32 = vsel %vm3013_vm1, %v10230_v12, %v3010_v38  ;;  %vm13876_vm1 = vcmask 376928  }
 0xc85   :  { %3077 = vst.sshfl [vmem:[#allocation1] sm:$0xff pattern:$0x73625140] %v12946_v36  ;;  %v2956_v37 = vsel %vm13884_vm8, %v2946_v47, 0.0  ;;  %v3070_v18 = vrot.slane %v12946_v36, 7  ;;  %v3036_v59 = vmul.f32 %v3014_v32, %v2988_v9 }
 0xc86   :  { %2957 = vadd.xlane.f32.xlu0 %v2956_v37  ;;  %3068 = vst.msk [vmem:[#allocation4] sm:$0x1] %vm3067_vm3, %v12946_v36 }
 0xc87   :  { %v12955_v39 = vrot.slane %v3070_v18, 2  ;;  %v12965_v55 = vadd.f32 %v3051_v62, %v3036_v59 }
 0xc89   :  { %3072 = vrot.lane.b32.xlu1 %v12955_v39, %s10455_s16  ;;  %v3147_v7 = vrot.slane %v12965_v55, 7 }
 0xc8b   :  { %v3148_v44 = vrot.slane %v3147_v7, 2 }
 0xc8c   :  { %v3079_v52 = vld [vmem:[#allocation1 + $0x1] ss:$4 sm:$0xff] }
 0xc8d   :  { %3085 = vst.sshfl [vmem:[#allocation1] sm:$0xff pattern:$0x73625140] %v12946_v36 }
 0xc91   :  { %3080 = vrot.lane.b32.xlu1 %v3079_v52, %s10456_s11  ;;  %v2980_v40 = vpop.permute.xlu0 %2979 }
 0xc94   :  { %v12962_v43 = vld [vmem:[#allocation1 + $0x1] ss:$4 sm:$0xff] }
 0xc95   :  { %3100 = vst.sshfl [vmem:[#allocation1] sm:$0xff pattern:$0x73625140] %v12946_v36  ;;  %v7298_v18 = vrot.slane %v12962_v43, 9 }
 0xc99   :  { %3429 = vrot.lane.b32.xlu1 %v12965_v55, %s10457_s24 }
 0xc9a   :  { %3371 = vrot.lane.b32.xlu0 %v12946_v36, %s10458_s8  ;;  %s10484_s8 = smov 119  }
 0xc9c   :  { %v12971_v50 = vld [vmem:[#allocation1 + $0x2] ss:$4 sm:$0xff] }
 0xc9d   :  { %3108 = vst.sshfl [vmem:[#allocation1] sm:$0xff pattern:$0x73625140] %v12946_v36 }
 0xca1   :  { %3149 = vrot.lane.b32.xlu1 %v3148_v44, %s10459_s19 }
 0xca2   :  { %3433 = vrot.lane.b32.xlu0 %v3148_v44, %s10460_s25 }
 0xca4   :  { %v12975_v33 = vld [vmem:[#allocation1 + $0x2] ss:$4 sm:$0xff] }
 0xca5   :  { %3118 = vst.sshfl [vmem:[#allocation1] sm:$0xff pattern:$0x73625140] %v12946_v36  ;;  %v7299_v43 = vrot.slane %v12975_v33, 9 }
 0xca9   :  { %v2924_v56 = vpop.xlane.xlu1 %2923 }
 0xcaa   :  { %v2937_v31 = vmul.f32 %v12912_v16, %v2924_v56 }
 0xcac   :  { %v12979_v10 = vld [vmem:[#allocation1 + $0x3] ss:$4 sm:$0xff]  ;;  %v2941_v15 = vsub.f32 %v2913_v0, %v2937_v31 }
 0xcad   :  { %3126 = vst.sshfl [vmem:[#allocation1] sm:$0xff pattern:$0x73625140] %v12946_v36 }
 0xcae   :  { %v2945_v61 = vmul.f32 %v2941_v15, %v2941_v15  ;;  %v2989_v57 = vmul.f32 %v2980_v40, %v2941_v15 }
 0xcb0   :  { %v2953_v27 = vsel %vm13884_vm8, %v2945_v61, 0.0  ;;  %vm3328_vm8 = vcmask 680328  }
 0xcb1   :  { %2954 = vadd.xlane.f32.xlu2 %v2953_v27 }
 0xcb4   :  { %v12985_v4 = vld [vmem:[#allocation1 + $0x3] ss:$4 sm:$0xff] }
 0xcb5   :  { %3154 = vst.sshfl [vmem:[#allocation1] sm:$0xff pattern:$0x73625140] %v12965_v55 }
 0xcbc   :  { %v12988_v6 = vld [vmem:[#allocation1 + $0x1] ss:$4 sm:$0xff] }
 0xcbd   :  { %3167 = vst.sshfl [vmem:[#allocation1] sm:$0xff pattern:$0x73625140] %v12965_v55 }
 0xcc1   :  { %v3056_v29 = vpop.permute.xlu1 %3055 }
 0xcc4   :  { %v12991_v60 = vld [vmem:[#allocation1 + $0x1] ss:$4 sm:$0xff] }
 0xcc5   :  { %3177 = vst.sshfl [vmem:[#allocation1] sm:$0xff pattern:$0x73625140] %v12965_v55  ;;  %v7301_v44 = vrot.slane %v12991_v60, 9 }
 0xcc9   :  { %2984 = vperm.xlu2 %9504, %v2966_v5   ;;  %v13007_v21 = vpop.permute.xlu1 %3060 }
 0xccc   :  { %v12997_v41 = vld [vmem:[#allocation1 + $0x2] ss:$4 sm:$0xff] }
 0xccd   :  { %3185 = vst.sshfl [vmem:[#allocation1] sm:$0xff pattern:$0x73625140] %v12965_v55 }
 0xcd1   :  { %3142 = vrot.lane.b32.xlu2 %v12965_v55, %s10460_s25  ;;  %s10485_s25 = smov 26  }
 0xcd4   :  { %v13001_v46 = vld [vmem:[#allocation1 + $0x2] ss:$4 sm:$0xff] }
 0xcd5   :  { %3195 = vst.sshfl [vmem:[#allocation1] sm:$0xff pattern:$0x73625140] %v12965_v55  ;;  %v7302_v33 = vrot.slane %v13001_v46, 9 }
 0xcdc   :  { %v13004_v51 = vld [vmem:[#allocation1 + $0x3] ss:$4 sm:$0xff] }
 0xcdd   :  { %3208 = vst.sshfl [vmem:[#allocation1] sm:$0xff pattern:$0x73625140] %v12965_v55 }
 0xce4   :  { %v13016_v53 = vld [vmem:[#allocation1 + $0x3] ss:$4 sm:$0xff] }
 0xce5   :  { %v7303_v15 = vrot.slane %v13016_v53, 9 }
 0xcf9   :  { %v2958_v48 = vpop.xlane.xlu0 %2957 }
 0xcfa   :  { %v2962_v8 = vmul.f32 %v2958_v48, %v12912_v16 }
 0xcfb   :  { %v3073_v58 = vpop.permute.xlu1 %3072 }
 0xcfc   :  { %3076 = vst.msk [vmem:[#allocation4] sm:$0x1] %vm3075_vm9, %v3073_v58  ;;  %v2994_v25 = vadd.f32 1e-05, %v2962_v8 }
 0xcfe   :  { %vm3031_vm12 = vweird.f32 %v2994_v25 }
 0xd03   :  { %v3081_v0 = vpop.permute.xlu1 %3080 }
 0xd04   :  { %3084 = vst.msk [vmem:[#allocation4] sm:$0x1] %vm13883_vm15, %v3081_v0  ;;  %vm3350_vm15 = vcmask 206850  }
 0xd0b   :  { %v13088_v0 = vpop.permute.xlu1 %3429 }
 0xd0c   :  { %v3372_v63 = vpop.permute.xlu0 %3371 }
 0xd0d   :  { %3374 = vst.msk [vmem:[#allocation4 + $0x1] sm:$0x1] %vm3067_vm3, %v3372_v63  ;;  %vm3097_vm3 = vcmask 92162  }
 0xd0e   :  { %3376 = vst.msk [vmem:[#allocation4 + $0x1] sm:$0x1] %vm3075_vm9, %v12955_v39  ;;  %vm13084_vm13 = vmor %vm3097_vm3, %vm3096_vm2  ;;  %vm13875_vm9 = vcmask 663928   ;;  %vm3163_vm2 = vcmask 1041136   ;;  %vm3164_vm3 = vcmask 2050  }
 0xd24   :  { %v2955_v30 = vpop.xlane.xlu2 %2954 }
 0xd25   :  { %v2961_v23 = vmul.f32 %v2955_v30, %v12912_v16  ;;  %v3150_v30 = vpop.permute.xlu1 %3149 }
 0xd27   :  { %v2993_v19 = vadd.f32 1e-05, %v2961_v23 }
 0xd29   :  { %10231 = vrsqrt.f32 %v2993_v19  ;;  %vm3021_vm4 = vweird.f32 %v2993_v19 }
 0xd2a   :  { %10233 = vrsqrt.f32 %v2994_v25 }
 0xd2c   :  { %v2985_v47 = vpop.permute.xlu2 %2984 }
 0xd2d   :  { %v2990_v37 = vmul.f32 %v2985_v47, %v12944_v45  ;;  %v7300_v45 = vrot.slane %v12985_v4, 9 }
 0xd2f   :  { %v10232_v34 = vpop.eup %10231 }
 0xd30   :  { %v3016_v3 = vmul.f32 %v10232_v34, %v2993_v19  ;;  %v10234_v1 = vpop.eup %10233  ;;  %vm3022_vm0 = vweird.f32 %v10232_v34  ;;  %v13098_v19 = vpop.permute.xlu0 %3433 }
 0xd31   :  { %v3026_v20 = vmul.f32 %v10234_v1, %v2994_v25  ;;  %vm3023_vm11 = vmor %vm3021_vm4, %vm3022_vm0  ;;  %vm3032_vm6 = vweird.f32 %v10234_v1  ;;  %vm3137_vm0 = vcmask 1041320   ;;  %vm3138_vm4 = vcmask 190466  }
 0xd32   :  { %v3017_v13 = vmul.f32 %v10232_v34, %v3016_v3  ;;  %vm3033_vm14 = vmor %vm3031_vm12, %vm3032_vm6  ;;  %vm13868_vm6 = vcmask 950928  }
 0xd33   :  { %v3027_v12 = vmul.f32 %v10234_v1, %v3026_v20  ;;  %vm13122_vm12 = vmor %vm3138_vm4, %vm3137_vm0  ;;  %vm13872_vm4 = vcmask 286728  }
 0xd34   :  { %v3018_v24 = vmul.f32 0.5, %v3017_v13  ;;  %vm13131_vm0 = vmor %vm3164_vm3, %vm3163_vm2  ;;  %vm3204_vm2 = vcmask 1041232   ;;  %vm3205_vm3 = vcmask 100354  }
 0xd35   :  { %v3028_v16 = vmul.f32 0.5, %v3027_v12 }
 0xd36   :  { %v3019_v26 = vsub.f32 1.5, %v3018_v24 }
 0xd37   :  { %v3029_v49 = vsub.f32 1.5, %v3028_v16 }
 0xd38   :  { %v3020_v11 = vmul.f32 %v10232_v34, %v3019_v26 }
 0xd39   :  { %v3030_v22 = vmul.f32 %v10234_v1, %v3029_v49 }
 0xd3a   :  { %v3024_v14 = vsel %vm3023_vm11, %v10232_v34, %v3020_v11  ;;  %vm3134_vm11 = vcmask 957440  }
 0xd3b   :  { %v3037_v28 = vmul.f32 %v3024_v14, %v2989_v57  ;;  %v3034_v2 = vsel %vm3033_vm14, %v10234_v1, %v3030_v22  ;;  %vm13873_vm14 = vcmask 475328  }
 0xd3c   :  { %v3038_v54 = vmul.f32 %v3034_v2, %v2990_v37 }
 0xd3d   :  { %v13014_v17 = vadd.f32 %v3056_v29, %v3037_v28 }
 0xd3e   :  { %v13031_v38 = vadd.f32 %v13007_v21, %v3038_v54 }
 0xd3f   :  { %3231 = vst.sshfl [vmem:[#allocation1] sm:$0xff pattern:$0x73625140] %v13014_v17  ;;  %3491 = vrot.lane.b32.xlu2 %v13014_v17, %s10461_s15  ;;  %3219 = vrot.lane.b32.xlu0 %v13014_v17, %s10462_s4  ;;  %v3224_v35 = vrot.slane %v13014_v17, 7 }
 0xd40   :  { %v3300_v32 = vrot.slane %v13031_v38, 7 }
 0xd41   :  { %v3225_v42 = vrot.slane %v3224_v35, 2 }
 0xd42   :  { %v3301_v9 = vrot.slane %v3300_v32, 2 }
 0xd43   :  { %3226 = vrot.lane.b32.xlu1 %v3225_v42, %s10463_s30 }
 0xd46   :  { %v3233_v39 = vld [vmem:[#allocation1 + $0x1] ss:$4 sm:$0xff] }
 0xd47   :  { %3244 = vst.sshfl [vmem:[#allocation1] sm:$0xff pattern:$0x73625140] %v13014_v17  ;;  %3090 = vrot.lane.b32.xlu2 %v7298_v18, %s10464_s2  ;;  %3495 = vrot.lane.b32.xlu0 %v3225_v42, %s10462_s4 }
 0xd4b   :  { %3103 = vrot.lane.b32.xlu1 %v12971_v50, %s10465_s9 }
 0xd4e   :  { %v3246_v52 = vld [vmem:[#allocation1 + $0x1] ss:$4 sm:$0xff] }
 0xd4f   :  { %3254 = vst.sshfl [vmem:[#allocation1] sm:$0xff pattern:$0x73625140] %v13014_v17  ;;  %3131 = vrot.lane.b32.xlu0 %v7300_v45, %s10457_s24  ;;  %3295 = vrot.lane.b32.xlu2 %v13031_v38, %s10466_s1  ;;  %v7304_v7 = vrot.slane %v3246_v52, 9  ;;  %s10483_s24 = smov 49  }
 0xd53   :  { %3553 = vrot.lane.b32.xlu1 %v13031_v38, %s10467_s5 }
 0xd56   :  { %v3256_v59 = vld [vmem:[#allocation1 + $0x2] ss:$4 sm:$0xff] }
 0xd57   :  { %3262 = vst.sshfl [vmem:[#allocation1] sm:$0xff pattern:$0x73625140] %v13014_v17  ;;  %3180 = vrot.lane.b32.xlu0 %v12997_v41, %s10468_s6  ;;  %3557 = vrot.lane.b32.xlu2 %v3301_v9, %s10466_s1  ;;  %v13074_v41 = vpop.permute.xlu2 %3142 }
 0xd5b   :  { %3302 = vrot.lane.b32.xlu1 %v3301_v9, %s10469_s28 }
 0xd5e   :  { %v3264_v62 = vld [vmem:[#allocation1 + $0x2] ss:$4 sm:$0xff] }
 0xd5f   :  { %3276 = vst.sshfl [vmem:[#allocation1] sm:$0xff pattern:$0x73625140] %v13014_v17  ;;  %3234 = vrot.lane.b32.xlu0 %v3233_v39, %s10470_s29  ;;  %3113 = vrot.lane.b32.xlu2 %v7299_v43, %s10471_s26  ;;  %v7305_v31 = vrot.slane %v3264_v62, 9 }
 0xd63   :  { %3121 = vrot.lane.b32.xlu1 %v12979_v10, %s10472_s20 }
 0xd66   :  { %v3278_v50 = vld [vmem:[#allocation1 + $0x3] ss:$4 sm:$0xff] }
 0xd67   :  { %3284 = vst.sshfl [vmem:[#allocation1] sm:$0xff pattern:$0x73625140] %v13014_v17  ;;  %3249 = vrot.lane.b32.xlu0 %v7304_v7, %s10473_s3  ;;  %3157 = vrot.lane.b32.xlu2 %v12988_v6, %s10474_s23 }
 0xd6b   :  { %3172 = vrot.lane.b32.xlu1 %v7301_v44, %s10475_s14 }
 0xd6e   :  { %v3286_v56 = vld [vmem:[#allocation1 + $0x3] ss:$4 sm:$0xff] }
 0xd6f   :  { %3312 = vst.sshfl [vmem:[#allocation1] sm:$0xff pattern:$0x73625140] %v13031_v38  ;;  %3190 = vrot.lane.b32.xlu2 %v7302_v33, %s10476_s22  ;;  %v7306_v6 = vrot.slane %v3286_v56, 9 }
 0xd73   :  { %3198 = vrot.lane.b32.xlu1 %v13004_v51, %s10477_s10 }
 0xd76   :  { %v3314_v10 = vld [vmem:[#allocation1 + $0x1] ss:$4 sm:$0xff] }
 0xd77   :  { %3320 = vst.sshfl [vmem:[#allocation1] sm:$0xff pattern:$0x73625140] %v13031_v38  ;;  %3315 = vrot.lane.b32.xlu0 %v3314_v10, %s10478_s7  ;;  %3267 = vrot.lane.b32.xlu2 %v7305_v31, %s10479_s13 }
 0xd7b   :  { %3213 = vrot.lane.b32.xlu1 %v7303_v15, %s10461_s15  ;;  %s151_s15 = sshll.u32 %s10487_s12, 4  ;;  %s152_s15 = int_to_ptr.vmem [resolvable:$true] %s151_s15 }
 0xd7c   :  { %154 = dma.hbm_to_vmem [thread:$0]  %s150_s27, 53760, %s152_s15, [#allocation3] }
 0xd7e   :  { %v3322_v61 = vld [vmem:[#allocation1 + $0x1] ss:$4 sm:$0xff] }
 0xd7f   :  { %3330 = vst.sshfl [vmem:[#allocation1] sm:$0xff pattern:$0x73625140] %v13031_v38  ;;  %3279 = vrot.lane.b32.xlu2 %v3278_v50, %s10480_s0  ;;  %v7307_v27 = vrot.slane %v3322_v61, 9 }
 0xd83   :  { %3257 = vrot.lane.b32.xlu1 %v3256_v59, %s10481_s18 }
 0xd86   :  { %v3332_v4 = vld [vmem:[#allocation1 + $0x2] ss:$4 sm:$0xff] }
 0xd87   :  { %3333 = vrot.lane.b32.xlu0 %v3332_v4, %s10482_s21  ;;  %3338 = vst.sshfl [vmem:[#allocation1] sm:$0xff pattern:$0x73625140] %v13031_v38  ;;  %3325 = vrot.lane.b32.xlu2 %v7307_v27, %s10483_s24 }
 0xd8b   :  { %3289 = vrot.lane.b32.xlu1 %v7306_v6, %s10467_s5 }
 0xd8e   :  { %v3340_v60 = vld [vmem:[#allocation1 + $0x2] ss:$4 sm:$0xff] }
 0xd8f   :  { %v7308_v5 = vrot.slane %v3340_v60, 9  ;;  %3353 = vst.sshfl [vmem:[#allocation1] sm:$0xff pattern:$0x73625140] %v13031_v38 }
 0xd91   :  { %3343 = vrot.lane.b32.xlu2 %v7308_v5, %s10484_s8 }
 0xd96   :  { %v3355_v46 = vld [vmem:[#allocation1 + $0x3] ss:$4 sm:$0xff] }
 0xd97   :  { %3361 = vst.sshfl [vmem:[#allocation1] sm:$0xff pattern:$0x73625140] %v13031_v38  ;;  %3356 = vrot.lane.b32.xlu1 %v3355_v46, %s10485_s25 }
 0xd99   :  { %v13079_v51 = vpop.permute.xlu2 %3491 }
 0xd9e   :  { %v13081_v29 = vld [vmem:[#allocation1 + $0x3] ss:$4 sm:$0xff] }
 0xd9f   :  { %3377 = vst.sshfl [vmem:[#allocation1] sm:$0xff pattern:$0x73625140] %v12946_v36 }
 0xda1   :  { %v3091_v21 = vpop.permute.xlu2 %3090 }
 0xda2   :  { %v3092_v40 = vrot.slane %v3091_v21, 6 }
 0xda4   :  { %v3094_v48 = vsel %vm3093_vm10, %v3092_v40, %v3091_v21  ;;  %vm3160_vm10 = vcmask 769024  }
 0xda5   :  { %3099 = vst.msk [vmem:[#allocation4] sm:$0x5] %vm13084_vm13, %v3094_v48 }
 0xda6   :  { %v3379_v63 = vld [vmem:[#allocation1 + $0x1] ss:$4 sm:$0xff] }
 0xda7   :  { %3380 = vrot.lane.b32.xlu1 %v3379_v63, %s10455_s16  ;;  %3384 = vst.sshfl [vmem:[#allocation1] sm:$0xff pattern:$0x73625140] %v12946_v36  ;;  %s10486_s16 = smov 61  }
 0xda9   :  { %v13094_v8 = vpop.permute.xlu2 %3295 }
 0xdae   :  { %v3386_v23 = vld [vmem:[#allocation1 + $0x1] ss:$4 sm:$0xff] }
 0xdaf   :  { %v7310_v25 = vrot.slane %v3386_v23, 9  ;;  %3395 = vst.sshfl [vmem:[#allocation1] sm:$0xff pattern:$0x73625140] %v12946_v36 }
 0xdb1   :  { %3389 = vrot.lane.b32.xlu2 %v7310_v25, %s10456_s11  ;;  %v13100_v34 = vpop.permute.xlu2 %3557  ;;  %v13106_v13 = vpop.permute.xlu0 %3219 }
 0xdb5   :  { %v13102_v3 = vpop.permute.xlu1 %3226 }
 0xdb6   :  { %v3397_v1 = vld [vmem:[#allocation1 + $0x2] ss:$4 sm:$0xff] }
 0xdb7   :  { %3398 = vrot.lane.b32.xlu0 %v3397_v1, %s10464_s2  ;;  %3402 = vst.sshfl [vmem:[#allocation1] sm:$0xff pattern:$0x73625140] %v12946_v36 }
 0xdb9   :  { %v3114_v26 = vpop.permute.xlu2 %3113  ;;  %v13112_v11 = vpop.permute.xlu0 %3495 }
 0xdbd   :  { %v3104_v20 = vpop.permute.xlu1 %3103 }
 0xdbe   :  { %3107 = vst.msk [vmem:[#allocation4 + $0x2] sm:$0x1] %vm13876_vm1, %v3104_v20  ;;  %v3404_v24 = vld [vmem:[#allocation1 + $0x2] ss:$4 sm:$0xff]  ;;  %vm3273_vm1 = vcmask 10242  }
 0xdbf   :  { %v7311_v12 = vrot.slane %v3404_v24, 9  ;;  %3411 = vst.sshfl [vmem:[#allocation1] sm:$0xff pattern:$0x73625140] %v12946_v36 }
 0xdc0   :  { %3117 = vst.msk [vmem:[#allocation4 + $0x2] sm:$0x1] %vm13875_vm9, %v3114_v26  ;;  %vm3272_vm9 = vcmask 1041144  }
 0xdc1   :  { %3407 = vrot.lane.b32.xlu1 %v7311_v12, %s10465_s9  ;;  %v3158_v28 = vpop.permute.xlu2 %3157  ;;  %v3132_v35 = vpop.permute.xlu0 %3131 }
 0xdc2   :  { %v3133_v42 = vrot.slane %v3132_v35, 6  ;;  %v3159_v22 = vrot.slane %v3158_v28, 6 }
 0xdc4   :  { %v3135_v37 = vsel %vm3134_vm11, %v3133_v42, %v3132_v35  ;;  %v3161_v54 = vsel %vm3160_vm10, %v3159_v22, %v3158_v28  ;;  %vm13871_vm11 = vcmask 573728   ;;  %vm3201_vm10 = vcmask 867328  }
 0xdc5   :  { %v13114_v57 = vpop.permute.xlu1 %3553 }
 0xdc6   :  { %v3413_v14 = vld [vmem:[#allocation1 + $0x3] ss:$4 sm:$0xff] }
 0xdc7   :  { %3414 = vrot.lane.b32.xlu0 %v3413_v14, %s10471_s26  ;;  %3418 = vst.sshfl [vmem:[#allocation1] sm:$0xff pattern:$0x73625140] %v12946_v36 }
 0xdc9   :  { %v3191_v39 = vpop.permute.xlu2 %3190  ;;  %v3181_v52 = vpop.permute.xlu0 %3180 }
 0xdcd   :  { %v13118_v16 = vpop.permute.xlu1 %3302 }
 0xdce   :  { %v3420_v53 = vld [vmem:[#allocation1 + $0x3] ss:$4 sm:$0xff]  ;;  %v3304_v48 = vrot.slane %v13118_v16, 6 }
 0xdcf   :  { %v7312_v49 = vrot.slane %v3420_v53, 9  ;;  %3437 = vst.sshfl [vmem:[#allocation1] sm:$0xff pattern:$0x73625140] %v12965_v55 }
 0xdd1   :  { %3423 = vrot.lane.b32.xlu2 %v7312_v49, %s10472_s20  ;;  %v3268_v9 = vpop.permute.xlu2 %3267  ;;  %v3235_v50 = vpop.permute.xlu0 %3234 }
 0xdd2   :  { %v3236_v31 = vrot.slane %v3235_v50, 6  ;;  %v3269_v4 = vrot.slane %v3268_v9, 6 }
 0xdd5   :  { %v3122_v36 = vpop.permute.xlu1 %3121 }
 0xdd6   :  { %3125 = vst.msk [vmem:[#allocation4 + $0x2] sm:$0x1] %vm13868_vm6, %v3122_v36  ;;  %v3439_v18 = vld [vmem:[#allocation1 + $0x1] ss:$4 sm:$0xff]  ;;  %vm13870_vm6 = vcmask 860728  }
 0xdd7   :  { %3140 = vst.msk [vmem:[#allocation4 + $0x2] sm:$0x5] %vm13122_vm12, %v3135_v37 }
 0xdd8   :  { %3146 = vst.msk [vmem:[#allocation4 + $0x4] sm:$0x1] %vm13873_vm14, %v13074_v41  ;;  %vm13877_vm14 = vcmask 959128  }
 0xdd9   :  { %3440 = vrot.lane.b32.xlu2 %v3439_v18, %s10459_s19  ;;  %3447 = vst.sshfl [vmem:[#allocation1] sm:$0xff pattern:$0x73625140] %v12965_v55  ;;  %v3280_v56 = vpop.permute.xlu2 %3279  ;;  %v3250_v6 = vpop.permute.xlu0 %3249 }
 0xdda   :  { %3153 = vst.msk [vmem:[#allocation4 + $0x4] sm:$0x1] %vm13869_vm5, %v3150_v30  ;;  %vm13145_vm5 = vmor %vm3205_vm3, %vm3204_vm2  ;;  %vm13879_vm2 = vcmask 672128   ;;  %vm3237_vm3 = vcmask 965632  }
 0xddb   :  { %3166 = vst.msk [vmem:[#allocation4 + $0x4] sm:$0x5] %vm13131_vm0, %v3161_v54  ;;  %v3238_v61 = vsel %vm3237_vm3, %v3236_v31, %v3235_v50  ;;  %vm13881_vm3 = vcmask 294928  }
 0xddd   :  { %v3173_v45 = vpop.permute.xlu1 %3172 }
 0xdde   :  { %3176 = vst.msk [vmem:[#allocation4 + $0x6] sm:$0x1] %vm13872_vm4, %v3173_v45  ;;  %vm3241_vm4 = vcmask 198658  }
 0xddf   :  { %3184 = vst.msk [vmem:[#allocation4 + $0x6] sm:$0x1] %vm13871_vm11, %v3181_v52  ;;  %vm3240_vm11 = vcmask 1041328  }
 0xde0   :  { %v3449_v32 = vld [vmem:[#allocation1 + $0x1] ss:$4 sm:$0xff]  ;;  %3194 = vst.msk [vmem:[#allocation4 + $0x6] sm:$0x1] %vm13870_vm6, %v3191_v39  ;;  %vm13882_vm6 = vcmask 385128  }
 0xde1   :  { %v7313_v59 = vrot.slane %v3449_v32, 9  ;;  %3456 = vst.sshfl [vmem:[#allocation1] sm:$0xff pattern:$0x73625140] %v12965_v55  ;;  %v3326_v41 = vpop.permute.xlu2 %3325 }
 0xde3   :  { %3452 = vrot.lane.b32.xlu2 %v7313_v59, %s10474_s23 }
 0xde5   :  { %v3199_v43 = vpop.permute.xlu1 %3198 }
 0xde6   :  { %v3200_v7 = vrot.slane %v3199_v43, 6 }
 0xde8   :  { %v3202_v44 = vsel %vm3201_vm10, %v3200_v7, %v3199_v43  ;;  %v3458_v33 = vld [vmem:[#allocation1 + $0x2] ss:$4 sm:$0xff]  ;;  %vm13154_vm10 = vmor %vm3241_vm4, %vm3240_vm11  ;;  %vm13880_vm4 = vcmask 770528  }
 0xde9   :  { %3207 = vst.msk [vmem:[#allocation4 + $0x6] sm:$0x5] %vm13145_vm5, %v3202_v44  ;;  %3459 = vrot.lane.b32.xlu0 %v3458_v33, %s10475_s14  ;;  %vm13167_vm11 = vmor %vm3273_vm1, %vm3272_vm9  ;;  %vm3308_vm1 = vcmask 1041240   ;;  %vm3309_vm9 = vcmask 108546   ;;  %v3316_v63 = vpop.permute.xlu0 %3315 }
 0xdea   :  { %3463 = vst.sshfl [vmem:[#allocation1] sm:$0xff pattern:$0x73625140] %v12965_v55 }
 0xdeb   :  { %v3344_v30 = vpop.permute.xlu2 %3343 }
 0xded   :  { %v3214_v10 = vpop.permute.xlu1 %3213 }
 0xdee   :  { %3217 = vst.msk [vmem:[#allocation4 + $0x8] sm:$0x1] %vm13882_vm6, %v3214_v10  ;;  %vm3349_vm6 = vcmask 1041336  }
 0xdef   :  { %3223 = vst.msk [vmem:[#allocation4 + $0x8] sm:$0x1] %vm13879_vm2, %v13106_v13  ;;  %vm3305_vm2 = vcmask 875520  }
 0xdf0   :  { %3230 = vst.msk [vmem:[#allocation4 + $0x8] sm:$0x1] %vm13877_vm14, %v13102_v3  ;;  %vm14073_vm14 = vcmask 777216   ;;  %v3306_v3 = vsel %vm3305_vm2, %v3304_v48, %v13118_v16  ;;  %vm13886_vm2 = vcmask 491728  }
 0xdf1   :  { %v3465_v27 = vld [vmem:[#allocation1 + $0x2] ss:$4 sm:$0xff]  ;;  %3243 = vst.msk [vmem:[#allocation4 + $0x8] sm:$0x5] %vm13154_vm10, %v3238_v61  ;;  %v3270_v21 = vsel %vm14073_vm14, %v3269_v4, %v3268_v9  ;;  %vm3298_vm14 = vcmask 868928  }
 0xdf2   :  { %v7314_v60 = vrot.slane %v3465_v27, 9  ;;  %3472 = vst.sshfl [vmem:[#allocation1] sm:$0xff pattern:$0x73625140] %v12965_v55 }
 0xdf3   :  { %3253 = vst.msk [vmem:[#allocation4 + $0xa] sm:$0x1] %vm13878_vm7, %v3250_v6  ;;  %vm13885_vm7 = vcmask 581928  }
 0xdf4   :  { %3468 = vrot.lane.b32.xlu2 %v7314_v60, %s10468_s6 }
 0xdf5   :  { %v3258_v46 = vpop.permute.xlu1 %3257 }
 0xdf6   :  { %3261 = vst.msk [vmem:[#allocation4 + $0xa] sm:$0x1] %vm13880_vm4, %v3258_v46  ;;  %vm13179_vm4 = vmor %vm3309_vm9, %vm3308_vm1  ;;  %vm3346_vm1 = vcmask 973824   ;;  %vm13887_vm9 = vcmask 967328  }
 0xdf7   :  { %3275 = vst.msk [vmem:[#allocation4 + $0xa] sm:$0x5] %vm13167_vm11, %v3270_v21 }
 0xdf8   :  { %3283 = vst.msk [vmem:[#allocation4 + $0xc] sm:$0x1] %vm13881_vm3, %v3280_v56  ;;  %vm3318_vm3 = vcmask 393328  }
 0xdf9   :  { %v3474_v40 = vld [vmem:[#allocation1 + $0x3] ss:$4 sm:$0xff] }
 0xdfa   :  { %3475 = vrot.lane.b32.xlu1 %v3474_v40, %s10476_s22  ;;  %3482 = vst.sshfl [vmem:[#allocation1] sm:$0xff pattern:$0x73625140] %v12965_v55  ;;  %v3345_v55 = vrot.slane %v3344_v30, 6 }
 0xdfc   :  { %v3347_v24 = vsel %vm3346_vm1, %v3345_v55, %v3344_v30  ;;  %vm14080_vm1 = vcmask 376928  }
 0xdfd   :  { %v3290_v25 = vpop.permute.xlu1 %3289 }
 0xdfe   :  { %3293 = vst.msk [vmem:[#allocation4 + $0xc] sm:$0x1] %vm13885_vm7, %v3290_v25  ;;  %vm13191_vm7 = vmor %vm3350_vm15, %vm3349_vm6  ;;  %vm14078_vm15 = vcmask 572416   ;;  %vm14079_vm6 = vcmask 852528  }
 0xdff   :  { %3299 = vst.msk [vmem:[#allocation4 + $0xc] sm:$0x1] %vm3298_vm14, %v13094_v8  ;;  %v3334_v8 = vpop.permute.xlu0 %3333 }
 0xe00   :  { %3311 = vst.msk [vmem:[#allocation4 + $0xc] sm:$0x5] %vm13179_vm4, %v3306_v3 }
 0xe01   :  { %v3484_v1 = vld [vmem:[#allocation1 + $0x3] ss:$4 sm:$0xff]  ;;  %3319 = vst.msk [vmem:[#allocation4 + $0xe] sm:$0x1] %vm3318_vm3, %v3316_v63  ;;  %v3559_v63 = vrot.slane %v13100_v34, 6 }
 0xe02   :  { %v7315_v13 = vrot.slane %v3484_v1, 9  ;;  %3499 = vst.sshfl [vmem:[#allocation1] sm:$0xff pattern:$0x73625140] %v13014_v17 }
 0xe03   :  { %3329 = vst.msk [vmem:[#allocation4 + $0xe] sm:$0x1] %vm3328_vm8, %v3326_v41 }
 0xe04   :  { %3487 = vrot.lane.b32.xlu2 %v7315_v13, %s10477_s10  ;;  %3337 = vst.msk [vmem:[#allocation4 + $0xe] sm:$0x1] %vm13887_vm9, %v3334_v8  ;;  %vm14086_vm9 = vcmask 286728  }
 0xe05   :  { %3352 = vst.msk [vmem:[#allocation4 + $0xe] sm:$0x5] %vm13191_vm7, %v3347_v24 }
 0xe09   :  { %v3501_v26 = vld [vmem:[#allocation1 + $0x1] ss:$4 sm:$0xff]  ;;  %v3357_v12 = vpop.permute.xlu1 %3356 }
 0xe0a   :  { %3502 = vrot.lane.b32.xlu1 %v3501_v26, %s10463_s30  ;;  %3509 = vst.sshfl [vmem:[#allocation1] sm:$0xff pattern:$0x73625140] %v13014_v17 }
 0xe0b   :  { %3360 = vst.msk [vmem:[#allocation4 + $0x10] sm:$0x1] %vm13886_vm2, %v3357_v12  ;;  %v3390_v16 = vpop.permute.xlu2 %3389  ;;  %vm14084_vm2 = vcmask 475328  }
 0xe0c   :  { %v3391_v53 = vrot.slane %v3390_v16, 6 }
 0xe0e   :  { %v3392_v42 = vsel %vm14078_vm15, %v3391_v53, %v3390_v16  ;;  %vm14082_vm15 = vcmask 670720  }
 0xe11   :  { %v3511_v14 = vld [vmem:[#allocation1 + $0x1] ss:$4 sm:$0xff] }
 0xe12   :  { %v7316_v28 = vrot.slane %v3511_v14, 9  ;;  %3518 = vst.sshfl [vmem:[#allocation1] sm:$0xff pattern:$0x73625140] %v13014_v17 }
 0xe14   :  { %3514 = vrot.lane.b32.xlu2 %v7316_v28, %s10470_s29 }
 0xe19   :  { %v3520_v35 = vld [vmem:[#allocation1 + $0x2] ss:$4 sm:$0xff]  ;;  %v3381_v49 = vpop.permute.xlu1 %3380 }
 0xe1a   :  { %3521 = vrot.lane.b32.xlu0 %v3520_v35, %s10473_s3  ;;  %3525 = vst.sshfl [vmem:[#allocation1] sm:$0xff pattern:$0x73625140] %v13014_v17 }
 0xe1b   :  { %3383 = vst.msk [vmem:[#allocation4 + $0x1] sm:$0x1] %vm14079_vm6, %v3381_v49  ;;  %vm3443_vm6 = vcmask 482304  }
 0xe1c   :  { %3394 = vst.msk [vmem:[#allocation4 + $0x1] sm:$0x5] %vm13084_vm13, %v3392_v42  ;;  %vm14081_vm13 = vcmask 663928  }
 0xe21   :  { %v3527_v36 = vld [vmem:[#allocation1 + $0x2] ss:$4 sm:$0xff] }
 0xe22   :  { %v7317_v22 = vrot.slane %v3527_v36, 9  ;;  %3537 = vst.sshfl [vmem:[#allocation1] sm:$0xff pattern:$0x73625140] %v13014_v17 }
 0xe24   :  { %3530 = vrot.lane.b32.xlu1 %v7317_v22, %s10481_s18 }
 0xe29   :  { %v3539_v37 = vld [vmem:[#allocation1 + $0x3] ss:$4 sm:$0xff]  ;;  %v3399_v18 = vpop.permute.xlu0 %3398 }
 0xe2a   :  { %3540 = vrot.lane.b32.xlu0 %v3539_v37, %s10479_s13  ;;  %3544 = vst.sshfl [vmem:[#allocation1] sm:$0xff pattern:$0x73625140] %v13014_v17 }
 0xe2b   :  { %3401 = vst.msk [vmem:[#allocation4 + $0x3] sm:$0x1] %vm14080_vm1, %v3399_v18  ;;  %v3424_v39 = vpop.permute.xlu2 %3423  ;;  %vm14083_vm1 = vcmask 950928  }
 0xe2c   :  { %v3425_v32 = vrot.slane %v3424_v39, 6 }
 0xe2e   :  { %v3426_v17 = vsel %vm14082_vm15, %v3425_v32, %v3424_v39  ;;  %vm14090_vm15 = vcmask 672128  }
 0xe31   :  { %v3546_v54 = vld [vmem:[#allocation1 + $0x3] ss:$4 sm:$0xff] }
 0xe32   :  { %v7318_v45 = vrot.slane %v3546_v54, 9  ;;  %3564 = vst.sshfl [vmem:[#allocation1] sm:$0xff pattern:$0x73625140] %v13031_v38 }
 0xe33   :  { %v3408_v58 = vpop.permute.xlu1 %3407  ;;  %v3441_v52 = vpop.permute.xlu2 %3440 }
 0xe34   :  { %3549 = vrot.lane.b32.xlu0 %v7318_v45, %s10480_s0  ;;  %3410 = vst.msk [vmem:[#allocation4 + $0x3] sm:$0x1] %vm14081_vm13, %v3408_v58  ;;  %v3442_v43 = vrot.slane %v3441_v52, 6  ;;  %vm14085_vm13 = vcmask 762328  }
 0xe36   :  { %v3444_v7 = vsel %vm3443_vm6, %v3442_v43, %v3441_v52  ;;  %vm14091_vm6 = vcmask 959128  }
 0xe39   :  { %v3566_v9 = vld [vmem:[#allocation1 + $0x1] ss:$4 sm:$0xff]  ;;  %v3415_v59 = vpop.permute.xlu0 %3414 }
 0xe3a   :  { %3567 = vrot.lane.b32.xlu1 %v3566_v9, %s10469_s28  ;;  %3571 = vst.sshfl [vmem:[#allocation1] sm:$0xff pattern:$0x73625140] %v13031_v38 }
 0xe3b   :  { %3417 = vst.msk [vmem:[#allocation4 + $0x3] sm:$0x1] %vm14083_vm1, %v3415_v59  ;;  %vm3505_vm1 = vcmask 678912  }
 0xe3c   :  { %3428 = vst.msk [vmem:[#allocation4 + $0x3] sm:$0x5] %vm13122_vm12, %v3426_v17  ;;  %vm14087_vm12 = vcmask 573728  }
 0xe3d   :  { %3432 = vst.msk [vmem:[#allocation4 + $0x5] sm:$0x1] %vm14084_vm2, %v13088_v0  ;;  %v3453_v50 = vpop.permute.xlu2 %3452  ;;  %v7309_v0 = vrot.slane %v13081_v29, 9  ;;  %vm14089_vm2 = vcmask 385128  }
 0xe3e   :  { %3436 = vst.msk [vmem:[#allocation4 + $0x5] sm:$0x1] %vm14085_vm13, %v13098_v19  ;;  %vm14092_vm13 = vcmask 483528  }
 0xe3f   :  { %3446 = vst.msk [vmem:[#allocation4 + $0x5] sm:$0x5] %vm13131_vm0, %v3444_v7  ;;  %vm14088_vm0 = vcmask 860728  }
 0xe40   :  { %3455 = vst.msk [vmem:[#allocation4 + $0x7] sm:$0x1] %vm14086_vm9, %v3453_v50  ;;  %vm3478_vm9 = vcmask 580608  }
 0xe41   :  { %v3573_v44 = vld [vmem:[#allocation1 + $0x1] ss:$4 sm:$0xff] }
 0xe42   :  { %v7319_v33 = vrot.slane %v3573_v44, 9  ;;  %3580 = vst.sshfl [vmem:[#allocation1] sm:$0xff pattern:$0x73625140] %v13031_v38 }
 0xe44   :  { %3576 = vrot.lane.b32.xlu1 %v7319_v33, %s10478_s7 }
 0xe49   :  { %v3582_v47 = vld [vmem:[#allocation1 + $0x2] ss:$4 sm:$0xff] }
 0xe4a   :  { %3583 = vrot.lane.b32.xlu2 %v3582_v47, %s10483_s24  ;;  %3587 = vst.sshfl [vmem:[#allocation1] sm:$0xff pattern:$0x73625140] %v13031_v38 }
 0xe4e   :  { %v3469_v31 = vpop.permute.xlu2 %3468 }
 0xe51   :  { %v3589_v19 = vld [vmem:[#allocation1 + $0x2] ss:$4 sm:$0xff] }
 0xe52   :  { %3366 = vrot.lane.b32.xlu2 %v7309_v0, %s10486_s16  ;;  %v7320_v2 = vrot.slane %v3589_v19, 9  ;;  %3599 = vst.sshfl [vmem:[#allocation1] sm:$0xff pattern:$0x73625140] %v13031_v38 }
 0xe54   :  { %3592 = vrot.lane.b32.xlu0 %v7320_v2, %s10482_s21 }
 0xe59   :  { %v3601_v56 = vld [vmem:[#allocation1 + $0x3] ss:$4 sm:$0xff] }
 0xe5a   :  { %3606 = vst.sshfl [vmem:[#allocation1] sm:$0xff pattern:$0x73625140] %v13031_v38 }
 0xe5b   :  { %v3460_v29 = vpop.permute.xlu0 %3459 }
 0xe5c   :  { %3602 = vrot.lane.b32.xlu0 %v3601_v56, %s10484_s8  ;;  %3462 = vst.msk [vmem:[#allocation4 + $0x7] sm:$0x1] %vm14087_vm12, %v3460_v29  ;;  %vm3533_vm12 = vcmask 490496  }
 0xe5d   :  { %3471 = vst.msk [vmem:[#allocation4 + $0x7] sm:$0x1] %vm14088_vm0, %v3469_v31  ;;  %vm14094_vm0 = vcmask 294928  }
 0xe5e   :  { %v3488_v60 = vpop.permute.xlu2 %3487 }
 0xe61   :  { %v3608_v10 = vld [vmem:[#allocation1 + $0x3] ss:$4 sm:$0xff] }
 0xe62   :  { %v7321_v61 = vrot.slane %v3608_v10, 9 }
 0xe64   :  { %3611 = vrot.lane.b32.xlu1 %v7321_v61, %s10485_s25 }
 0xe6c   :  { %v3476_v27 = vpop.permute.xlu1 %3475 }
 0xe6d   :  { %v3477_v4 = vrot.slane %v3476_v27, 6 }
 0xe6e   :  { %v3515_v21 = vpop.permute.xlu2 %3514 }
 0xe6f   :  { %v3479_v6 = vsel %vm3478_vm9, %v3477_v4, %v3476_v27  ;;  %vm3560_vm9 = vcmask 588800  }
 0xe70   :  { %3481 = vst.msk [vmem:[#allocation4 + $0x7] sm:$0x5] %vm13145_vm5, %v3479_v6  ;;  %vm14093_vm5 = vcmask 770528   ;;  %v3561_v25 = vsel %vm3560_vm9, %v3559_v63, %v13100_v34 }
 0xe71   :  { %3490 = vst.msk [vmem:[#allocation4 + $0x9] sm:$0x1] %vm14089_vm2, %v3488_v60  ;;  %vm3369_vm2 = vcmask 778728  }
 0xe72   :  { %3494 = vst.msk [vmem:[#allocation4 + $0x9] sm:$0x1] %vm14090_vm15, %v13079_v51  ;;  %vm3595_vm15 = vcmask 687104  }
 0xe73   :  { %3498 = vst.msk [vmem:[#allocation4 + $0x9] sm:$0x1] %vm14091_vm6, %v13112_v11 }
 0xe7c   :  { %v3503_v38 = vpop.permute.xlu1 %3502 }
 0xe7d   :  { %v3504_v41 = vrot.slane %v3503_v38, 6 }
 0xe7f   :  { %v3506_v46 = vsel %vm3505_vm1, %v3504_v41, %v3503_v38 }
 0xe80   :  { %3508 = vst.msk [vmem:[#allocation4 + $0x9] sm:$0x5] %vm13154_vm10, %v3506_v46  ;;  %vm14095_vm10 = vcmask 581928  }
 0xe81   :  { %3517 = vst.msk [vmem:[#allocation4 + $0xb] sm:$0x1] %vm14092_vm13, %v3515_v21 }
 0xe8c   :  { %v3522_v62 = vpop.permute.xlu0 %3521 }
 0xe8d   :  { %3524 = vst.msk [vmem:[#allocation4 + $0xb] sm:$0x1] %vm14093_vm5, %v3522_v62 }
 0xe96   :  { %v3531_v40 = vpop.permute.xlu1 %3530 }
 0xe97   :  { %v3532_v48 = vrot.slane %v3531_v40, 6 }
 0xe99   :  { %v3534_v51 = vsel %vm3533_vm12, %v3532_v48, %v3531_v40 }
 0xe9a   :  { %3536 = vst.msk [vmem:[#allocation4 + $0xb] sm:$0x5] %vm13167_vm11, %v3534_v51  ;;  %vm14096_vm11 = vcmask 967328  }
 0xe9c   :  { %v3541_v11 = vpop.permute.xlu0 %3540 }
 0xe9d   :  { %3543 = vst.msk [vmem:[#allocation4 + $0xd] sm:$0x1] %vm14094_vm0, %v3541_v11 }
 0xea4   :  { %v3584_v30 = vpop.permute.xlu2 %3583 }
 0xea6   :  { %v3550_v15 = vpop.permute.xlu0 %3549 }
 0xea7   :  { %3552 = vst.msk [vmem:[#allocation4 + $0xd] sm:$0x1] %vm14095_vm10, %v3550_v15 }
 0xea8   :  { %3556 = vst.msk [vmem:[#allocation4 + $0xd] sm:$0x1] %vm3298_vm14, %v13114_v57 }
 0xea9   :  { %3563 = vst.msk [vmem:[#allocation4 + $0xd] sm:$0x5] %vm13179_vm4, %v3561_v25  ;;  %vm14097_vm4 = vcmask 491728  }
 0xeac   :  { %v3367_v5 = vpop.permute.xlu2 %3366  ;;  %v3568_v3 = vpop.permute.xlu1 %3567 }
 0xead   :  { %3370 = vst.msk [vmem:[#allocation4 + $0x10] sm:$0x1] %vm3369_vm2, %v3367_v5 }
 0xeae   :  { %3570 = vst.msk [vmem:[#allocation4 + $0xf] sm:$0x1] %vm3318_vm3, %v3568_v3 }
 0xeb6   :  { %v3577_v55 = vpop.permute.xlu1 %3576 }
 0xeb7   :  { %3579 = vst.msk [vmem:[#allocation4 + $0xf] sm:$0x1] %vm3328_vm8, %v3577_v55 }
 0xeb8   :  { %3586 = vst.msk [vmem:[#allocation4 + $0xf] sm:$0x1] %vm14096_vm11, %v3584_v30 }
 0xec6   :  { %v3593_v34 = vpop.permute.xlu0 %3592 }
 0xec7   :  { %v3594_v1 = vrot.slane %v3593_v34, 6 }
 0xec9   :  { %v3596_v13 = vsel %vm3595_vm15, %v3594_v1, %v3593_v34 }
 0xeca   :  { %3598 = vst.msk [vmem:[#allocation4 + $0xf] sm:$0x5] %vm13191_vm7, %v3596_v13 }
 0xece   :  { %v3603_v57 = vpop.permute.xlu0 %3602 }
 0xecf   :  { %3605 = vst.msk [vmem:[#allocation4 + $0x11] sm:$0x1] %vm14097_vm4, %v3603_v57 }
 0xed6   :  { %v3612_v23 = vpop.permute.xlu1 %3611 }
 0xed7   :  { %3614 = vst.msk [vmem:[#allocation4 + $0x11] sm:$0x1] %vm3369_vm2, %v3612_v23 }
 0xed8   :  { %10428 = dma.done.wait [#allocation3], 53760 }
 0xed9   :  { %10429 = vsyncadd [#allocation3], 4294913536  ;;  %v7492_v8 = vld [vmem:[#allocation2 + $0x150] sm:$0xf]  ;;  %v9060_v24 = vld [vmem:[#allocation2 + $0x164] sm:$0xf0] }
 0xeda   :  { %v7684_v26 = vld [vmem:[#allocation2 + $0x2d0] sm:$0xf]  ;;  %v7493_v12 = vor.u32 %v9060_v24, %v7492_v8  ;;  %v9108_v14 = vld [vmem:[#allocation2 + $0x2e4] sm:$0xf0]  ;;  %v7468_v42 = vld [vmem:[#allocation2 + $0x120] sm:$0xf] }
 0xedb   :  { %v7876_v28 = vld [vmem:[#allocation2 + $0x450] sm:$0xf]  ;;  %v9156_v16 = vld [vmem:[#allocation2 + $0x464] sm:$0xf0]  ;;  %v7685_v53 = vor.u32 %v9108_v14, %v7684_v26  ;;  %v9054_v22 = vld [vmem:[#allocation2 + $0x134] sm:$0xf0] }
 0xedc   :  { %v7877_v35 = vor.u32 %v9156_v16, %v7876_v28  ;;  %v8068_v49 = vld [vmem:[#allocation2 + $0x5d0] sm:$0xf]  ;;  %v9204_v20 = vld [vmem:[#allocation2 + $0x5e4] sm:$0xf0]  ;;  %6193 = vmatpush.bf16.msrb.mxu2 %v7493_v12  ;;  %v7660_v37 = vld [vmem:[#allocation2 + $0x2a0] sm:$0xf]  ;;  %v7469_v39 = vor.u32 %v9054_v22, %v7468_v42 }
 0xedd   :  { %v8069_v36 = vor.u32 %v9204_v20, %v8068_v49  ;;  %v9102_v18 = vld [vmem:[#allocation2 + $0x2b4] sm:$0xf0]  ;;  %6206 = vmatpush.bf16.msra.mxu3 %v7685_v53  ;;  %v7852_v45 = vld [vmem:[#allocation2 + $0x420] sm:$0xf]  ;;  %v7444_v59 = vld [vmem:[#allocation2 + $0xf0] sm:$0xf] }
 0xede   :  { %6219 = vmatpush.bf16.msra.mxu0 %v7877_v35  ;;  %v7661_v54 = vor.u32 %v9102_v18, %v7660_v37  ;;  %v9150_v58 = vld [vmem:[#allocation2 + $0x434] sm:$0xf0]  ;;  %v8044_v52 = vld [vmem:[#allocation2 + $0x5a0] sm:$0xf]  ;;  %v9048_v43 = vld [vmem:[#allocation2 + $0x104] sm:$0xf0] }
 0xedf   :  { %6232 = vmatpush.bf16.msra.mxu1 %v8069_v36  ;;  %v7853_v32 = vor.u32 %v9150_v58, %v7852_v45  ;;  %v9198_v9 = vld [vmem:[#allocation2 + $0x5b4] sm:$0xf0]  ;;  %v7636_v7 = vld [vmem:[#allocation2 + $0x270] sm:$0xf]  ;;  %v9096_v50 = vld [vmem:[#allocation2 + $0x284] sm:$0xf0]  ;;  %v7445_v33 = vor.u32 %v9048_v43, %v7444_v59 }
 0xee0   :  { %v8045_v17 = vor.u32 %v9198_v9, %v8044_v52  ;;  %v7828_v44 = vld [vmem:[#allocation2 + $0x3f0] sm:$0xf]  ;;  %6194 = vmatpush.bf16.msrb.mxu2 %v7469_v39  ;;  %v9144_v47 = vld [vmem:[#allocation2 + $0x404] sm:$0xf0]  ;;  %v7637_v2 = vor.u32 %v9096_v50, %v7636_v7  ;;  %v7420_v29 = vld [vmem:[#allocation2 + $0xc0] sm:$0xf] }
 0xee1   :  { %v8020_v0 = vld [vmem:[#allocation2 + $0x570] sm:$0xf]  ;;  %v9192_v19 = vld [vmem:[#allocation2 + $0x584] sm:$0xf0]  ;;  %6207 = vmatpush.bf16.msra.mxu3 %v7661_v54  ;;  %v7829_v56 = vor.u32 %v9144_v47, %v7828_v44  ;;  %v9042_v31 = vld [vmem:[#allocation2 + $0xd4] sm:$0xf0] }
 0xee2   :  { %6220 = vmatpush.bf16.msra.mxu0 %v7853_v32  ;;  %v7612_v10 = vld [vmem:[#allocation2 + $0x240] sm:$0xf]  ;;  %v8021_v61 = vor.u32 %v9192_v19, %v8020_v0  ;;  %v9090_v27 = vld [vmem:[#allocation2 + $0x254] sm:$0xf0]  ;;  %v7421_v41 = vor.u32 %v9042_v31, %v7420_v29  ;;  %v7396_v62 = vld [vmem:[#allocation2 + $0x90] sm:$0xf] }
 0xee3   :  { %6233 = vmatpush.bf16.msra.mxu1 %v8045_v17  ;;  %v7804_v4 = vld [vmem:[#allocation2 + $0x3c0] sm:$0xf]  ;;  %v9138_v6 = vld [vmem:[#allocation2 + $0x3d4] sm:$0xf0]  ;;  %v7613_v46 = vor.u32 %v9090_v27, %v7612_v10  ;;  %v9036_v40 = vld [vmem:[#allocation2 + $0xa4] sm:$0xf0] }
 0xee4   :  { %v7996_v60 = vld [vmem:[#allocation2 + $0x540] sm:$0xf]  ;;  %v9186_v38 = vld [vmem:[#allocation2 + $0x554] sm:$0xf0]  ;;  %6195 = vmatpush.bf16.msrb.mxu2 %v7445_v33  ;;  %v7805_v21 = vor.u32 %v9138_v6, %v7804_v4  ;;  %v7588_v48 = vld [vmem:[#allocation2 + $0x210] sm:$0xf]  ;;  %v7397_v5 = vor.u32 %v9036_v40, %v7396_v62 }
 0xee5   :  { %6208 = vmatpush.bf16.msra.mxu3 %v7637_v2  ;;  %v7997_v51 = vor.u32 %v9186_v38, %v7996_v60  ;;  %v9084_v11 = vld [vmem:[#allocation2 + $0x224] sm:$0xf0]  ;;  %v7780_v63 = vld [vmem:[#allocation2 + $0x390] sm:$0xf]  ;;  %v7372_v34 = vld [vmem:[#allocation2 + $0x60] sm:$0xf] }
 0xee6   :  { %6221 = vmatpush.bf16.msra.mxu0 %v7829_v56  ;;  %v9132_v30 = vld [vmem:[#allocation2 + $0x3a4] sm:$0xf0]  ;;  %v7972_v15 = vld [vmem:[#allocation2 + $0x510] sm:$0xf]  ;;  %v7589_v3 = vor.u32 %v9084_v11, %v7588_v48  ;;  %v9030_v1 = vld [vmem:[#allocation2 + $0x74] sm:$0xf0] }
 0xee7   :  { %6234 = vmatpush.bf16.msra.mxu1 %v8021_v61  ;;  %v9180_v25 = vld [vmem:[#allocation2 + $0x524] sm:$0xf0]  ;;  %v7781_v55 = vor.u32 %v9132_v30, %v7780_v63  ;;  %v7564_v13 = vld [vmem:[#allocation2 + $0x1e0] sm:$0xf]  ;;  %v9078_v23 = vld [vmem:[#allocation2 + $0x1f4] sm:$0xf0]  ;;  %v7373_v14 = vor.u32 %v9030_v1, %v7372_v34 }
 0xee8   :  { %6196 = vmatpush.bf16.msrb.mxu2 %v7421_v41  ;;  %v7973_v57 = vor.u32 %v9180_v25, %v7972_v15  ;;  %v7756_v8 = vld [vmem:[#allocation2 + $0x360] sm:$0xf]  ;;  %v9126_v24 = vld [vmem:[#allocation2 + $0x374] sm:$0xf0]  ;;  %v7565_v28 = vor.u32 %v9078_v23, %v7564_v13  ;;  %v7348_v53 = vld [vmem:[#allocation2 + $0x30] sm:$0xf] }
 0xee9   :  { %6209 = vmatpush.bf16.msra.mxu3 %v7613_v46  ;;  %v7948_v26 = vld [vmem:[#allocation2 + $0x4e0] sm:$0xf]  ;;  %v9174_v12 = vld [vmem:[#allocation2 + $0x4f4] sm:$0xf0]  ;;  %v7757_v16 = vor.u32 %v9126_v24, %v7756_v8  ;;  %v9024_v35 = vld [vmem:[#allocation2 + $0x44] sm:$0xf0] }
 0xeea   :  { %6222 = vmatpush.bf16.msra.mxu0 %v7805_v21  ;;  %v7540_v49 = vld [vmem:[#allocation2 + $0x1b0] sm:$0xf]  ;;  %v7949_v20 = vor.u32 %v9174_v12, %v7948_v26  ;;  %v9072_v42 = vld [vmem:[#allocation2 + $0x1c4] sm:$0xf0]  ;;  %v7349_v39 = vor.u32 %v9024_v35, %v7348_v53  ;;  %v7324_v54 = vld [vmem:[#allocation2] sm:$0xf] }
 0xeeb   :  { %6235 = vmatpush.bf16.msra.mxu1 %v7997_v51  ;;  %v7732_v36 = vld [vmem:[#allocation2 + $0x330] sm:$0xf]  ;;  %v9120_v22 = vld [vmem:[#allocation2 + $0x344] sm:$0xf0]  ;;  %v9018_v45 = vld [vmem:[#allocation2 + $0x14] sm:$0xf0]  ;;  %v7541_v58 = vor.u32 %v9072_v42, %v7540_v49 }
 0xeec   :  { %6197 = vmatpush.bf16.msrb.mxu2 %v7397_v5  ;;  %v7924_v37 = vld [vmem:[#allocation2 + $0x4b0] sm:$0xf]  ;;  %v9168_v18 = vld [vmem:[#allocation2 + $0x4c4] sm:$0xf0]  ;;  %v7733_v52 = vor.u32 %v9120_v22, %v7732_v36  ;;  %v7516_v32 = vld [vmem:[#allocation2 + $0x180] sm:$0xf]  ;;  %v7325_v0 = vor.u32 %v9018_v45, %v7324_v54 }
 0xeed   :  { %6210 = vmatpush.bf16.msra.mxu3 %v7589_v3  ;;  %v9066_v9 = vld [vmem:[#allocation2 + $0x194] sm:$0xf0]  ;;  %v7708_v59 = vld [vmem:[#allocation2 + $0x300] sm:$0xf]  ;;  %v7925_v43 = vor.u32 %v9168_v18, %v7924_v37  ;;  %v8260_v44 = vld [vmem:[#allocation2 + $0x750] sm:$0xf] }
 0xeee   :  { %6223 = vmatpush.bf16.msra.mxu0 %v7781_v55  ;;  %v9114_v17 = vld [vmem:[#allocation2 + $0x314] sm:$0xf0]  ;;  %v7900_v7 = vld [vmem:[#allocation2 + $0x480] sm:$0xf]  ;;  %v9252_v33 = vld [vmem:[#allocation2 + $0x764] sm:$0xf0]  ;;  %v7517_v29 = vor.u32 %v9066_v9, %v7516_v32 }
 0xeef   :  { %6236 = vmatpush.bf16.msra.mxu1 %v7973_v57  ;;  %v9162_v50 = vld [vmem:[#allocation2 + $0x494] sm:$0xf0]  ;;  %v8452_v47 = vld [vmem:[#allocation2 + $0x8d0] sm:$0xf]  ;;  %v9300_v19 = vld [vmem:[#allocation2 + $0x8e4] sm:$0xf0]  ;;  %v7709_v31 = vor.u32 %v9114_v17, %v7708_v59  ;;  %v8261_v4 = vor.u32 %v9252_v33, %v8260_v44 }
 0xef0   :  { %6198 = vmatpush.bf16.msrb.mxu2 %v7373_v14  ;;  %v8644_v2 = vld [vmem:[#allocation2 + $0xa50] sm:$0xf]  ;;  %v9348_v56 = vld [vmem:[#allocation2 + $0xa64] sm:$0xf0]  ;;  %v7901_v27 = vor.u32 %v9162_v50, %v7900_v7  ;;  %v8453_v6 = vor.u32 %v9300_v19, %v8452_v47  ;;  %v8236_v38 = vld [vmem:[#allocation2 + $0x720] sm:$0xf] }
 0xef1   :  { %6211 = vmatpush.bf16.msra.mxu3 %v7565_v28  ;;  %v8836_v10 = vld [vmem:[#allocation2 + $0xbd0] sm:$0xf]  ;;  %v9396_v61 = vld [vmem:[#allocation2 + $0xbe4] sm:$0xf0]  ;;  %v8645_v60 = vor.u32 %v9348_v56, %v8644_v2  ;;  %v9246_v41 = vld [vmem:[#allocation2 + $0x734] sm:$0xf0] }
 0xef2   :  { %6224 = vmatpush.bf16.msra.mxu0 %v7757_v16  ;;  %v8428_v46 = vld [vmem:[#allocation2 + $0x8a0] sm:$0xf]  ;;  %v8837_v21 = vor.u32 %v9396_v61, %v8836_v10  ;;  %v9294_v62 = vld [vmem:[#allocation2 + $0x8b4] sm:$0xf0]  ;;  %v8237_v30 = vor.u32 %v9246_v41, %v8236_v38  ;;  %v8212_v5 = vld [vmem:[#allocation2 + $0x6f0] sm:$0xf] }
 0xef3   :  { %6237 = vmatpush.bf16.msra.mxu1 %v7949_v20  ;;  %v8620_v40 = vld [vmem:[#allocation2 + $0xa20] sm:$0xf]  ;;  %v9342_v48 = vld [vmem:[#allocation2 + $0xa34] sm:$0xf0]  ;;  %v8429_v15 = vor.u32 %v9294_v62, %v8428_v46  ;;  %v9240_v3 = vld [vmem:[#allocation2 + $0x704] sm:$0xf0] }
 0xef4   :  { %6199 = vmatpush.bf16.msrb.mxu2 %v7349_v39  ;;  %v8812_v51 = vld [vmem:[#allocation2 + $0xba0] sm:$0xf]  ;;  %v9390_v11 = vld [vmem:[#allocation2 + $0xbb4] sm:$0xf0]  ;;  %v8621_v25 = vor.u32 %v9342_v48, %v8620_v40  ;;  %v8404_v55 = vld [vmem:[#allocation2 + $0x870] sm:$0xf]  ;;  %v8213_v24 = vor.u32 %v9240_v3, %v8212_v5 }
 0xef5   :  { %6212 = vmatpush.bf16.msra.mxu3 %v7541_v58  ;;  %v3619_v63 = vld [vmem:[#allocation4] sm:$0xff]  ;;  %v8813_v34 = vor.u32 %v9390_v11, %v8812_v51  ;;  %v9288_v1 = vld [vmem:[#allocation2 + $0x884] sm:$0xf0]  ;;  %v8596_v13 = vld [vmem:[#allocation2 + $0x9f0] sm:$0xf]  ;;  %vm14098_vm7 = vcmask 785408  }
 0xef6   :  { %6225 = vmatpush.bf16.msra.mxu0 %v7733_v52  ;;  %3625 = vst [vmem:[#allocation1] ss:$4 sm:$0xff] %v3619_v63  ;;  %v9336_v57 = vld [vmem:[#allocation2 + $0xa04] sm:$0xf0]  ;;  %v8788_v23 = vld [vmem:[#allocation2 + $0xb70] sm:$0xf]  ;;  %v8405_v14 = vor.u32 %v9288_v1, %v8404_v55  ;;  %vm14099_vm8 = vmmov %vm14098_vm7 }
 0xef7   :  { %6238 = vmatpush.bf16.msra.mxu1 %v7925_v43  ;;  %v9384_v8 = vld [vmem:[#allocation2 + $0xb84] sm:$0xf0]  ;;  %v8188_v26 = vld [vmem:[#allocation2 + $0x6c0] sm:$0xf]  ;;  %v9234_v12 = vld [vmem:[#allocation2 + $0x6d4] sm:$0xf0]  ;;  %v8597_v28 = vor.u32 %v9336_v57, %v8596_v13 }
 0xef8   :  { %6200 = vmatpush.bf16.msrb.mxu2 %v7325_v0  ;;  %v8380_v16 = vld [vmem:[#allocation2 + $0x840] sm:$0xf]  ;;  %v9282_v53 = vld [vmem:[#allocation2 + $0x854] sm:$0xf0]  ;;  %v8789_v49 = vor.u32 %v9384_v8, %v8788_v23  ;;  %v8164_v37 = vld [vmem:[#allocation2 + $0x690] sm:$0xf]  ;;  %v8189_v54 = vor.u32 %v9234_v12, %v8188_v26 }
 0xef9   :  { %6213 = vmatpush.bf16.msra.mxu3 %v7517_v29  ;;  %v8572_v35 = vld [vmem:[#allocation2 + $0x9c0] sm:$0xf]  ;;  %v9330_v20 = vld [vmem:[#allocation2 + $0x9d4] sm:$0xf0]  ;;  %v9228_v18 = vld [vmem:[#allocation2 + $0x6a4] sm:$0xf0]  ;;  %v8381_v9 = vor.u32 %v9282_v53, %v8380_v16 }
 0xefa   :  { %6226 = vmatpush.bf16.msra.mxu0 %v7709_v31  ;;  %v8764_v42 = vld [vmem:[#allocation2 + $0xb40] sm:$0xf]  ;;  %v9378_v36 = vld [vmem:[#allocation2 + $0xb54] sm:$0xf0]  ;;  %v8356_v58 = vld [vmem:[#allocation2 + $0x810] sm:$0xf]  ;;  %v8573_v59 = vor.u32 %v9330_v20, %v8572_v35  ;;  %v8165_v56 = vor.u32 %v9228_v18, %v8164_v37 }
 0xefb   :  { %6239 = vmatpush.bf16.msra.mxu1 %v7901_v27  ;;  %v9276_v43 = vld [vmem:[#allocation2 + $0x824] sm:$0xf0]  ;;  %v8548_v17 = vld [vmem:[#allocation2 + $0x990] sm:$0xf]  ;;  %v8765_v44 = vor.u32 %v9378_v36, %v8764_v42  ;;  %v8140_v29 = vld [vmem:[#allocation2 + $0x660] sm:$0xf] }
 0xefc   :  { %6245 = vmatpush.bf16.msra.mxu2 %v8261_v4  ;;  %v3621_v50 = vld [vmem:[#allocation4 + $0x10] sm:$0x3]  ;;  %v9324_v33 = vld [vmem:[#allocation2 + $0x9a4] sm:$0xf0]  ;;  %v8357_v31 = vor.u32 %v9276_v43, %v8356_v58  ;;  %v9222_v61 = vld [vmem:[#allocation2 + $0x674] sm:$0xf0] }
 0xefd   :  { %6258 = vmatpush.bf16.msrb.mxu3 %v8453_v6  ;;  %v3628_v22 = vld.sshfl [vmem:[#allocation1] sm:$0xff pattern:$0x73625140]  ;;  %v3629_v39 = vld.sshfl [vmem:[#allocation1 + $0x8] sm:$0xff pattern:$0x73625140]  ;;  %v8549_v10 = vor.u32 %v9324_v33, %v8548_v17  ;;  %v8141_v62 = vor.u32 %v9222_v61, %v8140_v29  ;;  %vm14100_vm3 = vmmov %vm14098_vm7 }
 0xefe   :  { %6271 = vmatpush.bf16.msrb.mxu0 %v8645_v60  ;;  %v13276_v45 = vpack.c.bf16 %v3628_v22, %v3628_v22  ;;  %v13278_v52 = vpack.c.bf16 %v3629_v39, %v3629_v39  ;;  %v3630_v32 = vld.sshfl [vmem:[#allocation1 + $0x10] sm:$0xff pattern:$0x73625140]  ;;  %v3631_v47 = vld.sshfl [vmem:[#allocation1 + $0x18] sm:$0xff pattern:$0x73625140]  ;;  %vm14101_vm14 = vmmov %vm14100_vm3 }
 0xeff   :  { %6284 = vmatpush.bf16.msrb.mxu1 %v8837_v21  ;;  %v13280_v7 = vpack.c.bf16 %v3630_v32, %v3630_v32  ;;  %v8740_v0 = vld [vmem:[#allocation2 + $0xb10] sm:$0xf]  ;;  %v9372_v19 = vld [vmem:[#allocation2 + $0xb24] sm:$0xf0]  ;;  %3636 = vst [vmem:[#allocation1] ss:$4 sm:$0xff] %v3621_v50  ;;  %v13285_v2 = vpack.c.bf16 %v3631_v47, %v3631_v47  ;;  %vm14102_vm6 = vmmov %vm14100_vm3 }
 0xf00   :  { %6246 = vmatpush.bf16.msra.mxu2 %v8237_v30  ;;  %6214 = vmatmul.bf16.vlgmr.msra.gmra.mxu3 %v13278_v52  ;;  %v8332_v27 = vld [vmem:[#allocation2 + $0x7e0] sm:$0xf]  ;;  %v3620_v4 = vld [vmem:[#allocation4 + $0x8] sm:$0xff]  ;;  %v8741_v6 = vor.u32 %v9372_v19, %v8740_v0  ;;  %v9270_v60 = vld [vmem:[#allocation2 + $0x7f4] sm:$0xf0]  ;;  %s14103_s30 = sld [smem:[#allocation80_spill]] }
 0xf01   :  { %6259 = vmatpush.bf16.msrb.mxu3 %v8429_v15  ;;  %6201 = vmatmul.bf16.vlgmr.msrb.gmra.mxu2 %v13276_v45  ;;  %v8524_v38 = vld [vmem:[#allocation2 + $0x960] sm:$0xf]  ;;  %v9318_v41 = vld [vmem:[#allocation2 + $0x974] sm:$0xf0]  ;;  %3627 = vst [vmem:[#allocation1 + $0x20] ss:$4 sm:$0xff] %v3620_v4  ;;  %v8333_v40 = vor.u32 %v9270_v60, %v8332_v27  ;;  %vm14104_vm13 = vmmov %vm14100_vm3 }
 0xf02   :  { %6272 = vmatpush.bf16.msrb.mxu0 %v8621_v25  ;;  %v8716_v46 = vld [vmem:[#allocation2 + $0xae0] sm:$0xf]  ;;  %v9366_v21 = vld [vmem:[#allocation2 + $0xaf4] sm:$0xf0]  ;;  %6240 = vmatmul.bf16.vlgmr.msra.gmra.mxu1 %v13285_v2  ;;  %v8525_v48 = vor.u32 %v9318_v41, %v8524_v38  ;;  %v8116_v51 = vld [vmem:[#allocation2 + $0x630] sm:$0xf] }
 0xf03   :  { %6285 = vmatpush.bf16.msrb.mxu1 %v8813_v34  ;;  %6227 = vmatmul.bf16.vlgmr.msra.gmra.mxu0 %v13280_v7  ;;  %v9216_v11 = vld [vmem:[#allocation2 + $0x644] sm:$0xf0]  ;;  %v8308_v63 = vld [vmem:[#allocation2 + $0x7b0] sm:$0xf]  ;;  %v8717_v30 = vor.u32 %v9366_v21, %v8716_v46  ;;  %v8092_v34 = vld [vmem:[#allocation2 + $0x600] sm:$0xf] }
 0xf04   :  { %6247 = vmatpush.bf16.msra.mxu2 %v8213_v24  ;;  %v9264_v15 = vld [vmem:[#allocation2 + $0x7c4] sm:$0xf0]  ;;  %v8500_v25 = vld [vmem:[#allocation2 + $0x930] sm:$0xf]  ;;  %v8117_v1 = vor.u32 %v9216_v11, %v8116_v51  ;;  %v9210_v13 = vld [vmem:[#allocation2 + $0x614] sm:$0xf0] }
 0xf05   :  { %6260 = vmatpush.bf16.msrb.mxu3 %v8405_v14  ;;  %v9312_v5 = vld [vmem:[#allocation2 + $0x944] sm:$0xf0]  ;;  %v8692_v3 = vld [vmem:[#allocation2 + $0xab0] sm:$0xf]  ;;  %v8284_v57 = vld [vmem:[#allocation2 + $0x780] sm:$0xf]  ;;  %v8309_v8 = vor.u32 %v9264_v15, %v8308_v63  ;;  %v8093_v36 = vor.u32 %v9210_v13, %v8092_v34 }
 0xf06   :  { %6273 = vmatpush.bf16.msrb.mxu0 %v8597_v28  ;;  %v9360_v55 = vld [vmem:[#allocation2 + $0xac4] sm:$0xf0]  ;;  %v9258_v23 = vld [vmem:[#allocation2 + $0x794] sm:$0xf0]  ;;  %v8501_v24 = vor.u32 %v9312_v5, %v8500_v25  ;;  %v8476_v26 = vld [vmem:[#allocation2 + $0x900] sm:$0xf] }
 0xf07   :  { %6286 = vmatpush.bf16.msrb.mxu1 %v8789_v49  ;;  %v9306_v12 = vld [vmem:[#allocation2 + $0x914] sm:$0xf0]  ;;  %v8668_v14 = vld [vmem:[#allocation2 + $0xa80] sm:$0xf]  ;;  %v8693_v28 = vor.u32 %v9360_v55, %v8692_v3  ;;  %v8980_v53 = vld [vmem:[#allocation2 + $0xcf0] sm:$0xf]  ;;  %v8285_v39 = vor.u32 %v9258_v23, %v8284_v57 }
 0xf08   :  { %6248 = vmatpush.bf16.msra.mxu2 %v8189_v54  ;;  %v9354_v16 = vld [vmem:[#allocation2 + $0xa94] sm:$0xf0]  ;;  %v9432_v35 = vld [vmem:[#allocation2 + $0xd04] sm:$0xf0]  ;;  %v9057_v49 = vld [vmem:[#allocation2 + $0x154] sm:$0xf]  ;;  %v8477_v54 = vor.u32 %v9306_v12, %v8476_v26 }
 0xf09   :  { %6261 = vmatpush.bf16.msrb.mxu3 %v8381_v9  ;;  %v7494_v20 = vld [vmem:[#allocation2 + $0x168] sm:$0xf0]  ;;  %v9105_v42 = vld [vmem:[#allocation2 + $0x2d4] sm:$0xf]  ;;  %v8956_v32 = vld [vmem:[#allocation2 + $0xcc0] sm:$0xf]  ;;  %v8981_v43 = vor.u32 %v9432_v35, %v8980_v53 }
 0xf0a   :  { %6274 = vmatpush.bf16.msrb.mxu0 %v8573_v59  ;;  %v7686_v22 = vld [vmem:[#allocation2 + $0x2e8] sm:$0xf0]  ;;  %v9153_v37 = vld [vmem:[#allocation2 + $0x454] sm:$0xf]  ;;  %v9426_v9 = vld [vmem:[#allocation2 + $0xcd4] sm:$0xf0]  ;;  %v8669_v59 = vor.u32 %v9354_v16, %v8668_v14 }
 0xf0b   :  { %6287 = vmatpush.bf16.msrb.mxu1 %v8765_v44  ;;  %v7878_v18 = vld [vmem:[#allocation2 + $0x468] sm:$0xf0]  ;;  %v3632_v58 = vld.sshfl [vmem:[#allocation1 + $0x20] sm:$0xff pattern:$0x73625140]  ;;  %v7497_v44 = vor.u32 %v9057_v49, %v7494_v20  ;;  %v7689_v33 = vor.u32 %v9105_v42, %v7686_v22  ;;  %v8957_v60 = vor.u32 %v9426_v9, %v8956_v32  ;;  %vm7163_vm2 = vcmask 74752  }
 0xf0c   :  { %6249 = vmatpush.bf16.msra.mxu2 %v8165_v56  ;;  %v3633_v17 = vld.sshfl [vmem:[#allocation1 + $0x28] sm:$0xff pattern:$0x73625140]  ;;  %v3634_v50 = vld.sshfl [vmem:[#allocation1 + $0x30] sm:$0xff pattern:$0x73625140]  ;;  %v7881_v19 = vor.u32 %v9153_v37, %v7878_v18  ;;  %v13288_v56 = vpack.c.bf16 %v3632_v58, %v3632_v58 }
 0xf0d   :  { %6262 = vmatpush.bf16.msrb.mxu3 %v8357_v31  ;;  %v9051_v47 = vld [vmem:[#allocation2 + $0x124] sm:$0xf]  ;;  %v3635_v0 = vld.sshfl [vmem:[#allocation1 + $0x38] sm:$0xff pattern:$0x73625140]  ;;  %v13290_v61 = vpack.c.bf16 %v3633_v17, %v3633_v17  ;;  %s14105_s10 = sld [smem:[#allocation81_spill]] }
 0xf0e   :  { %6275 = vmatpush.bf16.msrb.mxu0 %v8549_v10  ;;  %v7470_v29 = vld [vmem:[#allocation2 + $0x138] sm:$0xf0]  ;;  %v9099_v31 = vld [vmem:[#allocation2 + $0x2a4] sm:$0xf]  ;;  %v13294_v38 = vpack.c.bf16 %v3635_v0, %v3635_v0  ;;  %v8932_v21 = vld [vmem:[#allocation2 + $0xc90] sm:$0xf] }
 0xf0f   :  { %6288 = vmatpush.bf16.msrb.mxu1 %v8741_v6  ;;  %v7662_v10 = vld [vmem:[#allocation2 + $0x2b8] sm:$0xf0]  ;;  %v9147_v27 = vld [vmem:[#allocation2 + $0x424] sm:$0xf]  ;;  %v13292_v6 = vpack.c.bf16 %v3634_v50, %v3634_v50  ;;  %v7473_v41 = vor.u32 %v9051_v47, %v7470_v29  ;;  %v7446_v51 = vld [vmem:[#allocation2 + $0x108] sm:$0xf0] }
 0xf10   :  { %6250 = vmatpush.bf16.msra.mxu2 %v8141_v62  ;;  %v7854_v4 = vld [vmem:[#allocation2 + $0x438] sm:$0xf0]  ;;  %v7665_v46 = vor.u32 %v9099_v31, %v7662_v10  ;;  %v9420_v62 = vld [vmem:[#allocation2 + $0xca4] sm:$0xf0]  ;;  %v9093_v11 = vld [vmem:[#allocation2 + $0x274] sm:$0xf] }
 0xf11   :  { %6263 = vmatpush.bf16.msrb.mxu3 %v8333_v40  ;;  %v9045_v40 = vld [vmem:[#allocation2 + $0xf4] sm:$0xf]  ;;  %v7638_v63 = vld [vmem:[#allocation2 + $0x288] sm:$0xf0]  ;;  %v8933_v25 = vor.u32 %v9420_v62, %v8932_v21  ;;  %v8908_v55 = vld [vmem:[#allocation2 + $0xc60] sm:$0xf] }
 0xf12   :  { %6276 = vmatpush.bf16.msrb.mxu0 %v8525_v48  ;;  %v7857_v48 = vor.u32 %v9147_v27, %v7854_v4  ;;  %v7830_v15 = vld [vmem:[#allocation2 + $0x408] sm:$0xf0]  ;;  %v7449_v5 = vor.u32 %v9045_v40, %v7446_v51  ;;  %v7641_v3 = vor.u32 %v9093_v11, %v7638_v63  ;;  %v9414_v34 = vld [vmem:[#allocation2 + $0xc74] sm:$0xf0]  ;;  %v7422_v57 = vld [vmem:[#allocation2 + $0xd8] sm:$0xf0] }
 0xf13   :  { %6289 = vmatpush.bf16.msrb.mxu1 %v8717_v30  ;;  %v9141_v30 = vld [vmem:[#allocation2 + $0x3f4] sm:$0xf]  ;;  %v9087_v23 = vld [vmem:[#allocation2 + $0x244] sm:$0xf]  ;;  %v7806_v26 = vld [vmem:[#allocation2 + $0x3d8] sm:$0xf0]  ;;  %v8909_v12 = vor.u32 %v9414_v34, %v8908_v55 }
 0xf14   :  { %6251 = vmatpush.bf16.msra.mxu2 %v8117_v1  ;;  %v9039_v1 = vld [vmem:[#allocation2 + $0xc4] sm:$0xf]  ;;  %v7833_v13 = vor.u32 %v9141_v30, %v7830_v15  ;;  %v8884_v16 = vld [vmem:[#allocation2 + $0xc30] sm:$0xf]  ;;  %v9408_v53 = vld [vmem:[#allocation2 + $0xc44] sm:$0xf0] }
 0xf15   :  { %6264 = vmatpush.bf16.msrb.mxu3 %v8309_v8  ;;  %v7614_v8 = vld [vmem:[#allocation2 + $0x258] sm:$0xf0]  ;;  %v7425_v14 = vor.u32 %v9039_v1, %v7422_v57  ;;  %v9033_v35 = vld [vmem:[#allocation2 + $0x94] sm:$0xf]  ;;  %v7398_v20 = vld [vmem:[#allocation2 + $0xa8] sm:$0xf0]  ;;  %v8885_v18 = vor.u32 %v9408_v53, %v8884_v16 }
 0xf16   :  { %6277 = vmatpush.bf16.msrb.mxu0 %v8501_v24  ;;  %v9135_v24 = vld [vmem:[#allocation2 + $0x3c4] sm:$0xf]  ;;  %v9081_v42 = vld [vmem:[#allocation2 + $0x214] sm:$0xf]  ;;  %v7782_v37 = vld [vmem:[#allocation2 + $0x3a8] sm:$0xf0] }
 0xf17   :  { %6290 = vmatpush.bf16.msrb.mxu1 %v8693_v28  ;;  %v7617_v28 = vor.u32 %v9087_v23, %v7614_v8  ;;  %v7809_v49 = vor.u32 %v9135_v24, %v7806_v26  ;;  %v9129_v22 = vld [vmem:[#allocation2 + $0x394] sm:$0xf]  ;;  %v9402_v32 = vld [vmem:[#allocation2 + $0xc14] sm:$0xf0]  ;;  %v9027_v9 = vld [vmem:[#allocation2 + $0x64] sm:$0xf] }
 0xf18   :  { %6252 = vmatpush.bf16.msra.mxu2 %v8093_v36  ;;  %v7590_v36 = vld [vmem:[#allocation2 + $0x228] sm:$0xf0]  ;;  %v9075_v17 = vld [vmem:[#allocation2 + $0x1e4] sm:$0xf]  ;;  %v7566_v50 = vld [vmem:[#allocation2 + $0x1f8] sm:$0xf0] }
 0xf19   :  { %6265 = vmatpush.bf16.msrb.mxu3 %v8285_v39  ;;  %v8860_v39 = vld [vmem:[#allocation2 + $0xc00] sm:$0xf]  ;;  %v7593_v58 = vor.u32 %v9081_v42, %v7590_v36  ;;  %v9201_v47 = vld [vmem:[#allocation2 + $0x5d4] sm:$0xf]  ;;  %v8070_v0 = vld [vmem:[#allocation2 + $0x5e8] sm:$0xf0]  ;;  %v7569_v10 = vor.u32 %v9075_v17, %v7566_v50 }
 0xf1a   :  { %6278 = vmatpush.bf16.msrb.mxu0 %v8477_v54  ;;  %v7401_v54 = vor.u32 %v9033_v35, %v7398_v20  ;;  %v3637_v29 = vld.sshfl [vmem:[#allocation1] sm:$0xff pattern:$0x73625140]  ;;  %v9021_v27 = vld [vmem:[#allocation2 + $0x34] sm:$0xf]  ;;  %s7196_s7 = sshll.u32 %s14105_s10, 4  ;;  %s7197_s7 = int_to_ptr.hbm [resolvable:$true] %s7196_s7 }
 0xf1b   :  { %6291 = vmatpush.bf16.msrb.mxu1 %v8669_v59  ;;  %6253 = vmatmul.bf16.vlgmr.msra.gmra.mxu2 %v13288_v56  ;;  %v7374_v59 = vld [vmem:[#allocation2 + $0x78] sm:$0xf0]  ;;  %v7350_v4 = vld [vmem:[#allocation2 + $0x48] sm:$0xf0]  ;;  %v9117_v62 = vld [vmem:[#allocation2 + $0x334] sm:$0xf]  ;;  %v13300_v40 = vpack.c.bf16 %v3637_v29, %v3637_v29 }
 0xf1c   :  { %6299 = vmatpush.bf16.msrb.mxu2 %v8981_v43  ;;  %6266 = vmatmul.bf16.vlgmr.msrb.gmra.mxu3 %v13290_v61  ;;  %v7785_v43 = vor.u32 %v9129_v22, %v7782_v37  ;;  %v7377_v31 = vor.u32 %v9027_v9, %v7374_v59  ;;  %v7542_v21 = vld [vmem:[#allocation2 + $0x1c8] sm:$0xf0]  ;;  %v9195_v51 = vld [vmem:[#allocation2 + $0x5a4] sm:$0xf]  ;;  %v8046_v11 = vld [vmem:[#allocation2 + $0x5b8] sm:$0xf0]  ;;  %v7353_v63 = vor.u32 %v9021_v27, %v7350_v4 }
 0xf1d   :  { %6310 = vmatpush.bf16.msra.mxu3 %v7497_v44  ;;  %6279 = vmatmul.bf16.vlgmr.msrb.gmra.mxu0 %v13292_v6  ;;  %v9123_v44 = vld [vmem:[#allocation2 + $0x364] sm:$0xf]  ;;  %v8049_v55 = vor.u32 %v9195_v51, %v8046_v11  ;;  %v7518_v34 = vld [vmem:[#allocation2 + $0x198] sm:$0xf0]  ;;  %v9189_v57 = vld [vmem:[#allocation2 + $0x574] sm:$0xf] }
 0xf1e   :  { %6323 = vmatpush.bf16.msra.mxu0 %v7689_v33  ;;  %6292 = vmatmul.bf16.vlgmr.msrb.gmra.mxu1 %v13294_v38  ;;  %v7758_v33 = vld [vmem:[#allocation2 + $0x378] sm:$0xf0]  ;;  %v9015_v15 = vld [vmem:[#allocation2 + $0x4] sm:$0xf]  ;;  %v8022_v23 = vld [vmem:[#allocation2 + $0x588] sm:$0xf0] }
 0xf1f   :  { %6336 = vmatpush.bf16.msra.mxu1 %v7881_v19  ;;  %v8861_v19 = vor.u32 %v9402_v32, %v8860_v39  ;;  %v9111_v1 = vld [vmem:[#allocation2 + $0x304] sm:$0xf]  ;;  %v9249_v8 = vld [vmem:[#allocation2 + $0x754] sm:$0xf]  ;;  %v8262_v24 = vld [vmem:[#allocation2 + $0x768] sm:$0xf0] }
 0xf20   :  { %6300 = vmatpush.bf16.msrb.mxu2 %v8957_v60  ;;  %v7761_v60 = vor.u32 %v9123_v44, %v7758_v33  ;;  %v9297_v26 = vld [vmem:[#allocation2 + $0x8d4] sm:$0xf]  ;;  %v8646_v53 = vld [vmem:[#allocation2 + $0xa68] sm:$0xf0]  ;;  %v8265_v20 = vor.u32 %v9249_v8, %v8262_v24  ;;  %v9183_v36 = vld [vmem:[#allocation2 + $0x544] sm:$0xf] }
 0xf21   :  { %6311 = vmatpush.bf16.msra.mxu3 %v7473_v41  ;;  %v8073_v41 = vor.u32 %v9201_v47, %v8070_v0  ;;  %v9345_v16 = vld [vmem:[#allocation2 + $0xa54] sm:$0xf]  ;;  %v7998_v22 = vld [vmem:[#allocation2 + $0x558] sm:$0xf0]  ;;  %v9243_v37 = vld [vmem:[#allocation2 + $0x724] sm:$0xf] }
 0xf22   :  { %6324 = vmatpush.bf16.msra.mxu0 %v7665_v46  ;;  %v9069_v46 = vld [vmem:[#allocation2 + $0x1b4] sm:$0xf]  ;;  %v8238_v39 = vld [vmem:[#allocation2 + $0x738] sm:$0xf0]  ;;  %v9339_v32 = vld [vmem:[#allocation2 + $0xa24] sm:$0xf]  ;;  %v8001_v59 = vor.u32 %v9183_v36, %v7998_v22 }
 0xf23   :  { %6337 = vmatpush.bf16.msra.mxu1 %v7857_v48  ;;  %v7734_v48 = vld [vmem:[#allocation2 + $0x348] sm:$0xf0]  ;;  %v7545_v30 = vor.u32 %v9069_v46, %v7542_v21  ;;  %v8622_v9 = vld [vmem:[#allocation2 + $0xa38] sm:$0xf0]  ;;  %v9177_v50 = vld [vmem:[#allocation2 + $0x514] sm:$0xf] }
 0xf24   :  { %6301 = vmatpush.bf16.msrb.mxu2 %v8933_v25  ;;  %v7326_v25 = vld [vmem:[#allocation2 + $0x18] sm:$0xf0]  ;;  %v7974_v44 = vld [vmem:[#allocation2 + $0x528] sm:$0xf0]  ;;  %v9237_v33 = vld [vmem:[#allocation2 + $0x6f4] sm:$0xf]  ;;  %v8625_v47 = vor.u32 %v9339_v32, %v8622_v9 }
 0xf25   :  { %6312 = vmatpush.bf16.msra.mxu3 %v7449_v5  ;;  %v9063_v5 = vld [vmem:[#allocation2 + $0x184] sm:$0xf]  ;;  %v8214_v0 = vld [vmem:[#allocation2 + $0x708] sm:$0xf0]  ;;  %v7977_v27 = vor.u32 %v9177_v50, %v7974_v44  ;;  %v7950_v46 = vld [vmem:[#allocation2 + $0x4f8] sm:$0xf0] }
 0xf26   :  { %6325 = vmatpush.bf16.msra.mxu0 %v7641_v3  ;;  %v7737_v3 = vor.u32 %v9117_v62, %v7734_v48  ;;  %v8406_v29 = vld [vmem:[#allocation2 + $0x888] sm:$0xf0]  ;;  %v8217_v4 = vor.u32 %v9237_v33, %v8214_v0  ;;  %v9231_v21 = vld [vmem:[#allocation2 + $0x6c4] sm:$0xf]  ;;  %v8190_v48 = vld [vmem:[#allocation2 + $0x6d8] sm:$0xf0] }
 0xf27   :  { %6338 = vmatpush.bf16.msra.mxu1 %v7833_v13  ;;  %v7710_v13 = vld [vmem:[#allocation2 + $0x318] sm:$0xf0]  ;;  %v9279_v51 = vld [vmem:[#allocation2 + $0x844] sm:$0xf]  ;;  %v9321_v8 = vld [vmem:[#allocation2 + $0x994] sm:$0xf] }
 0xf28   :  { %6302 = vmatpush.bf16.msrb.mxu2 %v8909_v12  ;;  %v8454_v12 = vld [vmem:[#allocation2 + $0x8e8] sm:$0xf0]  ;;  %v7713_v35 = vor.u32 %v9111_v1, %v7710_v13  ;;  %v8382_v11 = vld [vmem:[#allocation2 + $0x858] sm:$0xf0]  ;;  %v9315_v36 = vld [vmem:[#allocation2 + $0x964] sm:$0xf] }
 0xf29   :  { %6313 = vmatpush.bf16.msra.mxu3 %v7425_v14  ;;  %v7329_v14 = vor.u32 %v9015_v15, %v7326_v25  ;;  %v8457_v42 = vor.u32 %v9297_v26, %v8454_v12  ;;  %v8193_v25 = vor.u32 %v9231_v21, %v8190_v48  ;;  %v8166_v13 = vld [vmem:[#allocation2 + $0x6a8] sm:$0xf0]  ;;  %v9159_v12 = vld [vmem:[#allocation2 + $0x484] sm:$0xf]  ;;  %v8526_v22 = vld [vmem:[#allocation2 + $0x978] sm:$0xf0] }
 0xf2a   :  { %6326 = vmatpush.bf16.msra.mxu0 %v7617_v28  ;;  %v7521_v28 = vor.u32 %v9063_v5, %v7518_v34  ;;  %v8385_v5 = vor.u32 %v9279_v51, %v8382_v11  ;;  %v9225_v34 = vld [vmem:[#allocation2 + $0x694] sm:$0xf]  ;;  %v8550_v24 = vld [vmem:[#allocation2 + $0x9a8] sm:$0xf0]  ;;  %v8814_v0 = vld [vmem:[#allocation2 + $0xbb8] sm:$0xf0] }
 0xf2b   :  { %6339 = vmatpush.bf16.msra.mxu1 %v7809_v49  ;;  %v8025_v49 = vor.u32 %v9189_v57, %v8022_v23  ;;  %v9273_v57 = vld [vmem:[#allocation2 + $0x814] sm:$0xf]  ;;  %v8358_v23 = vld [vmem:[#allocation2 + $0x828] sm:$0xf0]  ;;  %v8478_v21 = vld [vmem:[#allocation2 + $0x918] sm:$0xf0] }
 0xf2c   :  { %6303 = vmatpush.bf16.msrb.mxu2 %v8885_v18  ;;  %v8649_v18 = vor.u32 %v9345_v16, %v8646_v53  ;;  %v7902_v16 = vld [vmem:[#allocation2 + $0x498] sm:$0xf0]  ;;  %v9219_v53 = vld [vmem:[#allocation2 + $0x664] sm:$0xf]  ;;  %v9213_v32 = vld [vmem:[#allocation2 + $0x634] sm:$0xf] }
 0xf2d   :  { %6314 = vmatpush.bf16.msra.mxu3 %v7401_v54  ;;  %v9291_v54 = vld [vmem:[#allocation2 + $0x8a4] sm:$0xf]  ;;  %v8118_v9 = vld [vmem:[#allocation2 + $0x648] sm:$0xf0]  ;;  %v9309_v44 = vld [vmem:[#allocation2 + $0x934] sm:$0xf] }
 0xf2e   :  { %6327 = vmatpush.bf16.msra.mxu0 %v7593_v58  ;;  %v8430_v58 = vld [vmem:[#allocation2 + $0x8b8] sm:$0xf0]  ;;  %v8310_v50 = vld [vmem:[#allocation2 + $0x7c8] sm:$0xf0]  ;;  %v9429_v51 = vld [vmem:[#allocation2 + $0xcf4] sm:$0xf] }
 0xf2f   :  { %6340 = vmatpush.bf16.msra.mxu1 %v7785_v43  ;;  %v8241_v43 = vor.u32 %v9243_v37, %v8238_v39  ;;  %v8433_v17 = vor.u32 %v9291_v54, %v8430_v58  ;;  %v9393_v37 = vld [vmem:[#allocation2 + $0xbd4] sm:$0xf]  ;;  %v7905_v39 = vor.u32 %v9159_v12, %v7902_v16  ;;  %v8502_v33 = vld [vmem:[#allocation2 + $0x948] sm:$0xf0]  ;;  %v7476_v12 = vld [vmem:[#allocation2 + $0x128] sm:$0xf] }
 0xf30   :  { %6304 = vmatpush.bf16.msrb.mxu2 %v8861_v19  ;;  %v9285_v19 = vld [vmem:[#allocation2 + $0x874] sm:$0xf]  ;;  %v8790_v48 = vld [vmem:[#allocation2 + $0xb88] sm:$0xf0]  ;;  %v9103_v16 = vld [vmem:[#allocation2 + $0x2bc] sm:$0xf0] }
 0xf31   :  { %6315 = vmatpush.bf16.msra.mxu3 %v7377_v31  ;;  %v9333_v31 = vld [vmem:[#allocation2 + $0x9f4] sm:$0xf]  ;;  %v8982_v11 = vld [vmem:[#allocation2 + $0xd08] sm:$0xf0] }
 0xf32   :  { %6328 = vmatpush.bf16.msra.mxu0 %v7569_v10  ;;  %v8598_v10 = vld [vmem:[#allocation2 + $0xa08] sm:$0xf0] }
 0xf33   :  { %6341 = vmatpush.bf16.msra.mxu1 %v7761_v60  ;;  %9002 = vmatmul.msk.bf16.vlgmr.msrb.gmra.mxu2 %vm14098_vm7, %v13300_v40  ;;  %v8409_v60 = vor.u32 %v9285_v19, %v8406_v29  ;;  %v8601_v62 = vor.u32 %v9333_v31, %v8598_v10  ;;  %v8121_v19 = vor.u32 %v9213_v32, %v8118_v9  ;;  %v9207_v31 = vld [vmem:[#allocation2 + $0x604] sm:$0xf]  ;;  %v8094_v10 = vld [vmem:[#allocation2 + $0x618] sm:$0xf0] }
 0xf34   :  { %6349 = vmatpush.bf16.msra.mxu2 %v8073_v41  ;;  %v9171_v41 = vld [vmem:[#allocation2 + $0x4e4] sm:$0xf] }
 0xf35   :  { %6316 = vmatpush.bf16.msra.mxu3 %v7353_v63  ;;  %v9327_v63 = vld [vmem:[#allocation2 + $0x9c4] sm:$0xf]  ;;  %v7953_v15 = vor.u32 %v9171_v41, %v7950_v46  ;;  %v8286_v41 = vld [vmem:[#allocation2 + $0x798] sm:$0xf0] }
 0xf36   :  { %6329 = vmatpush.bf16.msra.mxu0 %v7545_v30  ;;  %v8574_v30 = vld [vmem:[#allocation2 + $0x9d8] sm:$0xf0]  ;;  %v9303_v46 = vld [vmem:[#allocation2 + $0x904] sm:$0xf] }
 0xf37   :  { %6342 = vmatpush.bf16.msra.mxu1 %v7737_v3  ;;  %v9165_v3 = vld [vmem:[#allocation2 + $0x4b4] sm:$0xf]  ;;  %v8577_v1 = vor.u32 %v9327_v63, %v8574_v30  ;;  %v7500_v63 = vld [vmem:[#allocation2 + $0x158] sm:$0xf]  ;;  %v9061_v30 = vld [vmem:[#allocation2 + $0x16c] sm:$0xf0] }
 0xf38   :  { %6350 = vmatpush.bf16.msra.mxu2 %v8049_v55  ;;  %v7926_v55 = vld [vmem:[#allocation2 + $0x4c8] sm:$0xf0] }
 0xf39   :  { %6317 = vmatpush.bf16.msra.mxu3 %v7329_v14  ;;  %v7929_v26 = vor.u32 %v9165_v3, %v7926_v55  ;;  %v8169_v14 = vor.u32 %v9225_v34, %v8166_v13  ;;  %v9109_v3 = vld [vmem:[#allocation2 + $0x2ec] sm:$0xf0]  ;;  %v8481_v55 = vor.u32 %v9303_v46, %v8478_v21  ;;  %v7501_v13 = vor.u32 %v9061_v30, %v7500_v63  ;;  %v8886_v21 = vld [vmem:[#allocation2 + $0xc48] sm:$0xf0]  ;;  %v9351_v30 = vld [vmem:[#allocation2 + $0xa84] sm:$0xf] }
 0xf3a   :  { %6330 = vmatpush.bf16.msra.mxu0 %v7521_v28  ;;  %v8361_v28 = vor.u32 %v9273_v57, %v8358_v23  ;;  %v9375_v57 = vld [vmem:[#allocation2 + $0xb44] sm:$0xf]  ;;  %v8766_v23 = vld [vmem:[#allocation2 + $0xb58] sm:$0xf0] }
 0xf3b   :  { %6343 = vmatpush.bf16.msra.mxu1 %v7713_v35  ;;  %v8142_v35 = vld [vmem:[#allocation2 + $0x678] sm:$0xf0] }
 0xf3c   :  { %6351 = vmatpush.bf16.msra.mxu2 %v8025_v49  ;;  %6318 = vmatmul.bf16.vlgmr.msra.gmra.mxu3 %v13276_v45  ;;  %v8553_v49 = vor.u32 %v9321_v8, %v8550_v24  ;;  %v8145_v54 = vor.u32 %v9219_v53, %v8142_v35  ;;  %v9423_v8 = vld [vmem:[#allocation2 + $0xcc4] sm:$0xf]  ;;  %v8769_v53 = vor.u32 %v9375_v57, %v8766_v23  ;;  %v7572_v57 = vld [vmem:[#allocation2 + $0x1e8] sm:$0xf]  ;;  %v9079_v23 = vld [vmem:[#allocation2 + $0x1fc] sm:$0xf0] }
 0xf3d   :  { %6362 = vmatpush.bf16.msrb.mxu3 %v8265_v20  ;;  %6331 = vmatmul.bf16.vlgmr.msra.gmra.mxu0 %v13278_v52  ;;  %v9267_v20 = vld [vmem:[#allocation2 + $0x7e4] sm:$0xf] }
 0xf3e   :  { %6375 = vmatpush.bf16.msrb.mxu0 %v8457_v42  ;;  %6344 = vmatmul.bf16.vlgmr.msra.gmra.mxu1 %v13280_v7  ;;  %v8334_v42 = vld [vmem:[#allocation2 + $0x7f8] sm:$0xf0] }
 0xf3f   :  { %6388 = vmatpush.bf16.msrb.mxu1 %v8649_v18  ;;  %v8838_v18 = vld [vmem:[#allocation2 + $0xbe8] sm:$0xf0]  ;;  %v8337_v58 = vor.u32 %v9267_v20, %v8334_v42  ;;  %v9369_v20 = vld [vmem:[#allocation2 + $0xb14] sm:$0xf] }
 0xf40   :  { %6352 = vmatpush.bf16.msra.mxu2 %v8001_v59  ;;  %v8529_v59 = vor.u32 %v9315_v36, %v8526_v22  ;;  %v8742_v42 = vld [vmem:[#allocation2 + $0xb28] sm:$0xf0]  ;;  %v9417_v36 = vld [vmem:[#allocation2 + $0xc94] sm:$0xf] }
 0xf41   :  { %6363 = vmatpush.bf16.msrb.mxu3 %v8241_v43  ;;  %v8841_v43 = vor.u32 %v9393_v37, %v8838_v18  ;;  %v8934_v37 = vld [vmem:[#allocation2 + $0xca8] sm:$0xf0]  ;;  %v7452_v18 = vld [vmem:[#allocation2 + $0xf8] sm:$0xf]  ;;  %v8745_v32 = vor.u32 %v9369_v20, %v8742_v42  ;;  %v9025_v20 = vld [vmem:[#allocation2 + $0x4c] sm:$0xf0] }
 0xf42   :  { %6376 = vmatpush.bf16.msrb.mxu0 %v8433_v17  ;;  %v9261_v17 = vld [vmem:[#allocation2 + $0x7b4] sm:$0xf]  ;;  %v8937_v9 = vor.u32 %v9417_v36, %v8934_v37  ;;  %v7548_v42 = vld [vmem:[#allocation2 + $0x1b8] sm:$0xf]  ;;  %v7860_v37 = vld [vmem:[#allocation2 + $0x428] sm:$0xf] }
 0xf43   :  { %6389 = vmatpush.bf16.msrb.mxu1 %v8625_v47  ;;  %v9387_v47 = vld [vmem:[#allocation2 + $0xba4] sm:$0xf]  ;;  %v8313_v29 = vor.u32 %v9261_v17, %v8310_v50  ;;  %v8718_v17 = vld [vmem:[#allocation2 + $0xaf8] sm:$0xf0] }
 0xf44   :  { %6353 = vmatpush.bf16.msra.mxu2 %v7977_v27  ;;  %v9255_v27 = vld [vmem:[#allocation2 + $0x784] sm:$0xf] }
 0xf45   :  { %6364 = vmatpush.bf16.msrb.mxu3 %v8217_v4  ;;  %v8505_v4 = vor.u32 %v9309_v44, %v8502_v33  ;;  %v9411_v50 = vld [vmem:[#allocation2 + $0xc64] sm:$0xf]  ;;  %v8910_v33 = vld [vmem:[#allocation2 + $0xc78] sm:$0xf0] }
 0xf46   :  { %6377 = vmatpush.bf16.msrb.mxu0 %v8409_v60  ;;  %v8817_v60 = vor.u32 %v9387_v47, %v8814_v0  ;;  %v7428_v47 = vld [vmem:[#allocation2 + $0xc8] sm:$0xf]  ;;  %v9043_v0 = vld [vmem:[#allocation2 + $0xdc] sm:$0xf0] }
 0xf47   :  { %6390 = vmatpush.bf16.msrb.mxu1 %v8601_v62  ;;  %v9381_v62 = vld [vmem:[#allocation2 + $0xb74] sm:$0xf] }
 0xf48   :  { %6354 = vmatpush.bf16.msra.mxu2 %v7953_v15  ;;  %v8097_v15 = vor.u32 %v9207_v31, %v8094_v10  ;;  %v8793_v34 = vor.u32 %v9381_v62, %v8790_v48  ;;  %v8913_v10 = vor.u32 %v9411_v50, %v8910_v33  ;;  %v7404_v62 = vld [vmem:[#allocation2 + $0x98] sm:$0xf]  ;;  %v9037_v48 = vld [vmem:[#allocation2 + $0xac] sm:$0xf0]  ;;  %v9067_v50 = vld [vmem:[#allocation2 + $0x19c] sm:$0xf0] }
 0xf49   :  { %6365 = vmatpush.bf16.msrb.mxu3 %v8193_v25  ;;  %v8289_v25 = vor.u32 %v9255_v27, %v8286_v41  ;;  %v7429_v27 = vor.u32 %v9043_v0, %v7428_v47  ;;  %v9405_v41 = vld [vmem:[#allocation2 + $0xc34] sm:$0xf]  ;;  %v7836_v33 = vld [vmem:[#allocation2 + $0x3f8] sm:$0xf]  ;;  %v9145_v47 = vld [vmem:[#allocation2 + $0x40c] sm:$0xf0] }
 0xf4a   :  { %6378 = vmatpush.bf16.msrb.mxu0 %v8385_v5  ;;  %v7692_v5 = vld [vmem:[#allocation2 + $0x2d8] sm:$0xf] }
 0xf4b   :  { %6391 = vmatpush.bf16.msrb.mxu1 %v8577_v1  ;;  %v8985_v1 = vor.u32 %v9429_v51, %v8982_v11  ;;  %v7693_v24 = vor.u32 %v9109_v3, %v7692_v5  ;;  %v7596_v51 = vld [vmem:[#allocation2 + $0x218] sm:$0xf]  ;;  %v9085_v11 = vld [vmem:[#allocation2 + $0x22c] sm:$0xf0]  ;;  %v8670_v5 = vld [vmem:[#allocation2 + $0xa98] sm:$0xf0] }
 0xf4c   :  { %6355 = vmatpush.bf16.msra.mxu2 %v7929_v26  ;;  %v8958_v26 = vld [vmem:[#allocation2 + $0xcd8] sm:$0xf0]  ;;  %v9399_v3 = vld [vmem:[#allocation2 + $0xc04] sm:$0xf]  ;;  %v8028_v0 = vld [vmem:[#allocation2 + $0x578] sm:$0xf] }
 0xf4d   :  { %6366 = vmatpush.bf16.msrb.mxu3 %v8169_v14  ;;  %v9055_v14 = vld [vmem:[#allocation2 + $0x13c] sm:$0xf0]  ;;  %v8961_v35 = vor.u32 %v9423_v8, %v8958_v26  ;;  %v7884_v8 = vld [vmem:[#allocation2 + $0x458] sm:$0xf]  ;;  %v8673_v26 = vor.u32 %v9351_v30, %v8670_v5  ;;  %v8244_v30 = vld [vmem:[#allocation2 + $0x728] sm:$0xf] }
 0xf4e   :  { %6379 = vmatpush.bf16.msrb.mxu0 %v8361_v28  ;;  %v7668_v28 = vld [vmem:[#allocation2 + $0x2a8] sm:$0xf]  ;;  %v9295_v5 = vld [vmem:[#allocation2 + $0x8bc] sm:$0xf0] }
 0xf4f   :  { %6392 = vmatpush.bf16.msrb.mxu1 %v8553_v49  ;;  %v7477_v49 = vor.u32 %v9055_v14, %v7476_v12  ;;  %v7669_v22 = vor.u32 %v9103_v16, %v7668_v28  ;;  %v8076_v12 = vld [vmem:[#allocation2 + $0x5d8] sm:$0xf]  ;;  %v9205_v14 = vld [vmem:[#allocation2 + $0x5ec] sm:$0xf0] }
 0xf50   :  { %6356 = vmatpush.bf16.msra.mxu2 %v7905_v39  ;;  %v9049_v39 = vld [vmem:[#allocation2 + $0x10c] sm:$0xf0]  ;;  %v8077_v36 = vor.u32 %v9205_v14, %v8076_v12  ;;  %v8412_v12 = vld [vmem:[#allocation2 + $0x878] sm:$0xf] }
 0xf51   :  { %6367 = vmatpush.bf16.msrb.mxu3 %v8145_v54  ;;  %v7644_v54 = vld [vmem:[#allocation2 + $0x278] sm:$0xf]  ;;  %v9289_v14 = vld [vmem:[#allocation2 + $0x88c] sm:$0xf0] }
 0xf52   :  { %6380 = vmatpush.bf16.msrb.mxu0 %v8337_v58  ;;  %v9097_v58 = vld [vmem:[#allocation2 + $0x28c] sm:$0xf0] }
 0xf53   :  { %6393 = vmatpush.bf16.msrb.mxu1 %v8529_v59  ;;  %6357 = vmatmul.bf16.vlgmr.msra.gmra.mxu2 %v13285_v2  ;;  %v7453_v59 = vor.u32 %v9049_v39, %v7452_v18  ;;  %v7645_v44 = vor.u32 %v9097_v58, %v7644_v54  ;;  %v9151_v18 = vld [vmem:[#allocation2 + $0x43c] sm:$0xf0]  ;;  %v8052_v39 = vld [vmem:[#allocation2 + $0x5a8] sm:$0xf] }
 0xf54   :  { %6401 = vmatpush.bf16.msrb.mxu2 %v8841_v43  ;;  %v9363_v43 = vld [vmem:[#allocation2 + $0xae4] sm:$0xf]  ;;  %v9199_v54 = vld [vmem:[#allocation2 + $0x5bc] sm:$0xf0] }
 0xf55   :  { %6368 = vmatpush.bf16.msrb.mxu3 %v8121_v19  ;;  %v7620_v19 = vld [vmem:[#allocation2 + $0x248] sm:$0xf]  ;;  %v8721_v31 = vor.u32 %v9363_v43, %v8718_v17  ;;  %v9019_v43 = vld [vmem:[#allocation2 + $0x1c] sm:$0xf0] }
 0xf56   :  { %6381 = vmatpush.bf16.msrb.mxu0 %v8313_v29  ;;  %v9091_v29 = vld [vmem:[#allocation2 + $0x25c] sm:$0xf0]  ;;  %v7524_v17 = vld [vmem:[#allocation2 + $0x188] sm:$0xf] }
 0xf57   :  { %6394 = vmatpush.bf16.msrb.mxu1 %v8505_v4  ;;  %v9357_v4 = vld [vmem:[#allocation2 + $0xab4] sm:$0xf]  ;;  %v7621_v46 = vor.u32 %v9091_v29, %v7620_v19  ;;  %v9193_v19 = vld [vmem:[#allocation2 + $0x58c] sm:$0xf0]  ;;  %v8268_v29 = vld [vmem:[#allocation2 + $0x758] sm:$0xf] }
 0xf58   :  { %6402 = vmatpush.bf16.msrb.mxu2 %v8817_v60  ;;  %v8694_v60 = vld [vmem:[#allocation2 + $0xac8] sm:$0xf0] }
 0xf59   :  { %6369 = vmatpush.bf16.msrb.mxu3 %v8097_v15  ;;  %v8697_v63 = vor.u32 %v9357_v4, %v8694_v60  ;;  %v8889_v15 = vor.u32 %v9405_v41, %v8886_v21  ;;  %v9301_v4 = vld [vmem:[#allocation2 + $0x8ec] sm:$0xf0]  ;;  %v7525_v60 = vor.u32 %v9067_v50, %v7524_v17  ;;  %v7837_v41 = vor.u32 %v9145_v47, %v7836_v33  ;;  %v8364_v47 = vld [vmem:[#allocation2 + $0x818] sm:$0xf] }
 0xf5a   :  { %6382 = vmatpush.bf16.msrb.mxu0 %v8289_v25  ;;  %v7405_v25 = vor.u32 %v9037_v48, %v7404_v62  ;;  %v7812_v62 = vld [vmem:[#allocation2 + $0x3c8] sm:$0xf]  ;;  %v9139_v48 = vld [vmem:[#allocation2 + $0x3dc] sm:$0xf0]  ;;  %v9169_v50 = vld [vmem:[#allocation2 + $0x4cc] sm:$0xf0] }
 0xf5b   :  { %6395 = vmatpush.bf16.msrb.mxu1 %v8481_v55  ;;  %v8862_v55 = vld [vmem:[#allocation2 + $0xc18] sm:$0xf0]  ;;  %v9229_v33 = vld [vmem:[#allocation2 + $0x6ac] sm:$0xf0] }
 0xf5c   :  { %6403 = vmatpush.bf16.msrb.mxu2 %v8793_v34  ;;  %6370 = vmatmul.bf16.vlgmr.msrb.gmra.mxu3 %v13288_v56  ;;  %v7597_v34 = vor.u32 %v9085_v11, %v7596_v51  ;;  %v8865_v28 = vor.u32 %v9399_v3, %v8862_v55  ;;  %v8004_v51 = vld [vmem:[#allocation2 + $0x548] sm:$0xf]  ;;  %v7813_v3 = vor.u32 %v9139_v48, %v7812_v62  ;;  %v9271_v48 = vld [vmem:[#allocation2 + $0x7fc] sm:$0xf0] }
 0xf5d   :  { %6416 = vmatpush.bf16.msra.mxu3 %v8985_v1  ;;  %6383 = vmatmul.bf16.vlgmr.msrb.gmra.mxu0 %v13290_v61  ;;  %v7380_v1 = vld [vmem:[#allocation2 + $0x68] sm:$0xf] }
 0xf5e   :  { %6427 = vmatpush.bf16.msra.mxu0 %v7501_v13  ;;  %6396 = vmatmul.bf16.vlgmr.msrb.gmra.mxu1 %v13292_v6  ;;  %v9031_v13 = vld [vmem:[#allocation2 + $0x7c] sm:$0xf0]  ;;  %v8340_v62 = vld [vmem:[#allocation2 + $0x7e8] sm:$0xf] }
 0xf5f   :  { %6440 = vmatpush.bf16.msra.mxu1 %v7693_v24  ;;  %v9157_v24 = vld [vmem:[#allocation2 + $0x46c] sm:$0xf0]  ;;  %v7381_v16 = vor.u32 %v9031_v13, %v7380_v1  ;;  %v7788_v1 = vld [vmem:[#allocation2 + $0x398] sm:$0xf] }
 0xf60   :  { %6404 = vmatpush.bf16.msrb.mxu2 %v8769_v53  ;;  %v7573_v53 = vor.u32 %v9079_v23, %v7572_v57  ;;  %v9133_v13 = vld [vmem:[#allocation2 + $0x3ac] sm:$0xf0]  ;;  %v7980_v57 = vld [vmem:[#allocation2 + $0x518] sm:$0xf] }
 0xf61   :  { %6417 = vmatpush.bf16.msra.mxu3 %v8961_v35  ;;  %v7885_v35 = vor.u32 %v9157_v24, %v7884_v8  ;;  %v9181_v8 = vld [vmem:[#allocation2 + $0x52c] sm:$0xf0]  ;;  %v8220_v24 = vld [vmem:[#allocation2 + $0x6f8] sm:$0xf] }
 0xf62   :  { %6428 = vmatpush.bf16.msra.mxu0 %v7477_v49  ;;  %v7356_v49 = vld [vmem:[#allocation2 + $0x38] sm:$0xf] }
 0xf63   :  { %6441 = vmatpush.bf16.msra.mxu1 %v7669_v22  ;;  %v9073_v22 = vld [vmem:[#allocation2 + $0x1cc] sm:$0xf0]  ;;  %v7357_v58 = vor.u32 %v9025_v20, %v7356_v49  ;;  %v9127_v49 = vld [vmem:[#allocation2 + $0x37c] sm:$0xf0]  ;;  %v7956_v20 = vld [vmem:[#allocation2 + $0x4e8] sm:$0xf] }
 0xf64   :  { %6405 = vmatpush.bf16.msrb.mxu2 %v8745_v32  ;;  %v7332_v32 = vld [vmem:[#allocation2 + $0x8] sm:$0xf] }
 0xf65   :  { %6418 = vmatpush.bf16.msra.mxu3 %v8937_v9  ;;  %v7549_v9 = vor.u32 %v9073_v22, %v7548_v42  ;;  %v8413_v42 = vor.u32 %v9289_v14, %v8412_v12  ;;  %v8196_v22 = vld [vmem:[#allocation2 + $0x6c8] sm:$0xf]  ;;  %v9343_v14 = vld [vmem:[#allocation2 + $0xa3c] sm:$0xf0] }
 0xf66   :  { %6429 = vmatpush.bf16.msra.mxu0 %v7453_v59  ;;  %v7861_v59 = vor.u32 %v9151_v18, %v7860_v37  ;;  %v9235_v37 = vld [vmem:[#allocation2 + $0x6dc] sm:$0xf0]  ;;  %v8388_v18 = vld [vmem:[#allocation2 + $0x848] sm:$0xf] }
 0xf67   :  { %6442 = vmatpush.bf16.msra.mxu1 %v7645_v44  ;;  %v8053_v44 = vor.u32 %v9199_v54, %v8052_v39  ;;  %v9283_v39 = vld [vmem:[#allocation2 + $0x85c] sm:$0xf0]  ;;  %v8628_v12 = vld [vmem:[#allocation2 + $0xa28] sm:$0xf] }
 0xf68   :  { %6406 = vmatpush.bf16.msrb.mxu2 %v8721_v31  ;;  %v9253_v31 = vld [vmem:[#allocation2 + $0x76c] sm:$0xf0]  ;;  %v8389_v17 = vor.u32 %v9283_v39, %v8388_v18  ;;  %v9259_v18 = vld [vmem:[#allocation2 + $0x79c] sm:$0xf0] }
 0xf69   :  { %6419 = vmatpush.bf16.msra.mxu3 %v8913_v10  ;;  %v7333_v10 = vor.u32 %v9019_v43, %v7332_v32  ;;  %v8269_v21 = vor.u32 %v9253_v31, %v8268_v29  ;;  %v8197_v32 = vor.u32 %v9235_v37, %v8196_v22  ;;  %v7932_v43 = vld [vmem:[#allocation2 + $0x4b8] sm:$0xf]  ;;  %v7716_v29 = vld [vmem:[#allocation2 + $0x308] sm:$0xf]  ;;  %v9115_v31 = vld [vmem:[#allocation2 + $0x31c] sm:$0xf0] }
 0xf6a   :  { %6430 = vmatpush.bf16.msra.mxu0 %v7429_v27  ;;  %v8460_v27 = vld [vmem:[#allocation2 + $0x8d8] sm:$0xf]  ;;  %v9211_v22 = vld [vmem:[#allocation2 + $0x61c] sm:$0xf0]  ;;  %v8292_v37 = vld [vmem:[#allocation2 + $0x788] sm:$0xf] }
 0xf6b   :  { %6443 = vmatpush.bf16.msra.mxu1 %v7621_v46  ;;  %v8029_v46 = vor.u32 %v9193_v19, %v8028_v0  ;;  %v8461_v11 = vor.u32 %v9301_v4, %v8460_v27  ;;  %v9277_v0 = vld [vmem:[#allocation2 + $0x82c] sm:$0xf0]  ;;  %v7908_v4 = vld [vmem:[#allocation2 + $0x488] sm:$0xf] }
 0xf6c   :  { %6407 = vmatpush.bf16.msrb.mxu2 %v8697_v63  ;;  %v9187_v63 = vld [vmem:[#allocation2 + $0x55c] sm:$0xf0] }
 0xf6d   :  { %6420 = vmatpush.bf16.msra.mxu3 %v8889_v15  ;;  %v9247_v15 = vld [vmem:[#allocation2 + $0x73c] sm:$0xf0]  ;;  %v8005_v55 = vor.u32 %v9187_v63, %v8004_v51  ;;  %v8652_v51 = vld [vmem:[#allocation2 + $0xa58] sm:$0xf]  ;;  %v13316_v63 = vld [vmem:[#allocation11] sm:$0x3f] }
 0xf6e   :  { %6431 = vmatpush.bf16.msra.mxu0 %v7405_v25  ;;  %v8436_v25 = vld [vmem:[#allocation2 + $0x8a8] sm:$0xf] }
 0xf6f   :  { %6444 = vmatpush.bf16.msra.mxu1 %v7597_v34  ;;  %v8245_v34 = vor.u32 %v9247_v15, %v8244_v30  ;;  %v8437_v23 = vor.u32 %v9295_v5, %v8436_v25  ;;  %v7717_v30 = vor.u32 %v9115_v31, %v7716_v29  ;;  %v8844_v15 = vld [vmem:[#allocation2 + $0xbd8] sm:$0xf]  ;;  %v9397_v25 = vld [vmem:[#allocation2 + $0xbec] sm:$0xf0]  ;;  %v8293_v29 = vor.u32 %v9259_v18, %v8292_v37  ;;  %v8916_v37 = vld [vmem:[#allocation2 + $0xc68] sm:$0xf] }
 0xf70   :  { %6408 = vmatpush.bf16.msrb.mxu2 %v8673_v26  ;;  %v9241_v26 = vld [vmem:[#allocation2 + $0x70c] sm:$0xf0]  ;;  %v9415_v18 = vld [vmem:[#allocation2 + $0xc7c] sm:$0xf0] }
 0xf71   :  { %6421 = vmatpush.bf16.msra.mxu3 %v8865_v28  ;;  %v7789_v28 = vor.u32 %v9133_v13, %v7788_v1  ;;  %v8341_v1 = vor.u32 %v9271_v48, %v8340_v62  ;;  %v9379_v62 = vld [vmem:[#allocation2 + $0xb5c] sm:$0xf0]  ;;  %v8964_v48 = vld [vmem:[#allocation2 + $0xcc8] sm:$0xf] }
 0xf72   :  { %6432 = vmatpush.bf16.msra.mxu0 %v7381_v16  ;;  %v7981_v16 = vor.u32 %v9181_v8, %v7980_v57  ;;  %v9217_v57 = vld [vmem:[#allocation2 + $0x64c] sm:$0xf0]  ;;  %v4078_v8 = vperm.slane %v13316_v63, 0 }
 0xf73   :  { %6445 = vmatpush.bf16.msra.mxu1 %v7573_v53  ;;  %6409 = vmatmul.bf16.vlgmr.msrb.gmra.mxu2 %v13294_v38  ;;  %v8221_v53 = vor.u32 %v9241_v26, %v8220_v24  ;;  %v8845_v24 = vor.u32 %v9397_v25, %v8844_v15  ;;  %v9265_v26 = vld [vmem:[#allocation2 + $0x7cc] sm:$0xf0]  ;;  %v7478_v15 = vld [vmem:[#allocation2 + $0x140] sm:$0xf0] }
 0xf74   :  { %6453 = vmatpush.bf16.msra.mxu2 %v7885_v35  ;;  %9003 = vmatmul.msk.bf16.vlgmr.msra.gmra.mxu3 %vm14099_vm8, %v13300_v40  ;;  %v7764_v35 = vld [vmem:[#allocation2 + $0x368] sm:$0xf] }
 0xf75   :  { %6466 = vmatpush.bf16.msrb.mxu3 %v8077_v36  ;;  %v9175_v36 = vld [vmem:[#allocation2 + $0x4fc] sm:$0xf0]  ;;  %v7765_v54 = vor.u32 %v9127_v49, %v7764_v35  ;;  %v8100_v49 = vld [vmem:[#allocation2 + $0x608] sm:$0xf] }
 0xf76   :  { %6433 = vmatpush.bf16.msra.mxu0 %v7357_v58  ;;  %v7957_v58 = vor.u32 %v9175_v36, %v7956_v20  ;;  %v8629_v36 = vor.u32 %v9343_v14, %v8628_v12  ;;  %v9046_v12 = vld [vmem:[#allocation2 + $0xfc] sm:$0xf]  ;;  %v7454_v14 = vld [vmem:[#allocation2 + $0x110] sm:$0xf0] }
 0xf77   :  { %6446 = vmatpush.bf16.msra.mxu1 %v7549_v9  ;;  %v7740_v9 = vld [vmem:[#allocation2 + $0x338] sm:$0xf] }
 0xf78   :  { %6454 = vmatpush.bf16.msra.mxu2 %v7861_v59  ;;  %v9121_v59 = vld [vmem:[#allocation2 + $0x34c] sm:$0xf0] }
 0xf79   :  { %6467 = vmatpush.bf16.msrb.mxu3 %v8053_v44  ;;  %v8172_v44 = vld [vmem:[#allocation2 + $0x698] sm:$0xf]  ;;  %v7741_v19 = vor.u32 %v9121_v59, %v7740_v9  ;;  %v9337_v9 = vld [vmem:[#allocation2 + $0xa0c] sm:$0xf0] }
 0xf7a   :  { %6434 = vmatpush.bf16.msra.mxu0 %v7333_v10  ;;  %v7933_v10 = vor.u32 %v9169_v50, %v7932_v43  ;;  %v8173_v27 = vor.u32 %v9229_v33, %v8172_v44  ;;  %v8796_v59 = vld [vmem:[#allocation2 + $0xb78] sm:$0xf]  ;;  %v9385_v43 = vld [vmem:[#allocation2 + $0xb8c] sm:$0xf0] }
 0xf7b   :  { %6447 = vmatpush.bf16.msra.mxu1 %v7525_v60  ;;  %v9163_v60 = vld [vmem:[#allocation2 + $0x49c] sm:$0xf0]  ;;  %v9433_v50 = vld [vmem:[#allocation2 + $0xd0c] sm:$0xf0] }
 0xf7c   :  { %6455 = vmatpush.bf16.msra.mxu2 %v7837_v41  ;;  %v8148_v41 = vld [vmem:[#allocation2 + $0x668] sm:$0xf] }
 0xf7d   :  { %6468 = vmatpush.bf16.msrb.mxu3 %v8029_v46  ;;  %6435 = vmatmul.bf16.vlgmr.msra.gmra.mxu0 %v13276_v45  ;;  %v8365_v46 = vor.u32 %v9277_v0, %v8364_v47  ;;  %v8101_v47 = vor.u32 %v9211_v22, %v8100_v49  ;;  %v9058_v0 = vld [vmem:[#allocation2 + $0x15c] sm:$0xf]  ;;  %v8532_v49 = vld [vmem:[#allocation2 + $0x968] sm:$0xf]  ;;  %v9367_v22 = vld [vmem:[#allocation2 + $0xafc] sm:$0xf0] }
 0xf7e   :  { %6479 = vmatpush.bf16.msrb.mxu0 %v8269_v21  ;;  %6448 = vmatmul.bf16.vlgmr.msra.gmra.mxu1 %v13278_v52  ;;  %v9223_v21 = vld [vmem:[#allocation2 + $0x67c] sm:$0xf0] }
 0xf7f   :  { %6492 = vmatpush.bf16.msrb.mxu1 %v8461_v11  ;;  %v9349_v11 = vld [vmem:[#allocation2 + $0xa6c] sm:$0xf0] }
 0xf80   :  { %6456 = vmatpush.bf16.msra.mxu2 %v7813_v3  ;;  %v6228_v5 = vpop.f32.mrf.mxu0  ;;  %v7909_v3 = vor.u32 %v9163_v60, %v7908_v4  ;;  %v8653_v13 = vor.u32 %v9349_v11, %v8652_v51  ;;  %v8580_v60 = vld [vmem:[#allocation2 + $0x9c8] sm:$0xf]  ;;  %v9427_v51 = vld [vmem:[#allocation2 + $0xcdc] sm:$0xf0] }
 0xf81   :  { %6469 = vmatpush.bf16.msrb.mxu3 %v8005_v55  ;;  %v8149_v55 = vor.u32 %v9223_v21, %v8148_v41  ;;  %v9331_v41 = vld [vmem:[#allocation2 + $0x9dc] sm:$0xf0] }
 0xf82   :  { %6480 = vmatpush.bf16.msrb.mxu0 %v8245_v34  ;;  %v8124_v34 = vld [vmem:[#allocation2 + $0x638] sm:$0xf] }
 0xf83   :  { %6493 = vmatpush.bf16.msrb.mxu1 %v8437_v23  ;;  %v8316_v23 = vld [vmem:[#allocation2 + $0x7b8] sm:$0xf]  ;;  %v8125_v35 = vor.u32 %v9217_v57, %v8124_v34  ;;  %v8965_v34 = vor.u32 %v9427_v51, %v8964_v48  ;;  %v8676_v48 = vld [vmem:[#allocation2 + $0xa88] sm:$0xf]  ;;  %v9355_v51 = vld [vmem:[#allocation2 + $0xa9c] sm:$0xf0] }
 0xf84   :  { %6457 = vmatpush.bf16.msra.mxu2 %v7789_v28  ;;  %v8820_v28 = vld [vmem:[#allocation2 + $0xba8] sm:$0xf]  ;;  %v6202_v20 = vpop.f32.mrf.mxu2  ;;  %v8748_v57 = vld [vmem:[#allocation2 + $0xb18] sm:$0xf] }
 0xf85   :  { %6470 = vmatpush.bf16.msrb.mxu3 %v7981_v16  ;;  %v9391_v16 = vld [vmem:[#allocation2 + $0xbbc] sm:$0xf0]  ;;  %v6203_v39 = vadd.f32 %v6202_v20, %v4078_v8  ;;  %v9373_v8 = vld [vmem:[#allocation2 + $0xb2c] sm:$0xf0] }
 0xf86   :  { %6481 = vmatpush.bf16.msrb.mxu0 %v8221_v53  ;;  %v13319_v53 = vpop.f32.mrf.mxu1  ;;  %v9319_v20 = vld [vmem:[#allocation2 + $0x97c] sm:$0xf0] }
 0xf87   :  { %6494 = vmatpush.bf16.msrb.mxu1 %v8413_v42  ;;  %v8317_v42 = vor.u32 %v9265_v26, %v8316_v23  ;;  %v9421_v26 = vld [vmem:[#allocation2 + $0xcac] sm:$0xf0] }
 0xf88   :  { %6458 = vmatpush.bf16.msra.mxu2 %v7765_v54  ;;  %v6215_v54 = vpop.f32.mrf.mxu3  ;;  %v6230_v33 = vpop.f32.mrf.mxu0 }
 0xf89   :  { %6471 = vmatpush.bf16.msrb.mxu3 %v7957_v58  ;;  %v8821_v58 = vor.u32 %v9391_v16, %v8820_v28  ;;  %v6216_v44 = vadd.f32 %v6215_v54, %v6203_v39  ;;  %v8749_v16 = vor.u32 %v9373_v8, %v8748_v57  ;;  %v9040_v39 = vld [vmem:[#allocation2 + $0xcc] sm:$0xf]  ;;  %v7430_v54 = vld [vmem:[#allocation2 + $0xe0] sm:$0xf0]  ;;  %v7886_v57 = vld [vmem:[#allocation2 + $0x470] sm:$0xf0] }
 0xf8a   :  { %6482 = vmatpush.bf16.msrb.mxu0 %v8197_v32  ;;  %v8604_v32 = vld [vmem:[#allocation2 + $0x9f8] sm:$0xf]  ;;  %v7433_v33 = vor.u32 %v9040_v39, %v7430_v54  ;;  %v8078_v8 = vld [vmem:[#allocation2 + $0x5f0] sm:$0xf0]  ;;  %v7862_v54 = vld [vmem:[#allocation2 + $0x440] sm:$0xf0] }
 0xf8b   :  { %6495 = vmatpush.bf16.msrb.mxu1 %v8389_v17  ;;  %v8988_v17 = vld [vmem:[#allocation2 + $0xcf8] sm:$0xf]  ;;  %v8605_v31 = vor.u32 %v9337_v9, %v8604_v32 }
 0xf8c   :  { %6459 = vmatpush.bf16.msra.mxu2 %v7741_v19  ;;  %v7502_v19 = vld [vmem:[#allocation2 + $0x170] sm:$0xf0]  ;;  %v8989_v4 = vor.u32 %v9433_v50, %v8988_v17  ;;  %v6204_v25 = vpop.f32.mrf.mxu2  ;;  %v9313_v17 = vld [vmem:[#allocation2 + $0x94c] sm:$0xf0]  ;;  %v8700_v50 = vld [vmem:[#allocation2 + $0xab8] sm:$0xf] }
 0xf8d   :  { %6472 = vmatpush.bf16.msrb.mxu3 %v7933_v10  ;;  %v13323_v10 = vadd.f32 %v6228_v5, %v6216_v44  ;;  %v7505_v21 = vor.u32 %v9058_v0, %v7502_v19  ;;  %v8892_v0 = vld [vmem:[#allocation2 + $0xc38] sm:$0xf]  ;;  %v9409_v19 = vld [vmem:[#allocation2 + $0xc4c] sm:$0xf0] }
 0xf8e   :  { %6483 = vmatpush.bf16.msrb.mxu0 %v8173_v27  ;;  %v8797_v27 = vor.u32 %v9385_v43, %v8796_v59  ;;  %v6243_v11 = vpop.f32.mrf.mxu1  ;;  %v8917_v59 = vor.u32 %v9415_v18, %v8916_v37  ;;  %v8508_v43 = vld [vmem:[#allocation2 + $0x938] sm:$0xf]  ;;  %v7670_v37 = vld [vmem:[#allocation2 + $0x2c0] sm:$0xf0]  ;;  %v9148_v18 = vld [vmem:[#allocation2 + $0x42c] sm:$0xf] }
 0xf8f   :  { %6496 = vmatpush.bf16.msrb.mxu1 %v8365_v46  ;;  %v8772_v46 = vld [vmem:[#allocation2 + $0xb48] sm:$0xf] }
 0xf90   :  { %6460 = vmatpush.bf16.msra.mxu2 %v7717_v30  ;;  %v9052_v30 = vld [vmem:[#allocation2 + $0x12c] sm:$0xf]  ;;  %v6217_v5 = vpop.f32.mrf.mxu3  ;;  %v8868_v11 = vld [vmem:[#allocation2 + $0xc08] sm:$0xf] }
 0xf91   :  { %6473 = vmatpush.bf16.msrb.mxu3 %v7909_v3  ;;  %v8581_v3 = vor.u32 %v9331_v41, %v8580_v60  ;;  %v7481_v23 = vor.u32 %v9052_v30, %v7478_v15  ;;  %v8484_v60 = vld [vmem:[#allocation2 + $0x908] sm:$0xf]  ;;  %v9307_v41 = vld [vmem:[#allocation2 + $0x91c] sm:$0xf0]  ;;  %v9028_v5 = vld [vmem:[#allocation2 + $0x6c] sm:$0xf] }
 0xf92   :  { %6484 = vmatpush.bf16.msrb.mxu0 %v8149_v55  ;;  %v8773_v55 = vor.u32 %v9379_v62, %v8772_v46 }
 0xf93   :  { %6497 = vmatpush.bf16.msrb.mxu1 %v8341_v1  ;;  %6461 = vmatmul.bf16.vlgmr.msra.gmra.mxu2 %v13280_v7  ;;  %v8556_v1 = vld [vmem:[#allocation2 + $0x998] sm:$0xf] }
 0xf94   :  { %6505 = vmatpush.bf16.msrb.mxu2 %v8653_v13  ;;  %6474 = vmatmul.bf16.vlgmr.msrb.gmra.mxu3 %v13285_v2  ;;  %v9325_v13 = vld [vmem:[#allocation2 + $0x9ac] sm:$0xf0] }
 0xf95   :  { %6518 = vmatpush.bf16.msra.mxu3 %v8845_v24  ;;  %v8940_v24 = vld [vmem:[#allocation2 + $0xc98] sm:$0xf]  ;;  %v8557_v28 = vor.u32 %v9325_v13, %v8556_v1  ;;  %v8485_v13 = vor.u32 %v9307_v41, %v8484_v60  ;;  %v9250_v60 = vld [vmem:[#allocation2 + $0x75c] sm:$0xf]  ;;  %v8270_v41 = vld [vmem:[#allocation2 + $0x770] sm:$0xf0] }
 0xf96   :  { %6485 = vmatpush.bf16.msrb.mxu0 %v8125_v35  ;;  %v8941_v35 = vor.u32 %v9421_v26, %v8940_v24  ;;  %v8677_v26 = vor.u32 %v9355_v51, %v8676_v48  ;;  %v9088_v51 = vld [vmem:[#allocation2 + $0x24c] sm:$0xf] }
 0xf97   :  { %6498 = vmatpush.bf16.msrb.mxu1 %v8317_v42  ;;  %v8724_v42 = vld [vmem:[#allocation2 + $0xae8] sm:$0xf] }
 0xf98   :  { %6506 = vmatpush.bf16.msrb.mxu2 %v8629_v36  ;;  %v7457_v36 = vor.u32 %v9046_v12, %v7454_v14  ;;  %v8725_v9 = vor.u32 %v9367_v22, %v8724_v42  ;;  %v9100_v22 = vld [vmem:[#allocation2 + $0x2ac] sm:$0xf] }
 0xf99   :  { %6519 = vmatpush.bf16.msra.mxu3 %v8821_v58  ;;  %v8533_v58 = vor.u32 %v9319_v20, %v8532_v49  ;;  %v9022_v49 = vld [vmem:[#allocation2 + $0x3c] sm:$0xf]  ;;  %v7358_v20 = vld [vmem:[#allocation2 + $0x50] sm:$0xf0] }
 0xf9a   :  { %6486 = vmatpush.bf16.msrb.mxu0 %v8101_v47  ;;  %v6280_v32 = vpop.f32.mrf.mxu0  ;;  %v9361_v47 = vld [vmem:[#allocation2 + $0xacc] sm:$0xf0] }
 0xf9b   :  { %6499 = vmatpush.bf16.msrb.mxu1 %v8293_v29  ;;  %v6293_v44 = vpop.f32.mrf.mxu1  ;;  %v9034_v29 = vld [vmem:[#allocation2 + $0x9c] sm:$0xf]  ;;  %v8701_v46 = vor.u32 %v9361_v47, %v8700_v50  ;;  %v7334_v50 = vld [vmem:[#allocation2 + $0x20] sm:$0xf0]  ;;  %v7865_v47 = vor.u32 %v9148_v18, %v7862_v54  ;;  %v9172_v54 = vld [vmem:[#allocation2 + $0x4ec] sm:$0xf] }
 0xf9c   :  { %6507 = vmatpush.bf16.msrb.mxu2 %v8605_v31  ;;  %v7406_v31 = vld [vmem:[#allocation2 + $0xb0] sm:$0xf0]  ;;  %v7766_v18 = vld [vmem:[#allocation2 + $0x380] sm:$0xf0] }
 0xf9d   :  { %6520 = vmatpush.bf16.msra.mxu3 %v8797_v27  ;;  %6487 = vmatmul.bf16.vlgmr.msrb.gmra.mxu0 %v13288_v56  ;;  %v6242_v27 = vadd.f32 %v13319_v53, %v13323_v10  ;;  %v7409_v30 = vor.u32 %v9034_v29, %v7406_v31  ;;  %v9106_v53 = vld [vmem:[#allocation2 + $0x2dc] sm:$0xf]  ;;  %v7694_v10 = vld [vmem:[#allocation2 + $0x2f0] sm:$0xf0] }
 0xf9e   :  { %6533 = vmatpush.bf16.msra.mxu0 %v8989_v4  ;;  %6500 = vmatmul.bf16.vlgmr.msrb.gmra.mxu1 %v13290_v61  ;;  %v8509_v4 = vor.u32 %v9313_v17, %v8508_v43  ;;  %v6254_v62 = vpop.f32.mrf.mxu2  ;;  %v7673_v43 = vor.u32 %v9100_v22, %v7670_v37  ;;  %v9016_v17 = vld [vmem:[#allocation2 + $0xc] sm:$0xf]  ;;  %v9142_v29 = vld [vmem:[#allocation2 + $0x3fc] sm:$0xf]  ;;  %v7838_v31 = vld [vmem:[#allocation2 + $0x410] sm:$0xf0] }
 0xf9f   :  { %6544 = vmatpush.bf16.msra.mxu1 %v7505_v21  ;;  %v8893_v21 = vor.u32 %v9409_v19, %v8892_v0  ;;  %v6255_v15 = vadd.f32 %v6254_v62, %v6242_v27  ;;  %v6267_v25 = vpop.f32.mrf.mxu3  ;;  %v9094_v19 = vld [vmem:[#allocation2 + $0x27c] sm:$0xf]  ;;  %v7841_v62 = vor.u32 %v9142_v29, %v7838_v31  ;;  %v9124_v22 = vld [vmem:[#allocation2 + $0x36c] sm:$0xf]  ;;  %v7742_v29 = vld [vmem:[#allocation2 + $0x350] sm:$0xf0] }
 0xfa0   :  { %6508 = vmatpush.bf16.msrb.mxu2 %v8581_v3  ;;  %v9403_v3 = vld [vmem:[#allocation2 + $0xc1c] sm:$0xf0]  ;;  %v9190_v27 = vld [vmem:[#allocation2 + $0x57c] sm:$0xf] }
 0xfa1   :  { %6521 = vmatpush.bf16.msra.mxu3 %v8773_v55  ;;  %v7382_v55 = vld [vmem:[#allocation2 + $0x80] sm:$0xf0]  ;;  %v6268_v1 = vadd.f32 %v6267_v25, %v6255_v15  ;;  %v8869_v12 = vor.u32 %v9403_v3, %v8868_v11  ;;  %v8273_v15 = vor.u32 %v9250_v60, %v8270_v41  ;;  %v9184_v3 = vld [vmem:[#allocation2 + $0x54c] sm:$0xf]  ;;  %v9166_v31 = vld [vmem:[#allocation2 + $0x4bc] sm:$0xf] }
 0xfa2   :  { %6534 = vmatpush.bf16.msra.mxu0 %v8965_v34  ;;  %v9154_v34 = vld [vmem:[#allocation2 + $0x45c] sm:$0xf]  ;;  %v6282_v24 = vpop.f32.mrf.mxu0  ;;  %v7622_v11 = vld [vmem:[#allocation2 + $0x260] sm:$0xf0]  ;;  %v8174_v60 = vld [vmem:[#allocation2 + $0x6b0] sm:$0xf0] }
 0xfa3   :  { %6545 = vmatpush.bf16.msra.mxu1 %v7481_v23  ;;  %v9202_v23 = vld [vmem:[#allocation2 + $0x5dc] sm:$0xf]  ;;  %v6295_v14 = vpop.f32.mrf.mxu1  ;;  %v7889_v42 = vor.u32 %v9154_v34, %v7886_v57  ;;  %v7814_v25 = vld [vmem:[#allocation2 + $0x3e0] sm:$0xf0]  ;;  %v7598_v57 = vld [vmem:[#allocation2 + $0x230] sm:$0xf0] }
 0xfa4   :  { %6509 = vmatpush.bf16.msrb.mxu2 %v8557_v28  ;;  %v7385_v28 = vor.u32 %v9028_v5, %v7382_v55  ;;  %v8006_v5 = vld [vmem:[#allocation2 + $0x560] sm:$0xf0]  ;;  %v9244_v55 = vld [vmem:[#allocation2 + $0x72c] sm:$0xf]  ;;  %v7790_v24 = vld [vmem:[#allocation2 + $0x3b0] sm:$0xf0] }
 0xfa5   :  { %6522 = vmatpush.bf16.msra.mxu3 %v8749_v16  ;;  %v6281_v16 = vadd.f32 %v6280_v32, %v6268_v1  ;;  %v7361_v32 = vor.u32 %v9022_v49, %v7358_v20  ;;  %v8009_v1 = vor.u32 %v9184_v3, %v8006_v5  ;;  %v9238_v14 = vld [vmem:[#allocation2 + $0x6fc] sm:$0xf]  ;;  %v7910_v5 = vld [vmem:[#allocation2 + $0x4a0] sm:$0xf0] }
 0xfa6   :  { %6535 = vmatpush.bf16.msra.mxu0 %v8941_v35  ;;  %v7697_v35 = vor.u32 %v9106_v53, %v7694_v10  ;;  %v8246_v53 = vld [vmem:[#allocation2 + $0x740] sm:$0xf0]  ;;  %v7625_v10 = vor.u32 %v9088_v51, %v7622_v11  ;;  %v9112_v11 = vld [vmem:[#allocation2 + $0x30c] sm:$0xf] }
 0xfa7   :  { %6546 = vmatpush.bf16.msra.mxu1 %v7457_v36  ;;  %v8081_v36 = vor.u32 %v9202_v23, %v8078_v8  ;;  %v13329_v39 = vadd.f32 %v6293_v44, %v6281_v16  ;;  %v7646_v44 = vld [vmem:[#allocation2 + $0x290] sm:$0xf0]  ;;  %v9130_v23 = vld [vmem:[#allocation2 + $0x39c] sm:$0xf]  ;;  %v8249_v8 = vor.u32 %v9244_v55, %v8246_v53  ;;  %v9220_v55 = vld [vmem:[#allocation2 + $0x66c] sm:$0xf] }
 0xfa8   :  { %6510 = vmatpush.bf16.msrb.mxu2 %v8533_v58  ;;  %v9196_v58 = vld [vmem:[#allocation2 + $0x5ac] sm:$0xf]  ;;  %v7793_v49 = vor.u32 %v9130_v23, %v7790_v24  ;;  %v8150_v53 = vld [vmem:[#allocation2 + $0x680] sm:$0xf0]  ;;  %v9394_v23 = vld [vmem:[#allocation2 + $0xbdc] sm:$0xf] }
 0xfa9   :  { %6523 = vmatpush.bf16.msra.mxu3 %v8725_v9  ;;  %v8054_v9 = vld [vmem:[#allocation2 + $0x5c0] sm:$0xf0] }
 0xfaa   :  { %6536 = vmatpush.bf16.msra.mxu0 %v8917_v59  ;;  %v6256_v59 = vpop.f32.mrf.mxu2  ;;  %v8057_v0 = vor.u32 %v9196_v58, %v8054_v9  ;;  %v7958_v58 = vld [vmem:[#allocation2 + $0x500] sm:$0xf0]  ;;  %v9232_v9 = vld [vmem:[#allocation2 + $0x6cc] sm:$0xf] }
 0xfab   :  { %6547 = vmatpush.bf16.msra.mxu1 %v7433_v33  ;;  %v6269_v33 = vpop.f32.mrf.mxu3  ;;  %v8198_v59 = vld [vmem:[#allocation2 + $0x6e0] sm:$0xf0] }
 0xfac   :  { %6511 = vmatpush.bf16.msrb.mxu2 %v8509_v4  ;;  %v8030_v4 = vld [vmem:[#allocation2 + $0x590] sm:$0xf0]  ;;  %v7961_v33 = vor.u32 %v9172_v54, %v7958_v58  ;;  %v4079_v54 = vperm.slane %v13316_v63, 1  ;;  %v8630_v58 = vld [vmem:[#allocation2 + $0xa40] sm:$0xf0] }
 0xfad   :  { %6524 = vmatpush.bf16.msra.mxu3 %v8701_v46  ;;  %v7337_v46 = vor.u32 %v9016_v17, %v7334_v50  ;;  %v8033_v48 = vor.u32 %v9190_v27, %v8030_v4  ;;  %v7769_v50 = vor.u32 %v9124_v22, %v7766_v18  ;;  %v7934_v27 = vld [vmem:[#allocation2 + $0x4d0] sm:$0xf0]  ;;  %v9226_v4 = vld [vmem:[#allocation2 + $0x69c] sm:$0xf]  ;;  %v9340_v18 = vld [vmem:[#allocation2 + $0xa2c] sm:$0xf] }
 0xfae   :  { %6537 = vmatpush.bf16.msra.mxu0 %v8893_v21  ;;  %v7649_v21 = vor.u32 %v9094_v19, %v7646_v44  ;;  %v9118_v19 = vld [vmem:[#allocation2 + $0x33c] sm:$0xf]  ;;  %v8201_v44 = vor.u32 %v9232_v9, %v8198_v59  ;;  %v7937_v51 = vor.u32 %v9166_v31, %v7934_v27  ;;  %v8177_v3 = vor.u32 %v9226_v4, %v8174_v60  ;;  %v9388_v9 = vld [vmem:[#allocation2 + $0xbac] sm:$0xf]  ;;  %v8822_v59 = vld [vmem:[#allocation2 + $0xbc0] sm:$0xf0] }
 0xfaf   :  { %6548 = vmatpush.bf16.msra.mxu1 %v7409_v30  ;;  %v9136_v30 = vld [vmem:[#allocation2 + $0x3cc] sm:$0xf]  ;;  %v8414_v31 = vld [vmem:[#allocation2 + $0x890] sm:$0xf0]  ;;  %v9334_v63 = vld [vmem:[#allocation2 + $0x9fc] sm:$0xf] }
 0xfb0   :  { %6512 = vmatpush.bf16.msrb.mxu2 %v8485_v13  ;;  %v7817_v34 = vor.u32 %v9136_v30, %v7814_v25  ;;  %v9082_v13 = vld [vmem:[#allocation2 + $0x21c] sm:$0xf]  ;;  %v7718_v30 = vld [vmem:[#allocation2 + $0x320] sm:$0xf0]  ;;  %v8606_v4 = vld [vmem:[#allocation2 + $0xa10] sm:$0xf0] }
 0xfb1   :  { %6525 = vmatpush.bf16.msra.mxu3 %v8677_v26  ;;  %v9178_v26 = vld [vmem:[#allocation2 + $0x51c] sm:$0xf]  ;;  %v7601_v16 = vor.u32 %v9082_v13, %v7598_v57  ;;  %v8654_v57 = vld [vmem:[#allocation2 + $0xa70] sm:$0xf0] }
 0xfb2   :  { %6538 = vmatpush.bf16.msra.mxu0 %v8869_v12  ;;  %v7982_v12 = vld [vmem:[#allocation2 + $0x530] sm:$0xf0]  ;;  %v9382_v60 = vld [vmem:[#allocation2 + $0xb7c] sm:$0xf] }
 0xfb3   :  { %6549 = vmatpush.bf16.msra.mxu1 %v7385_v28  ;;  %6513 = vmatmul.bf16.vlgmr.msrb.gmra.mxu2 %v13292_v6  ;;  %v8222_v28 = vld [vmem:[#allocation2 + $0x710] sm:$0xf0]  ;;  %v7985_v20 = vor.u32 %v9178_v26, %v7982_v12  ;;  %v7721_v12 = vor.u32 %v9112_v11, %v7718_v30 }
 0xfb4   :  { %6557 = vmatpush.bf16.msra.mxu2 %v7697_v35  ;;  %6526 = vmatmul.bf16.vlgmr.msra.gmra.mxu3 %v13294_v38  ;;  %v8225_v37 = vor.u32 %v9238_v14, %v8222_v28  ;;  %v8153_v28 = vor.u32 %v9220_v55, %v8150_v53  ;;  %v8582_v55 = vld [vmem:[#allocation2 + $0x9e0] sm:$0xf0]  ;;  %v9376_v53 = vld [vmem:[#allocation2 + $0xb4c] sm:$0xf] }
 0xfb5   :  { %6570 = vmatpush.bf16.msrb.mxu3 %v7889_v42  ;;  %9004 = vmatmul.msk.bf16.vlgmr.msra.gmra.mxu0 %vm14100_vm3, %v13300_v40  ;;  %v9076_v42 = vld [vmem:[#allocation2 + $0x1ec] sm:$0xf] }
 0xfb6   :  { %6583 = vmatpush.bf16.msrb.mxu0 %v8081_v36  ;;  %v13336_v35 = vpop.f32.mrf.mxu2  ;;  %v7574_v36 = vld [vmem:[#allocation2 + $0x200] sm:$0xf0] }
 0xfb7   :  { %6550 = vmatpush.bf16.msra.mxu1 %v7361_v32  ;;  %v7577_v32 = vor.u32 %v9076_v42, %v7574_v36  ;;  %v9292_v42 = vld [vmem:[#allocation2 + $0x8ac] sm:$0xf] }
 0xfb8   :  { %6558 = vmatpush.bf16.msra.mxu2 %v7673_v43 }
 0xfb9   :  { %6571 = vmatpush.bf16.msrb.mxu3 %v7865_v47  ;;  %v9070_v47 = vld [vmem:[#allocation2 + $0x1bc] sm:$0xf] }
 0xfba   :  { %6584 = vmatpush.bf16.msrb.mxu0 %v8057_v0  ;;  %v13338_v43 = vpop.f32.mrf.mxu0  ;;  %v7550_v0 = vld [vmem:[#allocation2 + $0x1d0] sm:$0xf0] }
 0xfbb   :  { %6551 = vmatpush.bf16.msra.mxu1 %v7337_v46  ;;  %v13340_v17 = vpop.f32.mrf.mxu1  ;;  %v7553_v41 = vor.u32 %v9070_v47, %v7550_v0  ;;  %v9064_v46 = vld [vmem:[#allocation2 + $0x18c] sm:$0xf]  ;;  %v8102_v0 = vld [vmem:[#allocation2 + $0x620] sm:$0xf0] }
 0xfbc   :  { %6559 = vmatpush.bf16.msra.mxu2 %v7649_v21  ;;  %v7526_v21 = vld [vmem:[#allocation2 + $0x1a0] sm:$0xf0]  ;;  %v9208_v47 = vld [vmem:[#allocation2 + $0x60c] sm:$0xf] }
 0xfbd   :  { %6572 = vmatpush.bf16.msrb.mxu3 %v7841_v62  ;;  %v7529_v13 = vor.u32 %v9064_v46, %v7526_v21  ;;  %v8084_v46 = vld [vmem:[#allocation2 + $0x5e0] sm:$0xf]  ;;  %v9206_v21 = vld [vmem:[#allocation2 + $0x5f4] sm:$0xf0] }
 0xfbe   :  { %6585 = vmatpush.bf16.msrb.mxu0 %v8033_v48  ;;  %6552 = vmatmul.bf16.vlgmr.msra.gmra.mxu1 %v13276_v45  ;;  %v6308_v62 = vpop.f32.mrf.mxu2  ;;  %v7745_v48 = vor.u32 %v9118_v19, %v7742_v29  ;;  %v8633_v19 = vor.u32 %v9340_v18, %v8630_v58  ;;  %v9286_v29 = vld [vmem:[#allocation2 + $0x87c] sm:$0xf]  ;;  %v8342_v18 = vld [vmem:[#allocation2 + $0x800] sm:$0xf0] }
 0xfbf   :  { %6596 = vmatpush.bf16.msrb.mxu1 %v8273_v15  ;;  %v9160_v15 = vld [vmem:[#allocation2 + $0x48c] sm:$0xf]  ;;  %v6319_v25 = vpop.f32.mrf.mxu3  ;;  %v8105_v62 = vor.u32 %v9208_v47, %v8102_v0  ;;  %v9188_v47 = vld [vmem:[#allocation2 + $0x564] sm:$0xf0] }
 0xfc0   :  { %6560 = vmatpush.bf16.msra.mxu2 %v7625_v10  ;;  %v9298_v10 = vld [vmem:[#allocation2 + $0x8dc] sm:$0xf]  ;;  %v7913_v14 = vor.u32 %v9160_v15, %v7910_v5  ;;  %v6320_v27 = vadd.f32 %v6319_v25, %v4079_v54  ;;  %v9280_v15 = vld [vmem:[#allocation2 + $0x84c] sm:$0xf]  ;;  %v8390_v25 = vld [vmem:[#allocation2 + $0x860] sm:$0xf0]  ;;  %v8085_v5 = vor.u32 %v9206_v21, %v8084_v46 }
 0xfc1   :  { %6573 = vmatpush.bf16.msrb.mxu3 %v7817_v34  ;;  %v8462_v34 = vld [vmem:[#allocation2 + $0x8f0] sm:$0xf0]  ;;  %v9316_v54 = vld [vmem:[#allocation2 + $0x96c] sm:$0xf]  ;;  %v9358_v46 = vld [vmem:[#allocation2 + $0xabc] sm:$0xf] }
 0xfc2   :  { %6586 = vmatpush.bf16.msrb.mxu0 %v8009_v1  ;;  %v9346_v1 = vld [vmem:[#allocation2 + $0xa5c] sm:$0xf]  ;;  %v6334_v24 = vpop.f32.mrf.mxu0  ;;  %v6333_v30 = vadd.f32 %v13338_v43, %v6320_v27  ;;  %v8366_v43 = vld [vmem:[#allocation2 + $0x830] sm:$0xf0] }
 0xfc3   :  { %6597 = vmatpush.bf16.msrb.mxu1 %v8249_v8  ;;  %v8846_v8 = vld [vmem:[#allocation2 + $0xbf0] sm:$0xf0]  ;;  %v6347_v26 = vpop.f32.mrf.mxu1  ;;  %v8657_v36 = vor.u32 %v9346_v1, %v8654_v57  ;;  %v9200_v1 = vld [vmem:[#allocation2 + $0x5c4] sm:$0xf0]  ;;  %v9274_v24 = vld [vmem:[#allocation2 + $0x81c] sm:$0xf] }
 0xfc4   :  { %6561 = vmatpush.bf16.msra.mxu2 %v7601_v16  ;;  %v8465_v16 = vor.u32 %v9298_v10, %v8462_v34  ;;  %v8849_v22 = vor.u32 %v9394_v23, %v8846_v8  ;;  %v8774_v10 = vld [vmem:[#allocation2 + $0xb60] sm:$0xf0]  ;;  %v8060_v34 = vld [vmem:[#allocation2 + $0x5b0] sm:$0xf]  ;;  %v6346_v8 = vadd.f32 %v13340_v17, %v6333_v30  ;;  %v9322_v26 = vld [vmem:[#allocation2 + $0x99c] sm:$0xf] }
 0xfc5   :  { %6574 = vmatpush.bf16.msrb.mxu3 %v7793_v49  ;;  %v9214_v49 = vld [vmem:[#allocation2 + $0x63c] sm:$0xf]  ;;  %v8777_v23 = vor.u32 %v9376_v53, %v8774_v10  ;;  %v9268_v17 = vld [vmem:[#allocation2 + $0x7ec] sm:$0xf]  ;;  %v8318_v27 = vld [vmem:[#allocation2 + $0x7d0] sm:$0xf0] }
 0xfc6   :  { %6587 = vmatpush.bf16.msrb.mxu0 %v7985_v20  ;;  %v8126_v20 = vld [vmem:[#allocation2 + $0x650] sm:$0xf0]  ;;  %v8345_v0 = vor.u32 %v9268_v17, %v8342_v18  ;;  %v8294_v30 = vld [vmem:[#allocation2 + $0x7a0] sm:$0xf0]  ;;  %v9352_v10 = vld [vmem:[#allocation2 + $0xa8c] sm:$0xf] }
 0xfc7   :  { %6598 = vmatpush.bf16.msrb.mxu1 %v8225_v37  ;;  %v8438_v37 = vld [vmem:[#allocation2 + $0x8c0] sm:$0xf0]  ;;  %v8702_v21 = vld [vmem:[#allocation2 + $0xad0] sm:$0xf0]  ;;  %v7940_v18 = vld [vmem:[#allocation2 + $0x4c0] sm:$0xf] }
 0xfc8   :  { %6562 = vmatpush.bf16.msra.mxu2 %v7577_v32  ;;  %v6321_v32 = vpop.f32.mrf.mxu3  ;;  %v8486_v53 = vld [vmem:[#allocation2 + $0x920] sm:$0xf0] }
 0xfc9   :  { %6575 = vmatpush.bf16.msrb.mxu3 %v7769_v50  ;;  %v8129_v50 = vor.u32 %v9214_v49, %v8126_v20  ;;  %v8036_v49 = vld [vmem:[#allocation2 + $0x580] sm:$0xf]  ;;  %v9194_v20 = vld [vmem:[#allocation2 + $0x594] sm:$0xf0]  ;;  %v9364_v32 = vld [vmem:[#allocation2 + $0xaec] sm:$0xf] }
 0xfca   :  { %6588 = vmatpush.bf16.msrb.mxu0 %v7961_v33  ;;  %v8441_v33 = vor.u32 %v9292_v42, %v8438_v37  ;;  %v8369_v42 = vor.u32 %v9274_v24, %v8366_v43  ;;  %v8990_v24 = vld [vmem:[#allocation2 + $0xd10] sm:$0xf0]  ;;  %v7508_v43 = vld [vmem:[#allocation2 + $0x160] sm:$0xf] }
 0xfcb   :  { %6599 = vmatpush.bf16.msrb.mxu1 %v8201_v44  ;;  %v8825_v44 = vor.u32 %v9388_v9, %v8822_v59  ;;  %v8037_v9 = vor.u32 %v9194_v20, %v8036_v49  ;;  %v8534_v59 = vld [vmem:[#allocation2 + $0x980] sm:$0xf0] }
 0xfcc   :  { %6563 = vmatpush.bf16.msra.mxu2 %v7553_v41  ;;  %v8798_v41 = vld [vmem:[#allocation2 + $0xb90] sm:$0xf0] }
 0xfcd   :  { %6576 = vmatpush.bf16.msrb.mxu3 %v7745_v48  ;;  %v8417_v48 = vor.u32 %v9286_v29, %v8414_v31  ;;  %v8801_v11 = vor.u32 %v9382_v60, %v8798_v41  ;;  %v8537_v29 = vor.u32 %v9316_v54, %v8534_v59  ;;  %v8510_v41 = vld [vmem:[#allocation2 + $0x950] sm:$0xf0]  ;;  %v9170_v54 = vld [vmem:[#allocation2 + $0x4d4] sm:$0xf0]  ;;  %v9424_v59 = vld [vmem:[#allocation2 + $0xccc] sm:$0xf] }
 0xfce   :  { %6589 = vmatpush.bf16.msrb.mxu0 %v7937_v51  ;;  %v8609_v51 = vor.u32 %v9334_v63, %v8606_v4  ;;  %v9262_v63 = vld [vmem:[#allocation2 + $0x7bc] sm:$0xf] }
 0xfcf   :  { %6600 = vmatpush.bf16.msrb.mxu1 %v8177_v3  ;;  %v9328_v3 = vld [vmem:[#allocation2 + $0x9cc] sm:$0xf]  ;;  %v9310_v4 = vld [vmem:[#allocation2 + $0x93c] sm:$0xf] }
 0xfd0   :  { %6564 = vmatpush.bf16.msra.mxu2 %v7529_v13  ;;  %v8393_v13 = vor.u32 %v9280_v15, %v8390_v25  ;;  %v8585_v57 = vor.u32 %v9328_v3, %v8582_v55  ;;  %v8513_v25 = vor.u32 %v9310_v4, %v8510_v41  ;;  %v8705_v3 = vor.u32 %v9358_v46, %v8702_v21  ;;  %v9304_v55 = vld [vmem:[#allocation2 + $0x90c] sm:$0xf]  ;;  %v8942_v41 = vld [vmem:[#allocation2 + $0xcb0] sm:$0xf0]  ;;  %v7460_v46 = vld [vmem:[#allocation2 + $0x100] sm:$0xf] }
 0xfd1   :  { %6577 = vmatpush.bf16.msrb.mxu3 %v7721_v12  ;;  %v8061_v12 = vor.u32 %v9200_v1, %v8060_v34  ;;  %v9050_v21 = vld [vmem:[#allocation2 + $0x114] sm:$0xf0] }
 0xfd2   :  { %6590 = vmatpush.bf16.msrb.mxu0 %v7913_v14  ;;  %v8558_v14 = vld [vmem:[#allocation2 + $0x9b0] sm:$0xf0] }
 0xfd3   :  { %6601 = vmatpush.bf16.msrb.mxu1 %v8153_v28  ;;  %6565 = vmatmul.bf16.vlgmr.msra.gmra.mxu2 %v13278_v52  ;;  %v9370_v28 = vld [vmem:[#allocation2 + $0xb1c] sm:$0xf] }
 0xfd4   :  { %6609 = vmatpush.bf16.msrb.mxu2 %v8465_v16  ;;  %6578 = vmatmul.bf16.vlgmr.msrb.gmra.mxu3 %v13280_v7  ;;  %v8750_v16 = vld [vmem:[#allocation2 + $0xb30] sm:$0xf0] }
 0xfd5   :  { %6622 = vmatpush.bf16.msra.mxu3 %v8657_v36  ;;  %6591 = vmatmul.bf16.vlgmr.msrb.gmra.mxu0 %v13285_v2  ;;  %v8753_v37 = vor.u32 %v9370_v28, %v8750_v16  ;;  %v7700_v28 = vld [vmem:[#allocation2 + $0x2e0] sm:$0xf]  ;;  %v9110_v16 = vld [vmem:[#allocation2 + $0x2f4] sm:$0xf0] }
 0xfd6   :  { %6635 = vmatpush.bf16.msra.mxu0 %v8849_v22  ;;  %v6358_v36 = vpop.f32.mrf.mxu2  ;;  %v8561_v22 = vor.u32 %v9322_v26, %v8558_v14  ;;  %v9062_v14 = vld [vmem:[#allocation2 + $0x174] sm:$0xf0] }
 0xfd7   :  { %6602 = vmatpush.bf16.msrb.mxu1 %v8129_v50  ;;  %v6359_v58 = vadd.f32 %v6358_v36, %v6346_v8  ;;  %v8726_v50 = vld [vmem:[#allocation2 + $0xb00] sm:$0xf0]  ;;  %v9430_v8 = vld [vmem:[#allocation2 + $0xcfc] sm:$0xf] }
 0xfd8   :  { %6610 = vmatpush.bf16.msrb.mxu2 %v8441_v33  ;;  %v8012_v33 = vld [vmem:[#allocation2 + $0x550] sm:$0xf]  ;;  %v8729_v31 = vor.u32 %v9364_v32, %v8726_v50  ;;  %v8993_v17 = vor.u32 %v9430_v8, %v8990_v24  ;;  %v8966_v32 = vld [vmem:[#allocation2 + $0xce0] sm:$0xf0] }
 0xfd9   :  { %6623 = vmatpush.bf16.msra.mxu3 %v8633_v19  ;;  %v8013_v60 = vor.u32 %v9188_v47, %v8012_v33  ;;  %v7484_v50 = vld [vmem:[#allocation2 + $0x130] sm:$0xf]  ;;  %v9056_v33 = vld [vmem:[#allocation2 + $0x144] sm:$0xf0] }
 0xfda   :  { %6636 = vmatpush.bf16.msra.mxu0 %v8825_v44  ;;  %v6384_v19 = vpop.f32.mrf.mxu0  ;;  %v7676_v47 = vld [vmem:[#allocation2 + $0x2b0] sm:$0xf] }
 0xfdb   :  { %6603 = vmatpush.bf16.msrb.mxu1 %v8105_v62  ;;  %v6397_v44 = vpop.f32.mrf.mxu1  ;;  %v7988_v62 = vld [vmem:[#allocation2 + $0x520] sm:$0xf] }
 0xfdc   :  { %6611 = vmatpush.bf16.msrb.mxu2 %v8417_v48  ;;  %v9182_v48 = vld [vmem:[#allocation2 + $0x534] sm:$0xf0] }
 0xfdd   :  { %6624 = vmatpush.bf16.msra.mxu3 %v8609_v51  ;;  %v8321_v51 = vor.u32 %v9262_v63, %v8318_v27  ;;  %v7989_v34 = vor.u32 %v9182_v48, %v7988_v62  ;;  %v9164_v63 = vld [vmem:[#allocation2 + $0x4a4] sm:$0xf0]  ;;  %v7485_v27 = vor.u32 %v9056_v33, %v7484_v50  ;;  %v7652_v62 = vld [vmem:[#allocation2 + $0x280] sm:$0xf]  ;;  %v9098_v48 = vld [vmem:[#allocation2 + $0x294] sm:$0xf0] }
 0xfde   :  { %6637 = vmatpush.bf16.msra.mxu0 %v8801_v11  ;;  %6604 = vmatmul.bf16.vlgmr.msrb.gmra.mxu1 %v13288_v56  ;;  %v9256_v11 = vld [vmem:[#allocation2 + $0x78c] sm:$0xf]  ;;  %v6360_v15 = vpop.f32.mrf.mxu2  ;;  %v8870_v33 = vld [vmem:[#allocation2 + $0xc20] sm:$0xf0] }
 0xfdf   :  { %6700 = vmatpush.bf16.msra.mxu1 %v8085_v5  ;;  %v6371_v5 = vpop.f32.mrf.mxu3 }
 0xfe0   :  { %6612 = vmatpush.bf16.msrb.mxu2 %v8393_v13  ;;  %v6372_v1 = vadd.f32 %v6371_v5, %v6359_v58  ;;  %v8678_v13 = vld [vmem:[#allocation2 + $0xaa0] sm:$0xf0]  ;;  %v7509_v58 = vor.u32 %v9062_v14, %v7508_v43  ;;  %v9412_v5 = vld [vmem:[#allocation2 + $0xc6c] sm:$0xf]  ;;  %v7412_v14 = vld [vmem:[#allocation2 + $0xa0] sm:$0xf] }
 0xfe1   :  { %6625 = vmatpush.bf16.msra.mxu3 %v8585_v57  ;;  %v7964_v57 = vld [vmem:[#allocation2 + $0x4f0] sm:$0xf]  ;;  %v8681_v36 = vor.u32 %v9352_v10, %v8678_v13  ;;  %v9092_v13 = vld [vmem:[#allocation2 + $0x264] sm:$0xf0] }
 0xfe2   :  { %6638 = vmatpush.bf16.msra.mxu0 %v8777_v23  ;;  %v9176_v23 = vld [vmem:[#allocation2 + $0x504] sm:$0xf0]  ;;  %v6385_v26 = vadd.f32 %v6384_v19, %v6372_v1  ;;  %v6386_v49 = vpop.f32.mrf.mxu0  ;;  %v7628_v1 = vld [vmem:[#allocation2 + $0x250] sm:$0xf] }
 0xfe3   :  { %6701 = vmatpush.bf16.msra.mxu1 %v8061_v12  ;;  %v8297_v12 = vor.u32 %v9256_v11, %v8294_v30  ;;  %v6399_v20 = vpop.f32.mrf.mxu1  ;;  %v9398_v11 = vld [vmem:[#allocation2 + $0xbf4] sm:$0xf0]  ;;  %v7629_v43 = vor.u32 %v9092_v13, %v7628_v1  ;;  %v7604_v49 = vld [vmem:[#allocation2 + $0x220] sm:$0xf] }
 0xfe4   :  { %6613 = vmatpush.bf16.msrb.mxu2 %v8369_v42  ;;  %v8489_v42 = vor.u32 %v9304_v55, %v8486_v53  ;;  %v8918_v55 = vld [vmem:[#allocation2 + $0xc80] sm:$0xf0]  ;;  %v7436_v53 = vld [vmem:[#allocation2 + $0xd0] sm:$0xf]  ;;  %v9086_v20 = vld [vmem:[#allocation2 + $0x234] sm:$0xf0] }
 0xfe5   :  { %6626 = vmatpush.bf16.msra.mxu3 %v8561_v22  ;;  %v7965_v22 = vor.u32 %v9176_v23, %v7964_v57  ;;  %v8828_v57 = vld [vmem:[#allocation2 + $0xbb0] sm:$0xf]  ;;  %v9392_v23 = vld [vmem:[#allocation2 + $0xbc4] sm:$0xf0]  ;;  %v8921_v8 = vor.u32 %v9412_v5, %v8918_v55  ;;  %v8756_v5 = vld [vmem:[#allocation2 + $0xb20] sm:$0xf] }
 0xfe6   :  { %6639 = vmatpush.bf16.msra.mxu0 %v8753_v37  ;;  %v13349_v37 = vadd.f32 %v6397_v44, %v6385_v26  ;;  %v8969_v44 = vor.u32 %v9424_v59, %v8966_v32  ;;  %v9406_v26 = vld [vmem:[#allocation2 + $0xc3c] sm:$0xf]  ;;  %v7605_v59 = vor.u32 %v9086_v20, %v7604_v49  ;;  %v7844_v49 = vld [vmem:[#allocation2 + $0x400] sm:$0xf]  ;;  %v9146_v20 = vld [vmem:[#allocation2 + $0x414] sm:$0xf0] }
 0xfe7   :  { %6702 = vmatpush.bf16.msra.mxu1 %v8037_v9  ;;  %v7701_v9 = vor.u32 %v9110_v16, %v7700_v28  ;;  %v6373_v19 = vpop.f32.mrf.mxu3  ;;  %v8829_v28 = vor.u32 %v9392_v23, %v8828_v57  ;;  %v9038_v16 = vld [vmem:[#allocation2 + $0xb4] sm:$0xf0]  ;;  %v7340_v23 = vld [vmem:[#allocation2 + $0x10] sm:$0xf] }
 0xfe8   :  { %6614 = vmatpush.bf16.msrb.mxu2 %v8345_v0  ;;  %v9104_v0 = vld [vmem:[#allocation2 + $0x2c4] sm:$0xf0] }
 0xfe9   :  { %6627 = vmatpush.bf16.msra.mxu3 %v8537_v29  ;;  %v7941_v29 = vor.u32 %v9170_v54, %v7940_v18  ;;  %v7677_v4 = vor.u32 %v9104_v0, %v7676_v47  ;;  %v9400_v18 = vld [vmem:[#allocation2 + $0xc0c] sm:$0xf]  ;;  %v13355_v54 = vld [vmem:[#allocation11] sm:$0x3f]  ;;  %v9032_v0 = vld [vmem:[#allocation2 + $0x84] sm:$0xf0] }
 0xfea   :  { %6640 = vmatpush.bf16.msra.mxu0 %v8729_v31  ;;  %v7916_v31 = vld [vmem:[#allocation2 + $0x490] sm:$0xf] }
 0xfeb   :  { %6703 = vmatpush.bf16.msra.mxu1 %v8013_v60  ;;  %v9418_v60 = vld [vmem:[#allocation2 + $0xc9c] sm:$0xf]  ;;  %v7917_v30 = vor.u32 %v9164_v63, %v7916_v31  ;;  %v7388_v47 = vld [vmem:[#allocation2 + $0x70] sm:$0xf] }
 0xfec   :  { %6615 = vmatpush.bf16.msrb.mxu2 %v8321_v51  ;;  %v8852_v51 = vld [vmem:[#allocation2 + $0xbe0] sm:$0xf]  ;;  %v8945_v15 = vor.u32 %v9418_v60, %v8942_v41  ;;  %v8780_v31 = vld [vmem:[#allocation2 + $0xb50] sm:$0xf]  ;;  %v9158_v60 = vld [vmem:[#allocation2 + $0x474] sm:$0xf0] }
 0xfed   :  { %6628 = vmatpush.bf16.msra.mxu3 %v8513_v25  ;;  %v7461_v25 = vor.u32 %v9050_v21, %v7460_v46  ;;  %v8853_v10 = vor.u32 %v9398_v11, %v8852_v51  ;;  %v8873_v46 = vor.u32 %v9400_v18, %v8870_v33  ;;  %v7364_v51 = vld [vmem:[#allocation2 + $0x40] sm:$0xf]  ;;  %v9026_v11 = vld [vmem:[#allocation2 + $0x54] sm:$0xf0] }
 0xfee   :  { %6641 = vmatpush.bf16.msra.mxu0 %v8705_v3  ;;  %v7653_v3 = vor.u32 %v9098_v48, %v7652_v62  ;;  %v7365_v13 = vor.u32 %v9026_v11, %v7364_v51  ;;  %v9302_v18 = vld [vmem:[#allocation2 + $0x8f4] sm:$0xf0]  ;;  %v8708_v33 = vld [vmem:[#allocation2 + $0xac0] sm:$0xf] }
 0xfef   :  { %6704 = vmatpush.bf16.msra.mxu1 %v7989_v34  ;;  %v9044_v34 = vld [vmem:[#allocation2 + $0xe4] sm:$0xf0]  ;;  %v7796_v51 = vld [vmem:[#allocation2 + $0x3a0] sm:$0xf]  ;;  %v9134_v11 = vld [vmem:[#allocation2 + $0x3b4] sm:$0xf0] }
 0xff0   :  { %6616 = vmatpush.bf16.msrb.mxu2 %v8297_v12  ;;  %v7437_v24 = vor.u32 %v9044_v34, %v7436_v53  ;;  %v8894_v12 = vld [vmem:[#allocation2 + $0xc50] sm:$0xf0]  ;;  %v9374_v53 = vld [vmem:[#allocation2 + $0xb34] sm:$0xf0]  ;;  %v9152_v34 = vld [vmem:[#allocation2 + $0x444] sm:$0xf0] }
 0xff1   :  { %6629 = vmatpush.bf16.msra.mxu3 %v8489_v42  ;;  %v8804_v42 = vld [vmem:[#allocation2 + $0xb80] sm:$0xf] }
 0xff2   :  { %6642 = vmatpush.bf16.msra.mxu0 %v8681_v36  ;;  %v9386_v36 = vld [vmem:[#allocation2 + $0xb94] sm:$0xf0] }
 0xff3   :  { %6705 = vmatpush.bf16.msra.mxu1 %v7965_v22  ;;  %6617 = vmatmul.bf16.vlgmr.msrb.gmra.mxu2 %v13290_v61  ;;  %v8897_v22 = vor.u32 %v9406_v26, %v8894_v12  ;;  %v8805_v19 = vor.u32 %v9386_v36, %v8804_v42  ;;  %v8757_v26 = vor.u32 %v9374_v53, %v8756_v5  ;;  %v8276_v42 = vld [vmem:[#allocation2 + $0x760] sm:$0xf]  ;;  %v9155_v5 = vld [vmem:[#allocation2 + $0x464] sm:$0xf]  ;;  %v7894_v53 = vld [vmem:[#allocation2 + $0x478] sm:$0xf0] }
 0xff4   :  { %6661 = vmatpush.bf16.msra.mxu2 %v7509_v58  ;;  %6630 = vmatmul.bf16.vlgmr.msra.gmra.mxu3 %v13292_v6  ;;  %v4080_v58 = vperm.slane %v13355_v54, 2 }
 0xff5   :  { %6674 = vmatpush.bf16.msrb.mxu3 %v7701_v9  ;;  %6643 = vmatmul.bf16.vlgmr.msra.gmra.mxu0 %v13294_v38  ;;  %v7413_v9 = vor.u32 %v9038_v16, %v7412_v14  ;;  %v9068_v14 = vld [vmem:[#allocation2 + $0x1a4] sm:$0xf0] }
 0xff6   :  { %6650 = vmatpush.bf16.msrb.mxu0 %v8993_v17  ;;  %v6410_v17 = vpop.f32.mrf.mxu2  ;;  %v9368_v16 = vld [vmem:[#allocation2 + $0xb04] sm:$0xf0] }
 0xff7   :  { %6706 = vmatpush.bf16.msra.mxu1 %v7941_v29  ;;  %v6411_v32 = vadd.f32 %v6410_v17, %v13349_v37  ;;  %v6423_v50 = vpop.f32.mrf.mxu3  ;;  %v7580_v29 = vld [vmem:[#allocation2 + $0x1f0] sm:$0xf]  ;;  %v7389_v37 = vor.u32 %v9032_v0, %v7388_v47  ;;  %v8468_v17 = vld [vmem:[#allocation2 + $0x8e0] sm:$0xf]  ;;  %v9362_v47 = vld [vmem:[#allocation2 + $0xad4] sm:$0xf0] }
 0xff8   :  { %6662 = vmatpush.bf16.msra.mxu2 %v7485_v27  ;;  %v9380_v27 = vld [vmem:[#allocation2 + $0xb64] sm:$0xf0] }
 0xff9   :  { %6675 = vmatpush.bf16.msrb.mxu3 %v7677_v4  ;;  %v13359_v63 = vadd.f32 %v6423_v50, %v6411_v32  ;;  %v7892_v4 = vld [vmem:[#allocation2 + $0x460] sm:$0xf]  ;;  %v7845_v50 = vor.u32 %v9146_v20, %v7844_v49 }
 0xffa   :  { %6651 = vmatpush.bf16.msrb.mxu0 %v8969_v44  ;;  %v9080_v44 = vld [vmem:[#allocation2 + $0x204] sm:$0xf0]  ;;  %v6436_v41 = vpop.f32.mrf.mxu0 }
 0xffb   :  { %6707 = vmatpush.bf16.msra.mxu1 %v7917_v30  ;;  %v6437_v21 = vadd.f32 %v6436_v41, %v4080_v58  ;;  %v6449_v62 = vpop.f32.mrf.mxu1  ;;  %v7581_v48 = vor.u32 %v9080_v44, %v7580_v29  ;;  %v8781_v30 = vor.u32 %v9380_v27, %v8780_v31  ;;  %v7820_v29 = vld [vmem:[#allocation2 + $0x3d0] sm:$0xf]  ;;  %v9140_v44 = vld [vmem:[#allocation2 + $0x3e4] sm:$0xf0]  ;;  %v8709_v41 = vor.u32 %v9362_v47, %v8708_v33 }
 0xffc   :  { %6663 = vmatpush.bf16.msra.mxu2 %v7461_v25  ;;  %v7556_v25 = vld [vmem:[#allocation2 + $0x1c0] sm:$0xf]  ;;  %v8252_v31 = vld [vmem:[#allocation2 + $0x730] sm:$0xf]  ;;  %v9248_v27 = vld [vmem:[#allocation2 + $0x744] sm:$0xf0] }
 0xffd   :  { %6676 = vmatpush.bf16.msrb.mxu3 %v7653_v3  ;;  %v9074_v3 = vld [vmem:[#allocation2 + $0x1d4] sm:$0xf0]  ;;  %v13361_v55 = vadd.f32 %v6449_v62, %v6437_v21  ;;  %v8684_v21 = vld [vmem:[#allocation2 + $0xa90] sm:$0xf]  ;;  %v9356_v62 = vld [vmem:[#allocation2 + $0xaa4] sm:$0xf0] }
 0xffe   :  { %6652 = vmatpush.bf16.msrb.mxu0 %v8945_v15  ;;  %6708 = vmatmul.bf16.vlgmr.msra.gmra.mxu1 %v13285_v2  ;;  %v7893_v15 = vor.u32 %v9158_v60, %v7892_v4  ;;  %v6412_v1 = vpop.f32.mrf.mxu2  ;;  %v7557_v57 = vor.u32 %v9074_v3, %v7556_v25  ;;  %v8444_v4 = vld [vmem:[#allocation2 + $0x8b0] sm:$0xf]  ;;  %v9296_v60 = vld [vmem:[#allocation2 + $0x8c4] sm:$0xf0]  ;;  %v8420_v25 = vld [vmem:[#allocation2 + $0x880] sm:$0xf] }
 0xfff   :  { %6752 = vmatpush.bf16.msrb.mxu1 %v8853_v10  ;;  %v7868_v10 = vld [vmem:[#allocation2 + $0x430] sm:$0xf]  ;;  %v9290_v3 = vld [vmem:[#allocation2 + $0x894] sm:$0xf0]  ;;  %vm6896_vm1 = vcmp.gt.f32.partialorder %v13359_v63, 0.0 }
0x1000   :  { %6664 = vmatpush.bf16.msra.mxu2 %v7437_v24  ;;  %v7532_v24 = vld [vmem:[#allocation2 + $0x190] sm:$0xf]  ;;  %v7869_v12 = vor.u32 %v9152_v34, %v7868_v10  ;;  %v8685_v10 = vor.u32 %v9356_v62, %v8684_v21  ;;  %v7797_v34 = vor.u32 %v9134_v11, %v7796_v51  ;;  %v9137_v21 = vld [vmem:[#allocation2 + $0x3d4] sm:$0xf]  ;;  %v7822_v62 = vld [vmem:[#allocation2 + $0x3e8] sm:$0xf0] }
0x1001   :  { %6677 = vmatpush.bf16.msrb.mxu3 %v7629_v43  ;;  %v6425_v43 = vpop.f32.mrf.mxu3  ;;  %v7724_v33 = vld [vmem:[#allocation2 + $0x310] sm:$0xf] }
0x1002   :  { %6653 = vmatpush.bf16.msrb.mxu0 %v8921_v8  ;;  %v9020_v8 = vld [vmem:[#allocation2 + $0x24] sm:$0xf0]  ;;  %v6438_v36 = vpop.f32.mrf.mxu0 }
0x1003   :  { %6753 = vmatpush.bf16.msrb.mxu1 %v8829_v28  ;;  %v8732_v28 = vld [vmem:[#allocation2 + $0xaf0] sm:$0xf]  ;;  %v6451_v58 = vpop.f32.mrf.mxu1  ;;  %v9236_v43 = vld [vmem:[#allocation2 + $0x6e4] sm:$0xf0]  ;;  %v9122_v36 = vld [vmem:[#allocation2 + $0x354] sm:$0xf0] }
0x1004   :  { %6665 = vmatpush.bf16.msra.mxu2 %v7413_v9  ;;  %v7341_v9 = vor.u32 %v9020_v8, %v7340_v23  ;;  %v8733_v32 = vor.u32 %v9368_v16, %v8732_v28  ;;  %v9128_v23 = vld [vmem:[#allocation2 + $0x384] sm:$0xf0]  ;;  %v8204_v8 = vld [vmem:[#allocation2 + $0x6d0] sm:$0xf]  ;;  %v7870_v28 = vld [vmem:[#allocation2 + $0x448] sm:$0xf0] }
0x1005   :  { %6678 = vmatpush.bf16.msrb.mxu3 %v7605_v59  ;;  %v7533_v59 = vor.u32 %v9068_v14, %v7532_v24  ;;  %v7897_v24 = vor.u32 %v9155_v5, %v7894_v53  ;;  %v9149_v14 = vld [vmem:[#allocation2 + $0x434] sm:$0xf]  ;;  %v8205_v49 = vor.u32 %v9236_v43, %v8204_v8  ;;  %v8372_v58 = vld [vmem:[#allocation2 + $0x820] sm:$0xf]  ;;  %v8636_v8 = vld [vmem:[#allocation2 + $0xa30] sm:$0xf] }
0x1006   :  { %6654 = vmatpush.bf16.msrb.mxu0 %v8897_v22  ;;  %v9254_v22 = vld [vmem:[#allocation2 + $0x774] sm:$0xf0]  ;;  %v8132_v5 = vld [vmem:[#allocation2 + $0x640] sm:$0xf] }
0x1007   :  { %6754 = vmatpush.bf16.msrb.mxu1 %v8805_v19  ;;  %v8277_v0 = vor.u32 %v9254_v22, %v8276_v42  ;;  %v8469_v19 = vor.u32 %v9302_v18, %v8468_v17  ;;  %v7748_v42 = vld [vmem:[#allocation2 + $0x340] sm:$0xf]  ;;  %v7873_v17 = vor.u32 %v9149_v14, %v7870_v28  ;;  %v9230_v18 = vld [vmem:[#allocation2 + $0x6b4] sm:$0xf0]  ;;  %v8108_v28 = vld [vmem:[#allocation2 + $0x610] sm:$0xf] }
0x1008   :  { %6666 = vmatpush.bf16.msra.mxu2 %v7389_v37  ;;  %v8253_v37 = vor.u32 %v9248_v27, %v8252_v31  ;;  %v8180_v22 = vld [vmem:[#allocation2 + $0x6a0] sm:$0xf]  ;;  %v9224_v31 = vld [vmem:[#allocation2 + $0x684] sm:$0xf0] }
0x1009   :  { %6679 = vmatpush.bf16.msrb.mxu3 %v7581_v48  ;;  %v8445_v48 = vor.u32 %v9296_v60, %v8444_v4 }
0x100a   :  { %6655 = vmatpush.bf16.msrb.mxu0 %v8873_v46  ;;  %v7821_v46 = vor.u32 %v9140_v44, %v7820_v29  ;;  %v9116_v29 = vld [vmem:[#allocation2 + $0x324] sm:$0xf0]  ;;  %v8156_v44 = vld [vmem:[#allocation2 + $0x670] sm:$0xf] }
0x100b   :  { %6755 = vmatpush.bf16.msrb.mxu1 %v8781_v30  ;;  %v8228_v30 = vld [vmem:[#allocation2 + $0x700] sm:$0xf] }
0x100c   :  { %6667 = vmatpush.bf16.msra.mxu2 %v7365_v13  ;;  %v8421_v13 = vor.u32 %v9290_v3, %v8420_v25  ;;  %v8157_v25 = vor.u32 %v9224_v31, %v8156_v44 }
0x100d   :  { %9005 = vmatmul.msk.bf16.vlgmr.msrb.gmra.mxu0 %vm14101_vm14, %v13300_v40  ;;  %6680 = vmatpush.bf16.msrb.mxu3 %v7557_v57  ;;  %v7772_v57 = vld [vmem:[#allocation2 + $0x370] sm:$0xf] }
0x100e   :  { %6687 = vmatpush.bf16.msra.mxu0 %v7893_v15  ;;  %v9242_v15 = vld [vmem:[#allocation2 + $0x714] sm:$0xf0]  ;;  %v7773_v16 = vor.u32 %v9128_v23, %v7772_v57  ;;  %v9131_v57 = vld [vmem:[#allocation2 + $0x3a4] sm:$0xf]  ;;  %v7798_v23 = vld [vmem:[#allocation2 + $0x3b8] sm:$0xf0] }
0x100f   :  { %6756 = vmatpush.bf16.msrb.mxu1 %v8757_v26  ;;  %v8229_v1 = vor.u32 %v9242_v15, %v8228_v30  ;;  %v8396_v26 = vld [vmem:[#allocation2 + $0x850] sm:$0xf]  ;;  %v7725_v30 = vor.u32 %v9116_v29, %v7724_v33  ;;  %v9059_v33 = vld [vmem:[#allocation2 + $0x164] sm:$0xf] }
0x1010   :  { %6668 = vmatpush.bf16.msra.mxu2 %v7341_v9  ;;  %v9278_v9 = vld [vmem:[#allocation2 + $0x834] sm:$0xf0] }
0x1011   :  { %6681 = vmatpush.bf16.msrb.mxu3 %v7533_v59  ;;  %v9143_v59 = vld [vmem:[#allocation2 + $0x404] sm:$0xf] }
0x1012   :  { %6688 = vmatpush.bf16.msra.mxu0 %v7869_v12  ;;  %v9284_v12 = vld [vmem:[#allocation2 + $0x864] sm:$0xf0] }
0x1013   :  { %6757 = vmatpush.bf16.msrb.mxu1 %v8733_v32  ;;  %6669 = vmatmul.bf16.vlgmr.msra.gmra.mxu2 %v13276_v45  ;;  %v8397_v20 = vor.u32 %v9284_v12, %v8396_v26  ;;  %v7846_v32 = vld [vmem:[#allocation2 + $0x418] sm:$0xf0] }
0x1014   :  { %6713 = vmatpush.bf16.msrb.mxu2 %v8277_v0  ;;  %6682 = vmatmul.bf16.vlgmr.msrb.gmra.mxu3 %v13278_v52  ;;  %v8181_v0 = vor.u32 %v9230_v18, %v8180_v22  ;;  %v7849_v60 = vor.u32 %v9143_v59, %v7846_v32  ;;  %v9260_v22 = vld [vmem:[#allocation2 + $0x7a4] sm:$0xf0]  ;;  %v7774_v18 = vld [vmem:[#allocation2 + $0x388] sm:$0xf0]  ;;  %v8996_v59 = vld [vmem:[#allocation2 + $0xd00] sm:$0xf] }
0x1015   :  { %6726 = vmatpush.bf16.msra.mxu3 %v8469_v19  ;;  %v8373_v19 = vor.u32 %v9278_v9, %v8372_v58  ;;  %v8612_v58 = vld [vmem:[#allocation2 + $0xa00] sm:$0xf]  ;;  %v9338_v9 = vld [vmem:[#allocation2 + $0xa14] sm:$0xf0] }
0x1016   :  { %6689 = vmatpush.bf16.msra.mxu0 %v7845_v50  ;;  %v7749_v50 = vor.u32 %v9122_v36, %v7748_v42  ;;  %v6462_v47 = vpop.f32.mrf.mxu2  ;;  %v7801_v42 = vor.u32 %v9131_v57, %v7798_v23  ;;  %v8613_v31 = vor.u32 %v9338_v9, %v8612_v58  ;;  %v9347_v57 = vld [vmem:[#allocation2 + $0xa64] sm:$0xf]  ;;  %v8662_v23 = vld [vmem:[#allocation2 + $0xa78] sm:$0xf0] }
0x1017   :  { %6758 = vmatpush.bf16.msrb.mxu1 %v8709_v41  ;;  %v6463_v27 = vadd.f32 %v6462_v47, %v13361_v55  ;;  %v6475_v4 = vpop.f32.mrf.mxu3  ;;  %v8348_v41 = vld [vmem:[#allocation2 + $0x7f0] sm:$0xf]  ;;  %v9218_v55 = vld [vmem:[#allocation2 + $0x654] sm:$0xf0]  ;;  %v7510_v47 = vld [vmem:[#allocation2 + $0x178] sm:$0xf0] }
0x1018   :  { %6714 = vmatpush.bf16.msrb.mxu2 %v8253_v37  ;;  %v8660_v37 = vld [vmem:[#allocation2 + $0xa60] sm:$0xf]  ;;  %v8133_v12 = vor.u32 %v9218_v55, %v8132_v5 }
0x1019   :  { %6727 = vmatpush.bf16.msra.mxu3 %v8445_v48  ;;  %v9350_v48 = vld [vmem:[#allocation2 + $0xa74] sm:$0xf0]  ;;  %v6476_v51 = vadd.f32 %v6475_v4, %v6463_v27  ;;  %v9119_v27 = vld [vmem:[#allocation2 + $0x344] sm:$0xf]  ;;  %v7750_v4 = vld [vmem:[#allocation2 + $0x358] sm:$0xf0] }
0x101a   :  { %6690 = vmatpush.bf16.msra.mxu0 %v7821_v46  ;;  %v9272_v46 = vld [vmem:[#allocation2 + $0x804] sm:$0xf0]  ;;  %v6488_v11 = vpop.f32.mrf.mxu0  ;;  %v8564_v55 = vld [vmem:[#allocation2 + $0x9a0] sm:$0xf] }
0x101b   :  { %6759 = vmatpush.bf16.msrb.mxu1 %v8685_v10  ;;  %v6501_v15 = vpop.f32.mrf.mxu1  ;;  %v8349_v3 = vor.u32 %v9272_v46, %v8348_v41  ;;  %v6489_v53 = vadd.f32 %v6488_v11, %v6476_v51  ;;  %v7825_v10 = vor.u32 %v9137_v21, %v7822_v62  ;;  %v7513_v41 = vor.u32 %v9059_v33, %v7510_v47  ;;  %v8588_v46 = vld [vmem:[#allocation2 + $0x9d0] sm:$0xf]  ;;  %v9332_v21 = vld [vmem:[#allocation2 + $0x9e4] sm:$0xf0]  ;;  %v7486_v51 = vld [vmem:[#allocation2 + $0x148] sm:$0xf0] }
0x101c   :  { %6715 = vmatpush.bf16.msrb.mxu2 %v8229_v1  ;;  %v8324_v1 = vld [vmem:[#allocation2 + $0x7c0] sm:$0xf]  ;;  %v8972_v62 = vld [vmem:[#allocation2 + $0xcd0] sm:$0xf]  ;;  %v7753_v11 = vor.u32 %v9119_v27, %v7750_v4 }
0x101d   :  { %6728 = vmatpush.bf16.msra.mxu3 %v8421_v13  ;;  %v9266_v13 = vld [vmem:[#allocation2 + $0x7d4] sm:$0xf0]  ;;  %v13369_v43 = vadd.f32 %v6501_v15, %v6489_v53  ;;  %v9113_v15 = vld [vmem:[#allocation2 + $0x314] sm:$0xf]  ;;  %v8900_v33 = vld [vmem:[#allocation2 + $0xc40] sm:$0xf] }
0x101e   :  { %6691 = vmatpush.bf16.msra.mxu0 %v7797_v34  ;;  %6760 = vmatmul.bf16.vlgmr.msrb.gmra.mxu1 %v13294_v38  ;;  %v8661_v34 = vor.u32 %v9350_v48, %v8660_v37  ;;  %v6464_v26 = vpop.f32.mrf.mxu2  ;;  %v8325_v14 = vor.u32 %v9266_v13, %v8324_v1  ;;  %v9428_v37 = vld [vmem:[#allocation2 + $0xce4] sm:$0xf0]  ;;  %v9053_v48 = vld [vmem:[#allocation2 + $0x134] sm:$0xf]  ;;  %v9326_v53 = vld [vmem:[#allocation2 + $0x9b4] sm:$0xf0] }
0x101f   :  { %6804 = vmatpush.bf16.msra.mxu1 %v7897_v24  ;;  %v9344_v24 = vld [vmem:[#allocation2 + $0xa44] sm:$0xf0]  ;;  %v7489_v5 = vor.u32 %v9053_v48, %v7486_v51  ;;  %v9047_v1 = vld [vmem:[#allocation2 + $0x104] sm:$0xf]  ;;  %v7462_v13 = vld [vmem:[#allocation2 + $0x118] sm:$0xf0] }
0x1020   :  { %6716 = vmatpush.bf16.msrb.mxu2 %v8205_v49  ;;  %v8300_v49 = vld [vmem:[#allocation2 + $0x790] sm:$0xf]  ;;  %v8637_v36 = vor.u32 %v9344_v24, %v8636_v8  ;;  %v8565_v24 = vor.u32 %v9326_v53, %v8564_v55  ;;  %v9404_v48 = vld [vmem:[#allocation2 + $0xc24] sm:$0xf0] }
0x1021   :  { %6729 = vmatpush.bf16.msra.mxu3 %v8397_v20  ;;  %v6477_v20 = vpop.f32.mrf.mxu3  ;;  %v8301_v29 = vor.u32 %v9260_v22, %v8300_v49  ;;  %v8665_v49 = vor.u32 %v9347_v57, %v8662_v23  ;;  %v9341_v22 = vld [vmem:[#allocation2 + $0xa34] sm:$0xf]  ;;  %v8492_v4 = vld [vmem:[#allocation2 + $0x910] sm:$0xf] }
0x1022   :  { %6692 = vmatpush.bf16.msra.mxu0 %v7773_v16  ;;  %v9212_v16 = vld [vmem:[#allocation2 + $0x624] sm:$0xf0]  ;;  %v6490_v32 = vpop.f32.mrf.mxu0 }
0x1023   :  { %6805 = vmatpush.bf16.msra.mxu1 %v7873_v17  ;;  %v9125_v17 = vld [vmem:[#allocation2 + $0x374] sm:$0xf]  ;;  %v9416_v20 = vld [vmem:[#allocation2 + $0xc84] sm:$0xf0]  ;;  %v8516_v32 = vld [vmem:[#allocation2 + $0x940] sm:$0xf] }
0x1024   :  { %6717 = vmatpush.bf16.msrb.mxu2 %v8181_v0  ;;  %v6503_v0 = vpop.f32.mrf.mxu1  ;;  %v7777_v44 = vor.u32 %v9125_v17, %v7774_v18  ;;  %v8638_v17 = vld [vmem:[#allocation2 + $0xa48] sm:$0xf0] }
0x1025   :  { %6730 = vmatpush.bf16.msra.mxu3 %v8373_v19  ;;  %v8109_v19 = vor.u32 %v9212_v16, %v8108_v28  ;;  %v9320_v28 = vld [vmem:[#allocation2 + $0x984] sm:$0xf0]  ;;  %v8924_v16 = vld [vmem:[#allocation2 + $0xc70] sm:$0xf]  ;;  %v8641_v47 = vor.u32 %v9341_v22, %v8638_v17  ;;  %v9410_v0 = vld [vmem:[#allocation2 + $0xc54] sm:$0xf0] }
0x1026   :  { %6693 = vmatpush.bf16.msra.mxu0 %v7749_v50  ;;  %v9434_v50 = vld [vmem:[#allocation2 + $0xd14] sm:$0xf0]  ;;  %v8925_v9 = vor.u32 %v9416_v20, %v8924_v16  ;;  %v9101_v16 = vld [vmem:[#allocation2 + $0x2b4] sm:$0xf] }
0x1027   :  { %6806 = vmatpush.bf16.msra.mxu1 %v7849_v60  ;;  %v8997_v60 = vor.u32 %v9434_v50, %v8996_v59  ;;  %v9314_v50 = vld [vmem:[#allocation2 + $0x954] sm:$0xf0]  ;;  %v9197_v20 = vld [vmem:[#allocation2 + $0x5b4] sm:$0xf] }
0x1028   :  { %6718 = vmatpush.bf16.msrb.mxu2 %v8157_v25  ;;  %v7726_v25 = vld [vmem:[#allocation2 + $0x328] sm:$0xf0]  ;;  %v8517_v27 = vor.u32 %v9314_v50, %v8516_v32  ;;  %v9017_v22 = vld [vmem:[#allocation2 + $0x14] sm:$0xf] }
0x1029   :  { %6731 = vmatpush.bf16.msra.mxu3 %v8349_v3  ;;  %v8973_v3 = vor.u32 %v9428_v37, %v8972_v62  ;;  %v7729_v8 = vor.u32 %v9113_v15, %v7726_v25  ;;  %v9308_v62 = vld [vmem:[#allocation2 + $0x924] sm:$0xf0]  ;;  %v8876_v37 = vld [vmem:[#allocation2 + $0xc10] sm:$0xf]  ;;  %v7390_v15 = vld [vmem:[#allocation2 + $0x88] sm:$0xf0] }
0x102a   :  { %6694 = vmatpush.bf16.msra.mxu0 %v7725_v30  ;;  %v8589_v30 = vor.u32 %v9332_v21, %v8588_v46  ;;  %v9329_v25 = vld [vmem:[#allocation2 + $0x9d4] sm:$0xf]  ;;  %v8493_v53 = vor.u32 %v9308_v62, %v8492_v4  ;;  %v8542_v50 = vld [vmem:[#allocation2 + $0x988] sm:$0xf0] }
0x102b   :  { %6807 = vmatpush.bf16.msra.mxu1 %v7825_v10  ;;  %v8948_v10 = vld [vmem:[#allocation2 + $0xca0] sm:$0xf]  ;;  %v9317_v32 = vld [vmem:[#allocation2 + $0x974] sm:$0xf] }
0x102c   :  { %6719 = vmatpush.bf16.msrb.mxu2 %v8133_v12  ;;  %v7465_v12 = vor.u32 %v9047_v1, %v7462_v13  ;;  %v8877_v13 = vor.u32 %v9404_v48, %v8876_v37  ;;  %v9089_v48 = vld [vmem:[#allocation2 + $0x254] sm:$0xf] }
0x102d   :  { %6695 = vmatmul.bf16.vlgmr.msra.gmra.mxu0 %v13280_v7  ;;  %6732 = vmatpush.bf16.msra.mxu3 %v8325_v14  ;;  %v8540_v14 = vld [vmem:[#allocation2 + $0x970] sm:$0xf] }
0x102e   :  { %6739 = vmatpush.bf16.msrb.mxu0 %v8661_v34  ;;  %v9422_v34 = vld [vmem:[#allocation2 + $0xcb4] sm:$0xf0]  ;;  %v8541_v18 = vor.u32 %v9320_v28, %v8540_v14  ;;  %v8566_v28 = vld [vmem:[#allocation2 + $0x9b8] sm:$0xf0] }
0x102f   :  { %6808 = vmatpush.bf16.msra.mxu1 %v7801_v42  ;;  %v8949_v26 = vor.u32 %v9422_v34, %v8948_v10  ;;  %v9041_v42 = vld [vmem:[#allocation2 + $0xd4] sm:$0xf]  ;;  %v9203_v10 = vld [vmem:[#allocation2 + $0x5e4] sm:$0xf]  ;;  %v8086_v34 = vld [vmem:[#allocation2 + $0x5f8] sm:$0xf0] }
0x1030   :  { %6720 = vmatpush.bf16.msrb.mxu2 %v8109_v19  ;;  %v9035_v19 = vld [vmem:[#allocation2 + $0xa4] sm:$0xf]  ;;  %v8089_v14 = vor.u32 %v9203_v10, %v8086_v34 }
0x1031   :  { %6733 = vmatpush.bf16.msra.mxu3 %v8301_v29  ;;  %v7414_v29 = vld [vmem:[#allocation2 + $0xb8] sm:$0xf0]  ;;  %v9083_v34 = vld [vmem:[#allocation2 + $0x224] sm:$0xf] }
0x1032   :  { %6740 = vmatpush.bf16.msrb.mxu0 %v8637_v36  ;;  %v7438_v36 = vld [vmem:[#allocation2 + $0xe8] sm:$0xf0]  ;;  %v6540_v58 = vpop.f32.mrf.mxu0 }
0x1033   :  { %6809 = vmatpush.bf16.msra.mxu1 %v7777_v44  ;;  %6721 = vmatmul.bf16.vlgmr.msrb.gmra.mxu2 %v13288_v56  ;;  %v7441_v59 = vor.u32 %v9041_v42, %v7438_v36  ;;  %v9335_v44 = vld [vmem:[#allocation2 + $0xa04] sm:$0xf]  ;;  %v8062_v42 = vld [vmem:[#allocation2 + $0x5c8] sm:$0xf0] }
0x1034   :  { %6767 = vmatpush.bf16.msra.mxu2 %v8997_v60  ;;  %6734 = vmatmul.bf16.vlgmr.msra.gmra.mxu3 %v13290_v61  ;;  %v8901_v60 = vor.u32 %v9410_v0, %v8900_v33  ;;  %v8065_v33 = vor.u32 %v9197_v20, %v8062_v42  ;;  %v7654_v0 = vld [vmem:[#allocation2 + $0x298] sm:$0xf0]  ;;  %v9173_v20 = vld [vmem:[#allocation2 + $0x4f4] sm:$0xf]  ;;  %v7966_v42 = vld [vmem:[#allocation2 + $0x508] sm:$0xf0] }
0x1035   :  { %6778 = vmatpush.bf16.msrb.mxu3 %v7513_v41  ;;  %v7417_v41 = vor.u32 %v9035_v19, %v7414_v29  ;;  %v9191_v19 = vld [vmem:[#allocation2 + $0x584] sm:$0xf]  ;;  %v8038_v29 = vld [vmem:[#allocation2 + $0x598] sm:$0xf0] }
0x1036   :  { %6741 = vmatpush.bf16.msrb.mxu0 %v8613_v31  ;;  %v8614_v31 = vld [vmem:[#allocation2 + $0xa18] sm:$0xf0]  ;;  %v6514_v46 = vpop.f32.mrf.mxu2  ;;  %v8041_v62 = vor.u32 %v9191_v19, %v8038_v29  ;;  %v9227_v19 = vld [vmem:[#allocation2 + $0x6a4] sm:$0xf] }
0x1037   :  { %6810 = vmatpush.bf16.msra.mxu1 %v7753_v11  ;;  %v6527_v21 = vpop.f32.mrf.mxu3  ;;  %v8617_v51 = vor.u32 %v9335_v44, %v8614_v31  ;;  %v6515_v11 = vadd.f32 %v6514_v46, %v13369_v43  ;;  %v9251_v44 = vld [vmem:[#allocation2 + $0x764] sm:$0xf]  ;;  %v8278_v31 = vld [vmem:[#allocation2 + $0x778] sm:$0xf0] }
0x1038   :  { %6768 = vmatpush.bf16.msra.mxu2 %v8973_v3  ;;  %v9107_v3 = vld [vmem:[#allocation2 + $0x2e4] sm:$0xf]  ;;  %v8281_v37 = vor.u32 %v9251_v44, %v8278_v31  ;;  %v8182_v29 = vld [vmem:[#allocation2 + $0x6b8] sm:$0xf0] }
0x1039   :  { %6779 = vmatpush.bf16.msrb.mxu3 %v7489_v5  ;;  %v7702_v5 = vld [vmem:[#allocation2 + $0x2f8] sm:$0xf0]  ;;  %v6528_v55 = vadd.f32 %v6527_v21, %v6515_v11  ;;  %v9311_v46 = vld [vmem:[#allocation2 + $0x944] sm:$0xf]  ;;  %v9185_v11 = vld [vmem:[#allocation2 + $0x554] sm:$0xf] }
0x103a   :  { %6742 = vmatpush.bf16.msrb.mxu0 %v8589_v30  ;;  %v9029_v30 = vld [vmem:[#allocation2 + $0x74] sm:$0xf]  ;;  %v6542_v1 = vpop.f32.mrf.mxu0  ;;  %v7705_v43 = vor.u32 %v9107_v3, %v7702_v5  ;;  %v8518_v21 = vld [vmem:[#allocation2 + $0x958] sm:$0xf0]  ;;  %v6972_v44 = vld [vmem:[%s14103_s30 + $0xe8] sm:$0xff] }
0x103b   :  { %6811 = vmatpush.bf16.msra.mxu1 %v7729_v8  ;;  %v7393_v57 = vor.u32 %v9029_v30, %v7390_v15  ;;  %v13376_v8 = vadd.f32 %v6540_v58, %v6528_v55  ;;  %v13381_v4 = vpop.f32.mrf.mxu1  ;;  %v8014_v30 = vld [vmem:[#allocation2 + $0x568] sm:$0xf0]  ;;  %v9245_v15 = vld [vmem:[#allocation2 + $0x734] sm:$0xf]  ;;  %v7606_v1 = vld [vmem:[#allocation2 + $0x238] sm:$0xf0] }
0x103c   :  { %6769 = vmatpush.bf16.msra.mxu2 %v8949_v26  ;;  %v7366_v26 = vld [vmem:[#allocation2 + $0x58] sm:$0xf0]  ;;  %v9305_v5 = vld [vmem:[#allocation2 + $0x914] sm:$0xf]  ;;  %v8494_v55 = vld [vmem:[#allocation2 + $0x928] sm:$0xf0] }
0x103d   :  { %6780 = vmatpush.bf16.msrb.mxu3 %v7465_v12  ;;  %v9323_v12 = vld [vmem:[#allocation2 + $0x9a4] sm:$0xf]  ;;  %vm6897_vm12 = vcmp.gt.f32.partialorder %v13376_v8, 0.0 }
0x103e   :  { %6743 = vmatpush.bf16.msrb.mxu0 %v8565_v24  ;;  %6812 = vmatmul.bf16.vlgmr.msra.gmra.mxu1 %v13280_v7  ;;  %v8590_v7 = vld [vmem:[#allocation2 + $0x9e8] sm:$0xf0]  ;;  %v9023_v24 = vld [vmem:[#allocation2 + $0x44] sm:$0xf]  ;;  %v6516_v17 = vpop.f32.mrf.mxu2  ;;  %v8569_v58 = vor.u32 %v9323_v12, %v8566_v28  ;;  %v7609_v12 = vor.u32 %v9083_v34, %v7606_v1 }
0x103f   :  { %6856 = vmatpush.bf16.msrb.mxu1 %v8665_v49  ;;  %v8593_v23 = vor.u32 %v9329_v25, %v8590_v7  ;;  %v7678_v49 = vld [vmem:[#allocation2 + $0x2c8] sm:$0xf0]  ;;  %v7369_v36 = vor.u32 %v9023_v24, %v7366_v26  ;;  %v8521_v7 = vor.u32 %v9311_v46, %v8518_v21  ;;  %v8497_v26 = vor.u32 %v9305_v5, %v8494_v55  ;;  %v6974_v17 = vld [vmem:[%s14103_s30 + $0xf8] sm:$0xff]  ;;  %v9395_v5 = vld [vmem:[#allocation2 + $0xbe4] sm:$0xf] }
0x1040   :  { %6770 = vmatpush.bf16.msra.mxu2 %v8925_v9  ;;  %v7681_v9 = vor.u32 %v9101_v16, %v7678_v49  ;;  %v8254_v25 = vld [vmem:[#allocation2 + $0x748] sm:$0xf0]  ;;  %v9077_v16 = vld [vmem:[#allocation2 + $0x1f4] sm:$0xf]  ;;  %v8185_v46 = vor.u32 %v9227_v19, %v8182_v29  ;;  %v8854_v55 = vld [vmem:[#allocation2 + $0xbf8] sm:$0xf0] }
0x1041   :  { %6781 = vmatpush.bf16.msrb.mxu3 %v7441_v59  ;;  %v7342_v59 = vld [vmem:[#allocation2 + $0x28] sm:$0xf0]  ;;  %v8257_v10 = vor.u32 %v9245_v15, %v8254_v25  ;;  %v9065_v21 = vld [vmem:[#allocation2 + $0x194] sm:$0xf]  ;;  %v9299_v25 = vld [vmem:[#allocation2 + $0x8e4] sm:$0xf] }
0x1042   :  { %6744 = vmatpush.bf16.msrb.mxu0 %v8541_v18  ;;  %v6529_v18 = vpop.f32.mrf.mxu3  ;;  %v7582_v49 = vld [vmem:[#allocation2 + $0x208] sm:$0xf0]  ;;  %v6970_v15 = vld [vmem:[%s14103_s30 + $0xd8] sm:$0xff]  ;;  %v8998_v19 = vld [vmem:[#allocation2 + $0xd18] sm:$0xf0] }
0x1043   :  { %6857 = vmatpush.bf16.msrb.mxu1 %v8641_v47  ;;  %v9095_v47 = vld [vmem:[#allocation2 + $0x284] sm:$0xf]  ;;  %v6555_v24 = vpop.f32.mrf.mxu1  ;;  %v6973_v18 = vld [vmem:[%s14103_s30 + $0xf0] sm:$0xff] }
0x1044   :  { %6771 = vmatpush.bf16.msra.mxu2 %v8901_v60  ;;  %v8545_v60 = vor.u32 %v9317_v32, %v8542_v50  ;;  %v9071_v50 = vld [vmem:[#allocation2 + $0x1c4] sm:$0xf]  ;;  %v6969_v34 = vld [vmem:[%s14103_s30 + $0xd0] sm:$0xff] }
0x1045   :  { %6782 = vmatpush.bf16.msrb.mxu3 %v7417_v41  ;;  %v7657_v41 = vor.u32 %v9095_v47, %v7654_v0  ;;  %v9167_v47 = vld [vmem:[#allocation2 + $0x4c4] sm:$0xf]  ;;  %v7942_v0 = vld [vmem:[#allocation2 + $0x4d8] sm:$0xf0] }
0x1046   :  { %6745 = vmatpush.bf16.msrb.mxu0 %v8517_v27  ;;  %v7345_v27 = vor.u32 %v9017_v22, %v7342_v59  ;;  %v8206_v22 = vld [vmem:[#allocation2 + $0x6e8] sm:$0xf0]  ;;  %v7969_v59 = vor.u32 %v9173_v20, %v7966_v42  ;;  %v6968_v24 = vld [vmem:[%s14103_s30 + $0xc8] sm:$0xff] }
0x1047   :  { %6858 = vmatpush.bf16.msrb.mxu1 %v8617_v51  ;;  %v7630_v51 = vld [vmem:[#allocation2 + $0x268] sm:$0xf0] }
0x1048   :  { %6772 = vmatpush.bf16.msra.mxu2 %v8877_v13  ;;  %v7633_v3 = vor.u32 %v9089_v48, %v7630_v51  ;;  %v9179_v13 = vld [vmem:[#allocation2 + $0x524] sm:$0xf] }
0x1049   :  { %6783 = vmatpush.bf16.msrb.mxu3 %v7393_v57  ;;  %v7990_v57 = vld [vmem:[#allocation2 + $0x538] sm:$0xf0] }
0x104a   :  { %6746 = vmatpush.bf16.msrb.mxu0 %v8493_v53  ;;  %v8017_v53 = vor.u32 %v9185_v11, %v8014_v30  ;;  %v9221_v11 = vld [vmem:[#allocation2 + $0x674] sm:$0xf]  ;;  %v8158_v30 = vld [vmem:[#allocation2 + $0x688] sm:$0xf0] }
0x104b   :  { %6859 = vmatpush.bf16.msrb.mxu1 %v8593_v23  ;;  %9006 = vmatmul.msk.bf16.vlgmr.msra.gmra.mxu2 %vm14102_vm6, %v13300_v40  ;;  %v9239_v23 = vld [vmem:[#allocation2 + $0x704] sm:$0xf] }
0x104c   :  { %6817 = vmatpush.bf16.msrb.mxu2 %v8089_v14  ;;  %v7993_v14 = vor.u32 %v9179_v13, %v7990_v57  ;;  %v8161_v13 = vor.u32 %v9221_v11, %v8158_v30  ;;  %v9425_v11 = vld [vmem:[#allocation2 + $0xcd4] sm:$0xf]  ;;  %v8974_v30 = vld [vmem:[#allocation2 + $0xce8] sm:$0xf0] }
0x104d   :  { %6747 = vmatmul.bf16.vlgmr.msrb.gmra.mxu0 %v13292_v6  ;;  %6784 = vmatpush.bf16.msrb.mxu3 %v7369_v36  ;;  %v9233_v36 = vld [vmem:[#allocation2 + $0x6d4] sm:$0xf] }
0x104e   :  { %6791 = vmatpush.bf16.msra.mxu0 %v7705_v43  ;;  %v8230_v43 = vld [vmem:[#allocation2 + $0x718] sm:$0xf0]  ;;  %v8209_v32 = vor.u32 %v9233_v36, %v8206_v22  ;;  %v6966_v22 = vld [vmem:[%s14103_s30 + $0xb8] sm:$0xff] }
0x104f   :  { %6860 = vmatpush.bf16.msrb.mxu1 %v8569_v58  ;;  %v8233_v28 = vor.u32 %v9239_v23, %v8230_v43  ;;  %v7585_v58 = vor.u32 %v9077_v16, %v7582_v49  ;;  %v9215_v23 = vld [vmem:[#allocation2 + $0x644] sm:$0xf]  ;;  %v8134_v43 = vld [vmem:[#allocation2 + $0x658] sm:$0xf0]  ;;  %v8830_v16 = vld [vmem:[#allocation2 + $0xbc8] sm:$0xf0] }
0x1050   :  { %6818 = vmatpush.bf16.msrb.mxu2 %v8065_v33  ;;  %v7558_v33 = vld [vmem:[#allocation2 + $0x1d8] sm:$0xf0]  ;;  %v8137_v20 = vor.u32 %v9215_v23, %v8134_v43  ;;  %v6961_v43 = vld [vmem:[%s14103_s30 + $0x90] sm:$0xff] }
0x1051   :  { %6785 = vmatpush.bf16.msrb.mxu3 %v7345_v27  ;;  %v6971_v27 = vld [vmem:[%s14103_s30 + $0xe0] sm:$0xff] }
0x1052   :  { %6792 = vmatpush.bf16.msra.mxu0 %v7681_v9  ;;  %v13391_v9 = vpop.f32.mrf.mxu0  ;;  %v6967_v49 = vld [vmem:[%s14103_s30 + $0xc0] sm:$0xff] }
0x1053   :  { %6861 = vmatpush.bf16.msrb.mxu1 %v8545_v60  ;;  %v7561_v60 = vor.u32 %v9071_v50, %v7558_v33  ;;  %v8422_v50 = vld [vmem:[#allocation2 + $0x898] sm:$0xf0]  ;;  %v9383_v33 = vld [vmem:[#allocation2 + $0xb84] sm:$0xf] }
0x1054   :  { %6819 = vmatpush.bf16.msrb.mxu2 %v8041_v62  ;;  %6786 = vmatmul.bf16.vlgmr.msrb.gmra.mxu3 %v13276_v45  ;;  %v6902_v45 = vmin.f32 %v13359_v63, 0.0  ;;  %v7534_v62 = vld [vmem:[#allocation2 + $0x1a8] sm:$0xf0]  ;;  %v8950_v23 = vld [vmem:[#allocation2 + $0xcb8] sm:$0xf0] }
0x1055   :  { %6830 = vmatpush.bf16.msra.mxu3 %v8281_v37  ;;  %v9161_v37 = vld [vmem:[#allocation2 + $0x494] sm:$0xf] }
0x1056   :  { %6793 = vmatpush.bf16.msra.mxu0 %v7657_v41  ;;  %v6909_v31 = vmul.f32 1.442695, %v6902_v45  ;;  %v7945_v41 = vor.u32 %v9167_v47, %v7942_v0  ;;  %v13400_v48 = vpop.f32.mrf.mxu2  ;;  %v9209_v45 = vld [vmem:[#allocation2 + $0x614] sm:$0xf]  ;;  %v8806_v47 = vld [vmem:[#allocation2 + $0xb98] sm:$0xf0] }
0x1057   :  { %6862 = vmatpush.bf16.msrb.mxu1 %v8521_v7  ;;  %v13402_v51 = vpop.f32.mrf.mxu3  ;;  %v8470_v7 = vld [vmem:[#allocation2 + $0x8f8] sm:$0xf0]  ;;  %v9431_v0 = vld [vmem:[#allocation2 + $0xd04] sm:$0xf] }
0x1058   :  { %6820 = vmatpush.bf16.msrb.mxu2 %v8017_v53  ;;  %10236 = vpow2.f32 %v6909_v31  ;;  %v8473_v57 = vor.u32 %v9299_v25, %v8470_v7  ;;  %v6962_v25 = vld [vmem:[%s14103_s30 + $0x98] sm:$0xff] }
0x1059   :  { %6831 = vmatpush.bf16.msra.mxu3 %v8257_v10 }
0x105a   :  { %6794 = vmatpush.bf16.msra.mxu0 %v7633_v3  ;;  %v7537_v3 = vor.u32 %v9065_v21, %v7534_v62  ;;  %v6594_v53 = vpop.f32.mrf.mxu0  ;;  %v9281_v21 = vld [vmem:[#allocation2 + $0x854] sm:$0xf]  ;;  %v8398_v62 = vld [vmem:[#allocation2 + $0x868] sm:$0xf0] }
0x105b   :  { %6863 = vmatpush.bf16.msrb.mxu1 %v8497_v26  ;;  %v13407_v10 = vpop.f32.mrf.mxu1  ;;  %v8857_v26 = vor.u32 %v9395_v5, %v8854_v55  ;;  %v8401_v7 = vor.u32 %v9281_v21, %v8398_v62  ;;  %v8977_v55 = vor.u32 %v9425_v11, %v8974_v30  ;;  %v9275_v53 = vld [vmem:[#allocation2 + $0x824] sm:$0xf]  ;;  %v8878_v21 = vld [vmem:[#allocation2 + $0xc28] sm:$0xf0] }
0x105c   :  { %6821 = vmatpush.bf16.msrb.mxu2 %v7993_v14  ;;  %v8446_v14 = vld [vmem:[#allocation2 + $0x8c8] sm:$0xf0] }
0x105d   :  { %6832 = vmatpush.bf16.msra.mxu3 %v8233_v28  ;;  %v9389_v28 = vld [vmem:[#allocation2 + $0xbb4] sm:$0xf] }
0x105e   :  { %6795 = vmatpush.bf16.msra.mxu0 %v7609_v12  ;;  %6864 = vmatmul.bf16.vlgmr.msrb.gmra.mxu1 %v13292_v6  ;;  %v7918_v6 = vld [vmem:[#allocation2 + $0x4a8] sm:$0xf0]  ;;  %v9293_v12 = vld [vmem:[#allocation2 + $0x8b4] sm:$0xf]  ;;  %v6568_v42 = vpop.f32.mrf.mxu2 }
0x105f   :  { %7063 = vmatpush.msra.mxu1 %v6974_v17  ;;  %v7921_v1 = vor.u32 %v9161_v37, %v7918_v6  ;;  %v6581_v36 = vpop.f32.mrf.mxu3  ;;  %v8449_v17 = vor.u32 %v9293_v12, %v8446_v14  ;;  %v9377_v37 = vld [vmem:[#allocation2 + $0xb54] sm:$0xf]  ;;  %v8782_v6 = vld [vmem:[#allocation2 + $0xb68] sm:$0xf0] }
0x1060   :  { %6822 = vmatpush.bf16.msrb.mxu2 %v7969_v59  ;;  %v8833_v59 = vor.u32 %v9389_v28, %v8830_v16  ;;  %v8785_v5 = vor.u32 %v9377_v37, %v8782_v6  ;;  %v9269_v28 = vld [vmem:[#allocation2 + $0x7f4] sm:$0xf]  ;;  %v8350_v16 = vld [vmem:[#allocation2 + $0x808] sm:$0xf0]  ;;  %v6959_v36 = vld [vmem:[%s14103_s30 + $0x80] sm:$0xff] }
0x1061   :  { %7064 = vmatpush.msra.mxu1 %v6973_v18  ;;  %6833 = vmatpush.bf16.msra.mxu3 %v8209_v32  ;;  %v8110_v18 = vld [vmem:[#allocation2 + $0x628] sm:$0xf0]  ;;  %v9287_v32 = vld [vmem:[#allocation2 + $0x884] sm:$0xf]  ;;  %v9413_v42 = vld [vmem:[#allocation2 + $0xc74] sm:$0xf] }
0x1062   :  { %6796 = vmatpush.bf16.msra.mxu0 %v7585_v58  ;;  %v10237_v58 = vpop.eup %10236  ;;  %v8113_v31 = vor.u32 %v9209_v45, %v8110_v18 }
0x1063   :  { %7065 = vmatpush.msra.mxu1 %v6972_v44  ;;  %v6607_v29 = vpop.f32.mrf.mxu1  ;;  %v6965_v44 = vld [vmem:[%s14103_s30 + $0xb0] sm:$0xff] }
0x1064   :  { %6823 = vmatpush.bf16.msrb.mxu2 %v7945_v41  ;;  %v8809_v41 = vor.u32 %v9383_v33, %v8806_v47  ;;  %v8710_v33 = vld [vmem:[#allocation2 + $0xad8] sm:$0xf0]  ;;  %v9407_v47 = vld [vmem:[#allocation2 + $0xc44] sm:$0xf] }
0x1065   :  { %7066 = vmatpush.msra.mxu1 %v6971_v27  ;;  %6834 = vmatpush.bf16.msra.mxu3 %v8185_v46  ;;  %v9009_v27 = vadd.f32 -1.0, %v10237_v58  ;;  %v9001_v46 = vor.u32 %v9431_v0, %v8998_v19  ;;  %v8902_v0 = vld [vmem:[#allocation2 + $0xc58] sm:$0xf0] }
0x1066   :  { %6797 = vmatpush.bf16.msra.mxu0 %v7561_v60  ;;  %v4081_v60 = vperm.slane %v13355_v54, 3  ;;  %v6963_v54 = vld [vmem:[%s14103_s30 + $0xa0] sm:$0xff] }
0x1067   :  { %7067 = vmatpush.msra.mxu1 %v6970_v15  ;;  %v6926_v15 = vmul.f32 1.6732632, %v9009_v27 }
0x1068   :  { %6824 = vmatpush.bf16.msrb.mxu2 %v7921_v1  ;;  %v9371_v1 = vld [vmem:[#allocation2 + $0xb24] sm:$0xf] }
0x1069   :  { %7068 = vmatpush.msra.mxu1 %v6969_v34  ;;  %6835 = vmatpush.bf16.msra.mxu3 %v8161_v13  ;;  %v8374_v34 = vld [vmem:[#allocation2 + $0x838] sm:$0xf0] }
0x106a   :  { %6798 = vmatpush.bf16.msra.mxu0 %v7537_v3  ;;  %v6554_v3 = vadd.f32 %v13381_v4, %v4081_v60  ;;  %v8758_v13 = vld [vmem:[#allocation2 + $0xb38] sm:$0xf0]  ;;  %v6932_v4 = vsel %vm6896_vm1, %v13359_v63, %v6926_v15  ;;  %v8926_v63 = vld [vmem:[#allocation2 + $0xc88] sm:$0xf0]  ;;  %v9257_v60 = vld [vmem:[#allocation2 + $0x794] sm:$0xf] }
0x106b   :  { %7069 = vmatpush.msra.mxu1 %v6968_v24  ;;  %6825 = vmatmul.bf16.vlgmr.msrb.gmra.mxu2 %v13285_v2  ;;  %v8425_v2 = vor.u32 %v9287_v32, %v8422_v50  ;;  %v6960_v24 = vld [vmem:[%s14103_s30 + $0x88] sm:$0xff]  ;;  %v8761_v12 = vor.u32 %v9371_v1, %v8758_v13  ;;  %v8929_v58 = vor.u32 %v9413_v42, %v8926_v63  ;;  %v8326_v32 = vld [vmem:[#allocation2 + $0x7d8] sm:$0xf0]  ;;  %v6958_v15 = vld [vmem:[%s14103_s30 + $0x78] sm:$0xff] }
0x106c   :  { %6869 = vmatpush.bf16.msra.mxu2 %v8857_v26  ;;  %v8377_v26 = vor.u32 %v9275_v53, %v8374_v34  ;;  %v9359_v50 = vld [vmem:[#allocation2 + $0xac4] sm:$0xf]  ;;  %v7005_v53 = vld [vmem:[%s14103_s30 + $0x1f0] sm:$0xff]  ;;  %v6903_v34 = vmin.f32 %v13376_v8, 0.0 }
0x106d   :  { %6799 = vmatmul.bf16.vlgmr.msra.gmra.mxu0 %v13278_v52  ;;  %7070 = vmatpush.msra.mxu1 %v6967_v49  ;;  %v6964_v52 = vld [vmem:[%s14103_s30 + $0xa8] sm:$0xff]  ;;  %v9365_v49 = vld [vmem:[#allocation2 + $0xaf4] sm:$0xf]  ;;  %v7001_v42 = vld [vmem:[%s14103_s30 + $0x1d0] sm:$0xff] }
0x106e   :  { %6843 = vmatpush.bf16.msrb.mxu0 %v8473_v57  ;;  %6836 = vmatpush.bf16.msra.mxu3 %v8137_v20  ;;  %v9419_v57 = vld [vmem:[#allocation2 + $0xca4] sm:$0xf]  ;;  %v8734_v20 = vld [vmem:[#allocation2 + $0xb08] sm:$0xf0] }
0x106f   :  { %7071 = vmatpush.msra.mxu1 %v6966_v22  ;;  %v8953_v14 = vor.u32 %v9419_v57, %v8950_v23  ;;  %v6938_v22 = vmul.f32 1.050701, %v6932_v4  ;;  %v8737_v18 = vor.u32 %v9365_v49, %v8734_v20  ;;  %v6956_v1 = vld [vmem:[%s14103_s30 + $0x68] sm:$0xff]  ;;  %v6985_v49 = vld [vmem:[%s14103_s30 + $0x150] sm:$0xff] }
0x1070   :  { %6870 = vmatpush.bf16.msra.mxu2 %v8833_v59  ;;  %v9263_v59 = vld [vmem:[#allocation2 + $0x7c4] sm:$0xf] }
0x1071   :  { %7072 = vmatpush.msra.mxu1 %v6965_v44  ;;  %v8329_v19 = vor.u32 %v9263_v59, %v8326_v32  ;;  %v8713_v44 = vor.u32 %v9359_v50, %v8710_v33  ;;  %v6988_v13 = vld [vmem:[%s14103_s30 + $0x168] sm:$0xff]  ;;  %v6950_v59 = vld [vmem:[%s14103_s30 + $0x38] sm:$0xff] }
0x1072   :  { %6844 = vmatpush.bf16.msrb.mxu0 %v8449_v17  ;;  %6837 = vmatpush.bf16.msra.mxu3 %v8113_v31  ;;  %v8353_v17 = vor.u32 %v9269_v28, %v8350_v16  ;;  %v7004_v57 = vld [vmem:[%s14103_s30 + $0x1e8] sm:$0xff]  ;;  %v6953_v16 = vld [vmem:[%s14103_s30 + $0x50] sm:$0xff]  ;;  %v6982_v32 = vld [vmem:[%s14103_s30 + $0x138] sm:$0xff] }
0x1073   :  { %7073 = vmatpush.msra.mxu1 %v6964_v52  ;;  %v8302_v52 = vld [vmem:[#allocation2 + $0x7a8] sm:$0xf0]  ;;  %v6952_v63 = vld [vmem:[%s14103_s30 + $0x48] sm:$0xff] }
0x1074   :  { %6871 = vmatpush.bf16.msra.mxu2 %v8809_v41  ;;  %v8686_v41 = vld [vmem:[#allocation2 + $0xaa8] sm:$0xf0]  ;;  %v8305_v62 = vor.u32 %v9257_v60, %v8302_v52 }
0x1075   :  { %7074 = vmatpush.msra.mxu1 %v6963_v54  ;;  %6838 = vmatmul.bf16.vlgmr.msra.gmra.mxu3 %v13288_v56  ;;  %v6567_v56 = vadd.f32 %v13400_v48, %v6554_v3  ;;  %v13450_v48 = vpop.f32.mrf.mxu0 }
0x1076   :  { %6845 = vmatpush.bf16.msrb.mxu0 %v8425_v2  ;;  %6884 = vmatpush.bf16.msrb.mxu3 %v9001_v46  ;;  %v6618_v31 = vpop.f32.mrf.mxu2  ;;  %v9353_v2 = vld [vmem:[#allocation2 + $0xa94] sm:$0xf] }
0x1077   :  { %7075 = vmatpush.msra.mxu1 %v6962_v25  ;;  %v6580_v45 = vadd.f32 %v13402_v51, %v6567_v56  ;;  %v8905_v51 = vor.u32 %v9407_v47, %v8902_v0  ;;  %v6631_v27 = vpop.f32.mrf.mxu3  ;;  %v9401_v46 = vld [vmem:[#allocation2 + $0xc14] sm:$0xf]  ;;  %v8689_v11 = vor.u32 %v9353_v2, %v8686_v41  ;;  %v6996_v2 = vld [vmem:[%s14103_s30 + $0x1a8] sm:$0xff] }
0x1078   :  { %6872 = vmatpush.bf16.msra.mxu2 %v8785_v5  ;;  %v8881_v30 = vor.u32 %v9401_v46, %v8878_v21  ;;  %v6990_v25 = vld [vmem:[%s14103_s30 + $0x178] sm:$0xff]  ;;  %v6947_v46 = vld [vmem:[%s14103_s30 + $0x20] sm:$0xff] }
0x1079   :  { %7076 = vmatpush.msra.mxu1 %v6961_v43  ;;  %v6593_v29 = vadd.f32 %v13391_v9, %v6580_v45  ;;  %v13457_v9 = vadd.f32 %v13336_v35, %v13329_v39  ;;  %v6957_v39 = vld [vmem:[%s14103_s30 + $0x70] sm:$0xff]  ;;  %v7003_v43 = vld [vmem:[%s14103_s30 + $0x1e0] sm:$0xff]  ;;  %v6986_v56 = vld [vmem:[%s14103_s30 + $0x158] sm:$0xff] }
0x107a   :  { %6846 = vmatpush.bf16.msrb.mxu0 %v8401_v7  ;;  %6885 = vmatpush.bf16.msrb.mxu3 %v8977_v55  ;;  %v6989_v35 = vld [vmem:[%s14103_s30 + $0x170] sm:$0xff]  ;;  %v6951_v45 = vld [vmem:[%s14103_s30 + $0x40] sm:$0xff]  ;;  %v6998_v47 = vld [vmem:[%s14103_s30 + $0x1b8] sm:$0xff] }
0x107b   :  { %7077 = vmatpush.msra.mxu1 %v6960_v24  ;;  %v6606_v6 = vadd.f32 %v13407_v10, %v6593_v29  ;;  %v7006_v10 = vld [vmem:[%s14103_s30 + $0x1f8] sm:$0xff]  ;;  %v6901_v5 = vmin.f32 %v13457_v9, 0.0  ;;  %v6911_v24 = vmul.f32 1.442695, %v6903_v34  ;;  %v6981_v29 = vld [vmem:[%s14103_s30 + $0x130] sm:$0xff]  ;;  %v6979_v21 = vld [vmem:[%s14103_s30 + $0x120] sm:$0xff] }
0x107c   :  { %6873 = vmatpush.bf16.msra.mxu2 %v8761_v12  ;;  %vm6895_vm5 = vcmp.gt.f32.partialorder %v13457_v9, 0.0 }
0x107d   :  { %7078 = vmatpush.msra.mxu1 %v6959_v36  ;;  %v6646_v37 = vpop.f32.mrf.mxu0  ;;  %v6619_v54 = vadd.f32 %v6618_v31, %v6606_v6  ;;  %v6907_v23 = vmul.f32 1.442695, %v6901_v5  ;;  %v6984_v36 = vld [vmem:[%s14103_s30 + $0x148] sm:$0xff] }
0x107e   :  { %6847 = vmatpush.bf16.msrb.mxu0 %v8377_v26  ;;  %6886 = vmatpush.bf16.msrb.mxu3 %v8953_v14  ;;  %v6620_v7 = vpop.f32.mrf.mxu2  ;;  %v6954_v26 = vld [vmem:[%s14103_s30 + $0x58] sm:$0xff]  ;;  %v6948_v31 = vld [vmem:[%s14103_s30 + $0x28] sm:$0xff] }
0x107f   :  { %7079 = vmatmul.f32.vlgmr.msra.gmra.mxu1 %v6938_v22  ;;  %v6633_v3 = vpop.f32.mrf.mxu3  ;;  %v6632_v55 = vadd.f32 %v6631_v27, %v6619_v54  ;;  %v7002_v14 = vld [vmem:[%s14103_s30 + $0x1d8] sm:$0xff]  ;;  %10238 = vpow2.f32 %v6907_v23  ;;  %v6980_v27 = vld [vmem:[%s14103_s30 + $0x128] sm:$0xff]  ;;  %v6945_v7 = vld [vmem:[%s14103_s30 + $0x10] sm:$0xff] }
0x1080   :  { %6874 = vmatpush.bf16.msra.mxu2 %v8737_v18  ;;  %10240 = vpow2.f32 %v6911_v24  ;;  %v6983_v18 = vld [vmem:[%s14103_s30 + $0x140] sm:$0xff]  ;;  %v6978_v54 = vld [vmem:[%s14103_s30 + $0x118] sm:$0xff]  ;;  %v6977_v3 = vld [vmem:[%s14103_s30 + $0x110] sm:$0xff] }
0x1081   :  { %v6645_v4 = vadd.f32 %v13450_v48, %v6632_v55  ;;  %v7000_v48 = vld [vmem:[%s14103_s30 + $0x1c8] sm:$0xff]  ;;  %v7022_v24 = vld [vmem:[%s14103_s30 + $0x278] sm:$0xff] }
0x1082   :  { %6848 = vmatpush.bf16.msrb.mxu0 %v8353_v17  ;;  %6887 = vmatpush.bf16.msrb.mxu3 %v8929_v58  ;;  %v6999_v58 = vld [vmem:[%s14103_s30 + $0x1c0] sm:$0xff]  ;;  %v6944_v55 = vld [vmem:[%s14103_s30 + $0x8] sm:$0xff] }
0x1084   :  { %6875 = vmatpush.bf16.msra.mxu2 %v8713_v44  ;;  %v6997_v44 = vld [vmem:[%s14103_s30 + $0x1b0] sm:$0xff] }
0x1085   :  { %v10239_v33 = vpop.eup %10238 }
0x1086   :  { %6849 = vmatpush.bf16.msrb.mxu0 %v8329_v19  ;;  %6888 = vmatpush.bf16.msrb.mxu3 %v8905_v51  ;;  %v10241_v0 = vpop.eup %10240  ;;  %v6949_v19 = vld [vmem:[%s14103_s30 + $0x30] sm:$0xff]  ;;  %v9008_v51 = vadd.f32 -1.0, %v10239_v33  ;;  %v7012_v33 = vld [vmem:[%s14103_s30 + $0x228] sm:$0xff] }
0x1087   :  { %v9010_v52 = vadd.f32 -1.0, %v10241_v0 }
0x1088   :  { %6876 = vmatpush.bf16.msra.mxu2 %v8689_v11  ;;  %v6925_v11 = vmul.f32 1.6732632, %v9008_v51  ;;  %v7009_v51 = vld [vmem:[%s14103_s30 + $0x210] sm:$0xff] }
0x108a   :  { %6850 = vmatpush.bf16.msrb.mxu0 %v8305_v62  ;;  %6889 = vmatpush.bf16.msrb.mxu3 %v8881_v30  ;;  %v6657_v12 = vpop.f32.mrf.mxu0  ;;  %v6995_v62 = vld [vmem:[%s14103_s30 + $0x1a0] sm:$0xff]  ;;  %v6946_v30 = vld [vmem:[%s14103_s30 + $0x18] sm:$0xff]  ;;  %v6931_v5 = vsel %vm6895_vm5, %v13457_v9, %v6925_v11  ;;  %v6992_v9 = vld [vmem:[%s14103_s30 + $0x188] sm:$0xff] }
0x108b   :  { %6877 = vmatmul.bf16.vlgmr.msra.gmra.mxu2 %v13294_v38  ;;  %v6955_v38 = vld [vmem:[%s14103_s30 + $0x60] sm:$0xff]  ;;  %v13513_v28 = vadd.f32 %v6657_v12, %v6645_v4  ;;  %v7020_v12 = vld [vmem:[%s14103_s30 + $0x268] sm:$0xff] }
0x108c   :  { %7083 = vmatpush.msrb.mxu2 %v6990_v25  ;;  %v6991_v4 = vld [vmem:[%s14103_s30 + $0x180] sm:$0xff] }
0x108d   :  { %6851 = vmatmul.bf16.vlgmr.msrb.gmra.mxu0 %v13290_v61  ;;  %9007 = vmatmul.msk.bf16.vlgmr.msrb.gmra.mxu3 %vm14104_vm13, %v13300_v40  ;;  %v13489_v61 = vpop.f32.mrf.mxu1  ;;  %v6987_v40 = vld [vmem:[%s14103_s30 + $0x160] sm:$0xff]  ;;  %v6904_v20 = vmin.f32 %v13513_v28, 0.0  ;;  %vm6898_vm0 = vcmp.gt.f32.partialorder %v13513_v28, 0.0 }
0x108e   :  { %7043 = vmatpush.msra.mxu0 %v6958_v15  ;;  %7103 = vmatpush.msra.mxu3 %v7006_v10  ;;  %v6927_v15 = vmul.f32 1.6732632, %v9010_v52  ;;  %v6994_v10 = vld [vmem:[%s14103_s30 + $0x198] sm:$0xff] }
0x108f   :  { %7084 = vmatpush.msrb.mxu2 %v6989_v35  ;;  %v6913_v17 = vmul.f32 1.442695, %v6904_v20  ;;  %v6993_v35 = vld [vmem:[%s14103_s30 + $0x190] sm:$0xff] }
0x1090   :  { %7044 = vmatpush.msra.mxu0 %v6957_v39  ;;  %7104 = vmatpush.msra.mxu3 %v7005_v53  ;;  %v6976_v53 = vld [vmem:[%s14103_s30 + $0x108] sm:$0xff]  ;;  %v6933_v34 = vsel %vm6897_vm12, %v13376_v8, %v6927_v15 }
0x1091   :  { %7085 = vmatpush.msrb.mxu2 %v6988_v13  ;;  %10242 = vpow2.f32 %v6913_v17  ;;  %v6943_v13 = vld [vmem:[%s14103_s30] sm:$0xff]  ;;  %v6939_v23 = vmul.f32 1.050701, %v6933_v34  ;;  %v7036_v34 = vld [vmem:[%s14103_s30 + $0x2e8] sm:$0xff] }
0x1092   :  { %7045 = vmatpush.msra.mxu0 %v6956_v1  ;;  %7105 = vmatpush.msra.mxu3 %v7004_v57  ;;  %v6659_v50 = vpop.f32.mrf.mxu0  ;;  %v6975_v57 = vld [vmem:[%s14103_s30 + $0x100] sm:$0xff] }
0x1093   :  { %7086 = vmatpush.msrb.mxu2 %v6987_v40  ;;  %v7015_v17 = vld [vmem:[%s14103_s30 + $0x240] sm:$0xff] }
0x1094   :  { %7046 = vmatpush.msra.mxu0 %v6955_v38  ;;  %7106 = vmatpush.msra.mxu3 %v7003_v43  ;;  %v6937_v38 = vmul.f32 1.050701, %v6931_v5 }
0x1095   :  { %7087 = vmatpush.msrb.mxu2 %v6986_v56  ;;  %v6711_v22 = vpop.f32.mrf.mxu1 }
0x1096   :  { %7047 = vmatpush.msra.mxu0 %v6954_v26  ;;  %7107 = vmatpush.msra.mxu3 %v7002_v14  ;;  %v13579_v37 = vpop.f32.mrf.mxu2  ;;  %v7021_v26 = vld [vmem:[%s14103_s30 + $0x270] sm:$0xff]  ;;  %v7016_v22 = vld [vmem:[%s14103_s30 + $0x248] sm:$0xff] }
0x1097   :  { %7088 = vmatpush.msrb.mxu2 %v6985_v49  ;;  %v10243_v60 = vpop.eup %10242  ;;  %v13581_v6 = vpop.f32.mrf.mxu3  ;;  %v13642_v49 = vld [vmem:[#allocation11] sm:$0x3f] }
0x1098   :  { %7048 = vmatpush.msra.mxu0 %v6953_v16  ;;  %7108 = vmatpush.msra.mxu3 %v7001_v42  ;;  %v9011_v41 = vadd.f32 -1.0, %v10243_v60  ;;  %v7018_v16 = vld [vmem:[%s14103_s30 + $0x258] sm:$0xff]  ;;  %v4082_v20 = vperm.slane %v13642_v49, 4 }
0x1099   :  { %7089 = vmatpush.msrb.mxu2 %v6984_v36 }
0x109a   :  { %7049 = vmatpush.msra.mxu0 %v6952_v63  ;;  %7109 = vmatpush.msra.mxu3 %v7000_v48  ;;  %v6928_v25 = vmul.f32 1.6732632, %v9011_v41  ;;  %v7017_v63 = vld [vmem:[%s14103_s30 + $0x250] sm:$0xff]  ;;  %v6671_v36 = vadd.f32 %v13579_v37, %v4082_v20  ;;  %v7026_v20 = vld [vmem:[%s14103_s30 + $0x298] sm:$0xff] }
0x109b   :  { %7090 = vmatpush.msrb.mxu2 %v6983_v18 }
0x109c   :  { %7050 = vmatpush.msra.mxu0 %v6951_v45  ;;  %7110 = vmatpush.msra.mxu3 %v6999_v58  ;;  %v6934_v1 = vsel %vm6898_vm0, %v13513_v28, %v6928_v25  ;;  %v7019_v28 = vld [vmem:[%s14103_s30 + $0x260] sm:$0xff]  ;;  %v6684_v48 = vadd.f32 %v13581_v6, %v6671_v36  ;;  %v7014_v45 = vld [vmem:[%s14103_s30 + $0x238] sm:$0xff] }
0x109d   :  { %7091 = vmatpush.msrb.mxu2 %v6982_v32  ;;  %v13598_v39 = vpop.f32.mrf.mxu1  ;;  %v6940_v43 = vmul.f32 1.050701, %v6934_v1 }
0x109e   :  { %7051 = vmatpush.msra.mxu0 %v6950_v59  ;;  %7111 = vmatpush.msra.mxu3 %v6998_v47  ;;  %v6672_v8 = vpop.f32.mrf.mxu2  ;;  %v7013_v59 = vld [vmem:[%s14103_s30 + $0x230] sm:$0xff]  ;;  %v7011_v47 = vld [vmem:[%s14103_s30 + $0x220] sm:$0xff] }
0x109f   :  { %7092 = vmatpush.msrb.mxu2 %v6981_v29  ;;  %v6685_v40 = vpop.f32.mrf.mxu3  ;;  %v7033_v8 = vld [vmem:[%s14103_s30 + $0x2d0] sm:$0xff] }
0x10a0   :  { %7052 = vmatpush.msra.mxu0 %v6949_v19  ;;  %7112 = vmatpush.msra.mxu3 %v6997_v44  ;;  %v7010_v19 = vld [vmem:[%s14103_s30 + $0x218] sm:$0xff]  ;;  %v4083_v40 = vperm.slane %v13642_v49, 5 }
0x10a1   :  { %7093 = vmatpush.msrb.mxu2 %v6980_v27 }
0x10a2   :  { %7053 = vmatpush.msra.mxu0 %v6948_v31  ;;  %7113 = vmatpush.msra.mxu3 %v6996_v2  ;;  %v7008_v31 = vld [vmem:[%s14103_s30 + $0x208] sm:$0xff] }
0x10a3   :  { %7094 = vmatpush.msrb.mxu2 %v6979_v21 }
0x10a4   :  { %7054 = vmatpush.msra.mxu0 %v6947_v46  ;;  %7114 = vmatpush.msra.mxu3 %v6995_v62 }
0x10a5   :  { %7095 = vmatpush.msrb.mxu2 %v6978_v54  ;;  %v6763_v56 = vpop.f32.mrf.mxu1 }
0x10a6   :  { %7055 = vmatpush.msra.mxu0 %v6946_v30  ;;  %7115 = vmatpush.msra.mxu3 %v6994_v10 }
0x10a7   :  { %7096 = vmatpush.msrb.mxu2 %v6977_v3 }
0x10a8   :  { %7056 = vmatpush.msra.mxu0 %v6945_v7  ;;  %7116 = vmatpush.msra.mxu3 %v6993_v35  ;;  %v7038_v7 = vld [vmem:[%s14103_s30 + $0x2f8] sm:$0xff] }
0x10a9   :  { %7097 = vmatpush.msrb.mxu2 %v6976_v53  ;;  %7143 = vmatpush.msrb.mxu1 %v7038_v7  ;;  %v7037_v53 = vld [vmem:[%s14103_s30 + $0x2f0] sm:$0xff] }
0x10aa   :  { %7057 = vmatpush.msra.mxu0 %v6944_v55  ;;  %7117 = vmatpush.msra.mxu3 %v6992_v9  ;;  %v6696_v14 = vpop.f32.mrf.mxu0  ;;  %v7035_v9 = vld [vmem:[%s14103_s30 + $0x2e0] sm:$0xff] }
0x10ab   :  { %7098 = vmatpush.msrb.mxu2 %v6975_v57  ;;  %v6697_v32 = vadd.f32 %v6696_v14, %v6684_v48  ;;  %7144 = vmatpush.msrb.mxu1 %v7037_v53 }
0x10ac   :  { %7058 = vmatpush.msra.mxu0 %v6943_v13  ;;  %7099 = vmatmul.f32.vlgmr.msrb.gmra.mxu2 %v6939_v23  ;;  %v7034_v13 = vld [vmem:[%s14103_s30 + $0x2d8] sm:$0xff]  ;;  %v7032_v23 = vld [vmem:[%s14103_s30 + $0x2c8] sm:$0xff] }
0x10ad   :  { %7059 = vmatmul.f32.vlgmr.msra.gmra.mxu0 %v6937_v38  ;;  %7118 = vmatpush.msra.mxu3 %v6991_v4  ;;  %v6710_v0 = vadd.f32 %v13489_v61, %v6697_v32  ;;  %v7007_v61 = vld [vmem:[%s14103_s30 + $0x200] sm:$0xff] }
0x10ae   :  { %7123 = vmatpush.msrb.mxu0 %v7022_v24  ;;  %7119 = vmatmul.f32.vlgmr.msra.gmra.mxu3 %v6940_v43  ;;  %v7031_v43 = vld [vmem:[%s14103_s30 + $0x2c0] sm:$0xff]  ;;  %v7030_v24 = vld [vmem:[%s14103_s30 + $0x2b8] sm:$0xff] }
0x10af   :  { %7145 = vmatpush.msrb.mxu1 %v7036_v34 }
0x10b0   :  { %7124 = vmatpush.msrb.mxu0 %v7021_v26 }
0x10b1   :  { %7146 = vmatpush.msrb.mxu1 %v7035_v9 }
0x10b2   :  { %7125 = vmatpush.msrb.mxu0 %v7020_v12  ;;  %v6698_v42 = vpop.f32.mrf.mxu0  ;;  %v7029_v12 = vld [vmem:[%s14103_s30 + $0x2b0] sm:$0xff] }
0x10b3   :  { %7147 = vmatpush.msrb.mxu1 %v7034_v13 }
0x10b4   :  { %7126 = vmatpush.msrb.mxu0 %v7019_v28  ;;  %v7028_v28 = vld [vmem:[%s14103_s30 + $0x2a8] sm:$0xff] }
0x10b5   :  { %7148 = vmatpush.msrb.mxu1 %v7033_v8 }
0x10b6   :  { %7127 = vmatpush.msrb.mxu0 %v7018_v16  ;;  %v6722_v18 = vpop.f32.mrf.mxu2  ;;  %v7027_v16 = vld [vmem:[%s14103_s30 + $0x2a0] sm:$0xff] }
0x10b7   :  { %v6735_v58 = vpop.f32.mrf.mxu3  ;;  %v6723_v27 = vadd.f32 %v6722_v18, %v6710_v0  ;;  %7149 = vmatpush.msrb.mxu1 %v7032_v23 }
0x10b8   :  { %7128 = vmatpush.msrb.mxu0 %v7017_v63  ;;  %v7025_v63 = vld [vmem:[%s14103_s30 + $0x290] sm:$0xff] }
0x10b9   :  { %v6736_v52 = vadd.f32 %v6735_v58, %v6723_v27  ;;  %7150 = vmatpush.msrb.mxu1 %v7031_v43 }
0x10ba   :  { %7129 = vmatpush.msrb.mxu0 %v7016_v22  ;;  %v7024_v22 = vld [vmem:[%s14103_s30 + $0x288] sm:$0xff] }
0x10bb   :  { %v13662_v50 = vpop.f32.mrf.mxu1  ;;  %7151 = vmatpush.msrb.mxu1 %v7030_v24 }
0x10bc   :  { %7130 = vmatpush.msrb.mxu0 %v7015_v17  ;;  %v7023_v17 = vld [vmem:[%s14103_s30 + $0x280] sm:$0xff]  ;;  %s10488_s30 = smov [#allocation14]  }
0x10bd   :  { %7152 = vmatpush.msrb.mxu1 %v7029_v12  ;;  %s7194_s23 = sshll.u32 %s10488_s30, 4  ;;  %s7195_s23 = int_to_ptr.vmem [resolvable:$true] %s7194_s23 }
0x10be   :  { %7131 = vmatpush.msrb.mxu0 %v7014_v45  ;;  %v6724_v29 = vpop.f32.mrf.mxu2 }
0x10bf   :  { %v6737_v44 = vpop.f32.mrf.mxu3  ;;  %7153 = vmatpush.msrb.mxu1 %v7028_v28 }
0x10c0   :  { %7132 = vmatpush.msrb.mxu0 %v7013_v59 }
0x10c1   :  { %7154 = vmatpush.msrb.mxu1 %v7027_v16 }
0x10c2   :  { %7133 = vmatpush.msrb.mxu0 %v7012_v33 }
0x10c3   :  { %v6815_v60 = vpop.f32.mrf.mxu1  ;;  %7155 = vmatpush.msrb.mxu1 %v7026_v20 }
0x10c4   :  { %7134 = vmatpush.msrb.mxu0 %v7011_v47 }
0x10c5   :  { %7156 = vmatpush.msrb.mxu1 %v7025_v63 }
0x10c6   :  { %7135 = vmatpush.msrb.mxu0 %v7010_v19 }
0x10c7   :  { %7157 = vmatpush.msrb.mxu1 %v7024_v22 }
0x10c8   :  { %7136 = vmatpush.msrb.mxu0 %v7009_v51 }
0x10c9   :  { %7158 = vmatpush.msrb.mxu1 %v7023_v17 }
0x10ca   :  { %7137 = vmatpush.msrb.mxu0 %v7008_v31  ;;  %v6748_v2 = vpop.f32.mrf.mxu0 }
0x10cb   :  { %v6749_v41 = vadd.f32 %v6748_v2, %v6736_v52  ;;  %v10235_v52 = vld [vmem:[#allocation13] ss:$0 sm:$0xff] }
0x10cc   :  { %7138 = vmatpush.msrb.mxu0 %v7007_v61 }
0x10cd   :  { %v6762_v46 = vadd.f32 %v13598_v39, %v6749_v41 }
0x10ce   :  { %v6774_v21 = vpop.f32.mrf.mxu2 }
0x10cf   :  { %v6775_v62 = vadd.f32 %v6774_v21, %v6762_v46 }
0x10d1   :  { %v6905_v6 = vmin.f32 %v6775_v62, 0.0  ;;  %vm6899_vm9 = vcmp.gt.f32.partialorder %v6775_v62, 0.0 }
0x10d2   :  { %v6750_v37 = vpop.f32.mrf.mxu0 }
0x10d3   :  { %v6915_v11 = vmul.f32 1.442695, %v6905_v6 }
0x10d5   :  { %10244 = vpow2.f32 %v6915_v11 }
0x10d6   :  { %v6776_v54 = vpop.f32.mrf.mxu2 }
0x10d7   :  { %v6787_v30 = vpop.f32.mrf.mxu3 }
0x10d8   :  { %v6788_v4 = vadd.f32 %v6787_v30, %v4083_v40 }
0x10db   :  { %v6865_v15 = vpop.f32.mrf.mxu1  ;;  %v10245_v25 = vpop.eup %10244 }
0x10dc   :  { %v9012_v10 = vadd.f32 -1.0, %v10245_v25 }
0x10de   :  { %v6929_v3 = vmul.f32 1.6732632, %v9012_v10 }
0x10df   :  { %v6789_v35 = vpop.f32.mrf.mxu3 }
0x10e0   :  { %v6935_v39 = vsel %vm6899_vm9, %v6775_v62, %v6929_v3 }
0x10e1   :  { %v6941_v5 = vmul.f32 1.050701, %v6935_v39 }
0x10e3   :  { %v6867_v55 = vpop.f32.mrf.mxu1  ;;  %7139 = vmatmul.f32.vlgmr.msrb.gmra.mxu0 %v6941_v5 }
0x10ea   :  { %v6800_v1 = vpop.f32.mrf.mxu0 }
0x10eb   :  { %v6801_v14 = vadd.f32 %v6800_v1, %v6788_v4 }
0x10ed   :  { %v6814_v49 = vadd.f32 %v13662_v50, %v6801_v14 }
0x10ee   :  { %v6826_v57 = vpop.f32.mrf.mxu2 }
0x10ef   :  { %v6827_v36 = vadd.f32 %v6826_v57, %v6814_v49 }
0x10f2   :  { %v6802_v38 = vpop.f32.mrf.mxu0 }
0x10f6   :  { %v6828_v56 = vpop.f32.mrf.mxu2 }
0x10f8   :  { %v6839_v26 = vpop.f32.mrf.mxu3 }
0x10f9   :  { %v6840_v48 = vadd.f32 %v6839_v26, %v6827_v36 }
0x10fc   :  { %v7080_v46 = vpop.f32.mrf.mxu1 }
0x1100   :  { %v6841_v42 = vpop.f32.mrf.mxu3 }
0x110a   :  { %v6852_v45 = vpop.f32.mrf.mxu0 }
0x110b   :  { %v6853_v18 = vadd.f32 %v6852_v45, %v6840_v48 }
0x110d   :  { %v6866_v58 = vadd.f32 %v6865_v15, %v6853_v18 }
0x110e   :  { %v6878_v59 = vpop.f32.mrf.mxu2 }
0x110f   :  { %v6879_v50 = vadd.f32 %v6878_v59, %v6866_v58 }
0x1110   :  { %v6891_v32 = vpop.f32.mrf.mxu3 }
0x1111   :  { %v6892_v47 = vadd.f32 %v6891_v32, %v6879_v50 }
0x1112   :  { %v6854_v33 = vpop.f32.mrf.mxu0 }
0x1113   :  { %v6906_v0 = vmin.f32 %v6892_v47, 0.0  ;;  %vm6900_vm10 = vcmp.gt.f32.partialorder %v6892_v47, 0.0 }
0x1115   :  { %v6917_v19 = vmul.f32 1.442695, %v6906_v0 }
0x1116   :  { %v6880_v29 = vpop.f32.mrf.mxu2 }
0x1117   :  { %10246 = vpow2.f32 %v6917_v19 }
0x1118   :  { %v6893_v44 = vpop.f32.mrf.mxu3 }
0x111d   :  { %v10247_v51 = vpop.eup %10246 }
0x111e   :  { %v9013_v31 = vadd.f32 -1.0, %v10247_v51 }
0x1120   :  { %v6930_v27 = vmul.f32 1.6732632, %v9013_v31 }
0x1122   :  { %v6936_v60 = vsel %vm6900_vm10, %v6892_v47, %v6930_v27 }
0x1123   :  { %v6942_v61 = vmul.f32 1.050701, %v6936_v60 }
0x1125   :  { %7159 = vmatmul.f32.vlgmr.msrb.gmra.mxu1 %v6942_v61 }
0x112a   :  { %v7060_v2 = vpop.f32.mrf.mxu0 }
0x112b   :  { %v7061_v41 = vadd.f32 %v10235_v52, %v7060_v2 }
0x112d   :  { %v7081_v62 = vadd.f32 %v7080_v46, %v7061_v41 }
0x112f   :  { %v7100_v21 = vpop.f32.mrf.mxu2 }
0x1130   :  { %v7101_v37 = vadd.f32 %v7100_v21, %v7081_v62 }
0x1131   :  { %v7120_v6 = vpop.f32.mrf.mxu3 }
0x1132   :  { %v7121_v30 = vadd.f32 %v7120_v6, %v7101_v37 }
0x1160   :  { %v7140_v11 = vpop.f32.mrf.mxu0 }
0x1161   :  { %v7141_v54 = vadd.f32 %v7140_v11, %v7121_v30 }
0x11a2   :  { %v7160_v15 = vpop.f32.mrf.mxu1 }
0x11a3   :  { %v7161_v25 = vadd.f32 %v7160_v15, %v7141_v54 }
0x11a5   :  { %v7164_v10 = vsel %vm7163_vm2, %v7161_v25, -inf }
0x11a6   :  { %7165 = vmax.xlane.f32.xlu0 %v7164_v10 }
0x1219   :  { %v7166_v7 = vpop.xlane.xlu0 %7165 }
0x121a   :  { %v7167_v3 = vsub.f32 %v7161_v25, %v7166_v7 }
0x121c   :  { %v7168_v35 = vmul.f32 1.442695, %v7167_v3 }
0x121e   :  { %10248 = vpow2.f32 %v7168_v35 }
0x1224   :  { %v10249_v39 = vpop.eup %10248 }
0x1225   :  { %v7170_v5 = vsel %vm7163_vm2, %v10249_v39, 0.0 }
0x1226   :  { %7171 = vadd.xlane.f32.xlu0 %v7170_v5 }
0x1299   :  { %v7172_v55 = vpop.xlane.xlu0 %7171 }
0x129a   :  { %10250 = vrcp.f32 %v7172_v55  ;;  %v7184_v9 = vand.u32 2147483648, %v7172_v55  ;;  %v7182_v57 = vand.u32 2147483647, %v7172_v55  ;;  %vm7178_vm15 = vweird.f32 %v7172_v55 }
0x129c   :  { %v7185_v8 = vor.u32 1.1754944e-38, %v7184_v9  ;;  %vm7183_vm7 = vcmp.eq.f32.partialorder %v7182_v57, 8.507059e+37 }
0x12a0   :  { %v10251_v53 = vpop.eup %10250 }
0x12a1   :  { %v7174_v34 = vmul.f32 %v10251_v53, %v7172_v55  ;;  %vm7179_vm11 = vweird.f32 %v10251_v53 }
0x12a2   :  { %vm7180_vm4 = vmor %vm7178_vm15, %vm7179_vm11 }
0x12a3   :  { %v7175_v1 = vsub.f32 1.0, %v7174_v34 }
0x12a5   :  { %v7176_v13 = vmul.f32 %v10251_v53, %v7175_v1 }
0x12a7   :  { %v7177_v38 = vadd.f32 %v10251_v53, %v7176_v13 }
0x12a9   :  { %v7181_v40 = vsel %vm7180_vm4, %v10251_v53, %v7177_v38 }
0x12aa   :  { %v7186_v23 = vsel %vm7183_vm7, %v7185_v8, %v7181_v40 }
0x12ab   :  { %v7187_v43 = vmul.f32 %v10249_v39, %v7186_v23 }
0x12ad   :  { %7188 = vst.msk [vmem:[#allocation14] sm:$0x3] %vm7163_vm2, %v7187_v43 }
0x12ae   :  { %7199 = dma.vmem_to_hbm [thread:$0]  %s7195_s23, 32, %s7197_s7, [#allocation7]  }
0x12af   :  { %10430 = dma.done.wait [#allocation7], 32  }
0x12b0   :  { %10431 = vsyncadd [#allocation7], 4294967264 }
0x12b1   :  { %7204 = vsyncpa [#allocation6], 1 }
0x12b2   :  { %7205 = vsyncpa [#allocation9], 1 }
0x12b3   :  { %7206 = vsyncpa [#allocation12], 1 }
0x12b4   :  { %7207 = vsyncpa [#allocation7], 1 }
0x12b5   :  { %7208 = vsyncmov [#allocation3] }
0x12b8   :  { %s7209_s13 = vpop.sfrf %7208 }
0x12b9   :  { %p9014_p0 = scmp.ne.s32.totalorder %s7209_s13, 0 }
0x12bb   :  { %7213 = shalt.err (%p9014_p0)  }

</bundles_post_ra>
